<compile_context>
chip_gen: v5e
topology: v5e:2x2
jax: 0.10.0
libtpu: 0.0.40
codegen_flags: <defaults>
</compile_context>

<pallas_src>
import functools
import math

import jax
import jax.numpy as jnp
from jax.experimental import pallas as pl
from jax.experimental.pallas import tpu as pltpu

_BF16 = jnp.bfloat16  # MXU operand dtype (accumulation stays f32)


def _const_spec(shape):
    """Whole-array block that does not move with the grid (weights/biases)."""
    return pl.BlockSpec(shape, lambda i: (0,) * len(shape))


def _row_tile(m):
    """Row tile: split M across two grid steps (v7x megacore) when large."""
    if m >= 128 and m % 16 == 0 and (m // 2) % 8 == 0:
        return m // 2
    return m


# ----------------------------------------------------------------------------
# Kernel 1: fused stem  (backbone 1x1 conv + ReLU + input_proj 1x1 conv)
# ----------------------------------------------------------------------------
def _stem_kernel(x_ref, wbb_ref, bbb_ref, wpr_ref, bpr_ref, o_ref):
    x = x_ref[...].astype(_BF16)
    h = jnp.dot(x, wbb_ref[...].astype(_BF16), preferred_element_type=jnp.float32)
    h = jnp.maximum(h + bbb_ref[...], 0.0)
    s = jnp.dot(h.astype(_BF16), wpr_ref[...].astype(_BF16),
                preferred_element_type=jnp.float32)
    o_ref[...] = (s + bpr_ref[...]).astype(o_ref.dtype)


def stem(x, p_bb, p_proj):
    M, Cin = x.shape
    Cb = p_bb["w"].shape[1]
    D = p_proj["w"].shape[1]
    tm = _row_tile(M)
    grid = (M // tm,)
    sem = "parallel" if grid[0] > 1 else "arbitrary"
    return pl.pallas_call(
        _stem_kernel,
        out_shape=jax.ShapeDtypeStruct((M, D), jnp.float32),
        grid=grid,
        in_specs=[
            pl.BlockSpec((tm, Cin), lambda i: (i, 0)),
            _const_spec((Cin, Cb)),
            _const_spec((1, Cb)),
            _const_spec((Cb, D)),
            _const_spec((1, D)),
        ],
        out_specs=pl.BlockSpec((tm, D), lambda i: (i, 0)),
        compiler_params=pltpu.CompilerParams(dimension_semantics=(sem,)),
        cost_estimate=pl.CostEstimate(
            flops=int(2 * M * (Cin * Cb + Cb * D)),
            transcendentals=0,
            bytes_accessed=int(4 * (M * Cin + Cin * Cb + Cb * D + M * D))),
    )(x, p_bb["w"], p_bb["b"].reshape(1, Cb), p_proj["w"], p_proj["b"].reshape(1, D))


# ----------------------------------------------------------------------------
# Kernel 2: fused multi-head attention block
#   out = LayerNorm( x_q + OutProj( Attn(Wq(x_q+pos_q), Wk(x_kv+pos_kv), Wv(x_kv)) ) )
# ----------------------------------------------------------------------------
def _mha_ln_kernel(xq_ref, pq_ref, xkv_ref, pkv_ref,
                   wq_ref, bq_ref, wk_ref, bk_ref, wv_ref, bv_ref,
                   wo_ref, bo_ref, g_ref, b_ref, o_ref, *, nheads, eps):
    xq = xq_ref[0].astype(jnp.float32)        # (Lq, D): residual & query base
    pq = pq_ref[0].astype(jnp.float32)
    xkv = xkv_ref[0].astype(jnp.float32)      # (Lk, D): key base & value input
    pkv = pkv_ref[0].astype(jnp.float32)

    q_in = (xq + pq).astype(_BF16)
    k_in = (xkv + pkv).astype(_BF16)
    v_in = xkv.astype(_BF16)

    q = jnp.dot(q_in, wq_ref[...].astype(_BF16),
                preferred_element_type=jnp.float32) + bq_ref[...]
    k = jnp.dot(k_in, wk_ref[...].astype(_BF16),
                preferred_element_type=jnp.float32) + bk_ref[...]
    v = jnp.dot(v_in, wv_ref[...].astype(_BF16),
                preferred_element_type=jnp.float32) + bv_ref[...]

    D = q.shape[-1]
    dh = D // nheads
    scale = 1.0 / math.sqrt(dh)

    head_outs = []
    for h in range(nheads):                   # static unrolled per-head loop
        lo, hi = h * dh, (h + 1) * dh
        qh = (q[:, lo:hi] * scale).astype(_BF16)     # (Lq, dh)
        kh = k[:, lo:hi].astype(_BF16)               # (Lk, dh)
        vh = v[:, lo:hi].astype(_BF16)               # (Lk, dh)
        # scores: contract dh, lane dim of the result is Lk (no explicit .T)
        s = jax.lax.dot_general(qh, kh, (((1,), (1,)), ((), ())),
                                preferred_element_type=jnp.float32)  # (Lq, Lk)
        m = jnp.max(s, axis=-1, keepdims=True)
        p = jnp.exp(s - m)
        p = p * pl.reciprocal(jnp.sum(p, axis=-1, keepdims=True), approx=True)
        head_outs.append(jnp.dot(p.astype(_BF16), vh,
                                 preferred_element_type=jnp.float32))
    attn = jnp.concatenate(head_outs, axis=-1)       # (Lq, D)

    o = jnp.dot(attn.astype(_BF16), wo_ref[...].astype(_BF16),
                preferred_element_type=jnp.float32) + bo_ref[...]
    y = xq + o                                       # residual add
    mean = jnp.mean(y, axis=-1, keepdims=True)
    var = jnp.mean((y - mean) ** 2, axis=-1, keepdims=True)
    y = (y - mean) * jax.lax.rsqrt(var + eps)
    o_ref[0] = (y * g_ref[...] + b_ref[...]).astype(o_ref.dtype)


def mha_ln(x_q, pos_q, x_kv, pos_kv, p_attn, p_ln, nheads, eps=1e-5):
    B, Lq, D = x_q.shape
    Lk = x_kv.shape[1]
    dh = D // nheads
    flops = B * (2 * D * D * (2 * Lq + 2 * Lk) + 2 * nheads * 2 * Lq * Lk * dh)
    return pl.pallas_call(
        functools.partial(_mha_ln_kernel, nheads=nheads, eps=eps),
        out_shape=jax.ShapeDtypeStruct((B, Lq, D), jnp.float32),
        grid=(B,),
        in_specs=[
            pl.BlockSpec((1, Lq, D), lambda i: (i, 0, 0)),
            pl.BlockSpec((1, Lq, D), lambda i: (i, 0, 0)),
            pl.BlockSpec((1, Lk, D), lambda i: (i, 0, 0)),
            pl.BlockSpec((1, Lk, D), lambda i: (i, 0, 0)),
            _const_spec((D, D)), _const_spec((1, D)),   # Wq, bq
            _const_spec((D, D)), _const_spec((1, D)),   # Wk, bk
            _const_spec((D, D)), _const_spec((1, D)),   # Wv, bv
            _const_spec((D, D)), _const_spec((1, D)),   # Wo, bo
            _const_spec((1, D)), _const_spec((1, D)),   # LN gamma, beta
        ],
        out_specs=pl.BlockSpec((1, Lq, D), lambda i: (i, 0, 0)),
        compiler_params=pltpu.CompilerParams(dimension_semantics=("parallel",)),
        cost_estimate=pl.CostEstimate(
            flops=int(flops),
            transcendentals=int(B * nheads * Lq * Lk),
            bytes_accessed=int(4 * (B * (3 * Lq * D + 2 * Lk * D) + 4 * D * D + 6 * D))),
    )(x_q, pos_q, x_kv, pos_kv,
      p_attn["wq"], p_attn["bq"].reshape(1, D),
      p_attn["wk"], p_attn["bk"].reshape(1, D),
      p_attn["wv"], p_attn["bv"].reshape(1, D),
      p_attn["wo"], p_attn["bo"].reshape(1, D),
      p_ln["g"].reshape(1, D), p_ln["b"].reshape(1, D))


# ----------------------------------------------------------------------------
# Kernel 3: fused FFN block   out = LayerNorm(x + W2(ReLU(W1 x + b1)) + b2)
# ----------------------------------------------------------------------------
def _ffn_ln_kernel(x_ref, w1_ref, b1_ref, w2_ref, b2_ref, g_ref, b_ref, o_ref, *, eps):
    x = x_ref[...].astype(jnp.float32)
    h = jnp.dot(x.astype(_BF16), w1_ref[...].astype(_BF16),
                preferred_element_type=jnp.float32)
    h = jnp.maximum(h + b1_ref[...], 0.0)
    y = jnp.dot(h.astype(_BF16), w2_ref[...].astype(_BF16),
                preferred_element_type=jnp.float32)
    y = x + y + b2_ref[...]
    mean = jnp.mean(y, axis=-1, keepdims=True)
    var = jnp.mean((y - mean) ** 2, axis=-1, keepdims=True)
    y = (y - mean) * jax.lax.rsqrt(var + eps)
    o_ref[...] = (y * g_ref[...] + b_ref[...]).astype(o_ref.dtype)


def ffn_ln(x2d, p_ff1, p_ff2, p_ln, eps=1e-5):
    M, D = x2d.shape
    F = p_ff1["w"].shape[1]
    tm = _row_tile(M)
    grid = (M // tm,)
    sem = "parallel" if grid[0] > 1 else "arbitrary"
    return pl.pallas_call(
        functools.partial(_ffn_ln_kernel, eps=eps),
        out_shape=jax.ShapeDtypeStruct((M, D), jnp.float32),
        grid=grid,
        in_specs=[
            pl.BlockSpec((tm, D), lambda i: (i, 0)),
            _const_spec((D, F)), _const_spec((1, F)),
            _const_spec((F, D)), _const_spec((1, D)),
            _const_spec((1, D)), _const_spec((1, D)),
        ],
        out_specs=pl.BlockSpec((tm, D), lambda i: (i, 0)),
        compiler_params=pltpu.CompilerParams(dimension_semantics=(sem,)),
        cost_estimate=pl.CostEstimate(
            flops=int(4 * M * D * F),
            transcendentals=0,
            bytes_accessed=int(4 * (2 * M * D + 2 * D * F + F + 3 * D))),
    )(x2d, p_ff1["w"], p_ff1["b"].reshape(1, F),
      p_ff2["w"], p_ff2["b"].reshape(1, D),
      p_ln["g"].reshape(1, D), p_ln["b"].reshape(1, D))


# ----------------------------------------------------------------------------
# Kernel 4: fused prediction heads
#   hs = LayerNorm(tgt3) ; logits = class_embed(hs) ; boxes = sigmoid(MLP(hs))
# ----------------------------------------------------------------------------
def _heads_kernel(hs_ref, gf_ref, bf_ref,
                  wc_ref, bc_ref,
                  w0_ref, b0_ref, w1_ref, b1_ref, w2_ref, b2_ref,
                  logits_ref, boxes_ref, *, eps):
    x = hs_ref[...].astype(jnp.float32)
    mean = jnp.mean(x, axis=-1, keepdims=True)
    var = jnp.mean((x - mean) ** 2, axis=-1, keepdims=True)
    hs = (x - mean) * jax.lax.rsqrt(var + eps) * gf_ref[...] + bf_ref[...]
    hsb = hs.astype(_BF16)

    logits = jnp.dot(hsb, wc_ref[...].astype(_BF16),
                     preferred_element_type=jnp.float32) + bc_ref[...]
    logits_ref[...] = logits.astype(logits_ref.dtype)

    h = jnp.dot(hsb, w0_ref[...].astype(_BF16),
                preferred_element_type=jnp.float32) + b0_ref[...]
    h = jnp.maximum(h, 0.0)
    h = jnp.dot(h.astype(_BF16), w1_ref[...].astype(_BF16),
                preferred_element_type=jnp.float32) + b1_ref[...]
    h = jnp.maximum(h, 0.0)
    bx = jnp.dot(h.astype(_BF16), w2_ref[...].astype(_BF16),
                 preferred_element_type=jnp.float32) + b2_ref[...]
    boxes_ref[...] = jax.nn.sigmoid(bx).astype(boxes_ref.dtype)


def heads(hs2, p_final_ln, p_cls, p_bbox, eps=1e-5):
    M, D = hs2.shape
    C = p_cls["w"].shape[1]
    return pl.pallas_call(
        functools.partial(_heads_kernel, eps=eps),
        out_shape=(jax.ShapeDtypeStruct((M, C), jnp.float32),
                   jax.ShapeDtypeStruct((M, 4), jnp.float32)),
        grid=(1,),
        in_specs=[
            _const_spec((M, D)),
            _const_spec((1, D)), _const_spec((1, D)),        # final LN
            _const_spec((D, C)), _const_spec((1, C)),        # class embed
            _const_spec((D, D)), _const_spec((1, D)),        # bbox l0
            _const_spec((D, D)), _const_spec((1, D)),        # bbox l1
            _const_spec((D, 4)), _const_spec((1, 4)),        # bbox l2
        ],
        out_specs=[_const_spec((M, C)), _const_spec((M, 4))],
        compiler_params=pltpu.CompilerParams(dimension_semantics=("arbitrary",)),
        cost_estimate=pl.CostEstimate(
            flops=int(2 * M * D * (C + 2 * D + 4)),
            transcendentals=int(M * 4),
            bytes_accessed=int(4 * (M * D + D * (C + 2 * D + 4) + M * (C + 4)))),
    )(hs2,
      p_final_ln["g"].reshape(1, D), p_final_ln["b"].reshape(1, D),
      p_cls["w"], p_cls["b"].reshape(1, C),
      p_bbox["l0"]["w"], p_bbox["l0"]["b"].reshape(1, D),
      p_bbox["l1"]["w"], p_bbox["l1"]["b"].reshape(1, D),
      p_bbox["l2"]["w"], p_bbox["l2"]["b"].reshape(1, 4))


# ----------------------------------------------------------------------------
# Model glue (plain JAX setup only; all hot-path compute is in the kernels)
# ----------------------------------------------------------------------------
def sine_pos_embed(B, H, W, D):
    """DETR sine positional embedding (parameter-free setup glue)."""
    not_mask = jnp.ones((B, H, W), jnp.float32)
    y_embed = jnp.cumsum(not_mask, axis=1)
    x_embed = jnp.cumsum(not_mask, axis=2)
    eps, scale = 1e-6, 2 * math.pi
    y_embed = y_embed / (y_embed[:, -1:, :] + eps) * scale
    x_embed = x_embed / (x_embed[:, :, -1:] + eps) * scale
    npf = D // 2
    dim_t = jnp.arange(npf, dtype=jnp.float32)
    dim_t = 10000.0 ** (2.0 * jnp.floor(dim_t / 2.0) / npf)
    pos_x = x_embed[..., None] / dim_t
    pos_y = y_embed[..., None] / dim_t
    pos_x = jnp.stack([jnp.sin(pos_x[..., 0::2]), jnp.cos(pos_x[..., 1::2])], -1).reshape(B, H, W, npf)
    pos_y = jnp.stack([jnp.sin(pos_y[..., 0::2]), jnp.cos(pos_y[..., 1::2])], -1).reshape(B, H, W, npf)
    return jnp.concatenate([pos_y, pos_x], axis=-1)  # (B, H, W, D)


def transformer_forward(p, src, query_embed, pos, nheads=4):
    """1 encoder layer + 1 decoder layer, post-norm (DETR default)."""
    B, HW, D = src.shape
    Q = query_embed.shape[0]
    # TODO(synk): padding-mask handling (mask is all-False here, so attention is unmasked).
    # --- encoder layer: LN(src + SA(src+pos, src+pos, src)) then fused FFN+LN ---
    src2 = mha_ln(src, pos, src, pos, p["enc_sa"], p["enc_n1"], nheads)
    memory = ffn_ln(src2.reshape(B * HW, D), p["enc_ff1"], p["enc_ff2"], p["enc_n2"])
    memory = memory.reshape(B, HW, D)
    # --- decoder layer ---
    qpos = jnp.broadcast_to(query_embed[None], (B, Q, D)).astype(src.dtype)
    tgt = jnp.zeros((B, Q, D), src.dtype)
    tgt = mha_ln(tgt, qpos, tgt, qpos, p["dec_sa"], p["dec_n1"], nheads)       # self-attn
    tgt = mha_ln(tgt, qpos, memory, pos, p["dec_ca"], p["dec_n2"], nheads)     # cross-attn
    tgt3 = ffn_ln(tgt.reshape(B * Q, D), p["dec_ff1"], p["dec_ff2"], p["dec_n3"])
    # final decoder LayerNorm (dec_final) is fused into the heads kernel
    return tgt3.reshape(1, B, Q, D)  # (num_dec_layers=1, B, Q, D)


def detr_forward(params, x_nchw):
    """Input: NCHW image tensor (like the PyTorch module).  Returns pred dict."""
    B, Cin, H, W = x_nchw.shape
    # convert once: NCHW -> (B*H*W, C) channels-last matrix
    x = jnp.transpose(x_nchw, (0, 2, 3, 1)).reshape(B * H * W, Cin)
    # fused backbone 1x1-conv + ReLU + input_proj (per-pixel linear)
    src = stem(x, params["backbone"], params["input_proj"])           # (B*HW, D)
    D = src.shape[-1]
    src = src.reshape(B, H * W, D)
    pos = sine_pos_embed(B, H, W, D).reshape(B, H * W, D).astype(src.dtype)
    hs = transformer_forward(params["transformer"], src, params["query_embed"], pos)
    L, _, Q, _ = hs.shape
    hs2 = hs.reshape(L * B * Q, D)
    logits, boxes = heads(hs2, params["transformer"]["dec_final"],
                          params["class_embed"], params["bbox"])
    logits = logits.reshape(L, B, Q, -1)
    boxes = boxes.reshape(L, B, Q, 4)
    return {"pred_logits": logits[-1], "pred_boxes": boxes[-1]}


# ----------------------------------------------------------------------------
# Deterministic parameter init
# ----------------------------------------------------------------------------
def init_params(key, cin=3, c_backbone=8, d=32, ffn=64, num_queries=16, num_classes=4):
    it = iter(jax.random.split(key, 32))

    def lin(nin, nout):
        return {"w": jax.random.normal(next(it), (nin, nout), jnp.float32) * 0.05,
                "b": jnp.zeros((nout,), jnp.float32)}

    def mha_p():
        a, b, c, o = lin(d, d), lin(d, d), lin(d, d), lin(d, d)
        return {"wq": a["w"], "bq": a["b"], "wk": b["w"], "bk": b["b"],
                "wv": c["w"], "bv": c["b"], "wo": o["w"], "bo": o["b"]}

    def ln_p():
        return {"g": jnp.ones((d,), jnp.float32), "b": jnp.zeros((d,), jnp.float32)}

    return {
        "backbone": lin(cin, c_backbone),
        "input_proj": lin(c_backbone, d),
        "query_embed": jax.random.normal(next(it), (num_queries, d), jnp.float32) * 0.05,
        "class_embed": lin(d, num_classes + 1),
        "bbox": {"l0": lin(d, d), "l1": lin(d, d), "l2": lin(d, 4)},
        "transformer": {
            "enc_sa": mha_p(), "enc_n1": ln_p(),
            "enc_ff1": lin(d, ffn), "enc_ff2": lin(ffn, d), "enc_n2": ln_p(),
            "dec_sa": mha_p(), "dec_n1": ln_p(),
            "dec_ca": mha_p(), "dec_n2": ln_p(),
            "dec_ff1": lin(d, ffn), "dec_ff2": lin(ffn, d), "dec_n3": ln_p(),
            "dec_final": ln_p(),
        },
    }


# ----------------------------------------------------------------------------
# Main
# ----------------------------------------------------------------------------
if __name__ == "__main__":
    key = jax.random.PRNGKey(0)
    pkey, xkey = jax.random.split(key)
    params = init_params(pkey)
    # samples: batch of images, NCHW (B=2, C=3, H=W=8)
    x = jax.random.normal(xkey, (2, 3, 8, 8), jnp.float32)

    fwd = jax.jit(detr_forward)
    out = fwd(params, x)
    jax.block_until_ready(out)

    assert out["pred_logits"].shape == (2, 16, 5)
    assert out["pred_boxes"].shape == (2, 16, 4)
    assert bool(jnp.all(jnp.isfinite(out["pred_logits"])))
    assert bool(jnp.all((out["pred_boxes"] >= 0.0) & (out["pred_boxes"] <= 1.0)))
    print("KERNEL_OK")
</pallas_src>

<mosaic_0001>
module attributes {stable_mosaic.version = 11 : i64} {
  func.func @_stem_kernel(%arg0: i32, %arg1: memref<64x3xf32, #tpu.memory_space<vmem>>, %arg2: memref<3x8xf32, #tpu.memory_space<vmem>>, %arg3: memref<1x8xf32, #tpu.memory_space<vmem>>, %arg4: memref<8x32xf32, #tpu.memory_space<vmem>>, %arg5: memref<1x32xf32, #tpu.memory_space<vmem>>, %arg6: memref<64x32xf32, #tpu.memory_space<vmem>>) attributes {dimension_semantics = [#tpu.dimension_semantics<parallel>], iteration_bounds = array<i64: 2>, scalar_prefetch = 0 : i64, scratch_operands = 0 : i64, tpu.core_type = #tpu.core_type<tc>, window_params = [{transform_indices = @transform_0, window_bounds = array<i64: 64, 3>}, {pipeline_mode = #tpu.pipeline_mode<synchronous>, transform_indices = @transform_1, window_bounds = array<i64: 3, 8>}, {pipeline_mode = #tpu.pipeline_mode<synchronous>, transform_indices = @transform_2, window_bounds = array<i64: 1, 8>}, {pipeline_mode = #tpu.pipeline_mode<synchronous>, transform_indices = @transform_3, window_bounds = array<i64: 8, 32>}, {pipeline_mode = #tpu.pipeline_mode<synchronous>, transform_indices = @transform_4, window_bounds = array<i64: 1, 32>}, {transform_indices = @transform_5, window_bounds = array<i64: 64, 32>}]} {
    %c0 = arith.constant 0 : index
    %c0_0 = arith.constant 0 : index
    %0 = vector.load %arg1[%c0, %c0_0] : memref<64x3xf32, #tpu.memory_space<vmem>>, vector<64x3xf32>
    %1 = arith.truncf %0 : vector<64x3xf32> to vector<64x3xbf16>
    %c0_1 = arith.constant 0 : index
    %c0_2 = arith.constant 0 : index
    %2 = vector.load %arg2[%c0_1, %c0_2] : memref<3x8xf32, #tpu.memory_space<vmem>>, vector<3x8xf32>
    %3 = arith.truncf %2 : vector<3x8xf32> to vector<3x8xbf16>
    %cst = arith.constant dense<0.000000e+00> : vector<64x8xf32>
    %4 = tpu.matmul %1, %3, %cst {dimension_numbers = #tpu.dot_dimension_numbers<[1], [0], [0], [1], [0, 0, 1, 1], [], []>} : vector<64x3xbf16>, vector<3x8xbf16>, vector<64x8xf32> -> vector<64x8xf32>
    %c0_3 = arith.constant 0 : index
    %c0_4 = arith.constant 0 : index
    %5 = vector.load %arg3[%c0_3, %c0_4] : memref<1x8xf32, #tpu.memory_space<vmem>>, vector<1x8xf32>
    %6 = vector.broadcast %5 : vector<1x8xf32> to vector<64x8xf32>
    %7 = arith.addf %4, %6 : vector<64x8xf32>
    %cst_5 = arith.constant 0.000000e+00 : f32
    %8 = vector.broadcast %cst_5 : f32 to vector<64x8xf32>
    %9 = arith.maximumf %7, %8 : vector<64x8xf32>
    %10 = arith.truncf %9 : vector<64x8xf32> to vector<64x8xbf16>
    %c0_6 = arith.constant 0 : index
    %c0_7 = arith.constant 0 : index
    %11 = vector.load %arg4[%c0_6, %c0_7] : memref<8x32xf32, #tpu.memory_space<vmem>>, vector<8x32xf32>
    %12 = arith.truncf %11 : vector<8x32xf32> to vector<8x32xbf16>
    %cst_8 = arith.constant dense<0.000000e+00> : vector<64x32xf32>
    %13 = tpu.matmul %10, %12, %cst_8 {dimension_numbers = #tpu.dot_dimension_numbers<[1], [0], [0], [1], [0, 0, 1, 1], [], []>} : vector<64x8xbf16>, vector<8x32xbf16>, vector<64x32xf32> -> vector<64x32xf32>
    %c0_9 = arith.constant 0 : index
    %c0_10 = arith.constant 0 : index
    %14 = vector.load %arg5[%c0_9, %c0_10] : memref<1x32xf32, #tpu.memory_space<vmem>>, vector<1x32xf32>
    %15 = vector.broadcast %14 : vector<1x32xf32> to vector<64x32xf32>
    %16 = arith.addf %13, %15 : vector<64x32xf32>
    %c0_11 = arith.constant 0 : index
    %c0_12 = arith.constant 0 : index
    %17 = vector.load %arg6[%c0_11, %c0_12] : memref<64x32xf32, #tpu.memory_space<vmem>>, vector<64x32xf32>
    tpu.vector_store %arg6[%c0_11, %c0_12], %16 {strides = array<i32>} : memref<64x32xf32, #tpu.memory_space<vmem>>, vector<64x32xf32>,
    return
  }
  func.func @transform_0(%arg0: i32) -> (i32, i32) {
    %c0_i32 = arith.constant 0 : i32
    %c0_i32_0 = arith.constant 0 : i32
    return %arg0, %c0_i32 : i32, i32
  }
  func.func @transform_1(%arg0: i32) -> (i32, i32) {
    %c0_i32 = arith.constant 0 : i32
    %c0_i32_0 = arith.constant 0 : i32
    %c0_i32_1 = arith.constant 0 : i32
    return %c0_i32, %c0_i32_0 : i32, i32
  }
  func.func @transform_2(%arg0: i32) -> (i32, i32) {
    %c0_i32 = arith.constant 0 : i32
    %c0_i32_0 = arith.constant 0 : i32
    %c0_i32_1 = arith.constant 0 : i32
    return %c0_i32, %c0_i32_0 : i32, i32
  }
  func.func @transform_3(%arg0: i32) -> (i32, i32) {
    %c0_i32 = arith.constant 0 : i32
    %c0_i32_0 = arith.constant 0 : i32
    %c0_i32_1 = arith.constant 0 : i32
    return %c0_i32, %c0_i32_0 : i32, i32
  }
  func.func @transform_4(%arg0: i32) -> (i32, i32) {
    %c0_i32 = arith.constant 0 : i32
    %c0_i32_0 = arith.constant 0 : i32
    %c0_i32_1 = arith.constant 0 : i32
    return %c0_i32, %c0_i32_0 : i32, i32
  }
  func.func @transform_5(%arg0: i32) -> (i32, i32) {
    %c0_i32 = arith.constant 0 : i32
    %c0_i32_0 = arith.constant 0 : i32
    return %arg0, %c0_i32 : i32, i32
  }
}

module attributes {stable_mosaic.version = 11 : i64} {
  func.func @_mha_ln_kernel(%arg0: i32, %arg1: memref<1x64x32xf32, #tpu.memory_space<vmem>>, %arg2: memref<1x64x32xf32, #tpu.memory_space<vmem>>, %arg3: memref<1x64x32xf32, #tpu.memory_space<vmem>>, %arg4: memref<1x64x32xf32, #tpu.memory_space<vmem>>, %arg5: memref<32x32xf32, #tpu.memory_space<vmem>>, %arg6: memref<1x32xf32, #tpu.memory_space<vmem>>, %arg7: memref<32x32xf32, #tpu.memory_space<vmem>>, %arg8: memref<1x32xf32, #tpu.memory_space<vmem>>, %arg9: memref<32x32xf32, #tpu.memory_space<vmem>>, %arg10: memref<1x32xf32, #tpu.memory_space<vmem>>, %arg11: memref<32x32xf32, #tpu.memory_space<vmem>>, %arg12: memref<1x32xf32, #tpu.memory_space<vmem>>, %arg13: memref<1x32xf32, #tpu.memory_space<vmem>>, %arg14: memref<1x32xf32, #tpu.memory_space<vmem>>, %arg15: memref<1x64x32xf32, #tpu.memory_space<vmem>>) attributes {dimension_semantics = [#tpu.dimension_semantics<parallel>], iteration_bounds = array<i64: 2>, scalar_prefetch = 0 : i64, scratch_operands = 0 : i64, tpu.core_type = #tpu.core_type<tc>, window_params = [{transform_indices = @transform_0, window_bounds = array<i64: 1, 64, 32>}, {transform_indices = @transform_1, window_bounds = array<i64: 1, 64, 32>}, {transform_indices = @transform_2, window_bounds = array<i64: 1, 64, 32>}, {transform_indices = @transform_3, window_bounds = array<i64: 1, 64, 32>}, {pipeline_mode = #tpu.pipeline_mode<synchronous>, transform_indices = @transform_4, window_bounds = array<i64: 32, 32>}, {pipeline_mode = #tpu.pipeline_mode<synchronous>, transform_indices = @transform_5, window_bounds = array<i64: 1, 32>}, {pipeline_mode = #tpu.pipeline_mode<synchronous>, transform_indices = @transform_6, window_bounds = array<i64: 32, 32>}, {pipeline_mode = #tpu.pipeline_mode<synchronous>, transform_indices = @transform_7, window_bounds = array<i64: 1, 32>}, {pipeline_mode = #tpu.pipeline_mode<synchronous>, transform_indices = @transform_8, window_bounds = array<i64: 32, 32>}, {pipeline_mode = #tpu.pipeline_mode<synchronous>, transform_indices = @transform_9, window_bounds = array<i64: 1, 32>}, {pipeline_mode = #tpu.pipeline_mode<synchronous>, transform_indices = @transform_10, window_bounds = array<i64: 32, 32>}, {pipeline_mode = #tpu.pipeline_mode<synchronous>, transform_indices = @transform_11, window_bounds = array<i64: 1, 32>}, {pipeline_mode = #tpu.pipeline_mode<synchronous>, transform_indices = @transform_12, window_bounds = array<i64: 1, 32>}, {pipeline_mode = #tpu.pipeline_mode<synchronous>, transform_indices = @transform_13, window_bounds = array<i64: 1, 32>}, {transform_indices = @transform_14, window_bounds = array<i64: 1, 64, 32>}]} {
    %c0 = arith.constant 0 : index
    %c0_0 = arith.constant 0 : index
    %c0_1 = arith.constant 0 : index
    %0 = vector.load %arg1[%c0, %c0_0, %c0_1] : memref<1x64x32xf32, #tpu.memory_space<vmem>>, vector<1x64x32xf32>
    %1 = vector.shape_cast %0 : vector<1x64x32xf32> to vector<64x32xf32>
    %c0_2 = arith.constant 0 : index
    %c0_3 = arith.constant 0 : index
    %c0_4 = arith.constant 0 : index
    %2 = vector.load %arg2[%c0_2, %c0_3, %c0_4] : memref<1x64x32xf32, #tpu.memory_space<vmem>>, vector<1x64x32xf32>
    %3 = vector.shape_cast %2 : vector<1x64x32xf32> to vector<64x32xf32>
    %c0_5 = arith.constant 0 : index
    %c0_6 = arith.constant 0 : index
    %c0_7 = arith.constant 0 : index
    %4 = vector.load %arg3[%c0_5, %c0_6, %c0_7] : memref<1x64x32xf32, #tpu.memory_space<vmem>>, vector<1x64x32xf32>
    %5 = vector.shape_cast %4 : vector<1x64x32xf32> to vector<64x32xf32>
    %c0_8 = arith.constant 0 : index
    %c0_9 = arith.constant 0 : index
    %c0_10 = arith.constant 0 : index
    %6 = vector.load %arg4[%c0_8, %c0_9, %c0_10] : memref<1x64x32xf32, #tpu.memory_space<vmem>>, vector<1x64x32xf32>
    %7 = vector.shape_cast %6 : vector<1x64x32xf32> to vector<64x32xf32>
    %8 = arith.addf %1, %3 : vector<64x32xf32>
    %9 = arith.truncf %8 : vector<64x32xf32> to vector<64x32xbf16>
    %10 = arith.addf %5, %7 : vector<64x32xf32>
    %11 = arith.truncf %10 : vector<64x32xf32> to vector<64x32xbf16>
    %12 = arith.truncf %5 : vector<64x32xf32> to vector<64x32xbf16>
    %c0_11 = arith.constant 0 : index
    %c0_12 = arith.constant 0 : index
    %13 = vector.load %arg5[%c0_11, %c0_12] : memref<32x32xf32, #tpu.memory_space<vmem>>, vector<32x32xf32>
    %14 = arith.truncf %13 : vector<32x32xf32> to vector<32x32xbf16>
    %cst = arith.constant dense<0.000000e+00> : vector<64x32xf32>
    %15 = tpu.matmul %9, %14, %cst {dimension_numbers = #tpu.dot_dimension_numbers<[1], [0], [0], [1], [0, 0, 1, 1], [], []>} : vector<64x32xbf16>, vector<32x32xbf16>, vector<64x32xf32> -> vector<64x32xf32>
    %c0_13 = arith.constant 0 : index
    %c0_14 = arith.constant 0 : index
    %16 = vector.load %arg6[%c0_13, %c0_14] : memref<1x32xf32, #tpu.memory_space<vmem>>, vector<1x32xf32>
    %17 = vector.broadcast %16 : vector<1x32xf32> to vector<64x32xf32>
    %18 = arith.addf %15, %17 : vector<64x32xf32>
    %c0_15 = arith.constant 0 : index
    %c0_16 = arith.constant 0 : index
    %19 = vector.load %arg7[%c0_15, %c0_16] : memref<32x32xf32, #tpu.memory_space<vmem>>, vector<32x32xf32>
    %20 = arith.truncf %19 : vector<32x32xf32> to vector<32x32xbf16>
    %cst_17 = arith.constant dense<0.000000e+00> : vector<64x32xf32>
    %21 = tpu.matmul %11, %20, %cst_17 {dimension_numbers = #tpu.dot_dimension_numbers<[1], [0], [0], [1], [0, 0, 1, 1], [], []>} : vector<64x32xbf16>, vector<32x32xbf16>, vector<64x32xf32> -> vector<64x32xf32>
    %c0_18 = arith.constant 0 : index
    %c0_19 = arith.constant 0 : index
    %22 = vector.load %arg8[%c0_18, %c0_19] : memref<1x32xf32, #tpu.memory_space<vmem>>, vector<1x32xf32>
    %23 = vector.broadcast %22 : vector<1x32xf32> to vector<64x32xf32>
    %24 = arith.addf %21, %23 : vector<64x32xf32>
    %c0_20 = arith.constant 0 : index
    %c0_21 = arith.constant 0 : index
    %25 = vector.load %arg9[%c0_20, %c0_21] : memref<32x32xf32, #tpu.memory_space<vmem>>, vector<32x32xf32>
    %26 = arith.truncf %25 : vector<32x32xf32> to vector<32x32xbf16>
    %cst_22 = arith.constant dense<0.000000e+00> : vector<64x32xf32>
    %27 = tpu.matmul %12, %26, %cst_22 {dimension_numbers = #tpu.dot_dimension_numbers<[1], [0], [0], [1], [0, 0, 1, 1], [], []>} : vector<64x32xbf16>, vector<32x32xbf16>, vector<64x32xf32> -> vector<64x32xf32>
    %c0_23 = arith.constant 0 : index
    %c0_24 = arith.constant 0 : index
    %28 = vector.load %arg10[%c0_23, %c0_24] : memref<1x32xf32, #tpu.memory_space<vmem>>, vector<1x32xf32>
    %29 = vector.broadcast %28 : vector<1x32xf32> to vector<64x32xf32>
    %30 = arith.addf %27, %29 : vector<64x32xf32>
    %31 = vector.extract_strided_slice %18 {offsets = [0, 0], sizes = [64, 8], strides = [1, 1]} : vector<64x32xf32> to vector<64x8xf32>
    %cst_25 = arith.constant 0.353553385 : f32
    %32 = vector.broadcast %cst_25 : f32 to vector<64x8xf32>
    %33 = arith.mulf %31, %32 : vector<64x8xf32>
    %34 = arith.truncf %33 : vector<64x8xf32> to vector<64x8xbf16>
    %35 = vector.extract_strided_slice %24 {offsets = [0, 0], sizes = [64, 8], strides = [1, 1]} : vector<64x32xf32> to vector<64x8xf32>
    %36 = arith.truncf %35 : vector<64x8xf32> to vector<64x8xbf16>
    %37 = vector.extract_strided_slice %30 {offsets = [0, 0], sizes = [64, 8], strides = [1, 1]} : vector<64x32xf32> to vector<64x8xf32>
    %38 = arith.truncf %37 : vector<64x8xf32> to vector<64x8xbf16>
    %cst_26 = arith.constant dense<0.000000e+00> : vector<64x64xf32>
    %39 = tpu.matmul %34, %36, %cst_26 {dimension_numbers = #tpu.dot_dimension_numbers<[1], [1], [0], [0], [0, 0, 1, 0], [], []>} : vector<64x8xbf16>, vector<64x8xbf16>, vector<64x64xf32> -> vector<64x64xf32>
    %cst_27 = arith.constant dense<0xFF800000> : vector<64xf32>
    %40 = vector.multi_reduction <maximumf>, %39, %cst_27 [1] : vector<64x64xf32> to vector<64xf32>
    %41 = vector.shape_cast %40 : vector<64xf32> to vector<64x1xf32>
    %42 = vector.broadcast %41 : vector<64x1xf32> to vector<64x64xf32>
    %43 = arith.subf %39, %42 : vector<64x64xf32>
    %44 = math.exp %43 : vector<64x64xf32>
    %cst_28 = arith.constant dense<0.000000e+00> : vector<64xf32>
    %45 = vector.multi_reduction <add>, %44, %cst_28 [1] : vector<64x64xf32> to vector<64xf32>
    %46 = vector.shape_cast %45 : vector<64xf32> to vector<64x1xf32>
    %47 = tpu.reciprocal %46 {approx = true} : vector<64x1xf32> -> vector<64x1xf32>
    %48 = vector.broadcast %47 : vector<64x1xf32> to vector<64x64xf32>
    %49 = arith.mulf %44, %48 : vector<64x64xf32>
    %50 = arith.truncf %49 : vector<64x64xf32> to vector<64x64xbf16>
    %cst_29 = arith.constant dense<0.000000e+00> : vector<64x8xf32>
    %51 = tpu.matmul %50, %38, %cst_29 {dimension_numbers = #tpu.dot_dimension_numbers<[1], [0], [0], [1], [0, 0, 1, 1], [], []>} : vector<64x64xbf16>, vector<64x8xbf16>, vector<64x8xf32> -> vector<64x8xf32>
    %52 = vector.extract_strided_slice %18 {offsets = [0, 8], sizes = [64, 8], strides = [1, 1]} : vector<64x32xf32> to vector<64x8xf32>
    %cst_30 = arith.constant 0.353553385 : f32
    %53 = vector.broadcast %cst_30 : f32 to vector<64x8xf32>
    %54 = arith.mulf %52, %53 : vector<64x8xf32>
    %55 = arith.truncf %54 : vector<64x8xf32> to vector<64x8xbf16>
    %56 = vector.extract_strided_slice %24 {offsets = [0, 8], sizes = [64, 8], strides = [1, 1]} : vector<64x32xf32> to vector<64x8xf32>
    %57 = arith.truncf %56 : vector<64x8xf32> to vector<64x8xbf16>
    %58 = vector.extract_strided_slice %30 {offsets = [0, 8], sizes = [64, 8], strides = [1, 1]} : vector<64x32xf32> to vector<64x8xf32>
    %59 = arith.truncf %58 : vector<64x8xf32> to vector<64x8xbf16>
    %cst_31 = arith.constant dense<0.000000e+00> : vector<64x64xf32>
    %60 = tpu.matmul %55, %57, %cst_31 {dimension_numbers = #tpu.dot_dimension_numbers<[1], [1], [0], [0], [0, 0, 1, 0], [], []>} : vector<64x8xbf16>, vector<64x8xbf16>, vector<64x64xf32> -> vector<64x64xf32>
    %cst_32 = arith.constant dense<0xFF800000> : vector<64xf32>
    %61 = vector.multi_reduction <maximumf>, %60, %cst_32 [1] : vector<64x64xf32> to vector<64xf32>
    %62 = vector.shape_cast %61 : vector<64xf32> to vector<64x1xf32>
    %63 = vector.broadcast %62 : vector<64x1xf32> to vector<64x64xf32>
    %64 = arith.subf %60, %63 : vector<64x64xf32>
    %65 = math.exp %64 : vector<64x64xf32>
    %cst_33 = arith.constant dense<0.000000e+00> : vector<64xf32>
    %66 = vector.multi_reduction <add>, %65, %cst_33 [1] : vector<64x64xf32> to vector<64xf32>
    %67 = vector.shape_cast %66 : vector<64xf32> to vector<64x1xf32>
    %68 = tpu.reciprocal %67 {approx = true} : vector<64x1xf32> -> vector<64x1xf32>
    %69 = vector.broadcast %68 : vector<64x1xf32> to vector<64x64xf32>
    %70 = arith.mulf %65, %69 : vector<64x64xf32>
    %71 = arith.truncf %70 : vector<64x64xf32> to vector<64x64xbf16>
    %cst_34 = arith.constant dense<0.000000e+00> : vector<64x8xf32>
    %72 = tpu.matmul %71, %59, %cst_34 {dimension_numbers = #tpu.dot_dimension_numbers<[1], [0], [0], [1], [0, 0, 1, 1], [], []>} : vector<64x64xbf16>, vector<64x8xbf16>, vector<64x8xf32> -> vector<64x8xf32>
    %73 = vector.extract_strided_slice %18 {offsets = [0, 16], sizes = [64, 8], strides = [1, 1]} : vector<64x32xf32> to vector<64x8xf32>
    %cst_35 = arith.constant 0.353553385 : f32
    %74 = vector.broadcast %cst_35 : f32 to vector<64x8xf32>
    %75 = arith.mulf %73, %74 : vector<64x8xf32>
    %76 = arith.truncf %75 : vector<64x8xf32> to vector<64x8xbf16>
    %77 = vector.extract_strided_slice %24 {offsets = [0, 16], sizes = [64, 8], strides = [1, 1]} : vector<64x32xf32> to vector<64x8xf32>
    %78 = arith.truncf %77 : vector<64x8xf32> to vector<64x8xbf16>
    %79 = vector.extract_strided_slice %30 {offsets = [0, 16], sizes = [64, 8], strides = [1, 1]} : vector<64x32xf32> to vector<64x8xf32>
    %80 = arith.truncf %79 : vector<64x8xf32> to vector<64x8xbf16>
    %cst_36 = arith.constant dense<0.000000e+00> : vector<64x64xf32>
    %81 = tpu.matmul %76, %78, %cst_36 {dimension_numbers = #tpu.dot_dimension_numbers<[1], [1], [0], [0], [0, 0, 1, 0], [], []>} : vector<64x8xbf16>, vector<64x8xbf16>, vector<64x64xf32> -> vector<64x64xf32>
    %cst_37 = arith.constant dense<0xFF800000> : vector<64xf32>
    %82 = vector.multi_reduction <maximumf>, %81, %cst_37 [1] : vector<64x64xf32> to vector<64xf32>
    %83 = vector.shape_cast %82 : vector<64xf32> to vector<64x1xf32>
    %84 = vector.broadcast %83 : vector<64x1xf32> to vector<64x64xf32>
    %85 = arith.subf %81, %84 : vector<64x64xf32>
    %86 = math.exp %85 : vector<64x64xf32>
    %cst_38 = arith.constant dense<0.000000e+00> : vector<64xf32>
    %87 = vector.multi_reduction <add>, %86, %cst_38 [1] : vector<64x64xf32> to vector<64xf32>
    %88 = vector.shape_cast %87 : vector<64xf32> to vector<64x1xf32>
    %89 = tpu.reciprocal %88 {approx = true} : vector<64x1xf32> -> vector<64x1xf32>
    %90 = vector.broadcast %89 : vector<64x1xf32> to vector<64x64xf32>
    %91 = arith.mulf %86, %90 : vector<64x64xf32>
    %92 = arith.truncf %91 : vector<64x64xf32> to vector<64x64xbf16>
    %cst_39 = arith.constant dense<0.000000e+00> : vector<64x8xf32>
    %93 = tpu.matmul %92, %80, %cst_39 {dimension_numbers = #tpu.dot_dimension_numbers<[1], [0], [0], [1], [0, 0, 1, 1], [], []>} : vector<64x64xbf16>, vector<64x8xbf16>, vector<64x8xf32> -> vector<64x8xf32>
    %94 = vector.extract_strided_slice %18 {offsets = [0, 24], sizes = [64, 8], strides = [1, 1]} : vector<64x32xf32> to vector<64x8xf32>
    %cst_40 = arith.constant 0.353553385 : f32
    %95 = vector.broadcast %cst_40 : f32 to vector<64x8xf32>
    %96 = arith.mulf %94, %95 : vector<64x8xf32>
    %97 = arith.truncf %96 : vector<64x8xf32> to vector<64x8xbf16>
    %98 = vector.extract_strided_slice %24 {offsets = [0, 24], sizes = [64, 8], strides = [1, 1]} : vector<64x32xf32> to vector<64x8xf32>
    %99 = arith.truncf %98 : vector<64x8xf32> to vector<64x8xbf16>
    %100 = vector.extract_strided_slice %30 {offsets = [0, 24], sizes = [64, 8], strides = [1, 1]} : vector<64x32xf32> to vector<64x8xf32>
    %101 = arith.truncf %100 : vector<64x8xf32> to vector<64x8xbf16>
    %cst_41 = arith.constant dense<0.000000e+00> : vector<64x64xf32>
    %102 = tpu.matmul %97, %99, %cst_41 {dimension_numbers = #tpu.dot_dimension_numbers<[1], [1], [0], [0], [0, 0, 1, 0], [], []>} : vector<64x8xbf16>, vector<64x8xbf16>, vector<64x64xf32> -> vector<64x64xf32>
    %cst_42 = arith.constant dense<0xFF800000> : vector<64xf32>
    %103 = vector.multi_reduction <maximumf>, %102, %cst_42 [1] : vector<64x64xf32> to vector<64xf32>
    %104 = vector.shape_cast %103 : vector<64xf32> to vector<64x1xf32>
    %105 = vector.broadcast %104 : vector<64x1xf32> to vector<64x64xf32>
    %106 = arith.subf %102, %105 : vector<64x64xf32>
    %107 = math.exp %106 : vector<64x64xf32>
    %cst_43 = arith.constant dense<0.000000e+00> : vector<64xf32>
    %108 = vector.multi_reduction <add>, %107, %cst_43 [1] : vector<64x64xf32> to vector<64xf32>
    %109 = vector.shape_cast %108 : vector<64xf32> to vector<64x1xf32>
    %110 = tpu.reciprocal %109 {approx = true} : vector<64x1xf32> -> vector<64x1xf32>
    %111 = vector.broadcast %110 : vector<64x1xf32> to vector<64x64xf32>
    %112 = arith.mulf %107, %111 : vector<64x64xf32>
    %113 = arith.truncf %112 : vector<64x64xf32> to vector<64x64xbf16>
    %cst_44 = arith.constant dense<0.000000e+00> : vector<64x8xf32>
    %114 = tpu.matmul %113, %101, %cst_44 {dimension_numbers = #tpu.dot_dimension_numbers<[1], [0], [0], [1], [0, 0, 1, 1], [], []>} : vector<64x64xbf16>, vector<64x8xbf16>, vector<64x8xf32> -> vector<64x8xf32>
    %115 = tpu.concatenate %51, %72, %93, %114 in 1 : vector<64x8xf32>, vector<64x8xf32>, vector<64x8xf32>, vector<64x8xf32> -> vector<64x32xf32>
    %116 = arith.truncf %115 : vector<64x32xf32> to vector<64x32xbf16>
    %c0_45 = arith.constant 0 : index
    %c0_46 = arith.constant 0 : index
    %117 = vector.load %arg11[%c0_45, %c0_46] : memref<32x32xf32, #tpu.memory_space<vmem>>, vector<32x32xf32>
    %118 = arith.truncf %117 : vector<32x32xf32> to vector<32x32xbf16>
    %cst_47 = arith.constant dense<0.000000e+00> : vector<64x32xf32>
    %119 = tpu.matmul %116, %118, %cst_47 {dimension_numbers = #tpu.dot_dimension_numbers<[1], [0], [0], [1], [0, 0, 1, 1], [], []>} : vector<64x32xbf16>, vector<32x32xbf16>, vector<64x32xf32> -> vector<64x32xf32>
    %c0_48 = arith.constant 0 : index
    %c0_49 = arith.constant 0 : index
    %120 = vector.load %arg12[%c0_48, %c0_49] : memref<1x32xf32, #tpu.memory_space<vmem>>, vector<1x32xf32>
    %121 = vector.broadcast %120 : vector<1x32xf32> to vector<64x32xf32>
    %122 = arith.addf %119, %121 : vector<64x32xf32>
    %123 = arith.addf %1, %122 : vector<64x32xf32>
    %cst_50 = arith.constant dense<0.000000e+00> : vector<64xf32>
    %124 = vector.multi_reduction <add>, %123, %cst_50 [1] : vector<64x32xf32> to vector<64xf32>
    %125 = vector.shape_cast %124 : vector<64xf32> to vector<64x1xf32>
    %cst_51 = arith.constant 3.200000e+01 : f32
    %126 = vector.broadcast %cst_51 : f32 to vector<64x1xf32>
    %127 = arith.divf %125, %126 : vector<64x1xf32>
    %128 = vector.broadcast %127 : vector<64x1xf32> to vector<64x32xf32>
    %129 = arith.subf %123, %128 : vector<64x32xf32>
    %130 = arith.mulf %129, %129 : vector<64x32xf32>
    %cst_52 = arith.constant dense<0.000000e+00> : vector<64xf32>
    %131 = vector.multi_reduction <add>, %130, %cst_52 [1] : vector<64x32xf32> to vector<64xf32>
    %132 = vector.shape_cast %131 : vector<64xf32> to vector<64x1xf32>
    %cst_53 = arith.constant 3.200000e+01 : f32
    %133 = vector.broadcast %cst_53 : f32 to vector<64x1xf32>
    %134 = arith.divf %132, %133 : vector<64x1xf32>
    %135 = vector.broadcast %127 : vector<64x1xf32> to vector<64x32xf32>
    %136 = arith.subf %123, %135 : vector<64x32xf32>
    %cst_54 = arith.constant 9.99999974E-6 : f32
    %137 = vector.broadcast %cst_54 : f32 to vector<64x1xf32>
    %138 = arith.addf %134, %137 : vector<64x1xf32>
    %139 = math.rsqrt %138 : vector<64x1xf32>
    %140 = vector.broadcast %139 : vector<64x1xf32> to vector<64x32xf32>
    %141 = arith.mulf %136, %140 : vector<64x32xf32>
    %c0_55 = arith.constant 0 : index
    %c0_56 = arith.constant 0 : index
    %142 = vector.load %arg13[%c0_55, %c0_56] : memref<1x32xf32, #tpu.memory_space<vmem>>, vector<1x32xf32>
    %143 = vector.broadcast %142 : vector<1x32xf32> to vector<64x32xf32>
    %144 = arith.mulf %141, %143 : vector<64x32xf32>
    %c0_57 = arith.constant 0 : index
    %c0_58 = arith.constant 0 : index
    %145 = vector.load %arg14[%c0_57, %c0_58] : memref<1x32xf32, #tpu.memory_space<vmem>>, vector<1x32xf32>
    %146 = vector.broadcast %145 : vector<1x32xf32> to vector<64x32xf32>
    %147 = arith.addf %144, %146 : vector<64x32xf32>
    %c0_59 = arith.constant 0 : index
    %c0_60 = arith.constant 0 : index
    %c0_61 = arith.constant 0 : index
    %148 = vector.load %arg15[%c0_59, %c0_60, %c0_61] : memref<1x64x32xf32, #tpu.memory_space<vmem>>, vector<1x64x32xf32>
    %149 = vector.shape_cast %148 : vector<1x64x32xf32> to vector<64x32xf32>
    %150 = vector.shape_cast %147 : vector<64x32xf32> to vector<1x64x32xf32>
    tpu.vector_store %arg15[%c0_59, %c0_60, %c0_61], %150 {strides = array<i32>} : memref<1x64x32xf32, #tpu.memory_space<vmem>>, vector<1x64x32xf32>,
    return
  }
  func.func @transform_0(%arg0: i32) -> (i32, i32, i32) {
    %c0_i32 = arith.constant 0 : i32
    %c0_i32_0 = arith.constant 0 : i32
    %c0_i32_1 = arith.constant 0 : i32
    return %arg0, %c0_i32, %c0_i32_0 : i32, i32, i32
  }
  func.func @transform_1(%arg0: i32) -> (i32, i32, i32) {
    %c0_i32 = arith.constant 0 : i32
    %c0_i32_0 = arith.constant 0 : i32
    %c0_i32_1 = arith.constant 0 : i32
    return %arg0, %c0_i32, %c0_i32_0 : i32, i32, i32
  }
  func.func @transform_2(%arg0: i32) -> (i32, i32, i32) {
    %c0_i32 = arith.constant 0 : i32
    %c0_i32_0 = arith.constant 0 : i32
    %c0_i32_1 = arith.constant 0 : i32
    return %arg0, %c0_i32, %c0_i32_0 : i32, i32, i32
  }
  func.func @transform_3(%arg0: i32) -> (i32, i32, i32) {
    %c0_i32 = arith.constant 0 : i32
    %c0_i32_0 = arith.constant 0 : i32
    %c0_i32_1 = arith.constant 0 : i32
    return %arg0, %c0_i32, %c0_i32_0 : i32, i32, i32
  }
  func.func @transform_4(%arg0: i32) -> (i32, i32) {
    %c0_i32 = arith.constant 0 : i32
    %c0_i32_0 = arith.constant 0 : i32
    %c0_i32_1 = arith.constant 0 : i32
    return %c0_i32, %c0_i32_0 : i32, i32
  }
  func.func @transform_5(%arg0: i32) -> (i32, i32) {
    %c0_i32 = arith.constant 0 : i32
    %c0_i32_0 = arith.constant 0 : i32
    %c0_i32_1 = arith.constant 0 : i32
    return %c0_i32, %c0_i32_0 : i32, i32
  }
  func.func @transform_6(%arg0: i32) -> (i32, i32) {
    %c0_i32 = arith.constant 0 : i32
    %c0_i32_0 = arith.constant 0 : i32
    %c0_i32_1 = arith.constant 0 : i32
    return %c0_i32, %c0_i32_0 : i32, i32
  }
  func.func @transform_7(%arg0: i32) -> (i32, i32) {
    %c0_i32 = arith.constant 0 : i32
    %c0_i32_0 = arith.constant 0 : i32
    %c0_i32_1 = arith.constant 0 : i32
    return %c0_i32, %c0_i32_0 : i32, i32
  }
  func.func @transform_8(%arg0: i32) -> (i32, i32) {
    %c0_i32 = arith.constant 0 : i32
    %c0_i32_0 = arith.constant 0 : i32
    %c0_i32_1 = arith.constant 0 : i32
    return %c0_i32, %c0_i32_0 : i32, i32
  }
  func.func @transform_9(%arg0: i32) -> (i32, i32) {
    %c0_i32 = arith.constant 0 : i32
    %c0_i32_0 = arith.constant 0 : i32
    %c0_i32_1 = arith.constant 0 : i32
    return %c0_i32, %c0_i32_0 : i32, i32
  }
  func.func @transform_10(%arg0: i32) -> (i32, i32) {
    %c0_i32 = arith.constant 0 : i32
    %c0_i32_0 = arith.constant 0 : i32
    %c0_i32_1 = arith.constant 0 : i32
    return %c0_i32, %c0_i32_0 : i32, i32
  }
  func.func @transform_11(%arg0: i32) -> (i32, i32) {
    %c0_i32 = arith.constant 0 : i32
    %c0_i32_0 = arith.constant 0 : i32
    %c0_i32_1 = arith.constant 0 : i32
    return %c0_i32, %c0_i32_0 : i32, i32
  }
  func.func @transform_12(%arg0: i32) -> (i32, i32) {
    %c0_i32 = arith.constant 0 : i32
    %c0_i32_0 = arith.constant 0 : i32
    %c0_i32_1 = arith.constant 0 : i32
    return %c0_i32, %c0_i32_0 : i32, i32
  }
  func.func @transform_13(%arg0: i32) -> (i32, i32) {
    %c0_i32 = arith.constant 0 : i32
    %c0_i32_0 = arith.constant 0 : i32
    %c0_i32_1 = arith.constant 0 : i32
    return %c0_i32, %c0_i32_0 : i32, i32
  }
  func.func @transform_14(%arg0: i32) -> (i32, i32, i32) {
    %c0_i32 = arith.constant 0 : i32
    %c0_i32_0 = arith.constant 0 : i32
    %c0_i32_1 = arith.constant 0 : i32
    return %arg0, %c0_i32, %c0_i32_0 : i32, i32, i32
  }
}

module attributes {stable_mosaic.version = 11 : i64} {
  func.func @_ffn_ln_kernel(%arg0: i32, %arg1: memref<64x32xf32, #tpu.memory_space<vmem>>, %arg2: memref<32x64xf32, #tpu.memory_space<vmem>>, %arg3: memref<1x64xf32, #tpu.memory_space<vmem>>, %arg4: memref<64x32xf32, #tpu.memory_space<vmem>>, %arg5: memref<1x32xf32, #tpu.memory_space<vmem>>, %arg6: memref<1x32xf32, #tpu.memory_space<vmem>>, %arg7: memref<1x32xf32, #tpu.memory_space<vmem>>, %arg8: memref<64x32xf32, #tpu.memory_space<vmem>>) attributes {dimension_semantics = [#tpu.dimension_semantics<parallel>], iteration_bounds = array<i64: 2>, scalar_prefetch = 0 : i64, scratch_operands = 0 : i64, tpu.core_type = #tpu.core_type<tc>, window_params = [{transform_indices = @transform_0, window_bounds = array<i64: 64, 32>}, {pipeline_mode = #tpu.pipeline_mode<synchronous>, transform_indices = @transform_1, window_bounds = array<i64: 32, 64>}, {pipeline_mode = #tpu.pipeline_mode<synchronous>, transform_indices = @transform_2, window_bounds = array<i64: 1, 64>}, {pipeline_mode = #tpu.pipeline_mode<synchronous>, transform_indices = @transform_3, window_bounds = array<i64: 64, 32>}, {pipeline_mode = #tpu.pipeline_mode<synchronous>, transform_indices = @transform_4, window_bounds = array<i64: 1, 32>}, {pipeline_mode = #tpu.pipeline_mode<synchronous>, transform_indices = @transform_5, window_bounds = array<i64: 1, 32>}, {pipeline_mode = #tpu.pipeline_mode<synchronous>, transform_indices = @transform_6, window_bounds = array<i64: 1, 32>}, {transform_indices = @transform_7, window_bounds = array<i64: 64, 32>}]} {
    %c0 = arith.constant 0 : index
    %c0_0 = arith.constant 0 : index
    %0 = vector.load %arg1[%c0, %c0_0] : memref<64x32xf32, #tpu.memory_space<vmem>>, vector<64x32xf32>
    %1 = arith.truncf %0 : vector<64x32xf32> to vector<64x32xbf16>
    %c0_1 = arith.constant 0 : index
    %c0_2 = arith.constant 0 : index
    %2 = vector.load %arg2[%c0_1, %c0_2] : memref<32x64xf32, #tpu.memory_space<vmem>>, vector<32x64xf32>
    %3 = arith.truncf %2 : vector<32x64xf32> to vector<32x64xbf16>
    %cst = arith.constant dense<0.000000e+00> : vector<64x64xf32>
    %4 = tpu.matmul %1, %3, %cst {dimension_numbers = #tpu.dot_dimension_numbers<[1], [0], [0], [1], [0, 0, 1, 1], [], []>} : vector<64x32xbf16>, vector<32x64xbf16>, vector<64x64xf32> -> vector<64x64xf32>
    %c0_3 = arith.constant 0 : index
    %c0_4 = arith.constant 0 : index
    %5 = vector.load %arg3[%c0_3, %c0_4] : memref<1x64xf32, #tpu.memory_space<vmem>>, vector<1x64xf32>
    %6 = vector.broadcast %5 : vector<1x64xf32> to vector<64x64xf32>
    %7 = arith.addf %4, %6 : vector<64x64xf32>
    %cst_5 = arith.constant 0.000000e+00 : f32
    %8 = vector.broadcast %cst_5 : f32 to vector<64x64xf32>
    %9 = arith.maximumf %7, %8 : vector<64x64xf32>
    %10 = arith.truncf %9 : vector<64x64xf32> to vector<64x64xbf16>
    %c0_6 = arith.constant 0 : index
    %c0_7 = arith.constant 0 : index
    %11 = vector.load %arg4[%c0_6, %c0_7] : memref<64x32xf32, #tpu.memory_space<vmem>>, vector<64x32xf32>
    %12 = arith.truncf %11 : vector<64x32xf32> to vector<64x32xbf16>
    %cst_8 = arith.constant dense<0.000000e+00> : vector<64x32xf32>
    %13 = tpu.matmul %10, %12, %cst_8 {dimension_numbers = #tpu.dot_dimension_numbers<[1], [0], [0], [1], [0, 0, 1, 1], [], []>} : vector<64x64xbf16>, vector<64x32xbf16>, vector<64x32xf32> -> vector<64x32xf32>
    %14 = arith.addf %0, %13 : vector<64x32xf32>
    %c0_9 = arith.constant 0 : index
    %c0_10 = arith.constant 0 : index
    %15 = vector.load %arg5[%c0_9, %c0_10] : memref<1x32xf32, #tpu.memory_space<vmem>>, vector<1x32xf32>
    %16 = vector.broadcast %15 : vector<1x32xf32> to vector<64x32xf32>
    %17 = arith.addf %14, %16 : vector<64x32xf32>
    %cst_11 = arith.constant dense<0.000000e+00> : vector<64xf32>
    %18 = vector.multi_reduction <add>, %17, %cst_11 [1] : vector<64x32xf32> to vector<64xf32>
    %19 = vector.shape_cast %18 : vector<64xf32> to vector<64x1xf32>
    %cst_12 = arith.constant 3.200000e+01 : f32
    %20 = vector.broadcast %cst_12 : f32 to vector<64x1xf32>
    %21 = arith.divf %19, %20 : vector<64x1xf32>
    %22 = vector.broadcast %21 : vector<64x1xf32> to vector<64x32xf32>
    %23 = arith.subf %17, %22 : vector<64x32xf32>
    %24 = arith.mulf %23, %23 : vector<64x32xf32>
    %cst_13 = arith.constant dense<0.000000e+00> : vector<64xf32>
    %25 = vector.multi_reduction <add>, %24, %cst_13 [1] : vector<64x32xf32> to vector<64xf32>
    %26 = vector.shape_cast %25 : vector<64xf32> to vector<64x1xf32>
    %cst_14 = arith.constant 3.200000e+01 : f32
    %27 = vector.broadcast %cst_14 : f32 to vector<64x1xf32>
    %28 = arith.divf %26, %27 : vector<64x1xf32>
    %29 = vector.broadcast %21 : vector<64x1xf32> to vector<64x32xf32>
    %30 = arith.subf %17, %29 : vector<64x32xf32>
    %cst_15 = arith.constant 9.99999974E-6 : f32
    %31 = vector.broadcast %cst_15 : f32 to vector<64x1xf32>
    %32 = arith.addf %28, %31 : vector<64x1xf32>
    %33 = math.rsqrt %32 : vector<64x1xf32>
    %34 = vector.broadcast %33 : vector<64x1xf32> to vector<64x32xf32>
    %35 = arith.mulf %30, %34 : vector<64x32xf32>
    %c0_16 = arith.constant 0 : index
    %c0_17 = arith.constant 0 : index
    %36 = vector.load %arg6[%c0_16, %c0_17] : memref<1x32xf32, #tpu.memory_space<vmem>>, vector<1x32xf32>
    %37 = vector.broadcast %36 : vector<1x32xf32> to vector<64x32xf32>
    %38 = arith.mulf %35, %37 : vector<64x32xf32>
    %c0_18 = arith.constant 0 : index
    %c0_19 = arith.constant 0 : index
    %39 = vector.load %arg7[%c0_18, %c0_19] : memref<1x32xf32, #tpu.memory_space<vmem>>, vector<1x32xf32>
    %40 = vector.broadcast %39 : vector<1x32xf32> to vector<64x32xf32>
    %41 = arith.addf %38, %40 : vector<64x32xf32>
    %c0_20 = arith.constant 0 : index
    %c0_21 = arith.constant 0 : index
    %42 = vector.load %arg8[%c0_20, %c0_21] : memref<64x32xf32, #tpu.memory_space<vmem>>, vector<64x32xf32>
    tpu.vector_store %arg8[%c0_20, %c0_21], %41 {strides = array<i32>} : memref<64x32xf32, #tpu.memory_space<vmem>>, vector<64x32xf32>,
    return
  }
  func.func @transform_0(%arg0: i32) -> (i32, i32) {
    %c0_i32 = arith.constant 0 : i32
    %c0_i32_0 = arith.constant 0 : i32
    return %arg0, %c0_i32 : i32, i32
  }
  func.func @transform_1(%arg0: i32) -> (i32, i32) {
    %c0_i32 = arith.constant 0 : i32
    %c0_i32_0 = arith.constant 0 : i32
    %c0_i32_1 = arith.constant 0 : i32
    return %c0_i32, %c0_i32_0 : i32, i32
  }
  func.func @transform_2(%arg0: i32) -> (i32, i32) {
    %c0_i32 = arith.constant 0 : i32
    %c0_i32_0 = arith.constant 0 : i32
    %c0_i32_1 = arith.constant 0 : i32
    return %c0_i32, %c0_i32_0 : i32, i32
  }
  func.func @transform_3(%arg0: i32) -> (i32, i32) {
    %c0_i32 = arith.constant 0 : i32
    %c0_i32_0 = arith.constant 0 : i32
    %c0_i32_1 = arith.constant 0 : i32
    return %c0_i32, %c0_i32_0 : i32, i32
  }
  func.func @transform_4(%arg0: i32) -> (i32, i32) {
    %c0_i32 = arith.constant 0 : i32
    %c0_i32_0 = arith.constant 0 : i32
    %c0_i32_1 = arith.constant 0 : i32
    return %c0_i32, %c0_i32_0 : i32, i32
  }
  func.func @transform_5(%arg0: i32) -> (i32, i32) {
    %c0_i32 = arith.constant 0 : i32
    %c0_i32_0 = arith.constant 0 : i32
    %c0_i32_1 = arith.constant 0 : i32
    return %c0_i32, %c0_i32_0 : i32, i32
  }
  func.func @transform_6(%arg0: i32) -> (i32, i32) {
    %c0_i32 = arith.constant 0 : i32
    %c0_i32_0 = arith.constant 0 : i32
    %c0_i32_1 = arith.constant 0 : i32
    return %c0_i32, %c0_i32_0 : i32, i32
  }
  func.func @transform_7(%arg0: i32) -> (i32, i32) {
    %c0_i32 = arith.constant 0 : i32
    %c0_i32_0 = arith.constant 0 : i32
    return %arg0, %c0_i32 : i32, i32
  }
}

module attributes {stable_mosaic.version = 11 : i64} {
  func.func @_mha_ln_kernel(%arg0: i32, %arg1: memref<1x16x32xf32, #tpu.memory_space<vmem>>, %arg2: memref<1x16x32xf32, #tpu.memory_space<vmem>>, %arg3: memref<1x16x32xf32, #tpu.memory_space<vmem>>, %arg4: memref<1x16x32xf32, #tpu.memory_space<vmem>>, %arg5: memref<32x32xf32, #tpu.memory_space<vmem>>, %arg6: memref<1x32xf32, #tpu.memory_space<vmem>>, %arg7: memref<32x32xf32, #tpu.memory_space<vmem>>, %arg8: memref<1x32xf32, #tpu.memory_space<vmem>>, %arg9: memref<32x32xf32, #tpu.memory_space<vmem>>, %arg10: memref<1x32xf32, #tpu.memory_space<vmem>>, %arg11: memref<32x32xf32, #tpu.memory_space<vmem>>, %arg12: memref<1x32xf32, #tpu.memory_space<vmem>>, %arg13: memref<1x32xf32, #tpu.memory_space<vmem>>, %arg14: memref<1x32xf32, #tpu.memory_space<vmem>>, %arg15: memref<1x16x32xf32, #tpu.memory_space<vmem>>) attributes {dimension_semantics = [#tpu.dimension_semantics<parallel>], iteration_bounds = array<i64: 2>, scalar_prefetch = 0 : i64, scratch_operands = 0 : i64, tpu.core_type = #tpu.core_type<tc>, window_params = [{transform_indices = @transform_0, window_bounds = array<i64: 1, 16, 32>}, {transform_indices = @transform_1, window_bounds = array<i64: 1, 16, 32>}, {transform_indices = @transform_2, window_bounds = array<i64: 1, 16, 32>}, {transform_indices = @transform_3, window_bounds = array<i64: 1, 16, 32>}, {pipeline_mode = #tpu.pipeline_mode<synchronous>, transform_indices = @transform_4, window_bounds = array<i64: 32, 32>}, {pipeline_mode = #tpu.pipeline_mode<synchronous>, transform_indices = @transform_5, window_bounds = array<i64: 1, 32>}, {pipeline_mode = #tpu.pipeline_mode<synchronous>, transform_indices = @transform_6, window_bounds = array<i64: 32, 32>}, {pipeline_mode = #tpu.pipeline_mode<synchronous>, transform_indices = @transform_7, window_bounds = array<i64: 1, 32>}, {pipeline_mode = #tpu.pipeline_mode<synchronous>, transform_indices = @transform_8, window_bounds = array<i64: 32, 32>}, {pipeline_mode = #tpu.pipeline_mode<synchronous>, transform_indices = @transform_9, window_bounds = array<i64: 1, 32>}, {pipeline_mode = #tpu.pipeline_mode<synchronous>, transform_indices = @transform_10, window_bounds = array<i64: 32, 32>}, {pipeline_mode = #tpu.pipeline_mode<synchronous>, transform_indices = @transform_11, window_bounds = array<i64: 1, 32>}, {pipeline_mode = #tpu.pipeline_mode<synchronous>, transform_indices = @transform_12, window_bounds = array<i64: 1, 32>}, {pipeline_mode = #tpu.pipeline_mode<synchronous>, transform_indices = @transform_13, window_bounds = array<i64: 1, 32>}, {transform_indices = @transform_14, window_bounds = array<i64: 1, 16, 32>}]} {
    %c0 = arith.constant 0 : index
    %c0_0 = arith.constant 0 : index
    %c0_1 = arith.constant 0 : index
    %0 = vector.load %arg1[%c0, %c0_0, %c0_1] : memref<1x16x32xf32, #tpu.memory_space<vmem>>, vector<1x16x32xf32>
    %1 = vector.shape_cast %0 : vector<1x16x32xf32> to vector<16x32xf32>
    %c0_2 = arith.constant 0 : index
    %c0_3 = arith.constant 0 : index
    %c0_4 = arith.constant 0 : index
    %2 = vector.load %arg2[%c0_2, %c0_3, %c0_4] : memref<1x16x32xf32, #tpu.memory_space<vmem>>, vector<1x16x32xf32>
    %3 = vector.shape_cast %2 : vector<1x16x32xf32> to vector<16x32xf32>
    %c0_5 = arith.constant 0 : index
    %c0_6 = arith.constant 0 : index
    %c0_7 = arith.constant 0 : index
    %4 = vector.load %arg3[%c0_5, %c0_6, %c0_7] : memref<1x16x32xf32, #tpu.memory_space<vmem>>, vector<1x16x32xf32>
    %5 = vector.shape_cast %4 : vector<1x16x32xf32> to vector<16x32xf32>
    %c0_8 = arith.constant 0 : index
    %c0_9 = arith.constant 0 : index
    %c0_10 = arith.constant 0 : index
    %6 = vector.load %arg4[%c0_8, %c0_9, %c0_10] : memref<1x16x32xf32, #tpu.memory_space<vmem>>, vector<1x16x32xf32>
    %7 = vector.shape_cast %6 : vector<1x16x32xf32> to vector<16x32xf32>
    %8 = arith.addf %1, %3 : vector<16x32xf32>
    %9 = arith.truncf %8 : vector<16x32xf32> to vector<16x32xbf16>
    %10 = arith.addf %5, %7 : vector<16x32xf32>
    %11 = arith.truncf %10 : vector<16x32xf32> to vector<16x32xbf16>
    %12 = arith.truncf %5 : vector<16x32xf32> to vector<16x32xbf16>
    %c0_11 = arith.constant 0 : index
    %c0_12 = arith.constant 0 : index
    %13 = vector.load %arg5[%c0_11, %c0_12] : memref<32x32xf32, #tpu.memory_space<vmem>>, vector<32x32xf32>
    %14 = arith.truncf %13 : vector<32x32xf32> to vector<32x32xbf16>
    %cst = arith.constant dense<0.000000e+00> : vector<16x32xf32>
    %15 = tpu.matmul %9, %14, %cst {dimension_numbers = #tpu.dot_dimension_numbers<[1], [0], [0], [1], [0, 0, 1, 1], [], []>} : vector<16x32xbf16>, vector<32x32xbf16>, vector<16x32xf32> -> vector<16x32xf32>
    %c0_13 = arith.constant 0 : index
    %c0_14 = arith.constant 0 : index
    %16 = vector.load %arg6[%c0_13, %c0_14] : memref<1x32xf32, #tpu.memory_space<vmem>>, vector<1x32xf32>
    %17 = vector.broadcast %16 : vector<1x32xf32> to vector<16x32xf32>
    %18 = arith.addf %15, %17 : vector<16x32xf32>
    %c0_15 = arith.constant 0 : index
    %c0_16 = arith.constant 0 : index
    %19 = vector.load %arg7[%c0_15, %c0_16] : memref<32x32xf32, #tpu.memory_space<vmem>>, vector<32x32xf32>
    %20 = arith.truncf %19 : vector<32x32xf32> to vector<32x32xbf16>
    %cst_17 = arith.constant dense<0.000000e+00> : vector<16x32xf32>
    %21 = tpu.matmul %11, %20, %cst_17 {dimension_numbers = #tpu.dot_dimension_numbers<[1], [0], [0], [1], [0, 0, 1, 1], [], []>} : vector<16x32xbf16>, vector<32x32xbf16>, vector<16x32xf32> -> vector<16x32xf32>
    %c0_18 = arith.constant 0 : index
    %c0_19 = arith.constant 0 : index
    %22 = vector.load %arg8[%c0_18, %c0_19] : memref<1x32xf32, #tpu.memory_space<vmem>>, vector<1x32xf32>
    %23 = vector.broadcast %22 : vector<1x32xf32> to vector<16x32xf32>
    %24 = arith.addf %21, %23 : vector<16x32xf32>
    %c0_20 = arith.constant 0 : index
    %c0_21 = arith.constant 0 : index
    %25 = vector.load %arg9[%c0_20, %c0_21] : memref<32x32xf32, #tpu.memory_space<vmem>>, vector<32x32xf32>
    %26 = arith.truncf %25 : vector<32x32xf32> to vector<32x32xbf16>
    %cst_22 = arith.constant dense<0.000000e+00> : vector<16x32xf32>
    %27 = tpu.matmul %12, %26, %cst_22 {dimension_numbers = #tpu.dot_dimension_numbers<[1], [0], [0], [1], [0, 0, 1, 1], [], []>} : vector<16x32xbf16>, vector<32x32xbf16>, vector<16x32xf32> -> vector<16x32xf32>
    %c0_23 = arith.constant 0 : index
    %c0_24 = arith.constant 0 : index
    %28 = vector.load %arg10[%c0_23, %c0_24] : memref<1x32xf32, #tpu.memory_space<vmem>>, vector<1x32xf32>
    %29 = vector.broadcast %28 : vector<1x32xf32> to vector<16x32xf32>
    %30 = arith.addf %27, %29 : vector<16x32xf32>
    %31 = vector.extract_strided_slice %18 {offsets = [0, 0], sizes = [16, 8], strides = [1, 1]} : vector<16x32xf32> to vector<16x8xf32>
    %cst_25 = arith.constant 0.353553385 : f32
    %32 = vector.broadcast %cst_25 : f32 to vector<16x8xf32>
    %33 = arith.mulf %31, %32 : vector<16x8xf32>
    %34 = arith.truncf %33 : vector<16x8xf32> to vector<16x8xbf16>
    %35 = vector.extract_strided_slice %24 {offsets = [0, 0], sizes = [16, 8], strides = [1, 1]} : vector<16x32xf32> to vector<16x8xf32>
    %36 = arith.truncf %35 : vector<16x8xf32> to vector<16x8xbf16>
    %37 = vector.extract_strided_slice %30 {offsets = [0, 0], sizes = [16, 8], strides = [1, 1]} : vector<16x32xf32> to vector<16x8xf32>
    %38 = arith.truncf %37 : vector<16x8xf32> to vector<16x8xbf16>
    %cst_26 = arith.constant dense<0.000000e+00> : vector<16x16xf32>
    %39 = tpu.matmul %34, %36, %cst_26 {dimension_numbers = #tpu.dot_dimension_numbers<[1], [1], [0], [0], [0, 0, 1, 0], [], []>} : vector<16x8xbf16>, vector<16x8xbf16>, vector<16x16xf32> -> vector<16x16xf32>
    %cst_27 = arith.constant dense<0xFF800000> : vector<16xf32>
    %40 = vector.multi_reduction <maximumf>, %39, %cst_27 [1] : vector<16x16xf32> to vector<16xf32>
    %41 = vector.shape_cast %40 : vector<16xf32> to vector<16x1xf32>
    %42 = vector.broadcast %41 : vector<16x1xf32> to vector<16x16xf32>
    %43 = arith.subf %39, %42 : vector<16x16xf32>
    %44 = math.exp %43 : vector<16x16xf32>
    %cst_28 = arith.constant dense<0.000000e+00> : vector<16xf32>
    %45 = vector.multi_reduction <add>, %44, %cst_28 [1] : vector<16x16xf32> to vector<16xf32>
    %46 = vector.shape_cast %45 : vector<16xf32> to vector<16x1xf32>
    %47 = tpu.reciprocal %46 {approx = true} : vector<16x1xf32> -> vector<16x1xf32>
    %48 = vector.broadcast %47 : vector<16x1xf32> to vector<16x16xf32>
    %49 = arith.mulf %44, %48 : vector<16x16xf32>
    %50 = arith.truncf %49 : vector<16x16xf32> to vector<16x16xbf16>
    %cst_29 = arith.constant dense<0.000000e+00> : vector<16x8xf32>
    %51 = tpu.matmul %50, %38, %cst_29 {dimension_numbers = #tpu.dot_dimension_numbers<[1], [0], [0], [1], [0, 0, 1, 1], [], []>} : vector<16x16xbf16>, vector<16x8xbf16>, vector<16x8xf32> -> vector<16x8xf32>
    %52 = vector.extract_strided_slice %18 {offsets = [0, 8], sizes = [16, 8], strides = [1, 1]} : vector<16x32xf32> to vector<16x8xf32>
    %cst_30 = arith.constant 0.353553385 : f32
    %53 = vector.broadcast %cst_30 : f32 to vector<16x8xf32>
    %54 = arith.mulf %52, %53 : vector<16x8xf32>
    %55 = arith.truncf %54 : vector<16x8xf32> to vector<16x8xbf16>
    %56 = vector.extract_strided_slice %24 {offsets = [0, 8], sizes = [16, 8], strides = [1, 1]} : vector<16x32xf32> to vector<16x8xf32>
    %57 = arith.truncf %56 : vector<16x8xf32> to vector<16x8xbf16>
    %58 = vector.extract_strided_slice %30 {offsets = [0, 8], sizes = [16, 8], strides = [1, 1]} : vector<16x32xf32> to vector<16x8xf32>
    %59 = arith.truncf %58 : vector<16x8xf32> to vector<16x8xbf16>
    %cst_31 = arith.constant dense<0.000000e+00> : vector<16x16xf32>
    %60 = tpu.matmul %55, %57, %cst_31 {dimension_numbers = #tpu.dot_dimension_numbers<[1], [1], [0], [0], [0, 0, 1, 0], [], []>} : vector<16x8xbf16>, vector<16x8xbf16>, vector<16x16xf32> -> vector<16x16xf32>
    %cst_32 = arith.constant dense<0xFF800000> : vector<16xf32>
    %61 = vector.multi_reduction <maximumf>, %60, %cst_32 [1] : vector<16x16xf32> to vector<16xf32>
    %62 = vector.shape_cast %61 : vector<16xf32> to vector<16x1xf32>
    %63 = vector.broadcast %62 : vector<16x1xf32> to vector<16x16xf32>
    %64 = arith.subf %60, %63 : vector<16x16xf32>
    %65 = math.exp %64 : vector<16x16xf32>
    %cst_33 = arith.constant dense<0.000000e+00> : vector<16xf32>
    %66 = vector.multi_reduction <add>, %65, %cst_33 [1] : vector<16x16xf32> to vector<16xf32>
    %67 = vector.shape_cast %66 : vector<16xf32> to vector<16x1xf32>
    %68 = tpu.reciprocal %67 {approx = true} : vector<16x1xf32> -> vector<16x1xf32>
    %69 = vector.broadcast %68 : vector<16x1xf32> to vector<16x16xf32>
    %70 = arith.mulf %65, %69 : vector<16x16xf32>
    %71 = arith.truncf %70 : vector<16x16xf32> to vector<16x16xbf16>
    %cst_34 = arith.constant dense<0.000000e+00> : vector<16x8xf32>
    %72 = tpu.matmul %71, %59, %cst_34 {dimension_numbers = #tpu.dot_dimension_numbers<[1], [0], [0], [1], [0, 0, 1, 1], [], []>} : vector<16x16xbf16>, vector<16x8xbf16>, vector<16x8xf32> -> vector<16x8xf32>
    %73 = vector.extract_strided_slice %18 {offsets = [0, 16], sizes = [16, 8], strides = [1, 1]} : vector<16x32xf32> to vector<16x8xf32>
    %cst_35 = arith.constant 0.353553385 : f32
    %74 = vector.broadcast %cst_35 : f32 to vector<16x8xf32>
    %75 = arith.mulf %73, %74 : vector<16x8xf32>
    %76 = arith.truncf %75 : vector<16x8xf32> to vector<16x8xbf16>
    %77 = vector.extract_strided_slice %24 {offsets = [0, 16], sizes = [16, 8], strides = [1, 1]} : vector<16x32xf32> to vector<16x8xf32>
    %78 = arith.truncf %77 : vector<16x8xf32> to vector<16x8xbf16>
    %79 = vector.extract_strided_slice %30 {offsets = [0, 16], sizes = [16, 8], strides = [1, 1]} : vector<16x32xf32> to vector<16x8xf32>
    %80 = arith.truncf %79 : vector<16x8xf32> to vector<16x8xbf16>
    %cst_36 = arith.constant dense<0.000000e+00> : vector<16x16xf32>
    %81 = tpu.matmul %76, %78, %cst_36 {dimension_numbers = #tpu.dot_dimension_numbers<[1], [1], [0], [0], [0, 0, 1, 0], [], []>} : vector<16x8xbf16>, vector<16x8xbf16>, vector<16x16xf32> -> vector<16x16xf32>
    %cst_37 = arith.constant dense<0xFF800000> : vector<16xf32>
    %82 = vector.multi_reduction <maximumf>, %81, %cst_37 [1] : vector<16x16xf32> to vector<16xf32>
    %83 = vector.shape_cast %82 : vector<16xf32> to vector<16x1xf32>
    %84 = vector.broadcast %83 : vector<16x1xf32> to vector<16x16xf32>
    %85 = arith.subf %81, %84 : vector<16x16xf32>
    %86 = math.exp %85 : vector<16x16xf32>
    %cst_38 = arith.constant dense<0.000000e+00> : vector<16xf32>
    %87 = vector.multi_reduction <add>, %86, %cst_38 [1] : vector<16x16xf32> to vector<16xf32>
    %88 = vector.shape_cast %87 : vector<16xf32> to vector<16x1xf32>
    %89 = tpu.reciprocal %88 {approx = true} : vector<16x1xf32> -> vector<16x1xf32>
    %90 = vector.broadcast %89 : vector<16x1xf32> to vector<16x16xf32>
    %91 = arith.mulf %86, %90 : vector<16x16xf32>
    %92 = arith.truncf %91 : vector<16x16xf32> to vector<16x16xbf16>
    %cst_39 = arith.constant dense<0.000000e+00> : vector<16x8xf32>
    %93 = tpu.matmul %92, %80, %cst_39 {dimension_numbers = #tpu.dot_dimension_numbers<[1], [0], [0], [1], [0, 0, 1, 1], [], []>} : vector<16x16xbf16>, vector<16x8xbf16>, vector<16x8xf32> -> vector<16x8xf32>
    %94 = vector.extract_strided_slice %18 {offsets = [0, 24], sizes = [16, 8], strides = [1, 1]} : vector<16x32xf32> to vector<16x8xf32>
    %cst_40 = arith.constant 0.353553385 : f32
    %95 = vector.broadcast %cst_40 : f32 to vector<16x8xf32>
    %96 = arith.mulf %94, %95 : vector<16x8xf32>
    %97 = arith.truncf %96 : vector<16x8xf32> to vector<16x8xbf16>
    %98 = vector.extract_strided_slice %24 {offsets = [0, 24], sizes = [16, 8], strides = [1, 1]} : vector<16x32xf32> to vector<16x8xf32>
    %99 = arith.truncf %98 : vector<16x8xf32> to vector<16x8xbf16>
    %100 = vector.extract_strided_slice %30 {offsets = [0, 24], sizes = [16, 8], strides = [1, 1]} : vector<16x32xf32> to vector<16x8xf32>
    %101 = arith.truncf %100 : vector<16x8xf32> to vector<16x8xbf16>
    %cst_41 = arith.constant dense<0.000000e+00> : vector<16x16xf32>
    %102 = tpu.matmul %97, %99, %cst_41 {dimension_numbers = #tpu.dot_dimension_numbers<[1], [1], [0], [0], [0, 0, 1, 0], [], []>} : vector<16x8xbf16>, vector<16x8xbf16>, vector<16x16xf32> -> vector<16x16xf32>
    %cst_42 = arith.constant dense<0xFF800000> : vector<16xf32>
    %103 = vector.multi_reduction <maximumf>, %102, %cst_42 [1] : vector<16x16xf32> to vector<16xf32>
    %104 = vector.shape_cast %103 : vector<16xf32> to vector<16x1xf32>
    %105 = vector.broadcast %104 : vector<16x1xf32> to vector<16x16xf32>
    %106 = arith.subf %102, %105 : vector<16x16xf32>
    %107 = math.exp %106 : vector<16x16xf32>
    %cst_43 = arith.constant dense<0.000000e+00> : vector<16xf32>
    %108 = vector.multi_reduction <add>, %107, %cst_43 [1] : vector<16x16xf32> to vector<16xf32>
    %109 = vector.shape_cast %108 : vector<16xf32> to vector<16x1xf32>
    %110 = tpu.reciprocal %109 {approx = true} : vector<16x1xf32> -> vector<16x1xf32>
    %111 = vector.broadcast %110 : vector<16x1xf32> to vector<16x16xf32>
    %112 = arith.mulf %107, %111 : vector<16x16xf32>
    %113 = arith.truncf %112 : vector<16x16xf32> to vector<16x16xbf16>
    %cst_44 = arith.constant dense<0.000000e+00> : vector<16x8xf32>
    %114 = tpu.matmul %113, %101, %cst_44 {dimension_numbers = #tpu.dot_dimension_numbers<[1], [0], [0], [1], [0, 0, 1, 1], [], []>} : vector<16x16xbf16>, vector<16x8xbf16>, vector<16x8xf32> -> vector<16x8xf32>
    %115 = tpu.concatenate %51, %72, %93, %114 in 1 : vector<16x8xf32>, vector<16x8xf32>, vector<16x8xf32>, vector<16x8xf32> -> vector<16x32xf32>
    %116 = arith.truncf %115 : vector<16x32xf32> to vector<16x32xbf16>
    %c0_45 = arith.constant 0 : index
    %c0_46 = arith.constant 0 : index
    %117 = vector.load %arg11[%c0_45, %c0_46] : memref<32x32xf32, #tpu.memory_space<vmem>>, vector<32x32xf32>
    %118 = arith.truncf %117 : vector<32x32xf32> to vector<32x32xbf16>
    %cst_47 = arith.constant dense<0.000000e+00> : vector<16x32xf32>
    %119 = tpu.matmul %116, %118, %cst_47 {dimension_numbers = #tpu.dot_dimension_numbers<[1], [0], [0], [1], [0, 0, 1, 1], [], []>} : vector<16x32xbf16>, vector<32x32xbf16>, vector<16x32xf32> -> vector<16x32xf32>
    %c0_48 = arith.constant 0 : index
    %c0_49 = arith.constant 0 : index
    %120 = vector.load %arg12[%c0_48, %c0_49] : memref<1x32xf32, #tpu.memory_space<vmem>>, vector<1x32xf32>
    %121 = vector.broadcast %120 : vector<1x32xf32> to vector<16x32xf32>
    %122 = arith.addf %119, %121 : vector<16x32xf32>
    %123 = arith.addf %1, %122 : vector<16x32xf32>
    %cst_50 = arith.constant dense<0.000000e+00> : vector<16xf32>
    %124 = vector.multi_reduction <add>, %123, %cst_50 [1] : vector<16x32xf32> to vector<16xf32>
    %125 = vector.shape_cast %124 : vector<16xf32> to vector<16x1xf32>
    %cst_51 = arith.constant 3.200000e+01 : f32
    %126 = vector.broadcast %cst_51 : f32 to vector<16x1xf32>
    %127 = arith.divf %125, %126 : vector<16x1xf32>
    %128 = vector.broadcast %127 : vector<16x1xf32> to vector<16x32xf32>
    %129 = arith.subf %123, %128 : vector<16x32xf32>
    %130 = arith.mulf %129, %129 : vector<16x32xf32>
    %cst_52 = arith.constant dense<0.000000e+00> : vector<16xf32>
    %131 = vector.multi_reduction <add>, %130, %cst_52 [1] : vector<16x32xf32> to vector<16xf32>
    %132 = vector.shape_cast %131 : vector<16xf32> to vector<16x1xf32>
    %cst_53 = arith.constant 3.200000e+01 : f32
    %133 = vector.broadcast %cst_53 : f32 to vector<16x1xf32>
    %134 = arith.divf %132, %133 : vector<16x1xf32>
    %135 = vector.broadcast %127 : vector<16x1xf32> to vector<16x32xf32>
    %136 = arith.subf %123, %135 : vector<16x32xf32>
    %cst_54 = arith.constant 9.99999974E-6 : f32
    %137 = vector.broadcast %cst_54 : f32 to vector<16x1xf32>
    %138 = arith.addf %134, %137 : vector<16x1xf32>
    %139 = math.rsqrt %138 : vector<16x1xf32>
    %140 = vector.broadcast %139 : vector<16x1xf32> to vector<16x32xf32>
    %141 = arith.mulf %136, %140 : vector<16x32xf32>
    %c0_55 = arith.constant 0 : index
    %c0_56 = arith.constant 0 : index
    %142 = vector.load %arg13[%c0_55, %c0_56] : memref<1x32xf32, #tpu.memory_space<vmem>>, vector<1x32xf32>
    %143 = vector.broadcast %142 : vector<1x32xf32> to vector<16x32xf32>
    %144 = arith.mulf %141, %143 : vector<16x32xf32>
    %c0_57 = arith.constant 0 : index
    %c0_58 = arith.constant 0 : index
    %145 = vector.load %arg14[%c0_57, %c0_58] : memref<1x32xf32, #tpu.memory_space<vmem>>, vector<1x32xf32>
    %146 = vector.broadcast %145 : vector<1x32xf32> to vector<16x32xf32>
    %147 = arith.addf %144, %146 : vector<16x32xf32>
    %c0_59 = arith.constant 0 : index
    %c0_60 = arith.constant 0 : index
    %c0_61 = arith.constant 0 : index
    %148 = vector.load %arg15[%c0_59, %c0_60, %c0_61] : memref<1x16x32xf32, #tpu.memory_space<vmem>>, vector<1x16x32xf32>
    %149 = vector.shape_cast %148 : vector<1x16x32xf32> to vector<16x32xf32>
    %150 = vector.shape_cast %147 : vector<16x32xf32> to vector<1x16x32xf32>
    tpu.vector_store %arg15[%c0_59, %c0_60, %c0_61], %150 {strides = array<i32>} : memref<1x16x32xf32, #tpu.memory_space<vmem>>, vector<1x16x32xf32>,
    return
  }
  func.func @transform_0(%arg0: i32) -> (i32, i32, i32) {
    %c0_i32 = arith.constant 0 : i32
    %c0_i32_0 = arith.constant 0 : i32
    %c0_i32_1 = arith.constant 0 : i32
    return %arg0, %c0_i32, %c0_i32_0 : i32, i32, i32
  }
  func.func @transform_1(%arg0: i32) -> (i32, i32, i32) {
    %c0_i32 = arith.constant 0 : i32
    %c0_i32_0 = arith.constant 0 : i32
    %c0_i32_1 = arith.constant 0 : i32
    return %arg0, %c0_i32, %c0_i32_0 : i32, i32, i32
  }
  func.func @transform_2(%arg0: i32) -> (i32, i32, i32) {
    %c0_i32 = arith.constant 0 : i32
    %c0_i32_0 = arith.constant 0 : i32
    %c0_i32_1 = arith.constant 0 : i32
    return %arg0, %c0_i32, %c0_i32_0 : i32, i32, i32
  }
  func.func @transform_3(%arg0: i32) -> (i32, i32, i32) {
    %c0_i32 = arith.constant 0 : i32
    %c0_i32_0 = arith.constant 0 : i32
    %c0_i32_1 = arith.constant 0 : i32
    return %arg0, %c0_i32, %c0_i32_0 : i32, i32, i32
  }
  func.func @transform_4(%arg0: i32) -> (i32, i32) {
    %c0_i32 = arith.constant 0 : i32
    %c0_i32_0 = arith.constant 0 : i32
    %c0_i32_1 = arith.constant 0 : i32
    return %c0_i32, %c0_i32_0 : i32, i32
  }
  func.func @transform_5(%arg0: i32) -> (i32, i32) {
    %c0_i32 = arith.constant 0 : i32
    %c0_i32_0 = arith.constant 0 : i32
    %c0_i32_1 = arith.constant 0 : i32
    return %c0_i32, %c0_i32_0 : i32, i32
  }
  func.func @transform_6(%arg0: i32) -> (i32, i32) {
    %c0_i32 = arith.constant 0 : i32
    %c0_i32_0 = arith.constant 0 : i32
    %c0_i32_1 = arith.constant 0 : i32
    return %c0_i32, %c0_i32_0 : i32, i32
  }
  func.func @transform_7(%arg0: i32) -> (i32, i32) {
    %c0_i32 = arith.constant 0 : i32
    %c0_i32_0 = arith.constant 0 : i32
    %c0_i32_1 = arith.constant 0 : i32
    return %c0_i32, %c0_i32_0 : i32, i32
  }
  func.func @transform_8(%arg0: i32) -> (i32, i32) {
    %c0_i32 = arith.constant 0 : i32
    %c0_i32_0 = arith.constant 0 : i32
    %c0_i32_1 = arith.constant 0 : i32
    return %c0_i32, %c0_i32_0 : i32, i32
  }
  func.func @transform_9(%arg0: i32) -> (i32, i32) {
    %c0_i32 = arith.constant 0 : i32
    %c0_i32_0 = arith.constant 0 : i32
    %c0_i32_1 = arith.constant 0 : i32
    return %c0_i32, %c0_i32_0 : i32, i32
  }
  func.func @transform_10(%arg0: i32) -> (i32, i32) {
    %c0_i32 = arith.constant 0 : i32
    %c0_i32_0 = arith.constant 0 : i32
    %c0_i32_1 = arith.constant 0 : i32
    return %c0_i32, %c0_i32_0 : i32, i32
  }
  func.func @transform_11(%arg0: i32) -> (i32, i32) {
    %c0_i32 = arith.constant 0 : i32
    %c0_i32_0 = arith.constant 0 : i32
    %c0_i32_1 = arith.constant 0 : i32
    return %c0_i32, %c0_i32_0 : i32, i32
  }
  func.func @transform_12(%arg0: i32) -> (i32, i32) {
    %c0_i32 = arith.constant 0 : i32
    %c0_i32_0 = arith.constant 0 : i32
    %c0_i32_1 = arith.constant 0 : i32
    return %c0_i32, %c0_i32_0 : i32, i32
  }
  func.func @transform_13(%arg0: i32) -> (i32, i32) {
    %c0_i32 = arith.constant 0 : i32
    %c0_i32_0 = arith.constant 0 : i32
    %c0_i32_1 = arith.constant 0 : i32
    return %c0_i32, %c0_i32_0 : i32, i32
  }
  func.func @transform_14(%arg0: i32) -> (i32, i32, i32) {
    %c0_i32 = arith.constant 0 : i32
    %c0_i32_0 = arith.constant 0 : i32
    %c0_i32_1 = arith.constant 0 : i32
    return %arg0, %c0_i32, %c0_i32_0 : i32, i32, i32
  }
}

module attributes {stable_mosaic.version = 11 : i64} {
  func.func @_mha_ln_kernel(%arg0: i32, %arg1: memref<1x16x32xf32, #tpu.memory_space<vmem>>, %arg2: memref<1x16x32xf32, #tpu.memory_space<vmem>>, %arg3: memref<1x64x32xf32, #tpu.memory_space<vmem>>, %arg4: memref<1x64x32xf32, #tpu.memory_space<vmem>>, %arg5: memref<32x32xf32, #tpu.memory_space<vmem>>, %arg6: memref<1x32xf32, #tpu.memory_space<vmem>>, %arg7: memref<32x32xf32, #tpu.memory_space<vmem>>, %arg8: memref<1x32xf32, #tpu.memory_space<vmem>>, %arg9: memref<32x32xf32, #tpu.memory_space<vmem>>, %arg10: memref<1x32xf32, #tpu.memory_space<vmem>>, %arg11: memref<32x32xf32, #tpu.memory_space<vmem>>, %arg12: memref<1x32xf32, #tpu.memory_space<vmem>>, %arg13: memref<1x32xf32, #tpu.memory_space<vmem>>, %arg14: memref<1x32xf32, #tpu.memory_space<vmem>>, %arg15: memref<1x16x32xf32, #tpu.memory_space<vmem>>) attributes {dimension_semantics = [#tpu.dimension_semantics<parallel>], iteration_bounds = array<i64: 2>, scalar_prefetch = 0 : i64, scratch_operands = 0 : i64, tpu.core_type = #tpu.core_type<tc>, window_params = [{transform_indices = @transform_0, window_bounds = array<i64: 1, 16, 32>}, {transform_indices = @transform_1, window_bounds = array<i64: 1, 16, 32>}, {transform_indices = @transform_2, window_bounds = array<i64: 1, 64, 32>}, {transform_indices = @transform_3, window_bounds = array<i64: 1, 64, 32>}, {pipeline_mode = #tpu.pipeline_mode<synchronous>, transform_indices = @transform_4, window_bounds = array<i64: 32, 32>}, {pipeline_mode = #tpu.pipeline_mode<synchronous>, transform_indices = @transform_5, window_bounds = array<i64: 1, 32>}, {pipeline_mode = #tpu.pipeline_mode<synchronous>, transform_indices = @transform_6, window_bounds = array<i64: 32, 32>}, {pipeline_mode = #tpu.pipeline_mode<synchronous>, transform_indices = @transform_7, window_bounds = array<i64: 1, 32>}, {pipeline_mode = #tpu.pipeline_mode<synchronous>, transform_indices = @transform_8, window_bounds = array<i64: 32, 32>}, {pipeline_mode = #tpu.pipeline_mode<synchronous>, transform_indices = @transform_9, window_bounds = array<i64: 1, 32>}, {pipeline_mode = #tpu.pipeline_mode<synchronous>, transform_indices = @transform_10, window_bounds = array<i64: 32, 32>}, {pipeline_mode = #tpu.pipeline_mode<synchronous>, transform_indices = @transform_11, window_bounds = array<i64: 1, 32>}, {pipeline_mode = #tpu.pipeline_mode<synchronous>, transform_indices = @transform_12, window_bounds = array<i64: 1, 32>}, {pipeline_mode = #tpu.pipeline_mode<synchronous>, transform_indices = @transform_13, window_bounds = array<i64: 1, 32>}, {transform_indices = @transform_14, window_bounds = array<i64: 1, 16, 32>}]} {
    %c0 = arith.constant 0 : index
    %c0_0 = arith.constant 0 : index
    %c0_1 = arith.constant 0 : index
    %0 = vector.load %arg1[%c0, %c0_0, %c0_1] : memref<1x16x32xf32, #tpu.memory_space<vmem>>, vector<1x16x32xf32>
    %1 = vector.shape_cast %0 : vector<1x16x32xf32> to vector<16x32xf32>
    %c0_2 = arith.constant 0 : index
    %c0_3 = arith.constant 0 : index
    %c0_4 = arith.constant 0 : index
    %2 = vector.load %arg2[%c0_2, %c0_3, %c0_4] : memref<1x16x32xf32, #tpu.memory_space<vmem>>, vector<1x16x32xf32>
    %3 = vector.shape_cast %2 : vector<1x16x32xf32> to vector<16x32xf32>
    %c0_5 = arith.constant 0 : index
    %c0_6 = arith.constant 0 : index
    %c0_7 = arith.constant 0 : index
    %4 = vector.load %arg3[%c0_5, %c0_6, %c0_7] : memref<1x64x32xf32, #tpu.memory_space<vmem>>, vector<1x64x32xf32>
    %5 = vector.shape_cast %4 : vector<1x64x32xf32> to vector<64x32xf32>
    %c0_8 = arith.constant 0 : index
    %c0_9 = arith.constant 0 : index
    %c0_10 = arith.constant 0 : index
    %6 = vector.load %arg4[%c0_8, %c0_9, %c0_10] : memref<1x64x32xf32, #tpu.memory_space<vmem>>, vector<1x64x32xf32>
    %7 = vector.shape_cast %6 : vector<1x64x32xf32> to vector<64x32xf32>
    %8 = arith.addf %1, %3 : vector<16x32xf32>
    %9 = arith.truncf %8 : vector<16x32xf32> to vector<16x32xbf16>
    %10 = arith.addf %5, %7 : vector<64x32xf32>
    %11 = arith.truncf %10 : vector<64x32xf32> to vector<64x32xbf16>
    %12 = arith.truncf %5 : vector<64x32xf32> to vector<64x32xbf16>
    %c0_11 = arith.constant 0 : index
    %c0_12 = arith.constant 0 : index
    %13 = vector.load %arg5[%c0_11, %c0_12] : memref<32x32xf32, #tpu.memory_space<vmem>>, vector<32x32xf32>
    %14 = arith.truncf %13 : vector<32x32xf32> to vector<32x32xbf16>
    %cst = arith.constant dense<0.000000e+00> : vector<16x32xf32>
    %15 = tpu.matmul %9, %14, %cst {dimension_numbers = #tpu.dot_dimension_numbers<[1], [0], [0], [1], [0, 0, 1, 1], [], []>} : vector<16x32xbf16>, vector<32x32xbf16>, vector<16x32xf32> -> vector<16x32xf32>
    %c0_13 = arith.constant 0 : index
    %c0_14 = arith.constant 0 : index
    %16 = vector.load %arg6[%c0_13, %c0_14] : memref<1x32xf32, #tpu.memory_space<vmem>>, vector<1x32xf32>
    %17 = vector.broadcast %16 : vector<1x32xf32> to vector<16x32xf32>
    %18 = arith.addf %15, %17 : vector<16x32xf32>
    %c0_15 = arith.constant 0 : index
    %c0_16 = arith.constant 0 : index
    %19 = vector.load %arg7[%c0_15, %c0_16] : memref<32x32xf32, #tpu.memory_space<vmem>>, vector<32x32xf32>
    %20 = arith.truncf %19 : vector<32x32xf32> to vector<32x32xbf16>
    %cst_17 = arith.constant dense<0.000000e+00> : vector<64x32xf32>
    %21 = tpu.matmul %11, %20, %cst_17 {dimension_numbers = #tpu.dot_dimension_numbers<[1], [0], [0], [1], [0, 0, 1, 1], [], []>} : vector<64x32xbf16>, vector<32x32xbf16>, vector<64x32xf32> -> vector<64x32xf32>
    %c0_18 = arith.constant 0 : index
    %c0_19 = arith.constant 0 : index
    %22 = vector.load %arg8[%c0_18, %c0_19] : memref<1x32xf32, #tpu.memory_space<vmem>>, vector<1x32xf32>
    %23 = vector.broadcast %22 : vector<1x32xf32> to vector<64x32xf32>
    %24 = arith.addf %21, %23 : vector<64x32xf32>
    %c0_20 = arith.constant 0 : index
    %c0_21 = arith.constant 0 : index
    %25 = vector.load %arg9[%c0_20, %c0_21] : memref<32x32xf32, #tpu.memory_space<vmem>>, vector<32x32xf32>
    %26 = arith.truncf %25 : vector<32x32xf32> to vector<32x32xbf16>
    %cst_22 = arith.constant dense<0.000000e+00> : vector<64x32xf32>
    %27 = tpu.matmul %12, %26, %cst_22 {dimension_numbers = #tpu.dot_dimension_numbers<[1], [0], [0], [1], [0, 0, 1, 1], [], []>} : vector<64x32xbf16>, vector<32x32xbf16>, vector<64x32xf32> -> vector<64x32xf32>
    %c0_23 = arith.constant 0 : index
    %c0_24 = arith.constant 0 : index
    %28 = vector.load %arg10[%c0_23, %c0_24] : memref<1x32xf32, #tpu.memory_space<vmem>>, vector<1x32xf32>
    %29 = vector.broadcast %28 : vector<1x32xf32> to vector<64x32xf32>
    %30 = arith.addf %27, %29 : vector<64x32xf32>
    %31 = vector.extract_strided_slice %18 {offsets = [0, 0], sizes = [16, 8], strides = [1, 1]} : vector<16x32xf32> to vector<16x8xf32>
    %cst_25 = arith.constant 0.353553385 : f32
    %32 = vector.broadcast %cst_25 : f32 to vector<16x8xf32>
    %33 = arith.mulf %31, %32 : vector<16x8xf32>
    %34 = arith.truncf %33 : vector<16x8xf32> to vector<16x8xbf16>
    %35 = vector.extract_strided_slice %24 {offsets = [0, 0], sizes = [64, 8], strides = [1, 1]} : vector<64x32xf32> to vector<64x8xf32>
    %36 = arith.truncf %35 : vector<64x8xf32> to vector<64x8xbf16>
    %37 = vector.extract_strided_slice %30 {offsets = [0, 0], sizes = [64, 8], strides = [1, 1]} : vector<64x32xf32> to vector<64x8xf32>
    %38 = arith.truncf %37 : vector<64x8xf32> to vector<64x8xbf16>
    %cst_26 = arith.constant dense<0.000000e+00> : vector<16x64xf32>
    %39 = tpu.matmul %34, %36, %cst_26 {dimension_numbers = #tpu.dot_dimension_numbers<[1], [1], [0], [0], [0, 0, 1, 0], [], []>} : vector<16x8xbf16>, vector<64x8xbf16>, vector<16x64xf32> -> vector<16x64xf32>
    %cst_27 = arith.constant dense<0xFF800000> : vector<16xf32>
    %40 = vector.multi_reduction <maximumf>, %39, %cst_27 [1] : vector<16x64xf32> to vector<16xf32>
    %41 = vector.shape_cast %40 : vector<16xf32> to vector<16x1xf32>
    %42 = vector.broadcast %41 : vector<16x1xf32> to vector<16x64xf32>
    %43 = arith.subf %39, %42 : vector<16x64xf32>
    %44 = math.exp %43 : vector<16x64xf32>
    %cst_28 = arith.constant dense<0.000000e+00> : vector<16xf32>
    %45 = vector.multi_reduction <add>, %44, %cst_28 [1] : vector<16x64xf32> to vector<16xf32>
    %46 = vector.shape_cast %45 : vector<16xf32> to vector<16x1xf32>
    %47 = tpu.reciprocal %46 {approx = true} : vector<16x1xf32> -> vector<16x1xf32>
    %48 = vector.broadcast %47 : vector<16x1xf32> to vector<16x64xf32>
    %49 = arith.mulf %44, %48 : vector<16x64xf32>
    %50 = arith.truncf %49 : vector<16x64xf32> to vector<16x64xbf16>
    %cst_29 = arith.constant dense<0.000000e+00> : vector<16x8xf32>
    %51 = tpu.matmul %50, %38, %cst_29 {dimension_numbers = #tpu.dot_dimension_numbers<[1], [0], [0], [1], [0, 0, 1, 1], [], []>} : vector<16x64xbf16>, vector<64x8xbf16>, vector<16x8xf32> -> vector<16x8xf32>
    %52 = vector.extract_strided_slice %18 {offsets = [0, 8], sizes = [16, 8], strides = [1, 1]} : vector<16x32xf32> to vector<16x8xf32>
    %cst_30 = arith.constant 0.353553385 : f32
    %53 = vector.broadcast %cst_30 : f32 to vector<16x8xf32>
    %54 = arith.mulf %52, %53 : vector<16x8xf32>
    %55 = arith.truncf %54 : vector<16x8xf32> to vector<16x8xbf16>
    %56 = vector.extract_strided_slice %24 {offsets = [0, 8], sizes = [64, 8], strides = [1, 1]} : vector<64x32xf32> to vector<64x8xf32>
    %57 = arith.truncf %56 : vector<64x8xf32> to vector<64x8xbf16>
    %58 = vector.extract_strided_slice %30 {offsets = [0, 8], sizes = [64, 8], strides = [1, 1]} : vector<64x32xf32> to vector<64x8xf32>
    %59 = arith.truncf %58 : vector<64x8xf32> to vector<64x8xbf16>
    %cst_31 = arith.constant dense<0.000000e+00> : vector<16x64xf32>
    %60 = tpu.matmul %55, %57, %cst_31 {dimension_numbers = #tpu.dot_dimension_numbers<[1], [1], [0], [0], [0, 0, 1, 0], [], []>} : vector<16x8xbf16>, vector<64x8xbf16>, vector<16x64xf32> -> vector<16x64xf32>
    %cst_32 = arith.constant dense<0xFF800000> : vector<16xf32>
    %61 = vector.multi_reduction <maximumf>, %60, %cst_32 [1] : vector<16x64xf32> to vector<16xf32>
    %62 = vector.shape_cast %61 : vector<16xf32> to vector<16x1xf32>
    %63 = vector.broadcast %62 : vector<16x1xf32> to vector<16x64xf32>
    %64 = arith.subf %60, %63 : vector<16x64xf32>
    %65 = math.exp %64 : vector<16x64xf32>
    %cst_33 = arith.constant dense<0.000000e+00> : vector<16xf32>
    %66 = vector.multi_reduction <add>, %65, %cst_33 [1] : vector<16x64xf32> to vector<16xf32>
    %67 = vector.shape_cast %66 : vector<16xf32> to vector<16x1xf32>
    %68 = tpu.reciprocal %67 {approx = true} : vector<16x1xf32> -> vector<16x1xf32>
    %69 = vector.broadcast %68 : vector<16x1xf32> to vector<16x64xf32>
    %70 = arith.mulf %65, %69 : vector<16x64xf32>
    %71 = arith.truncf %70 : vector<16x64xf32> to vector<16x64xbf16>
    %cst_34 = arith.constant dense<0.000000e+00> : vector<16x8xf32>
    %72 = tpu.matmul %71, %59, %cst_34 {dimension_numbers = #tpu.dot_dimension_numbers<[1], [0], [0], [1], [0, 0, 1, 1], [], []>} : vector<16x64xbf16>, vector<64x8xbf16>, vector<16x8xf32> -> vector<16x8xf32>
    %73 = vector.extract_strided_slice %18 {offsets = [0, 16], sizes = [16, 8], strides = [1, 1]} : vector<16x32xf32> to vector<16x8xf32>
    %cst_35 = arith.constant 0.353553385 : f32
    %74 = vector.broadcast %cst_35 : f32 to vector<16x8xf32>
    %75 = arith.mulf %73, %74 : vector<16x8xf32>
    %76 = arith.truncf %75 : vector<16x8xf32> to vector<16x8xbf16>
    %77 = vector.extract_strided_slice %24 {offsets = [0, 16], sizes = [64, 8], strides = [1, 1]} : vector<64x32xf32> to vector<64x8xf32>
    %78 = arith.truncf %77 : vector<64x8xf32> to vector<64x8xbf16>
    %79 = vector.extract_strided_slice %30 {offsets = [0, 16], sizes = [64, 8], strides = [1, 1]} : vector<64x32xf32> to vector<64x8xf32>
    %80 = arith.truncf %79 : vector<64x8xf32> to vector<64x8xbf16>
    %cst_36 = arith.constant dense<0.000000e+00> : vector<16x64xf32>
    %81 = tpu.matmul %76, %78, %cst_36 {dimension_numbers = #tpu.dot_dimension_numbers<[1], [1], [0], [0], [0, 0, 1, 0], [], []>} : vector<16x8xbf16>, vector<64x8xbf16>, vector<16x64xf32> -> vector<16x64xf32>
    %cst_37 = arith.constant dense<0xFF800000> : vector<16xf32>
    %82 = vector.multi_reduction <maximumf>, %81, %cst_37 [1] : vector<16x64xf32> to vector<16xf32>
    %83 = vector.shape_cast %82 : vector<16xf32> to vector<16x1xf32>
    %84 = vector.broadcast %83 : vector<16x1xf32> to vector<16x64xf32>
    %85 = arith.subf %81, %84 : vector<16x64xf32>
    %86 = math.exp %85 : vector<16x64xf32>
    %cst_38 = arith.constant dense<0.000000e+00> : vector<16xf32>
    %87 = vector.multi_reduction <add>, %86, %cst_38 [1] : vector<16x64xf32> to vector<16xf32>
    %88 = vector.shape_cast %87 : vector<16xf32> to vector<16x1xf32>
    %89 = tpu.reciprocal %88 {approx = true} : vector<16x1xf32> -> vector<16x1xf32>
    %90 = vector.broadcast %89 : vector<16x1xf32> to vector<16x64xf32>
    %91 = arith.mulf %86, %90 : vector<16x64xf32>
    %92 = arith.truncf %91 : vector<16x64xf32> to vector<16x64xbf16>
    %cst_39 = arith.constant dense<0.000000e+00> : vector<16x8xf32>
    %93 = tpu.matmul %92, %80, %cst_39 {dimension_numbers = #tpu.dot_dimension_numbers<[1], [0], [0], [1], [0, 0, 1, 1], [], []>} : vector<16x64xbf16>, vector<64x8xbf16>, vector<16x8xf32> -> vector<16x8xf32>
    %94 = vector.extract_strided_slice %18 {offsets = [0, 24], sizes = [16, 8], strides = [1, 1]} : vector<16x32xf32> to vector<16x8xf32>
    %cst_40 = arith.constant 0.353553385 : f32
    %95 = vector.broadcast %cst_40 : f32 to vector<16x8xf32>
    %96 = arith.mulf %94, %95 : vector<16x8xf32>
    %97 = arith.truncf %96 : vector<16x8xf32> to vector<16x8xbf16>
    %98 = vector.extract_strided_slice %24 {offsets = [0, 24], sizes = [64, 8], strides = [1, 1]} : vector<64x32xf32> to vector<64x8xf32>
    %99 = arith.truncf %98 : vector<64x8xf32> to vector<64x8xbf16>
    %100 = vector.extract_strided_slice %30 {offsets = [0, 24], sizes = [64, 8], strides = [1, 1]} : vector<64x32xf32> to vector<64x8xf32>
    %101 = arith.truncf %100 : vector<64x8xf32> to vector<64x8xbf16>
    %cst_41 = arith.constant dense<0.000000e+00> : vector<16x64xf32>
    %102 = tpu.matmul %97, %99, %cst_41 {dimension_numbers = #tpu.dot_dimension_numbers<[1], [1], [0], [0], [0, 0, 1, 0], [], []>} : vector<16x8xbf16>, vector<64x8xbf16>, vector<16x64xf32> -> vector<16x64xf32>
    %cst_42 = arith.constant dense<0xFF800000> : vector<16xf32>
    %103 = vector.multi_reduction <maximumf>, %102, %cst_42 [1] : vector<16x64xf32> to vector<16xf32>
    %104 = vector.shape_cast %103 : vector<16xf32> to vector<16x1xf32>
    %105 = vector.broadcast %104 : vector<16x1xf32> to vector<16x64xf32>
    %106 = arith.subf %102, %105 : vector<16x64xf32>
    %107 = math.exp %106 : vector<16x64xf32>
    %cst_43 = arith.constant dense<0.000000e+00> : vector<16xf32>
    %108 = vector.multi_reduction <add>, %107, %cst_43 [1] : vector<16x64xf32> to vector<16xf32>
    %109 = vector.shape_cast %108 : vector<16xf32> to vector<16x1xf32>
    %110 = tpu.reciprocal %109 {approx = true} : vector<16x1xf32> -> vector<16x1xf32>
    %111 = vector.broadcast %110 : vector<16x1xf32> to vector<16x64xf32>
    %112 = arith.mulf %107, %111 : vector<16x64xf32>
    %113 = arith.truncf %112 : vector<16x64xf32> to vector<16x64xbf16>
    %cst_44 = arith.constant dense<0.000000e+00> : vector<16x8xf32>
    %114 = tpu.matmul %113, %101, %cst_44 {dimension_numbers = #tpu.dot_dimension_numbers<[1], [0], [0], [1], [0, 0, 1, 1], [], []>} : vector<16x64xbf16>, vector<64x8xbf16>, vector<16x8xf32> -> vector<16x8xf32>
    %115 = tpu.concatenate %51, %72, %93, %114 in 1 : vector<16x8xf32>, vector<16x8xf32>, vector<16x8xf32>, vector<16x8xf32> -> vector<16x32xf32>
    %116 = arith.truncf %115 : vector<16x32xf32> to vector<16x32xbf16>
    %c0_45 = arith.constant 0 : index
    %c0_46 = arith.constant 0 : index
    %117 = vector.load %arg11[%c0_45, %c0_46] : memref<32x32xf32, #tpu.memory_space<vmem>>, vector<32x32xf32>
    %118 = arith.truncf %117 : vector<32x32xf32> to vector<32x32xbf16>
    %cst_47 = arith.constant dense<0.000000e+00> : vector<16x32xf32>
    %119 = tpu.matmul %116, %118, %cst_47 {dimension_numbers = #tpu.dot_dimension_numbers<[1], [0], [0], [1], [0, 0, 1, 1], [], []>} : vector<16x32xbf16>, vector<32x32xbf16>, vector<16x32xf32> -> vector<16x32xf32>
    %c0_48 = arith.constant 0 : index
    %c0_49 = arith.constant 0 : index
    %120 = vector.load %arg12[%c0_48, %c0_49] : memref<1x32xf32, #tpu.memory_space<vmem>>, vector<1x32xf32>
    %121 = vector.broadcast %120 : vector<1x32xf32> to vector<16x32xf32>
    %122 = arith.addf %119, %121 : vector<16x32xf32>
    %123 = arith.addf %1, %122 : vector<16x32xf32>
    %cst_50 = arith.constant dense<0.000000e+00> : vector<16xf32>
    %124 = vector.multi_reduction <add>, %123, %cst_50 [1] : vector<16x32xf32> to vector<16xf32>
    %125 = vector.shape_cast %124 : vector<16xf32> to vector<16x1xf32>
    %cst_51 = arith.constant 3.200000e+01 : f32
    %126 = vector.broadcast %cst_51 : f32 to vector<16x1xf32>
    %127 = arith.divf %125, %126 : vector<16x1xf32>
    %128 = vector.broadcast %127 : vector<16x1xf32> to vector<16x32xf32>
    %129 = arith.subf %123, %128 : vector<16x32xf32>
    %130 = arith.mulf %129, %129 : vector<16x32xf32>
    %cst_52 = arith.constant dense<0.000000e+00> : vector<16xf32>
    %131 = vector.multi_reduction <add>, %130, %cst_52 [1] : vector<16x32xf32> to vector<16xf32>
    %132 = vector.shape_cast %131 : vector<16xf32> to vector<16x1xf32>
    %cst_53 = arith.constant 3.200000e+01 : f32
    %133 = vector.broadcast %cst_53 : f32 to vector<16x1xf32>
    %134 = arith.divf %132, %133 : vector<16x1xf32>
    %135 = vector.broadcast %127 : vector<16x1xf32> to vector<16x32xf32>
    %136 = arith.subf %123, %135 : vector<16x32xf32>
    %cst_54 = arith.constant 9.99999974E-6 : f32
    %137 = vector.broadcast %cst_54 : f32 to vector<16x1xf32>
    %138 = arith.addf %134, %137 : vector<16x1xf32>
    %139 = math.rsqrt %138 : vector<16x1xf32>
    %140 = vector.broadcast %139 : vector<16x1xf32> to vector<16x32xf32>
    %141 = arith.mulf %136, %140 : vector<16x32xf32>
    %c0_55 = arith.constant 0 : index
    %c0_56 = arith.constant 0 : index
    %142 = vector.load %arg13[%c0_55, %c0_56] : memref<1x32xf32, #tpu.memory_space<vmem>>, vector<1x32xf32>
    %143 = vector.broadcast %142 : vector<1x32xf32> to vector<16x32xf32>
    %144 = arith.mulf %141, %143 : vector<16x32xf32>
    %c0_57 = arith.constant 0 : index
    %c0_58 = arith.constant 0 : index
    %145 = vector.load %arg14[%c0_57, %c0_58] : memref<1x32xf32, #tpu.memory_space<vmem>>, vector<1x32xf32>
    %146 = vector.broadcast %145 : vector<1x32xf32> to vector<16x32xf32>
    %147 = arith.addf %144, %146 : vector<16x32xf32>
    %c0_59 = arith.constant 0 : index
    %c0_60 = arith.constant 0 : index
    %c0_61 = arith.constant 0 : index
    %148 = vector.load %arg15[%c0_59, %c0_60, %c0_61] : memref<1x16x32xf32, #tpu.memory_space<vmem>>, vector<1x16x32xf32>
    %149 = vector.shape_cast %148 : vector<1x16x32xf32> to vector<16x32xf32>
    %150 = vector.shape_cast %147 : vector<16x32xf32> to vector<1x16x32xf32>
    tpu.vector_store %arg15[%c0_59, %c0_60, %c0_61], %150 {strides = array<i32>} : memref<1x16x32xf32, #tpu.memory_space<vmem>>, vector<1x16x32xf32>,
    return
  }
  func.func @transform_0(%arg0: i32) -> (i32, i32, i32) {
    %c0_i32 = arith.constant 0 : i32
    %c0_i32_0 = arith.constant 0 : i32
    %c0_i32_1 = arith.constant 0 : i32
    return %arg0, %c0_i32, %c0_i32_0 : i32, i32, i32
  }
  func.func @transform_1(%arg0: i32) -> (i32, i32, i32) {
    %c0_i32 = arith.constant 0 : i32
    %c0_i32_0 = arith.constant 0 : i32
    %c0_i32_1 = arith.constant 0 : i32
    return %arg0, %c0_i32, %c0_i32_0 : i32, i32, i32
  }
  func.func @transform_2(%arg0: i32) -> (i32, i32, i32) {
    %c0_i32 = arith.constant 0 : i32
    %c0_i32_0 = arith.constant 0 : i32
    %c0_i32_1 = arith.constant 0 : i32
    return %arg0, %c0_i32, %c0_i32_0 : i32, i32, i32
  }
  func.func @transform_3(%arg0: i32) -> (i32, i32, i32) {
    %c0_i32 = arith.constant 0 : i32
    %c0_i32_0 = arith.constant 0 : i32
    %c0_i32_1 = arith.constant 0 : i32
    return %arg0, %c0_i32, %c0_i32_0 : i32, i32, i32
  }
  func.func @transform_4(%arg0: i32) -> (i32, i32) {
    %c0_i32 = arith.constant 0 : i32
    %c0_i32_0 = arith.constant 0 : i32
    %c0_i32_1 = arith.constant 0 : i32
    return %c0_i32, %c0_i32_0 : i32, i32
  }
  func.func @transform_5(%arg0: i32) -> (i32, i32) {
    %c0_i32 = arith.constant 0 : i32
    %c0_i32_0 = arith.constant 0 : i32
    %c0_i32_1 = arith.constant 0 : i32
    return %c0_i32, %c0_i32_0 : i32, i32
  }
  func.func @transform_6(%arg0: i32) -> (i32, i32) {
    %c0_i32 = arith.constant 0 : i32
    %c0_i32_0 = arith.constant 0 : i32
    %c0_i32_1 = arith.constant 0 : i32
    return %c0_i32, %c0_i32_0 : i32, i32
  }
  func.func @transform_7(%arg0: i32) -> (i32, i32) {
    %c0_i32 = arith.constant 0 : i32
    %c0_i32_0 = arith.constant 0 : i32
    %c0_i32_1 = arith.constant 0 : i32
    return %c0_i32, %c0_i32_0 : i32, i32
  }
  func.func @transform_8(%arg0: i32) -> (i32, i32) {
    %c0_i32 = arith.constant 0 : i32
    %c0_i32_0 = arith.constant 0 : i32
    %c0_i32_1 = arith.constant 0 : i32
    return %c0_i32, %c0_i32_0 : i32, i32
  }
  func.func @transform_9(%arg0: i32) -> (i32, i32) {
    %c0_i32 = arith.constant 0 : i32
    %c0_i32_0 = arith.constant 0 : i32
    %c0_i32_1 = arith.constant 0 : i32
    return %c0_i32, %c0_i32_0 : i32, i32
  }
  func.func @transform_10(%arg0: i32) -> (i32, i32) {
    %c0_i32 = arith.constant 0 : i32
    %c0_i32_0 = arith.constant 0 : i32
    %c0_i32_1 = arith.constant 0 : i32
    return %c0_i32, %c0_i32_0 : i32, i32
  }
  func.func @transform_11(%arg0: i32) -> (i32, i32) {
    %c0_i32 = arith.constant 0 : i32
    %c0_i32_0 = arith.constant 0 : i32
    %c0_i32_1 = arith.constant 0 : i32
    return %c0_i32, %c0_i32_0 : i32, i32
  }
  func.func @transform_12(%arg0: i32) -> (i32, i32) {
    %c0_i32 = arith.constant 0 : i32
    %c0_i32_0 = arith.constant 0 : i32
    %c0_i32_1 = arith.constant 0 : i32
    return %c0_i32, %c0_i32_0 : i32, i32
  }
  func.func @transform_13(%arg0: i32) -> (i32, i32) {
    %c0_i32 = arith.constant 0 : i32
    %c0_i32_0 = arith.constant 0 : i32
    %c0_i32_1 = arith.constant 0 : i32
    return %c0_i32, %c0_i32_0 : i32, i32
  }
  func.func @transform_14(%arg0: i32) -> (i32, i32, i32) {
    %c0_i32 = arith.constant 0 : i32
    %c0_i32_0 = arith.constant 0 : i32
    %c0_i32_1 = arith.constant 0 : i32
    return %arg0, %c0_i32, %c0_i32_0 : i32, i32, i32
  }
}

module attributes {stable_mosaic.version = 11 : i64} {
  func.func @_ffn_ln_kernel(%arg0: i32, %arg1: memref<32x32xf32, #tpu.memory_space<vmem>>, %arg2: memref<32x64xf32, #tpu.memory_space<vmem>>, %arg3: memref<1x64xf32, #tpu.memory_space<vmem>>, %arg4: memref<64x32xf32, #tpu.memory_space<vmem>>, %arg5: memref<1x32xf32, #tpu.memory_space<vmem>>, %arg6: memref<1x32xf32, #tpu.memory_space<vmem>>, %arg7: memref<1x32xf32, #tpu.memory_space<vmem>>, %arg8: memref<32x32xf32, #tpu.memory_space<vmem>>) attributes {dimension_semantics = [#tpu.dimension_semantics<arbitrary>], iteration_bounds = array<i64: 1>, scalar_prefetch = 0 : i64, scratch_operands = 0 : i64, tpu.core_type = #tpu.core_type<tc>, window_params = [{transform_indices = @transform_0, window_bounds = array<i64: 32, 32>}, {pipeline_mode = #tpu.pipeline_mode<synchronous>, transform_indices = @transform_1, window_bounds = array<i64: 32, 64>}, {pipeline_mode = #tpu.pipeline_mode<synchronous>, transform_indices = @transform_2, window_bounds = array<i64: 1, 64>}, {pipeline_mode = #tpu.pipeline_mode<synchronous>, transform_indices = @transform_3, window_bounds = array<i64: 64, 32>}, {pipeline_mode = #tpu.pipeline_mode<synchronous>, transform_indices = @transform_4, window_bounds = array<i64: 1, 32>}, {pipeline_mode = #tpu.pipeline_mode<synchronous>, transform_indices = @transform_5, window_bounds = array<i64: 1, 32>}, {pipeline_mode = #tpu.pipeline_mode<synchronous>, transform_indices = @transform_6, window_bounds = array<i64: 1, 32>}, {transform_indices = @transform_7, window_bounds = array<i64: 32, 32>}]} {
    %c0 = arith.constant 0 : index
    %c0_0 = arith.constant 0 : index
    %0 = vector.load %arg1[%c0, %c0_0] : memref<32x32xf32, #tpu.memory_space<vmem>>, vector<32x32xf32>
    %1 = arith.truncf %0 : vector<32x32xf32> to vector<32x32xbf16>
    %c0_1 = arith.constant 0 : index
    %c0_2 = arith.constant 0 : index
    %2 = vector.load %arg2[%c0_1, %c0_2] : memref<32x64xf32, #tpu.memory_space<vmem>>, vector<32x64xf32>
    %3 = arith.truncf %2 : vector<32x64xf32> to vector<32x64xbf16>
    %cst = arith.constant dense<0.000000e+00> : vector<32x64xf32>
    %4 = tpu.matmul %1, %3, %cst {dimension_numbers = #tpu.dot_dimension_numbers<[1], [0], [0], [1], [0, 0, 1, 1], [], []>} : vector<32x32xbf16>, vector<32x64xbf16>, vector<32x64xf32> -> vector<32x64xf32>
    %c0_3 = arith.constant 0 : index
    %c0_4 = arith.constant 0 : index
    %5 = vector.load %arg3[%c0_3, %c0_4] : memref<1x64xf32, #tpu.memory_space<vmem>>, vector<1x64xf32>
    %6 = vector.broadcast %5 : vector<1x64xf32> to vector<32x64xf32>
    %7 = arith.addf %4, %6 : vector<32x64xf32>
    %cst_5 = arith.constant 0.000000e+00 : f32
    %8 = vector.broadcast %cst_5 : f32 to vector<32x64xf32>
    %9 = arith.maximumf %7, %8 : vector<32x64xf32>
    %10 = arith.truncf %9 : vector<32x64xf32> to vector<32x64xbf16>
    %c0_6 = arith.constant 0 : index
    %c0_7 = arith.constant 0 : index
    %11 = vector.load %arg4[%c0_6, %c0_7] : memref<64x32xf32, #tpu.memory_space<vmem>>, vector<64x32xf32>
    %12 = arith.truncf %11 : vector<64x32xf32> to vector<64x32xbf16>
    %cst_8 = arith.constant dense<0.000000e+00> : vector<32x32xf32>
    %13 = tpu.matmul %10, %12, %cst_8 {dimension_numbers = #tpu.dot_dimension_numbers<[1], [0], [0], [1], [0, 0, 1, 1], [], []>} : vector<32x64xbf16>, vector<64x32xbf16>, vector<32x32xf32> -> vector<32x32xf32>
    %14 = arith.addf %0, %13 : vector<32x32xf32>
    %c0_9 = arith.constant 0 : index
    %c0_10 = arith.constant 0 : index
    %15 = vector.load %arg5[%c0_9, %c0_10] : memref<1x32xf32, #tpu.memory_space<vmem>>, vector<1x32xf32>
    %16 = vector.broadcast %15 : vector<1x32xf32> to vector<32x32xf32>
    %17 = arith.addf %14, %16 : vector<32x32xf32>
    %cst_11 = arith.constant dense<0.000000e+00> : vector<32xf32>
    %18 = vector.multi_reduction <add>, %17, %cst_11 [1] : vector<32x32xf32> to vector<32xf32>
    %19 = vector.shape_cast %18 : vector<32xf32> to vector<32x1xf32>
    %cst_12 = arith.constant 3.200000e+01 : f32
    %20 = vector.broadcast %cst_12 : f32 to vector<32x1xf32>
    %21 = arith.divf %19, %20 : vector<32x1xf32>
    %22 = vector.broadcast %21 : vector<32x1xf32> to vector<32x32xf32>
    %23 = arith.subf %17, %22 : vector<32x32xf32>
    %24 = arith.mulf %23, %23 : vector<32x32xf32>
    %cst_13 = arith.constant dense<0.000000e+00> : vector<32xf32>
    %25 = vector.multi_reduction <add>, %24, %cst_13 [1] : vector<32x32xf32> to vector<32xf32>
    %26 = vector.shape_cast %25 : vector<32xf32> to vector<32x1xf32>
    %cst_14 = arith.constant 3.200000e+01 : f32
    %27 = vector.broadcast %cst_14 : f32 to vector<32x1xf32>
    %28 = arith.divf %26, %27 : vector<32x1xf32>
    %29 = vector.broadcast %21 : vector<32x1xf32> to vector<32x32xf32>
    %30 = arith.subf %17, %29 : vector<32x32xf32>
    %cst_15 = arith.constant 9.99999974E-6 : f32
    %31 = vector.broadcast %cst_15 : f32 to vector<32x1xf32>
    %32 = arith.addf %28, %31 : vector<32x1xf32>
    %33 = math.rsqrt %32 : vector<32x1xf32>
    %34 = vector.broadcast %33 : vector<32x1xf32> to vector<32x32xf32>
    %35 = arith.mulf %30, %34 : vector<32x32xf32>
    %c0_16 = arith.constant 0 : index
    %c0_17 = arith.constant 0 : index
    %36 = vector.load %arg6[%c0_16, %c0_17] : memref<1x32xf32, #tpu.memory_space<vmem>>, vector<1x32xf32>
    %37 = vector.broadcast %36 : vector<1x32xf32> to vector<32x32xf32>
    %38 = arith.mulf %35, %37 : vector<32x32xf32>
    %c0_18 = arith.constant 0 : index
    %c0_19 = arith.constant 0 : index
    %39 = vector.load %arg7[%c0_18, %c0_19] : memref<1x32xf32, #tpu.memory_space<vmem>>, vector<1x32xf32>
    %40 = vector.broadcast %39 : vector<1x32xf32> to vector<32x32xf32>
    %41 = arith.addf %38, %40 : vector<32x32xf32>
    %c0_20 = arith.constant 0 : index
    %c0_21 = arith.constant 0 : index
    %42 = vector.load %arg8[%c0_20, %c0_21] : memref<32x32xf32, #tpu.memory_space<vmem>>, vector<32x32xf32>
    tpu.vector_store %arg8[%c0_20, %c0_21], %41 {strides = array<i32>} : memref<32x32xf32, #tpu.memory_space<vmem>>, vector<32x32xf32>,
    return
  }
  func.func @transform_0(%arg0: i32) -> (i32, i32) {
    %c0_i32 = arith.constant 0 : i32
    %c0_i32_0 = arith.constant 0 : i32
    return %arg0, %c0_i32 : i32, i32
  }
  func.func @transform_1(%arg0: i32) -> (i32, i32) {
    %c0_i32 = arith.constant 0 : i32
    %c0_i32_0 = arith.constant 0 : i32
    %c0_i32_1 = arith.constant 0 : i32
    return %c0_i32, %c0_i32_0 : i32, i32
  }
  func.func @transform_2(%arg0: i32) -> (i32, i32) {
    %c0_i32 = arith.constant 0 : i32
    %c0_i32_0 = arith.constant 0 : i32
    %c0_i32_1 = arith.constant 0 : i32
    return %c0_i32, %c0_i32_0 : i32, i32
  }
  func.func @transform_3(%arg0: i32) -> (i32, i32) {
    %c0_i32 = arith.constant 0 : i32
    %c0_i32_0 = arith.constant 0 : i32
    %c0_i32_1 = arith.constant 0 : i32
    return %c0_i32, %c0_i32_0 : i32, i32
  }
  func.func @transform_4(%arg0: i32) -> (i32, i32) {
    %c0_i32 = arith.constant 0 : i32
    %c0_i32_0 = arith.constant 0 : i32
    %c0_i32_1 = arith.constant 0 : i32
    return %c0_i32, %c0_i32_0 : i32, i32
  }
  func.func @transform_5(%arg0: i32) -> (i32, i32) {
    %c0_i32 = arith.constant 0 : i32
    %c0_i32_0 = arith.constant 0 : i32
    %c0_i32_1 = arith.constant 0 : i32
    return %c0_i32, %c0_i32_0 : i32, i32
  }
  func.func @transform_6(%arg0: i32) -> (i32, i32) {
    %c0_i32 = arith.constant 0 : i32
    %c0_i32_0 = arith.constant 0 : i32
    %c0_i32_1 = arith.constant 0 : i32
    return %c0_i32, %c0_i32_0 : i32, i32
  }
  func.func @transform_7(%arg0: i32) -> (i32, i32) {
    %c0_i32 = arith.constant 0 : i32
    %c0_i32_0 = arith.constant 0 : i32
    return %arg0, %c0_i32 : i32, i32
  }
}

module attributes {stable_mosaic.version = 11 : i64} {
  func.func @_heads_kernel(%arg0: i32, %arg1: memref<32x32xf32, #tpu.memory_space<vmem>>, %arg2: memref<1x32xf32, #tpu.memory_space<vmem>>, %arg3: memref<1x32xf32, #tpu.memory_space<vmem>>, %arg4: memref<32x5xf32, #tpu.memory_space<vmem>>, %arg5: memref<1x5xf32, #tpu.memory_space<vmem>>, %arg6: memref<32x32xf32, #tpu.memory_space<vmem>>, %arg7: memref<1x32xf32, #tpu.memory_space<vmem>>, %arg8: memref<32x32xf32, #tpu.memory_space<vmem>>, %arg9: memref<1x32xf32, #tpu.memory_space<vmem>>, %arg10: memref<32x4xf32, #tpu.memory_space<vmem>>, %arg11: memref<1x4xf32, #tpu.memory_space<vmem>>, %arg12: memref<32x5xf32, #tpu.memory_space<vmem>>, %arg13: memref<32x4xf32, #tpu.memory_space<vmem>>) attributes {dimension_semantics = [#tpu.dimension_semantics<arbitrary>], iteration_bounds = array<i64: 1>, scalar_prefetch = 0 : i64, scratch_operands = 0 : i64, tpu.core_type = #tpu.core_type<tc>, window_params = [{pipeline_mode = #tpu.pipeline_mode<synchronous>, transform_indices = @transform_0, window_bounds = array<i64: 32, 32>}, {pipeline_mode = #tpu.pipeline_mode<synchronous>, transform_indices = @transform_1, window_bounds = array<i64: 1, 32>}, {pipeline_mode = #tpu.pipeline_mode<synchronous>, transform_indices = @transform_2, window_bounds = array<i64: 1, 32>}, {pipeline_mode = #tpu.pipeline_mode<synchronous>, transform_indices = @transform_3, window_bounds = array<i64: 32, 5>}, {pipeline_mode = #tpu.pipeline_mode<synchronous>, transform_indices = @transform_4, window_bounds = array<i64: 1, 5>}, {pipeline_mode = #tpu.pipeline_mode<synchronous>, transform_indices = @transform_5, window_bounds = array<i64: 32, 32>}, {pipeline_mode = #tpu.pipeline_mode<synchronous>, transform_indices = @transform_6, window_bounds = array<i64: 1, 32>}, {pipeline_mode = #tpu.pipeline_mode<synchronous>, transform_indices = @transform_7, window_bounds = array<i64: 32, 32>}, {pipeline_mode = #tpu.pipeline_mode<synchronous>, transform_indices = @transform_8, window_bounds = array<i64: 1, 32>}, {pipeline_mode = #tpu.pipeline_mode<synchronous>, transform_indices = @transform_9, window_bounds = array<i64: 32, 4>}, {pipeline_mode = #tpu.pipeline_mode<synchronous>, transform_indices = @transform_10, window_bounds = array<i64: 1, 4>}, {pipeline_mode = #tpu.pipeline_mode<synchronous>, transform_indices = @transform_11, window_bounds = array<i64: 32, 5>}, {pipeline_mode = #tpu.pipeline_mode<synchronous>, transform_indices = @transform_12, window_bounds = array<i64: 32, 4>}]} {
    %c0 = arith.constant 0 : index
    %c0_0 = arith.constant 0 : index
    %0 = vector.load %arg1[%c0, %c0_0] : memref<32x32xf32, #tpu.memory_space<vmem>>, vector<32x32xf32>
    %cst = arith.constant dense<0.000000e+00> : vector<32xf32>
    %1 = vector.multi_reduction <add>, %0, %cst [1] : vector<32x32xf32> to vector<32xf32>
    %2 = vector.shape_cast %1 : vector<32xf32> to vector<32x1xf32>
    %cst_1 = arith.constant 3.200000e+01 : f32
    %3 = vector.broadcast %cst_1 : f32 to vector<32x1xf32>
    %4 = arith.divf %2, %3 : vector<32x1xf32>
    %5 = vector.broadcast %4 : vector<32x1xf32> to vector<32x32xf32>
    %6 = arith.subf %0, %5 : vector<32x32xf32>
    %7 = arith.mulf %6, %6 : vector<32x32xf32>
    %cst_2 = arith.constant dense<0.000000e+00> : vector<32xf32>
    %8 = vector.multi_reduction <add>, %7, %cst_2 [1] : vector<32x32xf32> to vector<32xf32>
    %9 = vector.shape_cast %8 : vector<32xf32> to vector<32x1xf32>
    %cst_3 = arith.constant 3.200000e+01 : f32
    %10 = vector.broadcast %cst_3 : f32 to vector<32x1xf32>
    %11 = arith.divf %9, %10 : vector<32x1xf32>
    %12 = vector.broadcast %4 : vector<32x1xf32> to vector<32x32xf32>
    %13 = arith.subf %0, %12 : vector<32x32xf32>
    %cst_4 = arith.constant 9.99999974E-6 : f32
    %14 = vector.broadcast %cst_4 : f32 to vector<32x1xf32>
    %15 = arith.addf %11, %14 : vector<32x1xf32>
    %16 = math.rsqrt %15 : vector<32x1xf32>
    %17 = vector.broadcast %16 : vector<32x1xf32> to vector<32x32xf32>
    %18 = arith.mulf %13, %17 : vector<32x32xf32>
    %c0_5 = arith.constant 0 : index
    %c0_6 = arith.constant 0 : index
    %19 = vector.load %arg2[%c0_5, %c0_6] : memref<1x32xf32, #tpu.memory_space<vmem>>, vector<1x32xf32>
    %20 = vector.broadcast %19 : vector<1x32xf32> to vector<32x32xf32>
    %21 = arith.mulf %18, %20 : vector<32x32xf32>
    %c0_7 = arith.constant 0 : index
    %c0_8 = arith.constant 0 : index
    %22 = vector.load %arg3[%c0_7, %c0_8] : memref<1x32xf32, #tpu.memory_space<vmem>>, vector<1x32xf32>
    %23 = vector.broadcast %22 : vector<1x32xf32> to vector<32x32xf32>
    %24 = arith.addf %21, %23 : vector<32x32xf32>
    %25 = arith.truncf %24 : vector<32x32xf32> to vector<32x32xbf16>
    %c0_9 = arith.constant 0 : index
    %c0_10 = arith.constant 0 : index
    %26 = vector.load %arg4[%c0_9, %c0_10] : memref<32x5xf32, #tpu.memory_space<vmem>>, vector<32x5xf32>
    %27 = arith.truncf %26 : vector<32x5xf32> to vector<32x5xbf16>
    %cst_11 = arith.constant dense<0.000000e+00> : vector<32x5xf32>
    %28 = tpu.matmul %25, %27, %cst_11 {dimension_numbers = #tpu.dot_dimension_numbers<[1], [0], [0], [1], [0, 0, 1, 1], [], []>} : vector<32x32xbf16>, vector<32x5xbf16>, vector<32x5xf32> -> vector<32x5xf32>
    %c0_12 = arith.constant 0 : index
    %c0_13 = arith.constant 0 : index
    %29 = vector.load %arg5[%c0_12, %c0_13] : memref<1x5xf32, #tpu.memory_space<vmem>>, vector<1x5xf32>
    %30 = vector.broadcast %29 : vector<1x5xf32> to vector<32x5xf32>
    %31 = arith.addf %28, %30 : vector<32x5xf32>
    %c0_14 = arith.constant 0 : index
    %c0_15 = arith.constant 0 : index
    %32 = vector.load %arg12[%c0_14, %c0_15] : memref<32x5xf32, #tpu.memory_space<vmem>>, vector<32x5xf32>
    tpu.vector_store %arg12[%c0_14, %c0_15], %31 {strides = array<i32>} : memref<32x5xf32, #tpu.memory_space<vmem>>, vector<32x5xf32>,
    %c0_16 = arith.constant 0 : index
    %c0_17 = arith.constant 0 : index
    %33 = vector.load %arg6[%c0_16, %c0_17] : memref<32x32xf32, #tpu.memory_space<vmem>>, vector<32x32xf32>
    %34 = arith.truncf %33 : vector<32x32xf32> to vector<32x32xbf16>
    %cst_18 = arith.constant dense<0.000000e+00> : vector<32x32xf32>
    %35 = tpu.matmul %25, %34, %cst_18 {dimension_numbers = #tpu.dot_dimension_numbers<[1], [0], [0], [1], [0, 0, 1, 1], [], []>} : vector<32x32xbf16>, vector<32x32xbf16>, vector<32x32xf32> -> vector<32x32xf32>
    %c0_19 = arith.constant 0 : index
    %c0_20 = arith.constant 0 : index
    %36 = vector.load %arg7[%c0_19, %c0_20] : memref<1x32xf32, #tpu.memory_space<vmem>>, vector<1x32xf32>
    %37 = vector.broadcast %36 : vector<1x32xf32> to vector<32x32xf32>
    %38 = arith.addf %35, %37 : vector<32x32xf32>
    %cst_21 = arith.constant 0.000000e+00 : f32
    %39 = vector.broadcast %cst_21 : f32 to vector<32x32xf32>
    %40 = arith.maximumf %38, %39 : vector<32x32xf32>
    %41 = arith.truncf %40 : vector<32x32xf32> to vector<32x32xbf16>
    %c0_22 = arith.constant 0 : index
    %c0_23 = arith.constant 0 : index
    %42 = vector.load %arg8[%c0_22, %c0_23] : memref<32x32xf32, #tpu.memory_space<vmem>>, vector<32x32xf32>
    %43 = arith.truncf %42 : vector<32x32xf32> to vector<32x32xbf16>
    %cst_24 = arith.constant dense<0.000000e+00> : vector<32x32xf32>
    %44 = tpu.matmul %41, %43, %cst_24 {dimension_numbers = #tpu.dot_dimension_numbers<[1], [0], [0], [1], [0, 0, 1, 1], [], []>} : vector<32x32xbf16>, vector<32x32xbf16>, vector<32x32xf32> -> vector<32x32xf32>
    %c0_25 = arith.constant 0 : index
    %c0_26 = arith.constant 0 : index
    %45 = vector.load %arg9[%c0_25, %c0_26] : memref<1x32xf32, #tpu.memory_space<vmem>>, vector<1x32xf32>
    %46 = vector.broadcast %45 : vector<1x32xf32> to vector<32x32xf32>
    %47 = arith.addf %44, %46 : vector<32x32xf32>
    %cst_27 = arith.constant 0.000000e+00 : f32
    %48 = vector.broadcast %cst_27 : f32 to vector<32x32xf32>
    %49 = arith.maximumf %47, %48 : vector<32x32xf32>
    %50 = arith.truncf %49 : vector<32x32xf32> to vector<32x32xbf16>
    %c0_28 = arith.constant 0 : index
    %c0_29 = arith.constant 0 : index
    %51 = vector.load %arg10[%c0_28, %c0_29] : memref<32x4xf32, #tpu.memory_space<vmem>>, vector<32x4xf32>
    %52 = arith.truncf %51 : vector<32x4xf32> to vector<32x4xbf16>
    %cst_30 = arith.constant dense<0.000000e+00> : vector<32x4xf32>
    %53 = tpu.matmul %50, %52, %cst_30 {dimension_numbers = #tpu.dot_dimension_numbers<[1], [0], [0], [1], [0, 0, 1, 1], [], []>} : vector<32x32xbf16>, vector<32x4xbf16>, vector<32x4xf32> -> vector<32x4xf32>
    %c0_31 = arith.constant 0 : index
    %c0_32 = arith.constant 0 : index
    %54 = vector.load %arg11[%c0_31, %c0_32] : memref<1x4xf32, #tpu.memory_space<vmem>>, vector<1x4xf32>
    %55 = vector.broadcast %54 : vector<1x4xf32> to vector<32x4xf32>
    %56 = arith.addf %53, %55 : vector<32x4xf32>
    %57 = arith.negf %56 : vector<32x4xf32>
    %58 = math.exp %57 : vector<32x4xf32>
    %cst_33 = arith.constant 1.000000e+00 : f32
    %59 = vector.broadcast %cst_33 : f32 to vector<32x4xf32>
    %60 = arith.addf %59, %58 : vector<32x4xf32>
    %61 = arith.divf %59, %60 : vector<32x4xf32>
    %c0_34 = arith.constant 0 : index
    %c0_35 = arith.constant 0 : index
    %62 = vector.load %arg13[%c0_34, %c0_35] : memref<32x4xf32, #tpu.memory_space<vmem>>, vector<32x4xf32>
    tpu.vector_store %arg13[%c0_34, %c0_35], %61 {strides = array<i32>} : memref<32x4xf32, #tpu.memory_space<vmem>>, vector<32x4xf32>,
    return
  }
  func.func @transform_0(%arg0: i32) -> (i32, i32) {
    %c0_i32 = arith.constant 0 : i32
    %c0_i32_0 = arith.constant 0 : i32
    %c0_i32_1 = arith.constant 0 : i32
    return %c0_i32, %c0_i32_0 : i32, i32
  }
  func.func @transform_1(%arg0: i32) -> (i32, i32) {
    %c0_i32 = arith.constant 0 : i32
    %c0_i32_0 = arith.constant 0 : i32
    %c0_i32_1 = arith.constant 0 : i32
    return %c0_i32, %c0_i32_0 : i32, i32
  }
  func.func @transform_2(%arg0: i32) -> (i32, i32) {
    %c0_i32 = arith.constant 0 : i32
    %c0_i32_0 = arith.constant 0 : i32
    %c0_i32_1 = arith.constant 0 : i32
    return %c0_i32, %c0_i32_0 : i32, i32
  }
  func.func @transform_3(%arg0: i32) -> (i32, i32) {
    %c0_i32 = arith.constant 0 : i32
    %c0_i32_0 = arith.constant 0 : i32
    %c0_i32_1 = arith.constant 0 : i32
    return %c0_i32, %c0_i32_0 : i32, i32
  }
  func.func @transform_4(%arg0: i32) -> (i32, i32) {
    %c0_i32 = arith.constant 0 : i32
    %c0_i32_0 = arith.constant 0 : i32
    %c0_i32_1 = arith.constant 0 : i32
    return %c0_i32, %c0_i32_0 : i32, i32
  }
  func.func @transform_5(%arg0: i32) -> (i32, i32) {
    %c0_i32 = arith.constant 0 : i32
    %c0_i32_0 = arith.constant 0 : i32
    %c0_i32_1 = arith.constant 0 : i32
    return %c0_i32, %c0_i32_0 : i32, i32
  }
  func.func @transform_6(%arg0: i32) -> (i32, i32) {
    %c0_i32 = arith.constant 0 : i32
    %c0_i32_0 = arith.constant 0 : i32
    %c0_i32_1 = arith.constant 0 : i32
    return %c0_i32, %c0_i32_0 : i32, i32
  }
  func.func @transform_7(%arg0: i32) -> (i32, i32) {
    %c0_i32 = arith.constant 0 : i32
    %c0_i32_0 = arith.constant 0 : i32
    %c0_i32_1 = arith.constant 0 : i32
    return %c0_i32, %c0_i32_0 : i32, i32
  }
  func.func @transform_8(%arg0: i32) -> (i32, i32) {
    %c0_i32 = arith.constant 0 : i32
    %c0_i32_0 = arith.constant 0 : i32
    %c0_i32_1 = arith.constant 0 : i32
    return %c0_i32, %c0_i32_0 : i32, i32
  }
  func.func @transform_9(%arg0: i32) -> (i32, i32) {
    %c0_i32 = arith.constant 0 : i32
    %c0_i32_0 = arith.constant 0 : i32
    %c0_i32_1 = arith.constant 0 : i32
    return %c0_i32, %c0_i32_0 : i32, i32
  }
  func.func @transform_10(%arg0: i32) -> (i32, i32) {
    %c0_i32 = arith.constant 0 : i32
    %c0_i32_0 = arith.constant 0 : i32
    %c0_i32_1 = arith.constant 0 : i32
    return %c0_i32, %c0_i32_0 : i32, i32
  }
  func.func @transform_11(%arg0: i32) -> (i32, i32) {
    %c0_i32 = arith.constant 0 : i32
    %c0_i32_0 = arith.constant 0 : i32
    %c0_i32_1 = arith.constant 0 : i32
    return %c0_i32, %c0_i32_0 : i32, i32
  }
  func.func @transform_12(%arg0: i32) -> (i32, i32) {
    %c0_i32 = arith.constant 0 : i32
    %c0_i32_0 = arith.constant 0 : i32
    %c0_i32_1 = arith.constant 0 : i32
    return %c0_i32, %c0_i32_0 : i32, i32
  }
}

</mosaic_0001>

<bundles_post_ra>
// kernel: detr_forward.7
= control target key start
LH: loop header
LB: loop body
LE: loop exit
PB: predicated region body
PF: predicated region fallthrough
CT: control target
= control target key end

     0   :  { %s496_s18 = smov 0   ;;  %s544_s0 = inlined_call_operand.vmem [shape: f32[128,3], index: 0, kind: input, shape index: {}]   ;;  %s545_s1 = inlined_call_operand.vmem [shape: f32[3,8], index: 1, kind: input, shape index: {}]   ;;  %s546_s2 = inlined_call_operand.vmem [shape: f32[1,8], index: 2, kind: input, shape index: {}]   ;;  %s547_s3 = inlined_call_operand.vmem [shape: f32[8,32], index: 3, kind: input, shape index: {}]   ;;  %s548_s4 = inlined_call_operand.vmem [shape: f32[1,32], index: 4, kind: input, shape index: {}]   ;;  %s549_s5 = inlined_call_operand.vmem [shape: f32[128,32], index: 5, kind: output, shape index: {}]  }
   0x1 LB: > { %s425_s19 = sadd.s32 4294967295, %s463_s18   ;;  %p429_p0 = scmp.ge.s32.totalorder %s463_s18, 1  ;;  %s463_s18 = sphi %s496_s18, %s15_s18  }
   0x2   : > { %p188_p1 = scmp.lt.s32.totalorder %s463_s18, 3 }
   0x4   : > { %p189_p2 = pnand %p429_p0, %p188_p1 }
   0x5   : > { %s430_s22 = sshll.u32 (!%p189_p2), %s425_s19, 3 }
   0x6   : > { %192 = sbr.rel (%p189_p2) target bundleno = 324 (0x144), region = 40  ;;  %p217_p3 = scmp.lt.s32.totalorder (!%p189_p2), %s430_s22, 15 }
   0xb   : > { %v241_v0 = vld [vmem:[%s545_s1] sm:$0x7]  ;;  %vm260_vm0 = vcmask 1040384   ;;  %vm261_vm1 = vcmask 1041408   ;;  %v465_v2 = vmov 65535   ;;  %s551_s22 = smov (!%p217_p3, %s430_s22), 15 }
   0xc   : > { %v242_v1 = vpack.c.bf16 %v241_v0, %v241_v0  ;;  %v262_v3 = vsel %vm260_vm0, 4294967295, %v465_v2  ;;  %s431_s23 = sshll.u32 %s551_s22, 3  ;;  %vm247_vm2 = vcmask 23552   ;;  %v308_v18 = vld [vmem:[%s547_s3] sm:$0xff]  ;;  %vm327_vm3 = vcmask 1043456  }
   0xd   : > { %v263_v4 = vsel %vm261_vm1, %v262_v3, 0  ;;  %s220_s26 = scalar_lea.vmem %s544_s0, %s431_s23  ;;  %v309_v19 = vpack.c.bf16 %v308_v18, %v308_v18  ;;  %v455_v22 = vld [vmem:[%s546_s2] ss:$0 sm:$0xff]  ;;  %vm314_vm4 = vcmask 64512   ;;  %s226_s10 = scalar_lea.vmem %s549_s5, %s431_s23  ;;  %vm360_vm5 = vcmask 261120  }
   0xe   : > { %v265_v5 = vand.u32 %v263_v4, %v242_v1  ;;  %v229_v6 = vld [vmem:[%s220_s26] sm:$0xff]  ;;  %v230_v7 = vld [vmem:[%s220_s26 + $0x8] sm:$0xff]  ;;  %v231_v12 = vld [vmem:[%s220_s26 + $0x10] sm:$0xff] }
   0xf   : > { %v233_v8 = vld [vmem:[%s220_s26 + $0x20] sm:$0xff]  ;;  %v237_v9 = vpack.c.bf16 %v230_v7, %v229_v6  ;;  %v234_v10 = vld [vmem:[%s220_s26 + $0x28] sm:$0xff]  ;;  %v232_v13 = vld [vmem:[%s220_s26 + $0x18] sm:$0xff]  ;;  %v329_v20 = vsel %vm327_vm3, %v309_v19, 0 }
  0x10   : > { %274 = vmatpush.bf16.msra.mxu0 %v265_v5  ;;  %444 = vmatpush.bf16.msra.mxu2 %v265_v5  ;;  %v239_v11 = vpack.c.bf16 %v234_v10, %v233_v8  ;;  %v235_v14 = vld [vmem:[%s220_s26 + $0x30] sm:$0xff]  ;;  %v236_v15 = vld [vmem:[%s220_s26 + $0x38] sm:$0xff]  ;;  %v238_v16 = vpack.c.bf16 %v232_v13, %v231_v12  ;;  %v456_v50 = vld [vmem:[%s548_s4] ss:$0 sm:$0xff] }
  0x11   : > { %v240_v17 = vpack.c.bf16 %v236_v15, %v235_v14  ;;  %338 = vmatpush.bf16.msra.mxu1 %v329_v20  ;;  %445 = vmatpush.bf16.msra.mxu3 %v329_v20 }
  0x13   : > { %434 = vmatmul.msk.bf16.vlgmr.msra.gmra.mxu0 %vm247_vm2, %v237_v9  ;;  %436 = vmatmul.msk.bf16.vlgmr.msra.gmra.mxu2 %vm247_vm2, %v239_v11 }
  0x23   : > { %435 = vmatmul.msk.bf16.gmra.mxu0 %vm247_vm2, %v238_v16  ;;  %437 = vmatmul.msk.bf16.gmra.mxu2 %vm247_vm2, %v240_v17 }
  0x90   : > { %v276_v21 = vpop.f32.mrf.mxu0 }
  0x91   : > { %v277_v23 = vadd.f32 %v455_v22, %v276_v21 }
  0x93   : > { %v296_v26 = vmax.f32 %v277_v23, 0.0 }
  0x96   : > { %v286_v24 = vpop.f32.mrf.mxu2 }
  0x97   : > { %v287_v30 = vadd.f32 %v455_v22, %v286_v24 }
  0x98   : > { %v278_v25 = vpop.f32.mrf.mxu0 }
  0x99   : > { %v279_v27 = vadd.f32 %v455_v22, %v278_v25  ;;  %v300_v34 = vmax.f32 %v287_v30, 0.0 }
  0x9b   : > { %v297_v28 = vmax.f32 %v279_v27, 0.0 }
  0x9d   : > { %v304_v29 = vpack.c.bf16 %v297_v28, %v296_v26 }
  0x9e   : > { %v288_v31 = vpop.f32.mrf.mxu2 }
  0x9f   : > { %438 = vmatmul.msk.bf16.vlgmr.msra.gmra.mxu1 %vm314_vm4, %v304_v29  ;;  %v289_v32 = vadd.f32 %v455_v22, %v288_v31 }
  0xa0   : > { %v281_v33 = vpop.f32.mrf.mxu0 }
  0xa1   : > { %v301_v35 = vmax.f32 %v289_v32, 0.0  ;;  %v282_v37 = vadd.f32 %v455_v22, %v281_v33 }
  0xa3   : > { %v306_v36 = vpack.c.bf16 %v301_v35, %v300_v34  ;;  %v298_v40 = vmax.f32 %v282_v37, 0.0 }
  0xa5   : > { %440 = vmatmul.msk.bf16.vlgmr.msra.gmra.mxu3 %vm314_vm4, %v306_v36 }
  0xa6   : > { %v291_v38 = vpop.f32.mrf.mxu2 }
  0xa7   : > { %v292_v44 = vadd.f32 %v455_v22, %v291_v38 }
  0xa8   : > { %v283_v39 = vpop.f32.mrf.mxu0 }
  0xa9   : > { %v284_v41 = vadd.f32 %v455_v22, %v283_v39  ;;  %v302_v47 = vmax.f32 %v292_v44, 0.0 }
  0xab   : > { %v299_v42 = vmax.f32 %v284_v41, 0.0 }
  0xad   : > { %v305_v43 = vpack.c.bf16 %v299_v42, %v298_v40 }
  0xae   : > { %v293_v45 = vpop.f32.mrf.mxu2 }
  0xaf   : > { %439 = vmatmul.msk.bf16.gmra.mxu1 %vm314_vm4, %v305_v43  ;;  %v294_v46 = vadd.f32 %v455_v22, %v293_v45 }
  0xb1   : > { %v303_v48 = vmax.f32 %v294_v46, 0.0 }
  0xb3   : > { %v307_v49 = vpack.c.bf16 %v303_v48, %v302_v47 }
  0xb5   : > { %441 = vmatmul.msk.bf16.gmra.mxu3 %vm314_vm4, %v307_v49 }
 0x11c   : > { %v340_v51 = vpop.f32.mrf.mxu1 }
 0x11d   : > { %v341_v52 = vadd.f32 %v456_v50, %v340_v51 }
 0x11f   : > { %361 = vst.msk [vmem:[%s226_s10] sm:$0xff] %vm360_vm5, %v341_v52 }
 0x124   : > { %v342_v53 = vpop.f32.mrf.mxu1 }
 0x125   : > { %v343_v54 = vadd.f32 %v456_v50, %v342_v53 }
 0x127   : > { %362 = vst.msk [vmem:[%s226_s10 + $0x8] sm:$0xff] %vm360_vm5, %v343_v54 }
 0x128   : > { %v350_v55 = vpop.f32.mrf.mxu3 }
 0x129   : > { %v351_v56 = vadd.f32 %v456_v50, %v350_v55 }
 0x12b   : > { %365 = vst.msk [vmem:[%s226_s10 + $0x20] sm:$0xff] %vm360_vm5, %v351_v56 }
 0x12c   : > { %v345_v57 = vpop.f32.mrf.mxu1 }
 0x12d   : > { %v346_v58 = vadd.f32 %v456_v50, %v345_v57 }
 0x12f   : > { %363 = vst.msk [vmem:[%s226_s10 + $0x10] sm:$0xff] %vm360_vm5, %v346_v58 }
 0x130   : > { %v352_v59 = vpop.f32.mrf.mxu3 }
 0x131   : > { %v353_v60 = vadd.f32 %v456_v50, %v352_v59 }
 0x133   : > { %366 = vst.msk [vmem:[%s226_s10 + $0x28] sm:$0xff] %vm360_vm5, %v353_v60 }
 0x134   : > { %v347_v61 = vpop.f32.mrf.mxu1 }
 0x135   : > { %v348_v62 = vadd.f32 %v456_v50, %v347_v61 }
 0x137   : > { %364 = vst.msk [vmem:[%s226_s10 + $0x18] sm:$0xff] %vm360_vm5, %v348_v62 }
 0x138   : > { %v355_v63 = vpop.f32.mrf.mxu3 }
 0x139   : > { %v356_v0 = vadd.f32 %v456_v50, %v355_v63 }
 0x13b   : > { %367 = vst.msk [vmem:[%s226_s10 + $0x30] sm:$0xff] %vm360_vm5, %v356_v0 }
 0x140   : > { %v357_v1 = vpop.f32.mrf.mxu3 }
 0x141   : > { %v358_v2 = vadd.f32 %v456_v50, %v357_v1 }
 0x143   : > { %368 = vst.msk [vmem:[%s226_s10 + $0x38] sm:$0xff] %vm360_vm5, %v358_v2 }
 0x144 PF: > { %s15_s18 = sadd.s32 1, %s463_s18  }
 0x145   : > { %p12_p4 = scmp.ge.s32.totalorder %s15_s18, 4  }
 0x147   :  { %14 = sbr.rel (!%p12_p4) target bundleno = 1 (0x1), region = 70 }

// kernel: detr_forward.9
= control target key start
LH: loop header
LB: loop body
LE: loop exit
PB: predicated region body
PF: predicated region fallthrough
CT: control target
= control target key end

     0   :  { %s809_s24 = smov 0   ;;  %s1033_s0 = inlined_call_operand.vmem [shape: f32[128,32], index: 0, kind: input, shape index: {}]   ;;  %s1034_s1 = inlined_call_operand.vmem [shape: f32[32,64], index: 1, kind: input, shape index: {}]   ;;  %s1035_s2 = inlined_call_operand.vmem [shape: f32[1,64], index: 2, kind: input, shape index: {}]   ;;  %s1036_s3 = inlined_call_operand.vmem [shape: f32[64,32], index: 3, kind: input, shape index: {}]   ;;  %s1037_s4 = inlined_call_operand.vmem [shape: f32[1,32], index: 4, kind: input, shape index: {}]   ;;  %s1038_s5 = inlined_call_operand.vmem [shape: f32[1,32], index: 5, kind: input, shape index: {}]   ;;  %s1039_s6 = inlined_call_operand.vmem [shape: f32[1,32], index: 6, kind: input, shape index: {}]   ;;  %s1040_s7 = inlined_call_operand.vmem [shape: f32[128,32], index: 7, kind: output, shape index: {}]  }
   0x1 LB: > { %s704_s25 = sadd.s32 4294967295, %s766_s24   ;;  %p708_p0 = scmp.ge.s32.totalorder %s766_s24, 1  ;;  %s766_s24 = sphi %s809_s24, %s17_s24  }
   0x2   : > { %p238_p1 = scmp.lt.s32.totalorder %s766_s24, 3 }
   0x4   : > { %p239_p2 = pnand %p708_p0, %p238_p1 }
   0x5   : > { %s709_s9 = sshll.u32 (!%p239_p2), %s704_s25, 3 }
   0x6   : > { %242 = sbr.rel (%p239_p2) target bundleno = 612 (0x264), region = 48  ;;  %p271_p3 = scmp.lt.s32.totalorder (!%p239_p2), %s709_s9, 15 }
   0xb   : > { %v297_v0 = vld [vmem:[%s1034_s1 + $0x10] sm:$0xff]  ;;  %v298_v1 = vld [vmem:[%s1034_s1 + $0x18] sm:$0xff]  ;;  %v295_v2 = vld [vmem:[%s1034_s1] sm:$0xff]  ;;  %s1042_s9 = smov (!%p271_p3, %s709_s9), 15  ;;  %vm305_vm0 = vcmask 261120   ;;  %vm371_vm1 = vcmask 523264  }
   0xc   : > { %v300_v3 = vpack.c.bf16 %v298_v1, %v297_v0  ;;  %v296_v4 = vld [vmem:[%s1034_s1 + $0x8] sm:$0xff]  ;;  %s710_s12 = sshll.u32 %s1042_s9, 3  ;;  %v365_v18 = vld [vmem:[%s1036_s3 + $0x30] sm:$0xff]  ;;  %v366_v19 = vld [vmem:[%s1036_s3 + $0x38] sm:$0xff] }
   0xd   : > { %v299_v5 = vpack.c.bf16 %v296_v4, %v295_v2  ;;  %s274_s15 = scalar_lea.vmem %s1033_s0, %s710_s12  ;;  %v370_v20 = vpack.c.bf16 %v366_v19, %v365_v18  ;;  %v363_v21 = vld [vmem:[%s1036_s3 + $0x20] sm:$0xff]  ;;  %v364_v22 = vld [vmem:[%s1036_s3 + $0x28] sm:$0xff]  ;;  %v361_v24 = vld [vmem:[%s1036_s3 + $0x10] sm:$0xff]  ;;  %s986_s22 = scalar_lea.vmem %s1040_s7, %s710_s12 }
   0xe   : > { %324 = vmatpush.bf16.msra.mxu0 %v300_v3  ;;  %723 = vmatpush.bf16.msra.mxu3 %v300_v3  ;;  %v837_v6 = vld [vmem:[%s274_s15] sm:$0xff]  ;;  %v839_v7 = vld [vmem:[%s274_s15 + $0x8] sm:$0xff]  ;;  %v841_v8 = vld [vmem:[%s274_s15 + $0x10] sm:$0xff]  ;;  %v369_v23 = vpack.c.bf16 %v364_v22, %v363_v21 }
   0xf   : > { %v291_v9 = vpack.c.bf16 %v839_v7, %v837_v6  ;;  %v845_v10 = vld [vmem:[%s274_s15 + $0x18] sm:$0xff]  ;;  %v851_v12 = vld [vmem:[%s274_s15 + $0x20] sm:$0xff]  ;;  %v853_v13 = vld [vmem:[%s274_s15 + $0x28] sm:$0xff]  ;;  %388 = vmatpush.bf16.msra.mxu1 %v370_v20  ;;  %725 = vmatpush.bf16.msra.mxu2 %v370_v20 }
  0x10   : > { %v292_v11 = vpack.c.bf16 %v845_v10, %v841_v8  ;;  %v293_v14 = vpack.c.bf16 %v853_v13, %v851_v12  ;;  %v858_v15 = vld [vmem:[%s274_s15 + $0x30] sm:$0xff]  ;;  %v860_v16 = vld [vmem:[%s274_s15 + $0x38] sm:$0xff]  ;;  %v359_v27 = vld [vmem:[%s1036_s3] sm:$0xff] }
  0x11   : > { %v294_v17 = vpack.c.bf16 %v860_v16, %v858_v15  ;;  %v362_v25 = vld [vmem:[%s1036_s3 + $0x18] sm:$0xff]  ;;  %v360_v28 = vld [vmem:[%s1036_s3 + $0x8] sm:$0xff]  ;;  %v738_v31 = vld [vmem:[%s1035_s2] ss:$0 sm:$0xff] }
  0x12   : > { %325 = vmatpush.bf16.msra.mxu0 %v299_v5  ;;  %724 = vmatpush.bf16.msra.mxu3 %v299_v5  ;;  %v368_v26 = vpack.c.bf16 %v362_v25, %v361_v24  ;;  %v367_v29 = vpack.c.bf16 %v360_v28, %v359_v27  ;;  %v739_v59 = vld [vmem:[%s1037_s4] ss:$0 sm:$0xff] }
  0x13   : > { %389 = vmatpush.bf16.msra.mxu1 %v369_v23  ;;  %726 = vmatpush.bf16.msra.mxu2 %v369_v23 }
  0x15   : > { %713 = vmatmul.msk.bf16.vlgmr.msra.gmra.mxu0 %vm305_vm0, %v291_v9  ;;  %714 = vmatmul.msk.bf16.vlgmr.msra.gmra.mxu3 %vm305_vm0, %v292_v11 }
  0x17   : > { %390 = vmatpush.bf16.msra.mxu1 %v368_v26  ;;  %727 = vmatpush.bf16.msra.mxu2 %v368_v26 }
  0x1b   : > { %391 = vmatpush.bf16.msra.mxu1 %v367_v29  ;;  %728 = vmatpush.bf16.msra.mxu2 %v367_v29 }
  0x25   : > { %715 = vmatmul.msk.bf16.gmra.mxu3 %vm305_vm0, %v293_v14 }
  0x35   : > { %716 = vmatmul.msk.bf16.gmra.mxu3 %vm305_vm0, %v294_v17 }
  0x92   : > { %v327_v30 = vpop.f32.mrf.mxu0 }
  0x93   : > { %v328_v32 = vadd.f32 %v738_v31, %v327_v30 }
  0x95   : > { %v347_v35 = vmax.f32 %v328_v32, 0.0 }
  0x98   : > { %v332_v33 = vpop.f32.mrf.mxu3 }
  0x99   : > { %v333_v41 = vadd.f32 %v738_v31, %v332_v33 }
  0x9a   : > { %v329_v34 = vpop.f32.mrf.mxu0 }
  0x9b   : > { %v330_v36 = vadd.f32 %v738_v31, %v329_v34  ;;  %v349_v44 = vmax.f32 %v333_v41, 0.0 }
  0x9d   : > { %v348_v37 = vmax.f32 %v330_v36, 0.0 }
  0x9f   : > { %v355_v38 = vpack.c.bf16 %v348_v37, %v347_v35 }
  0xa0   : > { %v334_v39 = vpop.f32.mrf.mxu3 }
  0xa1   : > { %717 = vmatmul.msk.bf16.vlgmr.msra.gmra.mxu1 %vm371_vm1, %v355_v38  ;;  %v335_v40 = vadd.f32 %v738_v31, %v334_v39 }
  0xa3   : > { %v350_v43 = vmax.f32 %v335_v40, 0.0 }
  0xa5   : > { %v356_v45 = vpack.c.bf16 %v350_v43, %v349_v44 }
  0xa8   : > { %v337_v42 = vpop.f32.mrf.mxu3 }
  0xa9   : > { %v338_v46 = vadd.f32 %v738_v31, %v337_v42 }
  0xab   : > { %v351_v49 = vmax.f32 %v338_v46, 0.0 }
  0xb0   : > { %v339_v47 = vpop.f32.mrf.mxu3 }
  0xb1   : > { %718 = vmatmul.msk.bf16.gmra.mxu1 %vm371_vm1, %v356_v45  ;;  %v340_v48 = vadd.f32 %v738_v31, %v339_v47 }
  0xb3   : > { %v352_v50 = vmax.f32 %v340_v48, 0.0 }
  0xb5   : > { %v357_v51 = vpack.c.bf16 %v352_v50, %v351_v49 }
  0xb7   : > { %719 = vmatmul.msk.bf16.vlgmr.msra.gmra.mxu2 %vm371_vm1, %v357_v51 }
  0xb8   : > { %v342_v52 = vpop.f32.mrf.mxu3 }
  0xb9   : > { %v343_v53 = vadd.f32 %v738_v31, %v342_v52 }
  0xbb   : > { %v353_v56 = vmax.f32 %v343_v53, 0.0 }
  0xc0   : > { %v344_v54 = vpop.f32.mrf.mxu3 }
  0xc1   : > { %v345_v55 = vadd.f32 %v738_v31, %v344_v54  ;;  %v768_v31 = vmov 32.0  }
  0xc2   : > { %742 = vrcp.f32 %v768_v31  ;;  %v971_v31 = vld [vmem:[%s1038_s5] ss:$0 sm:$0xff] }
  0xc3   : > { %v354_v57 = vmax.f32 %v345_v55, 0.0 }
  0xc5   : > { %v358_v58 = vpack.c.bf16 %v354_v57, %v353_v56 }
  0xc7   : > { %720 = vmatmul.msk.bf16.gmra.mxu2 %vm371_vm1, %v358_v58 }
 0x11e   : > { %v393_v60 = vpop.f32.mrf.mxu1 }
 0x11f   : > { %v413_v61 = vadd.f32 %v393_v60, %v837_v6 }
 0x121   : > { %v425_v62 = vadd.f32 %v739_v59, %v413_v61 }
 0x123   : > { %v433_v63 = vsel %vm305_vm0, %v425_v62, 0.0 }
 0x124   : > { %434 = vadd.xlane.f32.xlu0 %v433_v63 }
 0x126   : > { %v395_v0 = vpop.f32.mrf.mxu1 }
 0x127   : > { %v414_v1 = vadd.f32 %v395_v0, %v839_v7 }
 0x129   : > { %v426_v2 = vadd.f32 %v739_v59, %v414_v1 }
 0x12b   : > { %v436_v3 = vsel %vm305_vm0, %v426_v2, 0.0 }
 0x12c   : > { %437 = vadd.xlane.f32.xlu0 %v436_v3 }
 0x12e   : > { %v398_v4 = vpop.f32.mrf.mxu1 }
 0x12f   : > { %v415_v5 = vadd.f32 %v398_v4, %v841_v8 }
 0x131   : > { %v427_v9 = vadd.f32 %v739_v59, %v415_v5 }
 0x133   : > { %v439_v11 = vsel %vm305_vm0, %v427_v9, 0.0 }
 0x134   : > { %440 = vadd.xlane.f32.xlu1 %v439_v11 }
 0x136   : > { %v400_v14 = vpop.f32.mrf.mxu1 }
 0x137   : > { %v416_v6 = vadd.f32 %v400_v14, %v845_v10 }
 0x139   : > { %v428_v17 = vadd.f32 %v739_v59, %v416_v6 }
 0x13a   : > { %v403_v18 = vpop.f32.mrf.mxu2 }
 0x13b   : > { %v442_v19 = vsel %vm305_vm0, %v428_v17, 0.0  ;;  %v417_v7 = vadd.f32 %v403_v18, %v851_v12 }
 0x13c   : > { %443 = vadd.xlane.f32.xlu1 %v442_v19 }
 0x13d   : > { %v429_v20 = vadd.f32 %v739_v59, %v417_v7 }
 0x13f   : > { %v445_v21 = vsel %vm305_vm0, %v429_v20, 0.0 }
 0x140   : > { %446 = vadd.xlane.f32.xlu2 %v445_v21 }
 0x142   : > { %v405_v22 = vpop.f32.mrf.mxu2 }
 0x143   : > { %v418_v8 = vadd.f32 %v405_v22, %v853_v13  ;;  %v743_v13 = vpop.eup %742 }
 0x144   : > { %v458_v32 = vmul.f32 32.0, %v743_v13  ;;  %vm462_vm2 = vweird.f32 %v743_v13 }
 0x145   : > { %v430_v23 = vadd.f32 %v739_v59, %v418_v8 }
 0x146   : > { %v459_v33 = vsub.f32 1.0, %v458_v32 }
 0x147   : > { %v448_v24 = vsel %vm305_vm0, %v430_v23, 0.0 }
 0x148   : > { %449 = vadd.xlane.f32.xlu2 %v448_v24  ;;  %v460_v34 = vmul.f32 %v743_v13, %v459_v33  ;;  %v976_v33 = vld [vmem:[%s1039_s6] ss:$0 sm:$0xff] }
 0x14a   : > { %v408_v25 = vpop.f32.mrf.mxu2  ;;  %v461_v35 = vadd.f32 %v743_v13, %v460_v34 }
 0x14b   : > { %v419_v10 = vadd.f32 %v408_v25, %v858_v15 }
 0x14c   : > { %v915_v15 = vsel %vm462_vm2, %v743_v13, %v461_v35 }
 0x14d   : > { %v431_v26 = vadd.f32 %v739_v59, %v419_v10 }
 0x14f   : > { %v451_v27 = vsel %vm305_vm0, %v431_v26, 0.0 }
 0x150   : > { %452 = vadd.xlane.f32.xlu0 %v451_v27 }
 0x152   : > { %v410_v12 = vpop.f32.mrf.mxu2 }
 0x153   : > { %v420_v28 = vadd.f32 %v410_v12, %v860_v16 }
 0x155   : > { %v432_v29 = vadd.f32 %v739_v59, %v420_v28 }
 0x157   : > { %v454_v30 = vsel %vm305_vm0, %v432_v29, 0.0 }
 0x158   : > { %455 = vadd.xlane.f32.xlu1 %v454_v30 }
 0x197   : > { %v435_v36 = vpop.xlane.xlu0 %434 }
 0x198   : > { %v464_v37 = vmul.f32 %v915_v15, %v435_v36 }
 0x19a   : > { %v918_v38 = vsub.f32 %v425_v62, %v464_v37 }
 0x19c   : > { %v480_v16 = vmul.f32 %v918_v38, %v918_v38 }
 0x19e   : > { %v488_v39 = vsel %vm305_vm0, %v480_v16, 0.0 }
 0x19f   : > { %489 = vadd.xlane.f32.xlu2 %v488_v39  ;;  %v438_v40 = vpop.xlane.xlu0 %437 }
 0x1a0   : > { %v465_v41 = vmul.f32 %v915_v15, %v438_v40 }
 0x1a2   : > { %v924_v42 = vsub.f32 %v426_v2, %v465_v41 }
 0x1a4   : > { %v481_v43 = vmul.f32 %v924_v42, %v924_v42 }
 0x1a6   : > { %v491_v44 = vsel %vm305_vm0, %v481_v43, 0.0 }
 0x1a7   : > { %492 = vadd.xlane.f32.xlu0 %v491_v44  ;;  %v441_v45 = vpop.xlane.xlu1 %440 }
 0x1a8   : > { %v466_v46 = vmul.f32 %v915_v15, %v441_v45 }
 0x1aa   : > { %v930_v47 = vsub.f32 %v427_v9, %v466_v46 }
 0x1ac   : > { %v482_v48 = vmul.f32 %v930_v47, %v930_v47 }
 0x1ae   : > { %v494_v49 = vsel %vm305_vm0, %v482_v48, 0.0 }
 0x1af   : > { %495 = vadd.xlane.f32.xlu1 %v494_v49  ;;  %v444_v50 = vpop.xlane.xlu1 %443 }
 0x1b0   : > { %v467_v51 = vmul.f32 %v915_v15, %v444_v50 }
 0x1b2   : > { %v936_v52 = vsub.f32 %v428_v17, %v467_v51 }
 0x1b3   : > { %v447_v53 = vpop.xlane.xlu2 %446 }
 0x1b4   : > { %v483_v54 = vmul.f32 %v936_v52, %v936_v52  ;;  %v468_v55 = vmul.f32 %v915_v15, %v447_v53 }
 0x1b6   : > { %v497_v56 = vsel %vm305_vm0, %v483_v54, 0.0  ;;  %v942_v57 = vsub.f32 %v429_v20, %v468_v55 }
 0x1b7   : > { %498 = vadd.xlane.f32.xlu2 %v497_v56 }
 0x1b8   : > { %v484_v58 = vmul.f32 %v942_v57, %v942_v57 }
 0x1ba   : > { %v500_v59 = vsel %vm305_vm0, %v484_v58, 0.0 }
 0x1bb   : > { %v450_v60 = vpop.xlane.xlu2 %449  ;;  %501 = vadd.xlane.f32.xlu0 %v500_v59 }
 0x1bc   : > { %v469_v61 = vmul.f32 %v915_v15, %v450_v60 }
 0x1be   : > { %v948_v62 = vsub.f32 %v430_v23, %v469_v61 }
 0x1c0   : > { %v485_v63 = vmul.f32 %v948_v62, %v948_v62 }
 0x1c2   : > { %v503_v0 = vsel %vm305_vm0, %v485_v63, 0.0 }
 0x1c3   : > { %v453_v1 = vpop.xlane.xlu0 %452  ;;  %504 = vadd.xlane.f32.xlu1 %v503_v0 }
 0x1c4   : > { %v470_v2 = vmul.f32 %v915_v15, %v453_v1 }
 0x1c6   : > { %v954_v3 = vsub.f32 %v431_v26, %v470_v2 }
 0x1c8   : > { %v486_v4 = vmul.f32 %v954_v3, %v954_v3 }
 0x1ca   : > { %v506_v5 = vsel %vm305_vm0, %v486_v4, 0.0 }
 0x1cb   : > { %507 = vadd.xlane.f32.xlu2 %v506_v5  ;;  %v456_v9 = vpop.xlane.xlu1 %455 }
 0x1cc   : > { %v471_v11 = vmul.f32 %v915_v15, %v456_v9 }
 0x1ce   : > { %v960_v14 = vsub.f32 %v432_v29, %v471_v11 }
 0x1d0   : > { %v487_v6 = vmul.f32 %v960_v14, %v960_v14 }
 0x1d2   : > { %v509_v17 = vsel %vm305_vm0, %v487_v6, 0.0 }
 0x1d3   : > { %510 = vadd.xlane.f32.xlu0 %v509_v17 }
 0x212   : > { %v490_v18 = vpop.xlane.xlu2 %489 }
 0x213   : > { %v512_v19 = vmul.f32 %v490_v18, %v915_v15 }
 0x215   : > { %v520_v7 = vadd.f32 1e-05, %v512_v19 }
 0x217   : > { %744 = vrsqrt.f32 %v520_v7  ;;  %vm534_vm4 = vweird.f32 %v520_v7 }
 0x21a   : > { %v493_v20 = vpop.xlane.xlu0 %492 }
 0x21b   : > { %v513_v21 = vmul.f32 %v493_v20, %v915_v15 }
 0x21d   : > { %v745_v22 = vpop.eup %744  ;;  %v521_v8 = vadd.f32 1e-05, %v513_v21 }
 0x21e   : > { %v529_v23 = vmul.f32 %v745_v22, %v520_v7  ;;  %vm535_vm3 = vweird.f32 %v745_v22 }
 0x21f   : > { %746 = vrsqrt.f32 %v521_v8  ;;  %vm536_vm5 = vmor %vm534_vm4, %vm535_vm3  ;;  %vm544_vm7 = vweird.f32 %v521_v8 }
 0x220   : > { %v530_v24 = vmul.f32 %v745_v22, %v529_v23 }
 0x222   : > { %v531_v25 = vmul.f32 0.5, %v530_v24  ;;  %v496_v10 = vpop.xlane.xlu1 %495 }
 0x223   : > { %v514_v26 = vmul.f32 %v496_v10, %v915_v15 }
 0x224   : > { %v532_v27 = vsub.f32 1.5, %v531_v25 }
 0x225   : > { %v747_v12 = vpop.eup %746  ;;  %v522_v28 = vadd.f32 1e-05, %v514_v26 }
 0x226   : > { %v533_v29 = vmul.f32 %v745_v22, %v532_v27  ;;  %v539_v30 = vmul.f32 %v747_v12, %v521_v8  ;;  %vm545_vm6 = vweird.f32 %v747_v12 }
 0x227   : > { %748 = vrsqrt.f32 %v522_v28  ;;  %vm546_vm8 = vmor %vm544_vm7, %vm545_vm6  ;;  %vm554_vm10 = vweird.f32 %v522_v28 }
 0x228   : > { %v537_v13 = vsel %vm536_vm5, %v745_v22, %v533_v29  ;;  %v540_v32 = vmul.f32 %v747_v12, %v539_v30 }
 0x229   : > { %v608_v34 = vmul.f32 %v537_v13, %v918_v38 }
 0x22a   : > { %v541_v35 = vmul.f32 0.5, %v540_v32  ;;  %v499_v36 = vpop.xlane.xlu2 %498 }
 0x22b   : > { %v620_v37 = vmul.f32 %v971_v31, %v608_v34  ;;  %v515_v16 = vmul.f32 %v499_v36, %v915_v15 }
 0x22c   : > { %v542_v39 = vsub.f32 1.5, %v541_v35 }
 0x22d   : > { %v749_v40 = vpop.eup %748  ;;  %v632_v41 = vadd.f32 %v976_v33, %v620_v37  ;;  %v523_v43 = vadd.f32 1e-05, %v515_v16 }
 0x22e   : > { %v543_v38 = vmul.f32 %v747_v12, %v542_v39  ;;  %v549_v44 = vmul.f32 %v749_v40, %v522_v28  ;;  %v502_v45 = vpop.xlane.xlu0 %501  ;;  %vm555_vm9 = vweird.f32 %v749_v40 }
 0x22f   : > { %640 = vst.msk [vmem:[%s986_s22] sm:$0xff] %vm305_vm0, %v632_v41  ;;  %750 = vrsqrt.f32 %v523_v43  ;;  %v516_v49 = vmul.f32 %v502_v45, %v915_v15  ;;  %vm556_vm11 = vmor %vm554_vm10, %vm555_vm9  ;;  %vm564_vm13 = vweird.f32 %v523_v43 }
 0x230   : > { %v547_v46 = vsel %vm546_vm8, %v747_v12, %v543_v38  ;;  %v550_v48 = vmul.f32 %v749_v40, %v549_v44 }
 0x231   : > { %v609_v50 = vmul.f32 %v547_v46, %v924_v42  ;;  %v524_v53 = vadd.f32 1e-05, %v516_v49 }
 0x232   : > { %v551_v51 = vmul.f32 0.5, %v550_v48 }
 0x233   : > { %v621_v54 = vmul.f32 %v971_v31, %v609_v50  ;;  %752 = vrsqrt.f32 %v524_v53  ;;  %vm574_vm1 = vweird.f32 %v524_v53 }
 0x234   : > { %v552_v55 = vsub.f32 1.5, %v551_v51 }
 0x235   : > { %v751_v56 = vpop.eup %750  ;;  %v633_v58 = vadd.f32 %v976_v33, %v621_v54 }
 0x236   : > { %v553_v59 = vmul.f32 %v749_v40, %v552_v55  ;;  %v559_v60 = vmul.f32 %v751_v56, %v523_v43  ;;  %v505_v61 = vpop.xlane.xlu1 %504  ;;  %vm565_vm12 = vweird.f32 %v751_v56 }
 0x237   : > { %641 = vst.msk [vmem:[%s986_s22 + $0x8] sm:$0xff] %vm305_vm0, %v633_v58  ;;  %v517_v0 = vmul.f32 %v505_v61, %v915_v15  ;;  %vm566_vm14 = vmor %vm564_vm13, %vm565_vm12 }
 0x238   : > { %v557_v63 = vsel %vm556_vm11, %v749_v40, %v553_v59  ;;  %v560_v42 = vmul.f32 %v751_v56, %v559_v60 }
 0x239   : > { %v610_v1 = vmul.f32 %v557_v63, %v930_v47  ;;  %v753_v2 = vpop.eup %752  ;;  %v525_v5 = vadd.f32 1e-05, %v517_v0 }
 0x23a   : > { %v561_v4 = vmul.f32 0.5, %v560_v42  ;;  %v569_v11 = vmul.f32 %v753_v2, %v524_v53  ;;  %vm575_vm15 = vweird.f32 %v753_v2 }
 0x23b   : > { %v622_v9 = vmul.f32 %v971_v31, %v610_v1  ;;  %754 = vrsqrt.f32 %v525_v5  ;;  %vm576_vm2 = vmor %vm574_vm1, %vm575_vm15  ;;  %vm584_vm4 = vweird.f32 %v525_v5 }
 0x23c   : > { %v562_v6 = vsub.f32 1.5, %v561_v4  ;;  %v570_v18 = vmul.f32 %v753_v2, %v569_v11 }
 0x23d   : > { %v634_v17 = vadd.f32 %v976_v33, %v622_v9 }
 0x23e   : > { %v563_v19 = vmul.f32 %v751_v56, %v562_v6  ;;  %v571_v7 = vmul.f32 0.5, %v570_v18  ;;  %v508_v20 = vpop.xlane.xlu2 %507 }
 0x23f   : > { %642 = vst.msk [vmem:[%s986_s22 + $0x10] sm:$0xff] %vm305_vm0, %v634_v17  ;;  %v518_v21 = vmul.f32 %v508_v20, %v915_v15 }
 0x240   : > { %v567_v47 = vsel %vm566_vm14, %v751_v56, %v563_v19  ;;  %v572_v8 = vsub.f32 1.5, %v571_v7 }
 0x241   : > { %v611_v22 = vmul.f32 %v567_v47, %v936_v52  ;;  %v755_v23 = vpop.eup %754  ;;  %v526_v24 = vadd.f32 1e-05, %v518_v21 }
 0x242   : > { %v573_v10 = vmul.f32 %v753_v2, %v572_v8  ;;  %v579_v26 = vmul.f32 %v755_v23, %v525_v5  ;;  %vm585_vm3 = vweird.f32 %v755_v23 }
 0x243   : > { %v623_v25 = vmul.f32 %v971_v31, %v611_v22  ;;  %756 = vrsqrt.f32 %v526_v24  ;;  %vm586_vm5 = vmor %vm584_vm4, %vm585_vm3  ;;  %vm594_vm7 = vweird.f32 %v526_v24 }
 0x244   : > { %v577_v12 = vsel %vm576_vm2, %v753_v2, %v573_v10  ;;  %v580_v28 = vmul.f32 %v755_v23, %v579_v26 }
 0x245   : > { %v635_v27 = vadd.f32 %v976_v33, %v623_v25  ;;  %v612_v29 = vmul.f32 %v577_v12, %v942_v57 }
 0x246   : > { %v581_v52 = vmul.f32 0.5, %v580_v28  ;;  %v511_v30 = vpop.xlane.xlu0 %510 }
 0x247   : > { %643 = vst.msk [vmem:[%s986_s22 + $0x18] sm:$0xff] %vm305_vm0, %v635_v27  ;;  %v624_v13 = vmul.f32 %v971_v31, %v612_v29  ;;  %v519_v32 = vmul.f32 %v511_v30, %v915_v15 }
 0x248   : > { %v582_v34 = vsub.f32 1.5, %v581_v52 }
 0x249   : > { %v757_v35 = vpop.eup %756  ;;  %v636_v36 = vadd.f32 %v976_v33, %v624_v13  ;;  %v527_v37 = vadd.f32 1e-05, %v519_v32 }
 0x24a   : > { %v583_v16 = vmul.f32 %v755_v23, %v582_v34  ;;  %v589_v39 = vmul.f32 %v757_v35, %v526_v24  ;;  %vm595_vm6 = vweird.f32 %v757_v35 }
 0x24b   : > { %644 = vst.msk [vmem:[%s986_s22 + $0x20] sm:$0xff] %vm305_vm0, %v636_v36  ;;  %758 = vrsqrt.f32 %v527_v37  ;;  %vm596_vm8 = vmor %vm594_vm7, %vm595_vm6  ;;  %vm604_vm10 = vweird.f32 %v527_v37 }
 0x24c   : > { %v587_v57 = vsel %vm586_vm5, %v755_v23, %v583_v16  ;;  %v590_v40 = vmul.f32 %v757_v35, %v589_v39 }
 0x24d   : > { %v613_v41 = vmul.f32 %v587_v57, %v948_v62 }
 0x24e   : > { %v591_v43 = vmul.f32 0.5, %v590_v40 }
 0x24f   : > { %v625_v15 = vmul.f32 %v971_v31, %v613_v41 }
 0x250   : > { %v592_v38 = vsub.f32 1.5, %v591_v43 }
 0x251   : > { %v759_v44 = vpop.eup %758  ;;  %v637_v45 = vadd.f32 %v976_v33, %v625_v15 }
 0x252   : > { %v593_v46 = vmul.f32 %v757_v35, %v592_v38  ;;  %v599_v48 = vmul.f32 %v759_v44, %v527_v37  ;;  %vm605_vm9 = vweird.f32 %v759_v44 }
 0x253   : > { %645 = vst.msk [vmem:[%s986_s22 + $0x28] sm:$0xff] %vm305_vm0, %v637_v45  ;;  %vm606_vm11 = vmor %vm604_vm10, %vm605_vm9 }
 0x254   : > { %v597_v49 = vsel %vm596_vm8, %v757_v35, %v593_v46  ;;  %v600_v50 = vmul.f32 %v759_v44, %v599_v48 }
 0x255   : > { %v614_v62 = vmul.f32 %v597_v49, %v954_v3 }
 0x256   : > { %v601_v51 = vmul.f32 0.5, %v600_v50 }
 0x257   : > { %v626_v53 = vmul.f32 %v971_v31, %v614_v62 }
 0x258   : > { %v602_v54 = vsub.f32 1.5, %v601_v51 }
 0x259   : > { %v638_v55 = vadd.f32 %v976_v33, %v626_v53 }
 0x25a   : > { %v603_v56 = vmul.f32 %v759_v44, %v602_v54 }
 0x25b   : > { %646 = vst.msk [vmem:[%s986_s22 + $0x30] sm:$0xff] %vm305_vm0, %v638_v55 }
 0x25c   : > { %v607_v58 = vsel %vm606_vm11, %v759_v44, %v603_v56 }
 0x25d   : > { %v615_v59 = vmul.f32 %v607_v58, %v960_v14 }
 0x25f   : > { %v627_v60 = vmul.f32 %v971_v31, %v615_v59 }
 0x261   : > { %v639_v61 = vadd.f32 %v976_v33, %v627_v60 }
 0x263   : > { %647 = vst.msk [vmem:[%s986_s22 + $0x38] sm:$0xff] %vm305_vm0, %v639_v61 }
 0x264 PF: > { %s17_s24 = sadd.s32 1, %s766_s24  }
 0x265   : > { %p14_p4 = scmp.ge.s32.totalorder %s17_s24, 4  }
 0x267   :  { %16 = sbr.rel (!%p14_p4) target bundleno = 1 (0x1), region = 78 }

// kernel: detr_forward.8
= control target key start
LH: loop header
LB: loop body
LE: loop exit
PB: predicated region body
PF: predicated region fallthrough
CT: control target
= control target key end

     0   :  { %s2495_s29 = smov 0   ;;  %s3327_s0 = inlined_call_operand.vmem [shape: f32[2,64,32], index: 0, kind: input, shape index: {}, may-alias: {0,2}]   ;;  %s3328_s1 = inlined_call_operand.vmem [shape: f32[2,64,32], index: 1, kind: input, shape index: {}, may-alias: {1,3}]   ;;  %s3329_s2 = inlined_call_operand.vmem [shape: f32[2,64,32], index: 2, kind: input, shape index: {}, may-alias: {0,2}]   ;;  %s3330_s3 = inlined_call_operand.vmem [shape: f32[2,64,32], index: 3, kind: input, shape index: {}, may-alias: {1,3}]   ;;  %s3331_s4 = inlined_call_operand.vmem [shape: f32[32,32], index: 4, kind: input, shape index: {}]   ;;  %s3332_s5 = inlined_call_operand.vmem [shape: f32[1,32], index: 5, kind: input, shape index: {}]   ;;  %s3333_s6 = inlined_call_operand.vmem [shape: f32[32,32], index: 6, kind: input, shape index: {}]   ;;  %s3334_s7 = inlined_call_operand.vmem [shape: f32[1,32], index: 7, kind: input, shape index: {}]   ;;  %s3335_s8 = inlined_call_operand.vmem [shape: f32[32,32], index: 8, kind: input, shape index: {}]   ;;  %s3336_s9 = inlined_call_operand.vmem [shape: f32[1,32], index: 9, kind: input, shape index: {}]   ;;  %s3337_s10 = inlined_call_operand.vmem [shape: f32[32,32], index: 10, kind: input, shape index: {}]   ;;  %s3338_s11 = inlined_call_operand.vmem [shape: f32[1,32], index: 11, kind: input, shape index: {}]   ;;  %s3339_s12 = inlined_call_operand.vmem [shape: f32[1,32], index: 12, kind: input, shape index: {}]   ;;  %s3340_s13 = inlined_call_operand.vmem [shape: f32[1,32], index: 13, kind: input, shape index: {}]   ;;  %s3341_s14 = inlined_call_operand.vmem [shape: f32[2,64,32], index: 14, kind: output, shape index: {}]  }
   0x1 LB: > { %s2096_s30 = sadd.s32 4294967295, %s2411_s29   ;;  %p2100_p0 = scmp.ge.s32.totalorder %s2411_s29, 1  ;;  %s2411_s29 = sphi %s2495_s29, %s24_s29  }
   0x2   : > { %p442_p1 = scmp.lt.s32.totalorder %s2411_s29, 3 }
   0x4   : > { %p443_p2 = pnand %p2100_p0, %p442_p1 }
   0x5   : > { %p503_p3 = scmp.lt.s32.totalorder (!%p443_p2), %s2096_s30, 1  ;;  %s2413_s26 = smov (!%p443_p2), 120  }
   0x6   : > { %446 = sbr.rel (%p443_p2) target bundleno = 1669 (0x685), region = 76  ;;  %s2414_s15 = smov (!%p443_p2), 112  }
   0x7   : > { %s2415_s16 = smov (!%p443_p2), 104   ;;  %s2416_s21 = smov (!%p443_p2), 8  }
   0x8   : > { %s2417_s22 = smov (!%p443_p2), 16  }
   0xb   : > { %v591_v0 = vld [vmem:[%s3331_s4 + $0x10] sm:$0xff]  ;;  %v592_v1 = vld [vmem:[%s3331_s4 + $0x18] sm:$0xff]  ;;  %v589_v5 = vld [vmem:[%s3331_s4] sm:$0xff]  ;;  %s3343_s30 = smov (!%p503_p3, %s2096_s30), 1  ;;  %vm599_vm0 = vcmask 261120   ;;  %vm763_vm1 = vcmask 64512  }
   0xc   : > { %v643_v2 = vld [vmem:[%s3333_s6 + $0x10] sm:$0xff]  ;;  %v594_v3 = vpack.c.bf16 %v592_v1, %v591_v0  ;;  %v644_v4 = vld [vmem:[%s3333_s6 + $0x18] sm:$0xff]  ;;  %v590_v6 = vld [vmem:[%s3331_s4 + $0x8] sm:$0xff]  ;;  %s2527_s17 = sshll.u32 %s3343_s30, 6  ;;  %vm817_vm2 = vcmask 523264   ;;  %s2418_s30 = smov 24  }
   0xd   : > { %v646_v7 = vpack.c.bf16 %v644_v4, %v643_v2  ;;  %v641_v8 = vld [vmem:[%s3333_s6] sm:$0xff]  ;;  %v642_v9 = vld [vmem:[%s3333_s6 + $0x8] sm:$0xff]  ;;  %v593_v10 = vpack.c.bf16 %v590_v6, %v589_v5  ;;  %s2533_s20 = scalar_lea.vmem %s3327_s0, %s2527_s17  ;;  %s2539_s23 = scalar_lea.vmem %s3328_s1, %s2527_s17  ;;  %v694_v38 = vld [vmem:[%s3335_s8 + $0x10] sm:$0xff]  ;;  %vm1709_vm3 = vcmask 130048   ;;  %vm1718_vm4 = vcmask 195584  }
   0xe   : > { %618 = vmatpush.bf16.msra.mxu0 %v594_v3  ;;  %v645_v11 = vpack.c.bf16 %v642_v9, %v641_v8  ;;  %v529_v12 = vld [vmem:[%s2533_s20] sm:$0xff]  ;;  %v530_v13 = vld [vmem:[%s2533_s20 + $0x8] sm:$0xff]  ;;  %s2548_s25 = scalar_lea.vmem %s3329_s2, %s2527_s17  ;;  %s2554_s28 = scalar_lea.vmem %s3330_s3, %s2527_s17  ;;  %v531_v26 = vld [vmem:[%s2533_s20 + $0x10] sm:$0xff] }
   0xf   : > { %669 = vmatpush.bf16.msra.mxu1 %v646_v7  ;;  %v537_v14 = vld [vmem:[%s2539_s23] sm:$0xff]  ;;  %v538_v15 = vld [vmem:[%s2539_s23 + $0x8] sm:$0xff]  ;;  %v532_v27 = vld [vmem:[%s2533_s20 + $0x18] sm:$0xff] }
  0x10   : > { %v561_v16 = vadd.f32 %v537_v14, %v529_v12  ;;  %v545_v17 = vld [vmem:[%s2548_s25] sm:$0xff]  ;;  %v546_v18 = vld [vmem:[%s2548_s25 + $0x8] sm:$0xff]  ;;  %v562_v19 = vadd.f32 %v538_v15, %v530_v13  ;;  %v539_v28 = vld [vmem:[%s2539_s23 + $0x10] sm:$0xff] }
  0x11   : > { %v553_v20 = vld [vmem:[%s2554_s28] sm:$0xff]  ;;  %v554_v21 = vld [vmem:[%s2554_s28 + $0x8] sm:$0xff]  ;;  %v540_v29 = vld [vmem:[%s2539_s23 + $0x18] sm:$0xff]  ;;  %v563_v34 = vadd.f32 %v539_v28, %v531_v26  ;;  %v585_v46 = vpack.c.bf16 %v546_v18, %v545_v17 }
  0x12   : > { %619 = vmatpush.bf16.msra.mxu0 %v593_v10  ;;  %v573_v22 = vadd.f32 %v553_v20, %v545_v17  ;;  %v574_v23 = vadd.f32 %v554_v21, %v546_v18  ;;  %v569_v24 = vpack.c.bf16 %v562_v19, %v561_v16  ;;  %v547_v30 = vld [vmem:[%s2548_s25 + $0x10] sm:$0xff]  ;;  %v548_v31 = vld [vmem:[%s2548_s25 + $0x18] sm:$0xff]  ;;  %v564_v35 = vadd.f32 %v540_v29, %v532_v27  ;;  %v692_v43 = vld [vmem:[%s3335_s8] sm:$0xff] }
  0x13   : > { %670 = vmatpush.bf16.msra.mxu1 %v645_v11  ;;  %v555_v32 = vld [vmem:[%s2554_s28 + $0x10] sm:$0xff]  ;;  %v556_v33 = vld [vmem:[%s2554_s28 + $0x18] sm:$0xff]  ;;  %v693_v44 = vld [vmem:[%s3335_s8 + $0x8] sm:$0xff]  ;;  %v586_v61 = vpack.c.bf16 %v548_v31, %v547_v30 }
  0x14   : > { %v581_v25 = vpack.c.bf16 %v574_v23, %v573_v22  ;;  %v575_v36 = vadd.f32 %v555_v32, %v547_v30  ;;  %v576_v37 = vadd.f32 %v556_v33, %v548_v31  ;;  %v695_v39 = vld [vmem:[%s3335_s8 + $0x18] sm:$0xff]  ;;  %v570_v41 = vpack.c.bf16 %v564_v35, %v563_v34  ;;  %v533_v47 = vld [vmem:[%s2533_s20 + $0x20] sm:$0xff]  ;;  %v534_v48 = vld [vmem:[%s2533_s20 + $0x28] sm:$0xff] }
  0x15   : > { %2111 = vmatmul.msk.bf16.vlgmr.msra.gmra.mxu0 %vm599_vm0, %v569_v24  ;;  %v697_v40 = vpack.c.bf16 %v695_v39, %v694_v38  ;;  %v696_v45 = vpack.c.bf16 %v693_v44, %v692_v43  ;;  %v541_v49 = vld [vmem:[%s2539_s23 + $0x20] sm:$0xff]  ;;  %v542_v50 = vld [vmem:[%s2539_s23 + $0x28] sm:$0xff]  ;;  %v551_v62 = vld [vmem:[%s2548_s25 + $0x30] sm:$0xff] }
  0x16   : > { %2115 = vmatmul.msk.bf16.vlgmr.msra.gmra.mxu1 %vm599_vm0, %v581_v25  ;;  %v582_v42 = vpack.c.bf16 %v576_v37, %v575_v36  ;;  %v549_v51 = vld [vmem:[%s2548_s25 + $0x20] sm:$0xff]  ;;  %v550_v52 = vld [vmem:[%s2548_s25 + $0x28] sm:$0xff]  ;;  %v565_v55 = vadd.f32 %v541_v49, %v533_v47  ;;  %v566_v56 = vadd.f32 %v542_v50, %v534_v48  ;;  %v535_v63 = vld [vmem:[%s2533_s20 + $0x30] sm:$0xff] }
  0x17   : > { %720 = vmatpush.bf16.msra.mxu2 %v697_v40  ;;  %v557_v53 = vld [vmem:[%s2554_s28 + $0x20] sm:$0xff]  ;;  %v558_v54 = vld [vmem:[%s2554_s28 + $0x28] sm:$0xff]  ;;  %v536_v0 = vld [vmem:[%s2533_s20 + $0x38] sm:$0xff]  ;;  %v587_v12 = vpack.c.bf16 %v550_v52, %v549_v51 }
  0x18   : > { %v577_v57 = vadd.f32 %v557_v53, %v549_v51  ;;  %v578_v58 = vadd.f32 %v558_v54, %v550_v52  ;;  %v571_v59 = vpack.c.bf16 %v566_v56, %v565_v55  ;;  %v543_v1 = vld [vmem:[%s2539_s23 + $0x30] sm:$0xff]  ;;  %v544_v2 = vld [vmem:[%s2539_s23 + $0x38] sm:$0xff]  ;;  %v2612_v15 = vld [vmem:[%s3332_s5] ss:$0 sm:$0xff] }
  0x19   : > { %v552_v3 = vld [vmem:[%s2548_s25 + $0x38] sm:$0xff]  ;;  %v559_v4 = vld [vmem:[%s2554_s28 + $0x30] sm:$0xff]  ;;  %v567_v6 = vadd.f32 %v543_v1, %v535_v63  ;;  %v568_v7 = vadd.f32 %v544_v2, %v536_v0  ;;  %v2246_v27 = vld [vmem:[%s3334_s7] ss:$0 sm:$0xff]  ;;  %s3278_s25 = scalar_lea.vmem %s3341_s14, %s2527_s17 }
  0x1a   : > { %v583_v60 = vpack.c.bf16 %v578_v58, %v577_v57  ;;  %v560_v5 = vld [vmem:[%s2554_s28 + $0x38] sm:$0xff]  ;;  %v579_v8 = vadd.f32 %v559_v4, %v551_v62  ;;  %v588_v13 = vpack.c.bf16 %v552_v3, %v551_v62  ;;  %v2247_v4 = vld [vmem:[%s3336_s9] ss:$0 sm:$0xff] }
  0x1b   : > { %721 = vmatpush.bf16.msra.mxu2 %v696_v45  ;;  %v580_v9 = vadd.f32 %v560_v5, %v552_v3  ;;  %v572_v10 = vpack.c.bf16 %v568_v7, %v567_v6 }
  0x1d   : > { %v584_v11 = vpack.c.bf16 %v580_v9, %v579_v8 }
  0x1e   : > { %2119 = vmatmul.msk.bf16.vlgmr.msra.gmra.mxu2 %vm599_vm0, %v585_v46 }
  0x25   : > { %2112 = vmatmul.msk.bf16.gmra.mxu0 %vm599_vm0, %v570_v41 }
  0x26   : > { %2116 = vmatmul.msk.bf16.gmra.mxu1 %vm599_vm0, %v582_v42 }
  0x2e   : > { %2120 = vmatmul.msk.bf16.gmra.mxu2 %vm599_vm0, %v586_v61 }
  0x35   : > { %2113 = vmatmul.msk.bf16.gmra.mxu0 %vm599_vm0, %v571_v59 }
  0x36   : > { %2117 = vmatmul.msk.bf16.gmra.mxu1 %vm599_vm0, %v583_v60 }
  0x3e   : > { %2121 = vmatmul.msk.bf16.gmra.mxu2 %vm599_vm0, %v587_v12 }
  0x45   : > { %2114 = vmatmul.msk.bf16.gmra.mxu0 %vm599_vm0, %v572_v10 }
  0x46   : > { %2118 = vmatmul.msk.bf16.gmra.mxu1 %vm599_vm0, %v584_v11 }
  0x4e   : > { %2122 = vmatmul.msk.bf16.gmra.mxu2 %vm599_vm0, %v588_v13 }
  0x92   : > { %v621_v14 = vpop.f32.mrf.mxu0 }
  0x93   : > { %v672_v16 = vpop.f32.mrf.mxu1  ;;  %v622_v17 = vadd.f32 %v2612_v15, %v621_v14 }
  0x94   : > { %v673_v42 = vadd.f32 %v2246_v27, %v672_v16 }
  0x95   : > { %v743_v19 = vmul.f32 0.35355338, %v622_v17 }
  0x9a   : > { %v623_v18 = vpop.f32.mrf.mxu0 }
  0x9b   : > { %v624_v20 = vadd.f32 %v2612_v15, %v623_v18  ;;  %v674_v21 = vpop.f32.mrf.mxu1 }
  0x9c   : > { %v675_v38 = vadd.f32 %v2246_v27, %v674_v21 }
  0x9d   : > { %v744_v22 = vmul.f32 0.35355338, %v624_v20 }
  0x9e   : > { %v2634_v43 = vpack.c.bf16 %v675_v38, %v673_v42 }
  0x9f   : > { %v2616_v23 = vpack.c.bf16 %v744_v22, %v743_v19 }
  0xa0   : > { %v777_v17 = vsel %vm763_vm1, %v2634_v43, 0 }
  0xa1   : > { %955 = vrot.lane.b32.xlu2 %v2616_v23, %s2413_s26  ;;  %v2625_v32 = vpop.f32.mrf.mxu2 }
  0xa2   : > { %v626_v24 = vpop.f32.mrf.mxu0  ;;  %v724_v19 = vadd.f32 %v2247_v4, %v2625_v32 }
  0xa3   : > { %v677_v25 = vpop.f32.mrf.mxu1  ;;  %v627_v26 = vadd.f32 %v2612_v15, %v626_v24 }
  0xa4   : > { %v678_v33 = vadd.f32 %v2246_v27, %v677_v25 }
  0xa5   : > { %v745_v29 = vmul.f32 0.35355338, %v627_v26 }
  0xa9   : > { %v2632_v41 = vpop.f32.mrf.mxu2 }
  0xaa   : > { %v628_v28 = vpop.f32.mrf.mxu0  ;;  %v726_v20 = vadd.f32 %v2247_v4, %v2632_v41 }
  0xab   : > { %v629_v30 = vadd.f32 %v2612_v15, %v628_v28  ;;  %v679_v31 = vpop.f32.mrf.mxu1 }
  0xac   : > { %v680_v34 = vadd.f32 %v2246_v27, %v679_v31  ;;  %v2682_v24 = vpack.c.bf16 %v726_v20, %v724_v19 }
  0xad   : > { %v746_v35 = vmul.f32 0.35355338, %v629_v30 }
  0xae   : > { %v756_v36 = vpack.c.bf16 %v680_v34, %v678_v33 }
  0xaf   : > { %v2627_v37 = vpack.c.bf16 %v746_v35, %v745_v29 }
  0xb0   : > { %969 = vrot.lane.b32.xlu1 %v756_v36, %s2413_s26  ;;  %v780_v5 = vsel %vm763_vm1, %v756_v36, 0 }
  0xb1   : > { %957 = vrot.lane.b32.xlu2 %v2627_v37, %s2413_s26  ;;  %v728_v49 = vpop.f32.mrf.mxu2 }
  0xb2   : > { %v631_v39 = vpop.f32.mrf.mxu0  ;;  %v729_v21 = vadd.f32 %v2247_v4, %v728_v49 }
  0xb3   : > { %v682_v40 = vpop.f32.mrf.mxu1  ;;  %v632_v44 = vadd.f32 %v2612_v15, %v631_v39 }
  0xb4   : > { %v683_v55 = vadd.f32 %v2246_v27, %v682_v40 }
  0xb5   : > { %v747_v46 = vmul.f32 0.35355338, %v632_v44 }
  0xb8   : > { %967 = vrot.lane.b32.xlu1 %v2634_v43, %s2413_s26 }
  0xb9   : > { %1187 = vrot.lane.b32.xlu2 %v756_v36, %s2414_s15  ;;  %v730_v54 = vpop.f32.mrf.mxu2 }
  0xba   : > { %v633_v45 = vpop.f32.mrf.mxu0  ;;  %v731_v22 = vadd.f32 %v2247_v4, %v730_v54 }
  0xbb   : > { %v634_v47 = vadd.f32 %v2612_v15, %v633_v45  ;;  %v684_v48 = vpop.f32.mrf.mxu1 }
  0xbc   : > { %v685_v52 = vadd.f32 %v2246_v27, %v684_v48  ;;  %v2689_v25 = vpack.c.bf16 %v731_v22, %v729_v21 }
  0xbd   : > { %v748_v50 = vmul.f32 0.35355338, %v634_v47 }
  0xbe   : > { %v757_v56 = vpack.c.bf16 %v685_v52, %v683_v55 }
  0xbf   : > { %v2641_v51 = vpack.c.bf16 %v748_v50, %v747_v46 }
  0xc0   : > { %v783_v1 = vsel %vm763_vm1, %v757_v56, 0 }
  0xc1   : > { %959 = vrot.lane.b32.xlu1 %v2641_v51, %s2413_s26  ;;  %1185 = vrot.lane.b32.xlu2 %v2634_v43, %s2414_s15  ;;  %v733_v60 = vpop.f32.mrf.mxu2 }
  0xc2   : > { %v636_v63 = vpop.f32.mrf.mxu0  ;;  %v734_v8 = vadd.f32 %v2247_v4, %v733_v60 }
  0xc3   : > { %v687_v53 = vpop.f32.mrf.mxu1  ;;  %v637_v6 = vadd.f32 %v2612_v15, %v636_v63 }
  0xc4   : > { %v688_v58 = vadd.f32 %v2246_v27, %v687_v53 }
  0xc5   : > { %v749_v9 = vmul.f32 0.35355338, %v637_v6 }
  0xc9   : > { %1403 = vrot.lane.b32.xlu1 %v757_v56, %s2415_s16  ;;  %1391 = vrot.lane.b32.xlu2 %v2616_v23, %s2415_s16  ;;  %v735_v0 = vpop.f32.mrf.mxu2 }
  0xca   : > { %v638_v3 = vpop.f32.mrf.mxu0  ;;  %v736_v11 = vadd.f32 %v2247_v4, %v735_v0 }
  0xcb   : > { %v689_v57 = vpop.f32.mrf.mxu1  ;;  %v639_v7 = vadd.f32 %v2612_v15, %v638_v3 }
  0xcc   : > { %v690_v59 = vadd.f32 %v2246_v27, %v689_v57  ;;  %v2669_v16 = vpack.c.bf16 %v736_v11, %v734_v8 }
  0xcd   : > { %v750_v10 = vmul.f32 0.35355338, %v639_v7 }
  0xce   : > { %v758_v61 = vpack.c.bf16 %v690_v59, %v688_v58 }
  0xcf   : > { %v754_v15 = vpack.c.bf16 %v750_v10, %v749_v9 }
  0xd0   : > { %973 = vrot.lane.b32.xlu0 %v758_v61, %s2413_s26  ;;  %v786_v62 = vsel %vm763_vm1, %v758_v61, 0 }
  0xd1   : > { %792 = vmatpush.bf16.xpose.msrb.mxu0 %v786_v62  ;;  %2166 = vmatpush.bf16.xpose.msra.mxu3 %v786_v62  ;;  %v738_v2 = vpop.f32.mrf.mxu2 }
  0xd2   : > { %1401 = vrot.lane.b32.xlu1 %v756_v36, %s2415_s16  ;;  %1405 = vrot.lane.b32.xlu2 %v758_v61, %s2415_s16  ;;  %v739_v13 = vadd.f32 %v2247_v4, %v738_v2 }
  0xd8   : > { %971 = vrot.lane.b32.xlu0 %v757_v56, %s2413_s26 }
  0xd9   : > { %793 = vmatpush.bf16.xpose.msrb.mxu0 %v783_v1  ;;  %2167 = vmatpush.bf16.xpose.msra.mxu3 %v783_v1  ;;  %v740_v12 = vpop.f32.mrf.mxu2 }
  0xda   : > { %1177 = vrot.lane.b32.xlu1 %v2616_v23, %s2414_s15  ;;  %1181 = vrot.lane.b32.xlu2 %v2641_v51, %s2414_s15  ;;  %v741_v14 = vadd.f32 %v2247_v4, %v740_v12 }
  0xdc   : > { %v2674_v18 = vpack.c.bf16 %v741_v14, %v739_v13 }
  0xe0   : > { %1189 = vrot.lane.b32.xlu0 %v757_v56, %s2414_s15 }
  0xe1   : > { %794 = vmatpush.bf16.xpose.msrb.mxu0 %v780_v5  ;;  %2168 = vmatpush.bf16.xpose.msra.mxu3 %v780_v5 }
  0xe2   : > { %1393 = vrot.lane.b32.xlu1 %v2627_v37, %s2415_s16  ;;  %1128 = vrot.lane.b32.xlu2 %v2669_v16, %s2413_s26 }
  0xe8   : > { %1191 = vrot.lane.b32.xlu0 %v758_v61, %s2414_s15 }
  0xe9   : > { %795 = vmatpush.bf16.xpose.msrb.mxu0 %v777_v17  ;;  %2169 = vmatpush.bf16.xpose.msra.mxu3 %v777_v17 }
  0xea   : > { %1183 = vrot.lane.b32.xlu1 %v754_v15, %s2414_s15  ;;  %1124 = vrot.lane.b32.xlu2 %v2682_v24, %s2413_s26 }
  0xf0   : > { %1399 = vrot.lane.b32.xlu0 %v2634_v43, %s2415_s16  ;;  %2123 = vmatmul.msk.bf16.vlgmr.msrb.gmra.mxu0 %vm763_vm1, %v2616_v23 }
  0xf1   : > { %926 = vmatpush.bf16.msra.mxu0 %v2674_v18  ;;  %2124 = vmatmul.msk.bf16.vlgmr.msra.gmra.mxu3 %vm763_vm1, %v2627_v37 }
  0xf2   : > { %1130 = vrot.lane.b32.xlu1 %v2674_v18, %s2413_s26  ;;  %1397 = vrot.lane.b32.xlu2 %v754_v15, %s2415_s16 }
  0xf5   : > { %927 = vmatpush.bf16.msra.mxu0 %v2669_v16 }
  0xf8   : > { %961 = vrot.lane.b32.xlu0 %v754_v15, %s2413_s26 }
  0xf9   : > { %928 = vmatpush.bf16.msra.mxu0 %v2689_v25 }
  0xfa   : > { %1558 = vrot.lane.b32.xlu1 %v2674_v18, %s2415_s16 }
  0xfb   : > { %v956_v26 = vpop.permute.xlu2 %955 }
  0xfd   : > { %929 = vmatpush.bf16.msra.mxu0 %v2682_v24 }
 0x100   : > { %1179 = vrot.lane.b32.xlu0 %v2627_v37, %s2414_s15 }
 0x101   : > { %2125 = vmatmul.msk.bf16.gmra.mxu3 %vm763_vm1, %v2641_v51 }
 0x108   : > { %1395 = vrot.lane.b32.xlu0 %v2641_v51, %s2415_s16 }
 0x10b   : > { %v958_v28 = vpop.permute.xlu2 %957 }
 0x110   : > { %1126 = vrot.lane.b32.xlu0 %v2689_v25, %s2413_s26 }
 0x111   : > { %2126 = vmatmul.msk.bf16.gmra.mxu3 %vm763_vm1, %v754_v15 }
 0x113   : > { %v1188_v30 = vpop.permute.xlu2 %1187 }
 0x114   : > { %v1209_v56 = vsel %vm763_vm1, %v1188_v30, 0 }
 0x11b   : > { %v1186_v34 = vpop.permute.xlu2 %1185 }
 0x11c   : > { %v1206_v61 = vsel %vm763_vm1, %v1186_v34, 0 }
 0x122   : > { %v970_v23 = vpop.permute.xlu1 %969 }
 0x123   : > { %v2716_v39 = vpop.permute.xlu2 %1391  ;;  %v991_v41 = vsel %vm763_vm1, %v970_v23, 0 }
 0x12a   : > { %v968_v27 = vpop.permute.xlu1 %967 }
 0x12b   : > { %v988_v45 = vsel %vm763_vm1, %v968_v27, 0 }
 0x12c   : > { %v1406_v43 = vpop.permute.xlu2 %1405 }
 0x12d   : > { %v1429_v47 = vsel %vm763_vm1, %v1406_v43, 0 }
 0x133   : > { %v2712_v29 = vpop.permute.xlu1 %959 }
 0x134   : > { %v1182_v49 = vpop.permute.xlu2 %1181 }
 0x13b   : > { %v1404_v31 = vpop.permute.xlu1 %1403 }
 0x13c   : > { %v1426_v52 = vsel %vm763_vm1, %v1404_v31, 0  ;;  %v1129_v54 = vpop.permute.xlu2 %1128 }
 0x142   : > { %v974_v32 = vpop.permute.xlu0 %973 }
 0x143   : > { %v997_v33 = vsel %vm763_vm1, %v974_v32, 0 }
 0x144   : > { %1003 = vmatpush.bf16.xpose.msrb.mxu1 %v997_v33  ;;  %v1402_v35 = vpop.permute.xlu1 %1401  ;;  %v1125_v9 = vpop.permute.xlu2 %1124 }
 0x145   : > { %v1423_v57 = vsel %vm763_vm1, %v1402_v35, 0 }
 0x14a   : > { %v972_v36 = vpop.permute.xlu0 %971 }
 0x14b   : > { %v994_v37 = vsel %vm763_vm1, %v972_v36, 0 }
 0x14c   : > { %1004 = vmatpush.bf16.xpose.msrb.mxu1 %v994_v37  ;;  %v1178_v38 = vpop.permute.xlu1 %1177  ;;  %v1398_v15 = vpop.permute.xlu2 %1397 }
 0x152   : > { %v1190_v40 = vpop.permute.xlu0 %1189 }
 0x153   : > { %v1212_v51 = vsel %vm763_vm1, %v1190_v40, 0 }
 0x154   : > { %1005 = vmatpush.bf16.xpose.msrb.mxu1 %v991_v41  ;;  %v2719_v42 = vpop.permute.xlu1 %1393 }
 0x15a   : > { %v1192_v44 = vpop.permute.xlu0 %1191 }
 0x15b   : > { %v1215_v46 = vsel %vm763_vm1, %v1192_v44, 0 }
 0x15c   : > { %1006 = vmatpush.bf16.xpose.msrb.mxu1 %v988_v45  ;;  %1221 = vmatpush.bf16.xpose.msrb.mxu3 %v1215_v46  ;;  %v1184_v48 = vpop.permute.xlu1 %1183 }
 0x162   : > { %v1400_v50 = vpop.permute.xlu0 %1399 }
 0x163   : > { %2131 = vmatmul.msk.bf16.vlgmr.msrb.gmra.mxu1 %vm763_vm1, %v956_v26  ;;  %v1420_v62 = vsel %vm763_vm1, %v1400_v50, 0 }
 0x164   : > { %1435 = vmatpush.bf16.xpose.msra.mxu1 %v1429_v47  ;;  %1222 = vmatpush.bf16.xpose.msrb.mxu3 %v1212_v51  ;;  %v1131_v53 = vpop.permute.xlu1 %1130 }
 0x165   : > { %1152 = vmatpush.bf16.msrb.mxu2 %v1131_v53 }
 0x169   : > { %1153 = vmatpush.bf16.msrb.mxu2 %v1129_v54 }
 0x16a   : > { %v962_v55 = vpop.permute.xlu0 %961 }
 0x16c   : > { %1436 = vmatpush.bf16.xpose.msra.mxu1 %v1426_v52  ;;  %1223 = vmatpush.bf16.xpose.msrb.mxu3 %v1209_v56  ;;  %v1559_v19 = vpop.permute.xlu1 %1558 }
 0x16d   : > { %v797_v58 = vpop.f32.mrf.mxu0 }
 0x16e   : > { %v818_v59 = vsel %vm817_vm2, %v797_v58, -inf }
 0x16f   : > { %819 = vmax.xlane.f32.xlu2 %v818_v59 }
 0x172   : > { %v1180_v60 = vpop.permute.xlu0 %1179 }
 0x173   : > { %2132 = vmatmul.msk.bf16.gmra.mxu1 %vm763_vm1, %v958_v28 }
 0x174   : > { %1437 = vmatpush.bf16.xpose.msra.mxu1 %v1423_v57  ;;  %v802_v63 = vpop.f32.mrf.mxu3  ;;  %1224 = vmatpush.bf16.xpose.msrb.mxu3 %v1206_v61 }
 0x175   : > { %v824_v0 = vsel %vm817_vm2, %v802_v63, -inf  ;;  %v2734_v2 = vpop.f32.mrf.mxu0 }
 0x176   : > { %v821_v5 = vsel %vm817_vm2, %v2734_v2, -inf }
 0x177   : > { %825 = vmax.xlane.f32.xlu2 %v824_v0 }
 0x17a   : > { %v1396_v1 = vpop.permute.xlu0 %1395 }
 0x17b   : > { %2139 = vmatmul.msk.bf16.vlgmr.msrb.gmra.mxu3 %vm763_vm1, %v1178_v38 }
 0x17c   : > { %1438 = vmatpush.bf16.xpose.msra.mxu1 %v1420_v62  ;;  %v804_v3 = vpop.f32.mrf.mxu3 }
 0x17d   : > { %v827_v4 = vsel %vm817_vm2, %v804_v3, -inf }
 0x17e   : > { %828 = vmax.xlane.f32.xlu0 %v827_v4 }
 0x17f   : > { %822 = vmax.xlane.f32.xlu2 %v821_v5 }
 0x182   : > { %v1127_v6 = vpop.permute.xlu0 %1126 }
 0x183   : > { %2133 = vmatmul.msk.bf16.gmra.mxu1 %vm763_vm1, %v2712_v29  ;;  %1154 = vmatpush.bf16.msrb.mxu2 %v1127_v6 }
 0x184   : > { %v2742_v7 = vpop.f32.mrf.mxu3 }
 0x185   : > { %v830_v8 = vsel %vm817_vm2, %v2742_v7, -inf }
 0x186   : > { %831 = vmax.xlane.f32.xlu0 %v830_v8 }
 0x187   : > { %1155 = vmatpush.bf16.msrb.mxu2 %v1125_v9 }
 0x18b   : > { %2140 = vmatmul.msk.bf16.gmra.mxu3 %vm763_vm1, %v1180_v60  ;;  %1580 = vmatpush.bf16.msra.mxu2 %v1559_v19 }
 0x18c   : > { %v809_v10 = vpop.f32.mrf.mxu3 }
 0x18d   : > { %v833_v11 = vsel %vm817_vm2, %v809_v10, -inf }
 0x18e   : > { %834 = vmax.xlane.f32.xlu1 %v833_v11 }
 0x193   : > { %2134 = vmatmul.msk.bf16.gmra.mxu1 %vm763_vm1, %v962_v55 }
 0x194   : > { %v2749_v12 = vpop.f32.mrf.mxu3 }
 0x195   : > { %v836_v13 = vsel %vm817_vm2, %v2749_v12, -inf }
 0x196   : > { %837 = vmax.xlane.f32.xlu2 %v836_v13 }
 0x19b   : > { %2141 = vmatmul.msk.bf16.gmra.mxu3 %vm763_vm1, %v1182_v49 }
 0x19c   : > { %v2754_v14 = vpop.f32.mrf.mxu3 }
 0x19d   : > { %v839_v17 = vsel %vm817_vm2, %v2754_v14, -inf }
 0x19e   : > { %840 = vmax.xlane.f32.xlu0 %v839_v17 }
 0x1a3   : > { %2147 = vmatmul.msk.bf16.vlgmr.msra.gmra.mxu1 %vm763_vm1, %v2716_v39 }
 0x1ab   : > { %2142 = vmatmul.msk.bf16.gmra.mxu3 %vm763_vm1, %v1184_v48 }
 0x1b3   : > { %2148 = vmatmul.msk.bf16.gmra.mxu1 %vm763_vm1, %v2719_v42 }
 0x1c3   : > { %2149 = vmatmul.msk.bf16.gmra.mxu1 %vm763_vm1, %v1396_v1 }
 0x1d3   : > { %2150 = vmatmul.msk.bf16.gmra.mxu1 %vm763_vm1, %v1398_v15 }
 0x1e0   : > { %v2765_v20 = vpop.f32.mrf.mxu1 }
 0x1e1   : > { %v1028_v21 = vsel %vm817_vm2, %v2765_v20, -inf }
 0x1e2   : > { %1029 = vmax.xlane.f32.xlu0 %v1028_v21  ;;  %v820_v22 = vpop.xlane.xlu2 %819 }
 0x1e3   : > { %v842_v23 = vsub.f32 %v797_v58, %v820_v22 }
 0x1e5   : > { %v850_v26 = vmul.f32 1.442695, %v842_v23 }
 0x1e7   : > { %2251 = vpow2.f32 %v850_v26 }
 0x1e8   : > { %v2769_v27 = vpop.f32.mrf.mxu1 }
 0x1e9   : > { %v1031_v51 = vsel %vm817_vm2, %v2769_v27, -inf }
 0x1ea   : > { %v826_v28 = vpop.xlane.xlu2 %825 }
 0x1eb   : > { %v844_v30 = vsub.f32 %v802_v63, %v826_v28 }
 0x1ed   : > { %v2771_v29 = vpop.eup %2251  ;;  %v854_v33 = vmul.f32 1.442695, %v844_v30 }
 0x1ee   : > { %v866_v31 = vsel %vm817_vm2, %v2771_v29, 0.0 }
 0x1ef   : > { %867 = vadd.xlane.f32.xlu0 %v866_v31  ;;  %2253 = vpow2.f32 %v854_v33 }
 0x1f0   : > { %v2775_v32 = vpop.f32.mrf.mxu1 }
 0x1f1   : > { %v829_v34 = vpop.xlane.xlu0 %828  ;;  %v1034_v37 = vsel %vm817_vm2, %v2775_v32, -inf }
 0x1f2   : > { %v845_v35 = vsub.f32 %v804_v3, %v829_v34  ;;  %v823_v47 = vpop.xlane.xlu2 %822 }
 0x1f3   : > { %v843_v50 = vsub.f32 %v2734_v2, %v823_v47 }
 0x1f4   : > { %v856_v36 = vmul.f32 1.442695, %v845_v35 }
 0x1f5   : > { %v2781_v39 = vpop.eup %2253  ;;  %v852_v54 = vmul.f32 1.442695, %v843_v50 }
 0x1f6   : > { %2255 = vpow2.f32 %v856_v36  ;;  %v872_v43 = vsel %vm817_vm2, %v2781_v39, 0.0 }
 0x1f7   : > { %1035 = vmax.xlane.f32.xlu0 %v1034_v37 }
 0x1f8   : > { %v2779_v38 = vpop.f32.mrf.mxu1 }
 0x1f9   : > { %v832_v3 = vpop.xlane.xlu0 %831 }
 0x1fa   : > { %v846_v6 = vsub.f32 %v2742_v7, %v832_v3 }
 0x1fc   : > { %v2783_v40 = vpop.eup %2255  ;;  %v858_v13 = vmul.f32 1.442695, %v846_v6 }
 0x1fd   : > { %v875_v41 = vsel %vm817_vm2, %v2783_v40, 0.0 }
 0x1fe   : > { %876 = vadd.xlane.f32.xlu2 %v875_v41  ;;  %v2787_v42 = vpop.f32.mrf.mxu3 }
 0x1ff   : > { %873 = vadd.xlane.f32.xlu0 %v872_v43  ;;  %v1246_v44 = vsel %vm817_vm2, %v2787_v42, -inf }
 0x200   : > { %v2793_v45 = vpop.f32.mrf.mxu1  ;;  %1247 = vmax.xlane.f32.xlu1 %v1246_v44 }
 0x201   : > { %v835_v46 = vpop.xlane.xlu1 %834  ;;  %v1040_v19 = vsel %vm817_vm2, %v2793_v45, -inf }
 0x202   : > { %v847_v48 = vsub.f32 %v809_v10, %v835_v46  ;;  %v1037_v10 = vsel %vm817_vm2, %v2779_v38, -inf }
 0x204   : > { %v860_v53 = vmul.f32 1.442695, %v847_v48 }
 0x206   : > { %v2795_v49 = vpop.f32.mrf.mxu3  ;;  %2257 = vpow2.f32 %v860_v53 }
 0x207   : > { %2259 = vpow2.f32 %v852_v54  ;;  %v1249_v56 = vsel %vm817_vm2, %v2795_v49, -inf }
 0x208   : > { %v2800_v52 = vpop.f32.mrf.mxu1  ;;  %1032 = vmax.xlane.f32.xlu1 %v1031_v51 }
 0x209   : > { %v838_v2 = vpop.xlane.xlu2 %837  ;;  %v1043_v8 = vsel %vm817_vm2, %v2800_v52, -inf }
 0x20a   : > { %v848_v4 = vsub.f32 %v2749_v12, %v838_v2 }
 0x20c   : > { %v2810_v59 = vpop.eup %2257  ;;  %v862_v11 = vmul.f32 1.442695, %v848_v4 }
 0x20d   : > { %v2812_v60 = vpop.eup %2259  ;;  %v881_v62 = vsel %vm817_vm2, %v2810_v59, 0.0 }
 0x20e   : > { %v2802_v55 = vpop.f32.mrf.mxu3  ;;  %v869_v1 = vsel %vm817_vm2, %v2812_v60, 0.0  ;;  %2261 = vpow2.f32 %v862_v11 }
 0x20f   : > { %v1252_v57 = vsel %vm817_vm2, %v2802_v55, -inf  ;;  %2263 = vpow2.f32 %v858_v13 }
 0x210   : > { %v2808_v58 = vpop.f32.mrf.mxu1  ;;  %1250 = vmax.xlane.f32.xlu1 %v1249_v56  ;;  %1253 = vmax.xlane.f32.xlu0 %v1252_v57 }
 0x211   : > { %v1046_v7 = vsel %vm817_vm2, %v2808_v58, -inf  ;;  %v841_v22 = vpop.xlane.xlu0 %840 }
 0x212   : > { %v849_v28 = vsub.f32 %v2754_v14, %v841_v22 }
 0x214   : > { %v2844_v21 = vpop.eup %2261  ;;  %v864_v35 = vmul.f32 1.442695, %v849_v28 }
 0x215   : > { %v2846_v23 = vpop.eup %2263  ;;  %v884_v31 = vsel %vm817_vm2, %v2844_v21, 0.0 }
 0x216   : > { %v2814_v61 = vpop.f32.mrf.mxu3  ;;  %v878_v34 = vsel %vm817_vm2, %v2846_v23, 0.0  ;;  %2265 = vpow2.f32 %v864_v35 }
 0x217   : > { %v1255_v63 = vsel %vm817_vm2, %v2814_v61, -inf }
 0x218   : > { %v2820_v0 = vpop.f32.mrf.mxu1  ;;  %882 = vadd.xlane.f32.xlu0 %v881_v62  ;;  %1256 = vmax.xlane.f32.xlu2 %v1255_v63 }
 0x219   : > { %870 = vadd.xlane.f32.xlu1 %v869_v1  ;;  %v1049_v14 = vsel %vm817_vm2, %v2820_v0, -inf }
 0x21c   : > { %v2869_v44 = vpop.eup %2265 }
 0x21d   : > { %v887_v50 = vsel %vm817_vm2, %v2869_v44, 0.0 }
 0x21e   : > { %v2825_v5 = vpop.f32.mrf.mxu3 }
 0x21f   : > { %v1258_v43 = vsel %vm817_vm2, %v2825_v5, -inf }
 0x220   : > { %v2830_v9 = vpop.f32.mrf.mxu1  ;;  %1044 = vmax.xlane.f32.xlu2 %v1043_v8 }
 0x221   : > { %1038 = vmax.xlane.f32.xlu1 %v1037_v10  ;;  %v1460_v46 = vsel %vm817_vm2, %v2830_v9, -inf }
 0x226   : > { %v2834_v17 = vpop.f32.mrf.mxu3 }
 0x227   : > { %v1261_v12 = vsel %vm817_vm2, %v2834_v17, -inf }
 0x228   : > { %v2840_v15 = vpop.f32.mrf.mxu1  ;;  %1262 = vmax.xlane.f32.xlu0 %v1261_v12  ;;  %1047 = vmax.xlane.f32.xlu2 %v1046_v7 }
 0x229   : > { %1041 = vmax.xlane.f32.xlu1 %v1040_v19  ;;  %v1463_v47 = vsel %vm817_vm2, %v2840_v15, -inf }
 0x22e   : > { %v2848_v26 = vpop.f32.mrf.mxu3 }
 0x22f   : > { %v1264_v30 = vsel %vm817_vm2, %v2848_v26, -inf }
 0x230   : > { %v2855_v33 = vpop.f32.mrf.mxu1  ;;  %1265 = vmax.xlane.f32.xlu0 %v1264_v30  ;;  %885 = vadd.xlane.f32.xlu2 %v884_v31 }
 0x231   : > { %879 = vadd.xlane.f32.xlu1 %v878_v34  ;;  %v1466_v56 = vsel %vm817_vm2, %v2855_v33, -inf }
 0x236   : > { %v2859_v36 = vpop.f32.mrf.mxu3 }
 0x237   : > { %v1267_v37 = vsel %vm817_vm2, %v2859_v36, -inf }
 0x238   : > { %v2865_v41 = vpop.f32.mrf.mxu1  ;;  %1050 = vmax.xlane.f32.xlu0 %v1049_v14  ;;  %1268 = vmax.xlane.f32.xlu2 %v1267_v37 }
 0x239   : > { %1259 = vmax.xlane.f32.xlu1 %v1258_v43  ;;  %v1469_v51 = vsel %vm817_vm2, %v2865_v41, -inf }
 0x240   : > { %v2875_v48 = vpop.f32.mrf.mxu1  ;;  %1461 = vmax.xlane.f32.xlu0 %v1460_v46  ;;  %1464 = vmax.xlane.f32.xlu2 %v1463_v47 }
 0x241   : > { %888 = vadd.xlane.f32.xlu1 %v887_v50  ;;  %v1472_v53 = vsel %vm817_vm2, %v2875_v48, -inf }
 0x248   : > { %v2883_v54 = vpop.f32.mrf.mxu1  ;;  %1470 = vmax.xlane.f32.xlu0 %v1469_v51  ;;  %1473 = vmax.xlane.f32.xlu2 %v1472_v53 }
 0x249   : > { %1467 = vmax.xlane.f32.xlu1 %v1466_v56  ;;  %v1475_v62 = vsel %vm817_vm2, %v2883_v54, -inf }
 0x250   : > { %v2887_v57 = vpop.f32.mrf.mxu1 }
 0x251   : > { %1476 = vmax.xlane.f32.xlu1 %v1475_v62  ;;  %v1478_v63 = vsel %vm817_vm2, %v2887_v57, -inf }
 0x252   : > { %1479 = vmax.xlane.f32.xlu0 %v1478_v63 }
 0x255   : > { %v1030_v1 = vpop.xlane.xlu0 %1029 }
 0x256   : > { %v1052_v2 = vsub.f32 %v2765_v20, %v1030_v1 }
 0x258   : > { %v1060_v3 = vmul.f32 1.442695, %v1052_v2  ;;  %v2894_v4 = vpop.f32.mrf.mxu1 }
 0x259   : > { %v1481_v6 = vsel %vm817_vm2, %v2894_v4, -inf }
 0x25a   : > { %2267 = vpow2.f32 %v1060_v3  ;;  %1482 = vmax.xlane.f32.xlu2 %v1481_v6 }
 0x260   : > { %v2898_v8 = vpop.eup %2267 }
 0x261   : > { %v1076_v10 = vsel %vm817_vm2, %v2898_v8, 0.0 }
 0x262   : > { %1077 = vadd.xlane.f32.xlu2 %v1076_v10  ;;  %v868_v11 = vpop.xlane.xlu0 %867 }
 0x26a   : > { %v1036_v13 = vpop.xlane.xlu0 %1035 }
 0x26b   : > { %v1054_v20 = vsub.f32 %v2775_v32, %v1036_v13 }
 0x26d   : > { %v1064_v22 = vmul.f32 1.442695, %v1054_v20 }
 0x272   : > { %v874_v43 = vpop.xlane.xlu0 %873 }
 0x273   : > { %v1248_v12 = vpop.xlane.xlu1 %1247 }
 0x274   : > { %v1270_v7 = vsub.f32 %v2787_v42, %v1248_v12  ;;  %v877_v42 = vpop.xlane.xlu2 %876 }
 0x276   : > { %v1278_v19 = vmul.f32 1.442695, %v1270_v7 }
 0x278   : > { %2269 = vpow2.f32 %v1278_v19 }
 0x279   : > { %2271 = vpow2.f32 %v1064_v22 }
 0x27a   : > { %1344 = vrot.lane.b32.xlu2 %v2674_v18, %s2414_s15 }
 0x27b   : > { %v1033_v28 = vpop.xlane.xlu1 %1032 }
 0x27c   : > { %v1053_v30 = vsub.f32 %v2769_v27, %v1033_v28 }
 0x27e   : > { %v2907_v31 = vpop.eup %2269  ;;  %v1062_v34 = vmul.f32 1.442695, %v1053_v30 }
 0x27f   : > { %v1294_v35 = vsel %vm817_vm2, %v2907_v31, 0.0  ;;  %v2913_v14 = vpop.eup %2271 }
 0x280   : > { %2273 = vpow2.f32 %v1062_v34  ;;  %1295 = vadd.xlane.f32.xlu1 %v1294_v35  ;;  %v1082_v27 = vsel %vm817_vm2, %v2913_v14, 0.0 }
 0x281   : > { %2275 = vrcp.f32 %v868_v11 }
 0x283   : > { %v2911_v32 = vpop.xlane.xlu1 %1250  ;;  %v2923_v51 = vpop.xlane.xlu0 %1253 }
 0x286   : > { %v2915_v37 = vpop.eup %2273 }
 0x287   : > { %v1079_v18 = vsel %vm817_vm2, %v2915_v37, 0.0  ;;  %v2276_v50 = vpop.eup %2275 }
 0x288   : > { %1080 = vadd.xlane.f32.xlu0 %v1079_v18  ;;  %1083 = vadd.xlane.f32.xlu1 %v1082_v27  ;;  %v898_v62 = vmul.f32 %v2276_v50, %v2771_v29 }
 0x28b   : > { %v2921_v46 = vpop.xlane.xlu2 %1256  ;;  %v883_v11 = vpop.xlane.xlu0 %882 }
 0x28c   : > { %v871_v47 = vpop.xlane.xlu1 %870 }
 0x28d   : > { %2277 = vrcp.f32 %v871_v47 }
 0x28e   : > { %2279 = vrcp.f32 %v874_v43 }
 0x293   : > { %v2278_v53 = vpop.eup %2277  ;;  %v1045_v56 = vpop.xlane.xlu2 %1044 }
 0x294   : > { %v899_v63 = vmul.f32 %v2278_v53, %v2812_v60  ;;  %v1039_v1 = vpop.xlane.xlu1 %1038  ;;  %v1057_v10 = vsub.f32 %v2800_v52, %v1045_v56  ;;  %v2280_v7 = vpop.eup %2279 }
 0x295   : > { %v1055_v2 = vsub.f32 %v2779_v38, %v1039_v1  ;;  %v900_v22 = vmul.f32 %v2280_v7, %v2781_v39 }
 0x296   : > { %v906_v3 = vpack.c.bf16 %v899_v63, %v898_v62  ;;  %v1070_v13 = vmul.f32 1.442695, %v1057_v10 }
 0x297   : > { %v1066_v6 = vmul.f32 1.442695, %v1055_v2 }
 0x298   : > { %2127 = vmatmul.msk.bf16.vlgmr.msra.gmra.mxu0 %vm817_vm2, %v906_v3 }
 0x299   : > { %2281 = vpow2.f32 %v1066_v6 }
 0x29a   : > { %2283 = vrcp.f32 %v877_v42 }
 0x29b   : > { %v1048_v60 = vpop.xlane.xlu2 %1047  ;;  %2285 = vpow2.f32 %v1070_v13  ;;  %v2938_v28 = vpop.xlane.xlu0 %1262 }
 0x29c   : > { %v1042_v12 = vpop.xlane.xlu1 %1041  ;;  %1556 = vrot.lane.b32.xlu0 %v2669_v16, %s2415_s16  ;;  %v1058_v62 = vsub.f32 %v2808_v58, %v1048_v60 }
 0x29d   : > { %v1056_v29 = vsub.f32 %v2793_v45, %v1042_v12 }
 0x29e   : > { %v1072_v6 = vmul.f32 1.442695, %v1058_v62 }
 0x29f   : > { %v2933_v38 = vpop.eup %2281  ;;  %v1068_v20 = vmul.f32 1.442695, %v1056_v29 }
 0x2a0   : > { %v1085_v52 = vsel %vm817_vm2, %v2933_v38, 0.0  ;;  %v2284_v19 = vpop.eup %2283 }
 0x2a1   : > { %2287 = vpow2.f32 %v1068_v20  ;;  %1086 = vadd.xlane.f32.xlu1 %v1085_v52  ;;  %v901_v34 = vmul.f32 %v2284_v19, %v2783_v40  ;;  %v2941_v45 = vpop.eup %2285 }
 0x2a2   : > { %v1091_v43 = vsel %vm817_vm2, %v2941_v45, 0.0 }
 0x2a3   : > { %v907_v35 = vpack.c.bf16 %v901_v34, %v900_v22  ;;  %v886_v18 = vpop.xlane.xlu2 %885  ;;  %v2952_v40 = vpop.xlane.xlu0 %1265 }
 0x2a4   : > { %v880_v30 = vpop.xlane.xlu1 %879 }
 0x2a5   : > { %2289 = vrcp.f32 %v880_v30 }
 0x2a6   : > { %2291 = vrcp.f32 %v883_v11  ;;  %v1271_v11 = vsub.f32 %v2795_v49, %v2911_v32 }
 0x2a7   : > { %v2943_v42 = vpop.eup %2287 }
 0x2a8   : > { %2128 = vmatmul.msk.bf16.gmra.mxu0 %vm817_vm2, %v907_v35  ;;  %v1088_v27 = vsel %vm817_vm2, %v2943_v42, 0.0  ;;  %v1280_v13 = vmul.f32 1.442695, %v1271_v11 }
 0x2a9   : > { %1089 = vadd.xlane.f32.xlu2 %v1088_v27  ;;  %1092 = vadd.xlane.f32.xlu1 %v1091_v43  ;;  %v1273_v27 = vsub.f32 %v2814_v61, %v2921_v46 }
 0x2ab   : > { %v2290_v47 = vpop.eup %2289  ;;  %v2954_v53 = vpop.xlane.xlu2 %1268 }
 0x2ac   : > { %v2950_v39 = vpop.xlane.xlu1 %1259  ;;  %v2292_v50 = vpop.eup %2291  ;;  %v902_v56 = vmul.f32 %v2290_v47, %v2846_v23 }
 0x2ad   : > { %v903_v63 = vmul.f32 %v2292_v50, %v2810_v59  ;;  %v2959_v3 = vpop.xlane.xlu0 %1050  ;;  %v1284_v50 = vmul.f32 1.442695, %v1273_v27 }
 0x2af   : > { %v908_v2 = vpack.c.bf16 %v903_v63, %v902_v56 }
 0x2b3   : > { %v2962_v10 = vpop.xlane.xlu2 %1464 }
 0x2b4   : > { %v889_v1 = vpop.xlane.xlu1 %888 }
 0x2b5   : > { %2293 = vrcp.f32 %v889_v1  ;;  %v1462_v12 = vpop.xlane.xlu0 %1461  ;;  %v1277_v1 = vsub.f32 %v2859_v36, %v2954_v53 }
 0x2b6   : > { %2295 = vrcp.f32 %v886_v18  ;;  %v1484_v60 = vsub.f32 %v2830_v9, %v1462_v12 }
 0x2b7   : > { %2297 = vpow2.f32 %v1072_v6  ;;  %v1292_v46 = vmul.f32 1.442695, %v1277_v1  ;;  %v1059_v6 = vsub.f32 %v2820_v0, %v2959_v3  ;;  %v1485_v3 = vsub.f32 %v2840_v15, %v2962_v10 }
 0x2b8   : > { %2129 = vmatmul.msk.bf16.gmra.mxu0 %vm817_vm2, %v908_v2  ;;  %2299 = vpow2.f32 %v1280_v13  ;;  %v1492_v52 = vmul.f32 1.442695, %v1484_v60 }
 0x2b9   : > { %v1074_v53 = vmul.f32 1.442695, %v1059_v6 }
 0x2ba   : > { %2301 = vpow2.f32 %v1492_v52 }
 0x2bb   : > { %v2294_v23 = vpop.eup %2293  ;;  %v1474_v32 = vpop.xlane.xlu2 %1473 }
 0x2bc   : > { %v2296_v58 = vpop.eup %2295  ;;  %v905_v29 = vmul.f32 %v2294_v23, %v2869_v44  ;;  %v1272_v44 = vsub.f32 %v2802_v55, %v2923_v51  ;;  %v2995_v51 = vpop.xlane.xlu1 %1467  ;;  %v1488_v43 = vsub.f32 %v2875_v48, %v1474_v32 }
 0x2bd   : > { %v2968_v59 = vpop.eup %2297  ;;  %v904_v49 = vmul.f32 %v2296_v58, %v2844_v21  ;;  %v1471_v22 = vpop.xlane.xlu0 %1470 }
 0x2be   : > { %v1094_v7 = vsel %vm817_vm2, %v2968_v59, 0.0  ;;  %v1282_v19 = vmul.f32 1.442695, %v1272_v44  ;;  %v1500_v56 = vmul.f32 1.442695, %v1488_v43 }
 0x2bf   : > { %v909_v20 = vpack.c.bf16 %v905_v29, %v904_v49 }
 0x2c0   : > { %2303 = vpow2.f32 %v1282_v19 }
 0x2c1   : > { %1554 = vrot.lane.b32.xlu2 %v2689_v25, %s2415_s16 }
 0x2c2   : > { %1340 = vrot.lane.b32.xlu1 %v2689_v25, %s2414_s15  ;;  %v2980_v25 = vpop.eup %2299 }
 0x2c3   : > { %v1297_v21 = vsel %vm817_vm2, %v2980_v25, 0.0  ;;  %v2990_v30 = vpop.eup %2301 }
 0x2c4   : > { %v1508_v55 = vsel %vm817_vm2, %v2990_v30, 0.0  ;;  %v1477_v62 = vpop.xlane.xlu1 %1476 }
 0x2c5   : > { %v1489_v61 = vsub.f32 %v2883_v54, %v1477_v62  ;;  %v1274_v54 = vsub.f32 %v2825_v5, %v2950_v39  ;;  %v1480_v12 = vpop.xlane.xlu0 %1479  ;;  %v1494_v39 = vmul.f32 1.442695, %v1485_v3 }
 0x2c6   : > { %1095 = vadd.xlane.f32.xlu0 %v1094_v7  ;;  %v2997_v18 = vpop.eup %2303  ;;  %v1490_v60 = vsub.f32 %v2887_v57, %v1480_v12  ;;  %v1275_v12 = vsub.f32 %v2834_v17, %v2938_v28 }
 0x2c7   : > { %v1502_v11 = vmul.f32 1.442695, %v1489_v61  ;;  %v1286_v0 = vmul.f32 1.442695, %v1274_v54 }
 0x2c8   : > { %2130 = vmatmul.msk.bf16.gmra.mxu0 %vm817_vm2, %v909_v20  ;;  %v1504_v7 = vmul.f32 1.442695, %v1490_v60  ;;  %v1276_v20 = vsub.f32 %v2848_v26, %v2952_v40 }
 0x2c9   : > { %1342 = vrot.lane.b32.xlu2 %v2669_v16, %s2414_s15  ;;  %v1487_v16 = vsub.f32 %v2865_v41, %v1471_v22  ;;  %v1300_v41 = vsel %vm817_vm2, %v2997_v18, 0.0 }
 0x2ca   : > { %v1290_v19 = vmul.f32 1.442695, %v1276_v20 }
 0x2cb   : > { %v1498_v35 = vmul.f32 1.442695, %v1487_v16 }
 0x2cd   : > { %v2984_v9 = vpop.xlane.xlu2 %1482  ;;  %2305 = vpow2.f32 %v1498_v35 }
 0x2ce   : > { %1298 = vadd.xlane.f32.xlu0 %v1297_v21  ;;  %2307 = vpow2.f32 %v1284_v50 }
 0x2cf   : > { %2309 = vpow2.f32 %v1500_v56 }
 0x2d0   : > { %2311 = vpow2.f32 %v1292_v46 }
 0x2d1   : > { %1552 = vrot.lane.b32.xlu2 %v2682_v24, %s2415_s16  ;;  %2313 = vpow2.f32 %v1502_v11 }
 0x2d2   : > { %2315 = vpow2.f32 %v1074_v53 }
 0x2d3   : > { %v3004_v63 = vpop.eup %2305  ;;  %2317 = vpow2.f32 %v1286_v0 }
 0x2d4   : > { %v1517_v48 = vsel %vm817_vm2, %v3004_v63, 0.0  ;;  %v3011_v2 = vpop.eup %2307  ;;  %2319 = vpow2.f32 %v1494_v39 }
 0x2d5   : > { %v1078_v34 = vpop.xlane.xlu2 %1077  ;;  %v3015_v23 = vpop.eup %2309  ;;  %v1303_v36 = vsel %vm817_vm2, %v3011_v2, 0.0 }
 0x2d6   : > { %1509 = vadd.xlane.f32.xlu0 %v1508_v55  ;;  %v1520_v13 = vsel %vm817_vm2, %v3015_v23, 0.0  ;;  %v3023_v58 = vpop.eup %2311  ;;  %2321 = vrcp.f32 %v1078_v34 }
 0x2d7   : > { %v3027_v29 = vpop.eup %2313  ;;  %v1315_v5 = vsel %vm817_vm2, %v3023_v58, 0.0  ;;  %2323 = vpow2.f32 %v1504_v7 }
 0x2d8   : > { %v1523_v49 = vsel %vm817_vm2, %v3027_v29, 0.0  ;;  %v3034_v32 = vpop.eup %2315 }
 0x2d9   : > { %v1097_v15 = vsel %vm817_vm2, %v3034_v32, 0.0  ;;  %v3038_v10 = vpop.eup %2317 }
 0x2da   : > { %v1306_v52 = vsel %vm817_vm2, %v3038_v10, 0.0  ;;  %v3044_v44 = vpop.eup %2319 }
 0x2db   : > { %v1511_v16 = vsel %vm817_vm2, %v3044_v44, 0.0 }
 0x2dc   : > { %v2322_v21 = vpop.eup %2321 }
 0x2dd   : > { %v1345_v47 = vpop.permute.xlu2 %1344  ;;  %v3046_v22 = vpop.eup %2323  ;;  %v1108_v26 = vmul.f32 %v2322_v21, %v2898_v8 }
 0x2de   : > { %1301 = vadd.xlane.f32.xlu0 %v1300_v41  ;;  %1366 = vmatpush.bf16.msrb.mxu0 %v1345_v47  ;;  %v1526_v35 = vsel %vm817_vm2, %v3046_v22, 0.0 }
 0x2e6   : > { %1518 = vadd.xlane.f32.xlu0 %v1517_v48 }
 0x2ec   : > { %1304 = vadd.xlane.f32.xlu1 %v1303_v36 }
 0x2ee   : > { %1521 = vadd.xlane.f32.xlu0 %v1520_v13 }
 0x2f3   : > { %v3050_v55 = vpop.xlane.xlu1 %1295 }
 0x2f4   : > { %1316 = vadd.xlane.f32.xlu1 %v1315_v5 }
 0x2f6   : > { %1524 = vadd.xlane.f32.xlu0 %v1523_v49 }
 0x2fa   : > { %1098 = vadd.xlane.f32.xlu2 %v1097_v15 }
 0x2fb   : > { %v1081_v57 = vpop.xlane.xlu0 %1080  ;;  %v1084_v47 = vpop.xlane.xlu1 %1083 }
 0x2fc   : > { %2325 = vrcp.f32 %v1081_v57 }
 0x2fd   : > { %2327 = vpow2.f32 %v1290_v19 }
 0x2fe   : > { %1307 = vadd.xlane.f32.xlu0 %v1306_v52  ;;  %2329 = vrcp.f32 %v1084_v47 }
 0x302   : > { %v2326_v34 = vpop.eup %2325  ;;  %1512 = vadd.xlane.f32.xlu2 %v1511_v16 }
 0x303   : > { %v1109_v40 = vmul.f32 %v2326_v34, %v2915_v37  ;;  %v3057_v43 = vpop.eup %2327 }
 0x304   : > { %v1312_v41 = vsel %vm817_vm2, %v3057_v43, 0.0  ;;  %v2330_v37 = vpop.eup %2329 }
 0x305   : > { %v1116_v27 = vpack.c.bf16 %v1109_v40, %v1108_v26  ;;  %v1110_v1 = vmul.f32 %v2330_v37, %v2913_v14  ;;  %v1486_v14 = vsub.f32 %v2855_v33, %v2995_v51 }
 0x306   : > { %1527 = vadd.xlane.f32.xlu0 %v1526_v35 }
 0x307   : > { %2135 = vmatmul.msk.bf16.vlgmr.msrb.gmra.mxu2 %vm817_vm2, %v1116_v27  ;;  %v1496_v3 = vmul.f32 1.442695, %v1486_v14 }
 0x30e   : > { %v1557_v50 = vpop.permute.xlu0 %1556  ;;  %1313 = vadd.xlane.f32.xlu0 %v1312_v41 }
 0x30f   : > { %1581 = vmatpush.bf16.msra.mxu2 %v1557_v50 }
 0x314   : > { %v1087_v8 = vpop.xlane.xlu1 %1086 }
 0x315   : > { %2331 = vrcp.f32 %v1087_v8 }
 0x31a   : > { %1338 = vrot.lane.b32.xlu2 %v2682_v24, %s2414_s15 }
 0x31b   : > { %v2332_v56 = vpop.eup %2331 }
 0x31c   : > { %v1090_v62 = vpop.xlane.xlu2 %1089  ;;  %v1111_v61 = vmul.f32 %v2332_v56, %v2933_v38  ;;  %v1093_v48 = vpop.xlane.xlu1 %1092 }
 0x31d   : > { %2333 = vrcp.f32 %v1093_v48 }
 0x31e   : > { %v1117_v46 = vpack.c.bf16 %v1111_v61, %v1110_v1  ;;  %2335 = vrcp.f32 %v1090_v62 }
 0x31f   : > { %2337 = vpow2.f32 %v1496_v3 }
 0x320   : > { %2136 = vmatmul.msk.bf16.gmra.mxu2 %vm817_vm2, %v1117_v46 }
 0x323   : > { %v2334_v11 = vpop.eup %2333 }
 0x324   : > { %v1555_v6 = vpop.permute.xlu2 %1554  ;;  %v2336_v36 = vpop.eup %2335  ;;  %v1113_v24 = vmul.f32 %v2334_v11, %v2941_v45  ;;  %v1491_v45 = vsub.f32 %v2894_v4, %v2984_v9 }
 0x325   : > { %1582 = vmatpush.bf16.msra.mxu2 %v1555_v6  ;;  %v1112_v53 = vmul.f32 %v2336_v36, %v2943_v42  ;;  %v1288_v42 = vmul.f32 1.442695, %v1275_v12  ;;  %v3073_v60 = vpop.eup %2337  ;;  %v3101_v6 = vpop.f32.mrf.mxu0 }
 0x326   : > { %v1514_v5 = vsel %vm817_vm2, %v3073_v60, 0.0  ;;  %v1506_v33 = vmul.f32 1.442695, %v1491_v45 }
 0x327   : > { %v1118_v13 = vpack.c.bf16 %v1113_v24, %v1112_v53  ;;  %2339 = vpow2.f32 %v1288_v42 }
 0x328   : > { %2341 = vpow2.f32 %v1506_v33 }
 0x32c   : > { %v1343_v54 = vpop.permute.xlu2 %1342 }
 0x32d   : > { %1367 = vmatpush.bf16.msrb.mxu0 %v1343_v54  ;;  %v3079_v51 = vpop.eup %2339 }
 0x32e   : > { %v1309_v39 = vsel %vm817_vm2, %v3079_v51, 0.0  ;;  %v3083_v17 = vpop.eup %2341 }
 0x32f   : > { %v1529_v28 = vsel %vm817_vm2, %v3083_v17, 0.0 }
 0x330   : > { %2137 = vmatmul.msk.bf16.gmra.mxu2 %vm817_vm2, %v1118_v13 }
 0x334   : > { %v1341_v38 = vpop.permute.xlu1 %1340  ;;  %v1553_v0 = vpop.permute.xlu2 %1552 }
 0x335   : > { %1368 = vmatpush.bf16.msrb.mxu0 %v1341_v38  ;;  %1583 = vmatpush.bf16.msra.mxu2 %v1553_v0 }
 0x339   : > { %v1096_v49 = vpop.xlane.xlu0 %1095 }
 0x33a   : > { %2343 = vrcp.f32 %v1096_v49 }
 0x340   : > { %v2344_v7 = vpop.eup %2343 }
 0x341   : > { %v1299_v4 = vpop.xlane.xlu0 %1298  ;;  %v1114_v20 = vmul.f32 %v2344_v7, %v2968_v59 }
 0x343   : > { %1515 = vadd.xlane.f32.xlu2 %v1514_v5 }
 0x349   : > { %v1510_v21 = vpop.xlane.xlu0 %1509 }
 0x34b   : > { %1310 = vadd.xlane.f32.xlu2 %v1309_v39 }
 0x351   : > { %v1302_v59 = vpop.xlane.xlu0 %1301 }
 0x353   : > { %1530 = vadd.xlane.f32.xlu2 %v1529_v28 }
 0x35f   : > { %v1305_v27 = vpop.xlane.xlu1 %1304 }
 0x36d   : > { %v1099_v9 = vpop.xlane.xlu2 %1098 }
 0x36e   : > { %2345 = vrcp.f32 %v1099_v9 }
 0x36f   : > { %2347 = vrcp.f32 %v1299_v4 }
 0x370   : > { %2349 = vrcp.f32 %v3050_v55 }
 0x374   : > { %v2346_v15 = vpop.eup %2345 }
 0x375   : > { %v1513_v57 = vpop.xlane.xlu2 %1512  ;;  %v1115_v52 = vmul.f32 %v2346_v15, %v3034_v32  ;;  %v2348_v16 = vpop.eup %2347 }
 0x376   : > { %v2350_v34 = vpop.eup %2349  ;;  %2351 = vrcp.f32 %v1513_v57  ;;  %v1327_v26 = vmul.f32 %v2348_v16, %v2980_v25 }
 0x377   : > { %v1119_v19 = vpack.c.bf16 %v1115_v52, %v1114_v20  ;;  %2353 = vrcp.f32 %v1510_v21  ;;  %v1326_v40 = vmul.f32 %v2350_v34, %v2907_v31 }
 0x378   : > { %2355 = vrcp.f32 %v1305_v27 }
 0x379   : > { %2138 = vmatmul.msk.bf16.gmra.mxu2 %vm817_vm2, %v1119_v19  ;;  %v1334_v55 = vpack.c.bf16 %v1327_v26, %v1326_v40  ;;  %2357 = vrcp.f32 %v1302_v59 }
 0x37c   : > { %v2352_v47 = vpop.eup %2351 }
 0x37d   : > { %v1339_v35 = vpop.permute.xlu2 %1338  ;;  %v2354_v32 = vpop.eup %2353  ;;  %v1541_v41 = vmul.f32 %v2352_v47, %v3044_v44 }
 0x37e   : > { %1369 = vmatpush.bf16.msrb.mxu0 %v1339_v35  ;;  %v1540_v50 = vmul.f32 %v2354_v32, %v2990_v30  ;;  %v2356_v25 = vpop.eup %2355  ;;  %v1519_v44 = vpop.xlane.xlu0 %1518 }
 0x37f   : > { %v2358_v31 = vpop.eup %2357  ;;  %v1329_v56 = vmul.f32 %v2356_v25, %v3011_v2  ;;  %2359 = vrcp.f32 %v1519_v44  ;;  %v3103_v2 = vpop.f32.mrf.mxu0 }
 0x380   : > { %v1548_v8 = vpack.c.bf16 %v1541_v41, %v1540_v50  ;;  %v1328_v62 = vmul.f32 %v2358_v31, %v2997_v18 }
 0x381   : > { %2143 = vmatmul.msk.bf16.vlgmr.msrb.gmra.mxu0 %vm817_vm2, %v1334_v55 }
 0x382   : > { %v1335_v1 = vpack.c.bf16 %v1329_v56, %v1328_v62 }
 0x385   : > { %v2360_v18 = vpop.eup %2359 }
 0x386   : > { %v1522_v30 = vpop.xlane.xlu0 %1521  ;;  %v1543_v14 = vmul.f32 %v2360_v18, %v3004_v63 }
 0x387   : > { %v3108_v3 = vpop.f32.mrf.mxu0 }
 0x389   : > { %2151 = vmatmul.msk.bf16.vlgmr.msra.gmra.mxu2 %vm817_vm2, %v1548_v8 }
 0x38a   : > { %v1157_v37 = vpop.f32.mrf.mxu2 }
 0x38e   : > { %v1525_v46 = vpop.xlane.xlu0 %1524 }
 0x38f   : > { %v3114_v49 = vpop.f32.mrf.mxu0 }
 0x391   : > { %2144 = vmatmul.msk.bf16.gmra.mxu0 %vm817_vm2, %v1335_v1 }
 0x392   : > { %v1159_v61 = vpop.f32.mrf.mxu2 }
 0x393   : > { %v2185_v48 = vpack.i.bf16 %v1159_v61, %v1157_v37 }
 0x395   : > { %2186 = vrot.lane.b32.xlu2 %v2185_v48, %s2416_s21 }
 0x396   : > { %v1308_v11 = vpop.xlane.xlu0 %1307 }
 0x397   : > { %v3120_v52 = vpop.f32.mrf.mxu0 }
 0x39e   : > { %v1528_v24 = vpop.xlane.xlu0 %1527 }
 0x39f   : > { %v3125_v40 = vpop.f32.mrf.mxu0 }
 0x3a3   : > { %v1162_v20 = vpop.f32.mrf.mxu2 }
 0x3a6   : > { %v1314_v5 = vpop.xlane.xlu0 %1313 }
 0x3ab   : > { %v1164_v34 = vpop.f32.mrf.mxu2 }
 0x3ac   : > { %v2200_v50 = vpack.i.bf16 %v1164_v34, %v1162_v20 }
 0x3b6   : > { %v1516_v36 = vpop.xlane.xlu2 %1515 }
 0x3b7   : > { %2361 = vrcp.f32 %v1516_v36 }
 0x3b8   : > { %2363 = vrcp.f32 %v1308_v11 }
 0x3bd   : > { %v2362_v53 = vpop.eup %2361 }
 0x3be   : > { %v1311_v54 = vpop.xlane.xlu2 %1310  ;;  %v1542_v13 = vmul.f32 %v2362_v53, %v3073_v60  ;;  %v2364_v0 = vpop.eup %2363 }
 0x3bf   : > { %2365 = vrcp.f32 %v1311_v54  ;;  %v1330_v42 = vmul.f32 %v2364_v0, %v3038_v10  ;;  %v1317_v60 = vpop.xlane.xlu1 %1316 }
 0x3c0   : > { %v1549_v38 = vpack.c.bf16 %v1543_v14, %v1542_v13  ;;  %2367 = vrcp.f32 %v1525_v46  ;;  %v1733_v14 = vld [vmem:[%s3337_s10 + $0x10] sm:$0xff] }
 0x3c1   : > { %2369 = vrcp.f32 %v1522_v30 }
 0x3c2   : > { %2152 = vmatmul.msk.bf16.gmra.mxu2 %vm817_vm2, %v1549_v38  ;;  %2371 = vrcp.f32 %v1314_v5  ;;  %v1734_v38 = vld [vmem:[%s3337_s10 + $0x18] sm:$0xff] }
 0x3c3   : > { %2373 = vrcp.f32 %v1317_v60  ;;  %v1736_v0 = vpack.c.bf16 %v1734_v38, %v1733_v14 }
 0x3c5   : > { %v2366_v12 = vpop.eup %2365  ;;  %1759 = vmatpush.bf16.msra.mxu3 %v1736_v0 }
 0x3c6   : > { %v1331_v45 = vmul.f32 %v2366_v12, %v3079_v51  ;;  %v2368_v39 = vpop.eup %2367  ;;  %v1531_v9 = vpop.xlane.xlu2 %1530  ;;  %v1731_v12 = vld [vmem:[%s3337_s10] sm:$0xff] }
 0x3c7   : > { %v2370_v63 = vpop.eup %2369  ;;  %v1545_v28 = vmul.f32 %v2368_v39, %v3027_v29  ;;  %2375 = vrcp.f32 %v1531_v9 }
 0x3c8   : > { %v1336_v33 = vpack.c.bf16 %v1331_v45, %v1330_v42  ;;  %v1544_v4 = vmul.f32 %v2370_v63, %v3015_v23  ;;  %v2372_v10 = vpop.eup %2371  ;;  %2377 = vrcp.f32 %v1528_v24  ;;  %v1732_v42 = vld [vmem:[%s3337_s10 + $0x8] sm:$0xff] }
 0x3c9   : > { %v2374_v51 = vpop.eup %2373  ;;  %v1332_v15 = vmul.f32 %v2372_v10, %v3057_v43  ;;  %v1167_v43 = vpop.f32.mrf.mxu2  ;;  %v1735_v45 = vpack.c.bf16 %v1732_v42, %v1731_v12 }
 0x3ca   : > { %2145 = vmatmul.msk.bf16.gmra.mxu0 %vm817_vm2, %v1336_v33  ;;  %v1550_v7 = vpack.c.bf16 %v1545_v28, %v1544_v4  ;;  %v1333_v57 = vmul.f32 %v2374_v51, %v3023_v58  ;;  %v3128_v58 = vpop.f32.mrf.mxu0 }
 0x3cb   : > { %1760 = vmatpush.bf16.msra.mxu3 %v1735_v45 }
 0x3cc   : > { %v1337_v29 = vpack.c.bf16 %v1333_v57, %v1332_v15 }
 0x3cd   : > { %v2376_v21 = vpop.eup %2375 }
 0x3ce   : > { %v2378_v23 = vpop.eup %2377  ;;  %v1547_v19 = vmul.f32 %v2376_v21, %v3083_v17 }
 0x3cf   : > { %v1546_v16 = vmul.f32 %v2378_v23, %v3046_v22 }
 0x3d1   : > { %v1551_v26 = vpack.c.bf16 %v1547_v19, %v1546_v16  ;;  %v1169_v35 = vpop.f32.mrf.mxu2 }
 0x3d2   : > { %2153 = vmatmul.msk.bf16.gmra.mxu2 %vm817_vm2, %v1550_v7  ;;  %v3130_v55 = vpop.f32.mrf.mxu0  ;;  %v2215_v56 = vpack.i.bf16 %v1169_v35, %v1167_v43 }
 0x3da   : > { %2146 = vmatmul.msk.bf16.gmra.mxu0 %vm817_vm2, %v1337_v29 }
 0x3e2   : > { %2154 = vmatmul.msk.bf16.gmra.mxu2 %vm817_vm2, %v1551_v26 }
 0x3ef   : > { %v2187_v39 = vpop.permute.xlu2 %2186 }
 0x3f0   : > { %v2189_v63 = vunpack.i.h.bf16 %v2187_v39  ;;  %v2188_v28 = vunpack.i.l.bf16 %v2187_v39 }
 0x3f2   : > { %v1702_v10 = vsel %vm763_vm1, %v3103_v2, %v2189_v63  ;;  %v1701_v51 = vsel %vm763_vm1, %v3101_v6, %v2188_v28  ;;  %v2397_v28 = vld [vmem:[%s2533_s20] sm:$0xff] }
 0x3fc   : > { %v1172_v27 = vpop.f32.mrf.mxu2 }
 0x3fe   : > { %v1371_v47 = vpop.f32.mrf.mxu0 }
 0x404   : > { %v1174_v59 = vpop.f32.mrf.mxu2 }
 0x405   : > { %v2230_v62 = vpack.i.bf16 %v1174_v59, %v1172_v27 }
 0x406   : > { %v1373_v32 = vpop.f32.mrf.mxu0 }
 0x407   : > { %v2190_v41 = vpack.i.bf16 %v1373_v32, %v1371_v47 }
 0x409   : > { %2191 = vrot.lane.b32.xlu0 %v2190_v41, %s2417_s22 }
 0x40c   : > { %v1585_v22 = vpop.f32.mrf.mxu2 }
 0x40e   : > { %v1376_v17 = vpop.f32.mrf.mxu0 }
 0x411   : > { %2201 = vrot.lane.b32.xlu0 %v2200_v50, %s2416_s21 }
 0x414   : > { %v1587_v8 = vpop.f32.mrf.mxu2 }
 0x415   : > { %v2195_v25 = vpack.i.bf16 %v1587_v8, %v1585_v22 }
 0x416   : > { %v1378_v31 = vpop.f32.mrf.mxu0 }
 0x417   : > { %v2205_v37 = vpack.i.bf16 %v1378_v31, %v1376_v17  ;;  %2196 = vrot.lane.b32.xlu1 %v2195_v25, %s2418_s30 }
 0x419   : > { %2206 = vrot.lane.b32.xlu2 %v2205_v37, %s2417_s22 }
 0x421   : > { %2216 = vrot.lane.b32.xlu2 %v2215_v56, %s2416_s21 }
 0x429   : > { %2231 = vrot.lane.b32.xlu2 %v2230_v62, %s2416_s21 }
 0x445   : > { %v1590_v1 = vpop.f32.mrf.mxu2 }
 0x447   : > { %v1381_v61 = vpop.f32.mrf.mxu0 }
 0x44d   : > { %v1592_v48 = vpop.f32.mrf.mxu2 }
 0x44e   : > { %v2210_v44 = vpack.i.bf16 %v1592_v48, %v1590_v1 }
 0x44f   : > { %v1383_v30 = vpop.f32.mrf.mxu0 }
 0x450   : > { %v2220_v46 = vpack.i.bf16 %v1383_v30, %v1381_v61  ;;  %2211 = vrot.lane.b32.xlu0 %v2210_v44, %s2418_s30 }
 0x452   : > { %2221 = vrot.lane.b32.xlu1 %v2220_v46, %s2417_s22 }
 0x455   : > { %v1595_v11 = vpop.f32.mrf.mxu2 }
 0x457   : > { %v1386_v36 = vpop.f32.mrf.mxu0 }
 0x45d   : > { %v1597_v18 = vpop.f32.mrf.mxu2 }
 0x45e   : > { %v2225_v53 = vpack.i.bf16 %v1597_v18, %v1595_v11 }
 0x45f   : > { %v1388_v24 = vpop.f32.mrf.mxu0 }
 0x460   : > { %v2235_v54 = vpack.i.bf16 %v1388_v24, %v1386_v36  ;;  %2226 = vrot.lane.b32.xlu0 %v2225_v53, %s2418_s30 }
 0x462   : > { %2236 = vrot.lane.b32.xlu1 %v2235_v54, %s2417_s22 }
 0x465   : > { %v1600_v13 = vpop.f32.mrf.mxu2 }
 0x46d   : > { %v1602_v5 = vpop.f32.mrf.mxu2 }
 0x46e   : > { %v2240_v33 = vpack.i.bf16 %v1602_v5, %v1600_v13 }
 0x470   : > { %2241 = vrot.lane.b32.xlu0 %v2240_v33, %s2418_s30 }
 0x473   : > { %v2207_v2 = vpop.permute.xlu2 %2206 }
 0x474   : > { %v2209_v35 = vunpack.i.h.bf16 %v2207_v2  ;;  %v2208_v27 = vunpack.i.l.bf16 %v2207_v2 }
 0x47b   : > { %v2192_v60 = vpop.permute.xlu0 %2191 }
 0x47c   : > { %v2194_v4 = vunpack.i.h.bf16 %v2192_v60  ;;  %v2193_v9 = vunpack.i.l.bf16 %v2192_v60 }
 0x47e   : > { %v1710_v20 = vsel %vm1709_vm3, %v1701_v51, %v2193_v9  ;;  %v1711_v29 = vsel %vm1709_vm3, %v1702_v10, %v2194_v4  ;;  %v2398_v51 = vld [vmem:[%s2533_s20 + $0x8] sm:$0xff] }
 0x483   : > { %v2202_v16 = vpop.permute.xlu0 %2201 }
 0x484   : > { %v2204_v34 = vunpack.i.h.bf16 %v2202_v16  ;;  %v2203_v26 = vunpack.i.l.bf16 %v2202_v16 }
 0x486   : > { %v1704_v6 = vsel %vm763_vm1, %v3114_v49, %v2204_v34  ;;  %v1703_v43 = vsel %vm763_vm1, %v3108_v3, %v2203_v26  ;;  %v2217_v49 = vpop.permute.xlu2 %2216  ;;  %v2400_v26 = vld [vmem:[%s2533_s20 + $0x18] sm:$0xff] }
 0x487   : > { %v1712_v41 = vsel %vm1709_vm3, %v1703_v43, %v2208_v27  ;;  %v1713_v22 = vsel %vm1709_vm3, %v1704_v6, %v2209_v35  ;;  %v2219_v31 = vunpack.i.h.bf16 %v2217_v49  ;;  %v2218_v3 = vunpack.i.l.bf16 %v2217_v49  ;;  %v2401_v27 = vld [vmem:[%s2533_s20 + $0x20] sm:$0xff] }
 0x489   : > { %v2197_v7 = vpop.permute.xlu1 %2196  ;;  %v1706_v1 = vsel %vm763_vm1, %v3125_v40, %v2219_v31  ;;  %v1705_v61 = vsel %vm763_vm1, %v3120_v52, %v2218_v3 }
 0x48a   : > { %v2199_v15 = vunpack.i.h.bf16 %v2197_v7  ;;  %v2198_v57 = vunpack.i.l.bf16 %v2197_v7 }
 0x48c   : > { %v1719_v21 = vsel %vm1718_vm4, %v1710_v20, %v2198_v57  ;;  %v1720_v23 = vsel %vm1718_vm4, %v1711_v29, %v2199_v15 }
 0x48d   : > { %v1727_v19 = vpack.c.bf16 %v1720_v23, %v1719_v21  ;;  %v2399_v21 = vld [vmem:[%s2533_s20 + $0x10] sm:$0xff] }
 0x48e   : > { %v2232_v53 = vpop.permute.xlu2 %2231 }
 0x48f   : > { %2155 = vmatmul.msk.bf16.vlgmr.msra.gmra.mxu3 %vm599_vm0, %v1727_v19  ;;  %v2234_v54 = vunpack.i.h.bf16 %v2232_v53  ;;  %v2233_v40 = vunpack.i.l.bf16 %v2232_v53 }
 0x491   : > { %v1708_v38 = vsel %vm763_vm1, %v3130_v55, %v2234_v54  ;;  %v1707_v0 = vsel %vm763_vm1, %v3128_v58, %v2233_v40  ;;  %v2248_v55 = vld [vmem:[%s3338_s11] ss:$0 sm:$0xff] }
 0x4c2   : > { %v2212_v47 = vpop.permute.xlu0 %2211 }
 0x4c3   : > { %v2214_v59 = vunpack.i.h.bf16 %v2212_v47  ;;  %v2213_v32 = vunpack.i.l.bf16 %v2212_v47 }
 0x4c4   : > { %v2222_v25 = vpop.permute.xlu1 %2221 }
 0x4c5   : > { %v1721_v17 = vsel %vm1718_vm4, %v1712_v41, %v2213_v32  ;;  %v1722_v50 = vsel %vm1718_vm4, %v1713_v22, %v2214_v59  ;;  %v2224_v37 = vunpack.i.h.bf16 %v2222_v25  ;;  %v2223_v56 = vunpack.i.l.bf16 %v2222_v25  ;;  %v2402_v22 = vld [vmem:[%s2533_s20 + $0x28] sm:$0xff]  ;;  %v2403_v25 = vld [vmem:[%s2533_s20 + $0x30] sm:$0xff] }
 0x4c6   : > { %v1728_v8 = vpack.c.bf16 %v1722_v50, %v1721_v17 }
 0x4c7   : > { %v1714_v30 = vsel %vm1709_vm3, %v1705_v61, %v2223_v56  ;;  %v1715_v46 = vsel %vm1709_vm3, %v1706_v1, %v2224_v37  ;;  %v2419_v37 = vmov 32.0   ;;  %v2404_v61 = vld [vmem:[%s2533_s20 + $0x38] sm:$0xff] }
 0x4c8   : > { %2156 = vmatmul.msk.bf16.gmra.mxu3 %vm599_vm0, %v1728_v8  ;;  %2379 = vrcp.f32 %v2419_v37 }
 0x4ce   : > { %v2380_v1 = vpop.eup %2379 }
 0x4cf   : > { %vm1819_vm5 = vweird.f32 %v2380_v1 }
 0x4d2   : > { %v2227_v62 = vpop.permute.xlu0 %2226 }
 0x4d3   : > { %v2229_v48 = vunpack.i.h.bf16 %v2227_v62  ;;  %v2228_v44 = vunpack.i.l.bf16 %v2227_v62 }
 0x4d4   : > { %v2237_v24 = vpop.permute.xlu1 %2236 }
 0x4d5   : > { %v1723_v11 = vsel %vm1718_vm4, %v1714_v30, %v2228_v44  ;;  %v1724_v36 = vsel %vm1718_vm4, %v1715_v46, %v2229_v48  ;;  %v2239_v13 = vunpack.i.h.bf16 %v2237_v24  ;;  %v2238_v52 = vunpack.i.l.bf16 %v2237_v24 }
 0x4d6   : > { %v1729_v18 = vpack.c.bf16 %v1724_v36, %v1723_v11  ;;  %v1815_v30 = vmul.f32 32.0, %v2380_v1 }
 0x4d7   : > { %v1716_v45 = vsel %vm1709_vm3, %v1707_v0, %v2238_v52  ;;  %v1717_v5 = vsel %vm1709_vm3, %v1708_v38, %v2239_v13 }
 0x4d8   : > { %2157 = vmatmul.msk.bf16.gmra.mxu3 %vm599_vm0, %v1729_v18  ;;  %v1816_v46 = vsub.f32 1.0, %v1815_v30 }
 0x4da   : > { %v1817_v11 = vmul.f32 %v2380_v1, %v1816_v46 }
 0x4dc   : > { %v1818_v36 = vadd.f32 %v2380_v1, %v1817_v11 }
 0x4de   : > { %v3210_v18 = vsel %vm1819_vm5, %v2380_v1, %v1818_v36 }
 0x4e2   : > { %v2242_v14 = vpop.permute.xlu0 %2241 }
 0x4e3   : > { %v2244_v12 = vunpack.i.h.bf16 %v2242_v14  ;;  %v2243_v42 = vunpack.i.l.bf16 %v2242_v14 }
 0x4e5   : > { %v1725_v33 = vsel %vm1718_vm4, %v1716_v45, %v2243_v42  ;;  %v1726_v39 = vsel %vm1718_vm4, %v1717_v5, %v2244_v12 }
 0x4e6   : > { %v1730_v60 = vpack.c.bf16 %v1726_v39, %v1725_v33 }
 0x4e8   : > { %2158 = vmatmul.msk.bf16.gmra.mxu3 %vm599_vm0, %v1730_v60 }
 0x512   : > { %v1762_v58 = vpop.f32.mrf.mxu3 }
 0x513   : > { %v1763_v63 = vadd.f32 %v2248_v55, %v1762_v58 }
 0x515   : > { %v1782_v4 = vadd.f32 %v2397_v28, %v1763_v63 }
 0x517   : > { %v1790_v9 = vsel %vm599_vm0, %v1782_v4, 0.0 }
 0x518   : > { %1791 = vadd.xlane.f32.xlu2 %v1790_v9 }
 0x51a   : > { %v1764_v7 = vpop.f32.mrf.mxu3 }
 0x51b   : > { %v1765_v10 = vadd.f32 %v2248_v55, %v1764_v7 }
 0x51d   : > { %v1783_v15 = vadd.f32 %v2398_v51, %v1765_v10 }
 0x51f   : > { %v1793_v57 = vsel %vm599_vm0, %v1783_v15, 0.0 }
 0x520   : > { %1794 = vadd.xlane.f32.xlu1 %v1793_v57 }
 0x54b   : > { %v1767_v20 = vpop.f32.mrf.mxu3 }
 0x54c   : > { %v1768_v29 = vadd.f32 %v2248_v55, %v1767_v20 }
 0x54e   : > { %v1784_v23 = vadd.f32 %v2399_v21, %v1768_v29 }
 0x550   : > { %v1796_v19 = vsel %vm599_vm0, %v1784_v23, 0.0 }
 0x551   : > { %1797 = vadd.xlane.f32.xlu0 %v1796_v19 }
 0x553   : > { %v1769_v16 = vpop.f32.mrf.mxu3 }
 0x554   : > { %v1770_v34 = vadd.f32 %v2248_v55, %v1769_v16 }
 0x556   : > { %v1785_v2 = vadd.f32 %v2400_v26, %v1770_v34 }
 0x558   : > { %v1799_v6 = vsel %vm599_vm0, %v1785_v2, 0.0 }
 0x559   : > { %1800 = vadd.xlane.f32.xlu2 %v1799_v6 }
 0x55b   : > { %v1772_v43 = vpop.f32.mrf.mxu3 }
 0x55c   : > { %v1773_v35 = vadd.f32 %v2248_v55, %v1772_v43 }
 0x55e   : > { %v1786_v47 = vadd.f32 %v2401_v27, %v1773_v35 }
 0x560   : > { %v1802_v59 = vsel %vm599_vm0, %v1786_v47, 0.0 }
 0x561   : > { %1803 = vadd.xlane.f32.xlu1 %v1802_v59 }
 0x563   : > { %v1774_v32 = vpop.f32.mrf.mxu3 }
 0x564   : > { %v1775_v41 = vadd.f32 %v2248_v55, %v1774_v32 }
 0x566   : > { %v1787_v17 = vadd.f32 %v2402_v22, %v1775_v41 }
 0x568   : > { %v1805_v50 = vsel %vm599_vm0, %v1787_v17, 0.0 }
 0x569   : > { %1806 = vadd.xlane.f32.xlu0 %v1805_v50 }
 0x56b   : > { %v1777_v8 = vpop.f32.mrf.mxu3 }
 0x56c   : > { %v1778_v49 = vadd.f32 %v2248_v55, %v1777_v8 }
 0x56e   : > { %v1788_v31 = vadd.f32 %v2403_v25, %v1778_v49 }
 0x570   : > { %v1808_v3 = vsel %vm599_vm0, %v1788_v31, 0.0 }
 0x571   : > { %1809 = vadd.xlane.f32.xlu2 %v1808_v3 }
 0x573   : > { %v1779_v56 = vpop.f32.mrf.mxu3 }
 0x574   : > { %v1780_v62 = vadd.f32 %v2248_v55, %v1779_v56 }
 0x576   : > { %v1789_v48 = vadd.f32 %v2404_v61, %v1780_v62  ;;  %v3265_v62 = vld [vmem:[%s3339_s12] ss:$0 sm:$0xff] }
 0x578   : > { %v1811_v44 = vsel %vm599_vm0, %v1789_v48, 0.0 }
 0x579   : > { %1812 = vadd.xlane.f32.xlu1 %v1811_v44 }
 0x58b   : > { %v1792_v53 = vpop.xlane.xlu2 %1791 }
 0x58c   : > { %v1821_v24 = vmul.f32 %v3210_v18, %v1792_v53 }
 0x58e   : > { %v3213_v54 = vsub.f32 %v1782_v4, %v1821_v24 }
 0x590   : > { %v1837_v40 = vmul.f32 %v3213_v54, %v3213_v54 }
 0x592   : > { %v1845_v13 = vsel %vm599_vm0, %v1837_v40, 0.0 }
 0x593   : > { %v1795_v52 = vpop.xlane.xlu1 %1794  ;;  %1846 = vadd.xlane.f32.xlu0 %v1845_v13 }
 0x594   : > { %v1822_v14 = vmul.f32 %v3210_v18, %v1795_v52 }
 0x596   : > { %v3219_v38 = vsub.f32 %v1783_v15, %v1822_v14 }
 0x598   : > { %v1838_v0 = vmul.f32 %v3219_v38, %v3219_v38 }
 0x59a   : > { %v1848_v12 = vsel %vm599_vm0, %v1838_v0, 0.0 }
 0x59b   : > { %1849 = vadd.xlane.f32.xlu2 %v1848_v12 }
 0x5c4   : > { %v1798_v42 = vpop.xlane.xlu0 %1797 }
 0x5c5   : > { %v1823_v45 = vmul.f32 %v3210_v18, %v1798_v42 }
 0x5c7   : > { %v3225_v5 = vsub.f32 %v1784_v23, %v1823_v45 }
 0x5c9   : > { %v1839_v33 = vmul.f32 %v3225_v5, %v3225_v5 }
 0x5cb   : > { %v1851_v39 = vsel %vm599_vm0, %v1839_v33, 0.0 }
 0x5cc   : > { %1852 = vadd.xlane.f32.xlu1 %v1851_v39  ;;  %v1801_v60 = vpop.xlane.xlu2 %1800 }
 0x5cd   : > { %v1824_v55 = vmul.f32 %v3210_v18, %v1801_v60 }
 0x5cf   : > { %v3231_v58 = vsub.f32 %v1785_v2, %v1824_v55 }
 0x5d1   : > { %v1840_v63 = vmul.f32 %v3231_v58, %v3231_v58 }
 0x5d3   : > { %v1854_v28 = vsel %vm599_vm0, %v1840_v63, 0.0 }
 0x5d4   : > { %v1804_v4 = vpop.xlane.xlu1 %1803  ;;  %1855 = vadd.xlane.f32.xlu0 %v1854_v28 }
 0x5d5   : > { %v1825_v9 = vmul.f32 %v3210_v18, %v1804_v4 }
 0x5d7   : > { %v3237_v7 = vsub.f32 %v1786_v47, %v1825_v9 }
 0x5d9   : > { %v1841_v10 = vmul.f32 %v3237_v7, %v3237_v7 }
 0x5db   : > { %v1857_v51 = vsel %vm599_vm0, %v1841_v10, 0.0 }
 0x5dc   : > { %v1807_v15 = vpop.xlane.xlu0 %1806  ;;  %1858 = vadd.xlane.f32.xlu2 %v1857_v51 }
 0x5dd   : > { %v1826_v57 = vmul.f32 %v3210_v18, %v1807_v15 }
 0x5df   : > { %v3243_v20 = vsub.f32 %v1787_v17, %v1826_v57 }
 0x5e1   : > { %v1842_v29 = vmul.f32 %v3243_v20, %v3243_v20 }
 0x5e3   : > { %v1860_v21 = vsel %vm599_vm0, %v1842_v29, 0.0 }
 0x5e4   : > { %1861 = vadd.xlane.f32.xlu1 %v1860_v21  ;;  %v1810_v23 = vpop.xlane.xlu2 %1809 }
 0x5e5   : > { %v1827_v19 = vmul.f32 %v3210_v18, %v1810_v23 }
 0x5e7   : > { %v3249_v16 = vsub.f32 %v1788_v31, %v1827_v19 }
 0x5e9   : > { %v1843_v34 = vmul.f32 %v3249_v16, %v3249_v16 }
 0x5eb   : > { %v1863_v26 = vsel %vm599_vm0, %v1843_v34, 0.0 }
 0x5ec   : > { %v1813_v2 = vpop.xlane.xlu1 %1812  ;;  %1864 = vadd.xlane.f32.xlu0 %v1863_v26 }
 0x5ed   : > { %v1828_v6 = vmul.f32 %v3210_v18, %v1813_v2 }
 0x5ef   : > { %v3255_v43 = vsub.f32 %v1789_v48, %v1828_v6  ;;  %v3270_v48 = vld [vmem:[%s3340_s13] ss:$0 sm:$0xff] }
 0x5f1   : > { %v1844_v35 = vmul.f32 %v3255_v43, %v3255_v43 }
 0x5f3   : > { %v1866_v27 = vsel %vm599_vm0, %v1844_v35, 0.0 }
 0x5f4   : > { %1867 = vadd.xlane.f32.xlu2 %v1866_v27 }
 0x606   : > { %v1847_v47 = vpop.xlane.xlu0 %1846 }
 0x607   : > { %v1869_v59 = vmul.f32 %v1847_v47, %v3210_v18 }
 0x609   : > { %v1877_v32 = vadd.f32 1e-05, %v1869_v59 }
 0x60b   : > { %2381 = vrsqrt.f32 %v1877_v32  ;;  %vm1891_vm7 = vweird.f32 %v1877_v32 }
 0x60e   : > { %v1850_v41 = vpop.xlane.xlu2 %1849 }
 0x60f   : > { %v1870_v22 = vmul.f32 %v1850_v41, %v3210_v18 }
 0x611   : > { %v2382_v17 = vpop.eup %2381  ;;  %v1878_v50 = vadd.f32 1e-05, %v1870_v22 }
 0x612   : > { %v1886_v8 = vmul.f32 %v2382_v17, %v1877_v32  ;;  %vm1892_vm6 = vweird.f32 %v2382_v17 }
 0x613   : > { %2383 = vrsqrt.f32 %v1878_v50  ;;  %vm1893_vm8 = vmor %vm1891_vm7, %vm1892_vm6  ;;  %vm1901_vm10 = vweird.f32 %v1878_v50 }
 0x614   : > { %v1887_v49 = vmul.f32 %v2382_v17, %v1886_v8 }
 0x616   : > { %v1888_v25 = vmul.f32 0.5, %v1887_v49 }
 0x618   : > { %v1889_v31 = vsub.f32 1.5, %v1888_v25 }
 0x619   : > { %v2384_v3 = vpop.eup %2383 }
 0x61a   : > { %v1890_v37 = vmul.f32 %v2382_v17, %v1889_v31  ;;  %v1896_v56 = vmul.f32 %v2384_v3, %v1878_v50  ;;  %vm1902_vm9 = vweird.f32 %v2384_v3 }
 0x61b   : > { %vm1903_vm11 = vmor %vm1901_vm10, %vm1902_vm9 }
 0x61c   : > { %v1894_v1 = vsel %vm1893_vm8, %v2382_v17, %v1890_v37  ;;  %v1897_v61 = vmul.f32 %v2384_v3, %v1896_v56 }
 0x61d   : > { %v1965_v44 = vmul.f32 %v1894_v1, %v3213_v54 }
 0x61e   : > { %v1898_v30 = vmul.f32 0.5, %v1897_v61 }
 0x61f   : > { %v1977_v46 = vmul.f32 %v3265_v62, %v1965_v44 }
 0x620   : > { %v1899_v11 = vsub.f32 1.5, %v1898_v30 }
 0x621   : > { %v1989_v36 = vadd.f32 %v3270_v48, %v1977_v46 }
 0x622   : > { %v1900_v53 = vmul.f32 %v2384_v3, %v1899_v11 }
 0x623   : > { %1997 = vst.msk [vmem:[%s3278_s25] sm:$0xff] %vm599_vm0, %v1989_v36 }
 0x624   : > { %v1904_v24 = vsel %vm1903_vm11, %v2384_v3, %v1900_v53 }
 0x625   : > { %v1966_v54 = vmul.f32 %v1904_v24, %v3219_v38 }
 0x627   : > { %v1978_v40 = vmul.f32 %v3265_v62, %v1966_v54 }
 0x629   : > { %v1990_v13 = vadd.f32 %v3270_v48, %v1978_v40 }
 0x62b   : > { %1998 = vst.msk [vmem:[%s3278_s25 + $0x8] sm:$0xff] %vm599_vm0, %v1990_v13 }
 0x63f   : > { %v1853_v52 = vpop.xlane.xlu1 %1852 }
 0x640   : > { %v1871_v14 = vmul.f32 %v1853_v52, %v3210_v18 }
 0x642   : > { %v1879_v0 = vadd.f32 1e-05, %v1871_v14 }
 0x644   : > { %2385 = vrsqrt.f32 %v1879_v0  ;;  %vm1911_vm13 = vweird.f32 %v1879_v0 }
 0x647   : > { %v1856_v12 = vpop.xlane.xlu0 %1855 }
 0x648   : > { %v1872_v42 = vmul.f32 %v1856_v12, %v3210_v18 }
 0x64a   : > { %v2386_v45 = vpop.eup %2385  ;;  %v1880_v33 = vadd.f32 1e-05, %v1872_v42 }
 0x64b   : > { %v1906_v39 = vmul.f32 %v2386_v45, %v1879_v0  ;;  %vm1912_vm12 = vweird.f32 %v2386_v45 }
 0x64c   : > { %2387 = vrsqrt.f32 %v1880_v33  ;;  %vm1913_vm14 = vmor %vm1911_vm13, %vm1912_vm12  ;;  %vm1921_vm1 = vweird.f32 %v1880_v33 }
 0x64d   : > { %v1907_v60 = vmul.f32 %v2386_v45, %v1906_v39 }
 0x64f   : > { %v1908_v38 = vmul.f32 0.5, %v1907_v60  ;;  %v1859_v55 = vpop.xlane.xlu2 %1858 }
 0x650   : > { %v1873_v63 = vmul.f32 %v1859_v55, %v3210_v18 }
 0x651   : > { %v1909_v28 = vsub.f32 1.5, %v1908_v38 }
 0x652   : > { %v2388_v4 = vpop.eup %2387  ;;  %v1881_v9 = vadd.f32 1e-05, %v1873_v63 }
 0x653   : > { %v1910_v10 = vmul.f32 %v2386_v45, %v1909_v28  ;;  %v1916_v51 = vmul.f32 %v2388_v4, %v1880_v33  ;;  %vm1922_vm15 = vweird.f32 %v2388_v4 }
 0x654   : > { %2389 = vrsqrt.f32 %v1881_v9  ;;  %vm1923_vm2 = vmor %vm1921_vm1, %vm1922_vm15  ;;  %vm1931_vm4 = vweird.f32 %v1881_v9 }
 0x655   : > { %v1914_v15 = vsel %vm1913_vm14, %v2386_v45, %v1910_v10  ;;  %v1917_v57 = vmul.f32 %v2388_v4, %v1916_v51 }
 0x656   : > { %v1967_v29 = vmul.f32 %v1914_v15, %v3225_v5 }
 0x657   : > { %v1918_v21 = vmul.f32 0.5, %v1917_v57  ;;  %v1862_v23 = vpop.xlane.xlu1 %1861 }
 0x658   : > { %v1979_v19 = vmul.f32 %v3265_v62, %v1967_v29  ;;  %v1874_v34 = vmul.f32 %v1862_v23, %v3210_v18 }
 0x659   : > { %v1919_v26 = vsub.f32 1.5, %v1918_v21 }
 0x65a   : > { %v2390_v2 = vpop.eup %2389  ;;  %v1991_v6 = vadd.f32 %v3270_v48, %v1979_v19  ;;  %v1882_v35 = vadd.f32 1e-05, %v1874_v34 }
 0x65b   : > { %v1920_v27 = vmul.f32 %v2388_v4, %v1919_v26  ;;  %v1926_v47 = vmul.f32 %v2390_v2, %v1881_v9  ;;  %vm1932_vm3 = vweird.f32 %v2390_v2 }
 0x65c   : > { %1999 = vst.msk [vmem:[%s3278_s25 + $0x10] sm:$0xff] %vm599_vm0, %v1991_v6  ;;  %2391 = vrsqrt.f32 %v1882_v35  ;;  %vm1933_vm5 = vmor %vm1931_vm4, %vm1932_vm3  ;;  %vm1941_vm7 = vweird.f32 %v1882_v35 }
 0x65d   : > { %v1924_v5 = vsel %vm1923_vm2, %v2388_v4, %v1920_v27  ;;  %v1927_v59 = vmul.f32 %v2390_v2, %v1926_v47 }
 0x65e   : > { %v1968_v32 = vmul.f32 %v1924_v5, %v3231_v58 }
 0x65f   : > { %v1928_v41 = vmul.f32 0.5, %v1927_v59  ;;  %v1865_v22 = vpop.xlane.xlu0 %1864 }
 0x660   : > { %v1980_v17 = vmul.f32 %v3265_v62, %v1968_v32  ;;  %v1875_v50 = vmul.f32 %v1865_v22, %v3210_v18 }
 0x661   : > { %v1929_v8 = vsub.f32 1.5, %v1928_v41 }
 0x662   : > { %v2392_v49 = vpop.eup %2391  ;;  %v1992_v25 = vadd.f32 %v3270_v48, %v1980_v17  ;;  %v1883_v31 = vadd.f32 1e-05, %v1875_v50 }
 0x663   : > { %v1930_v3 = vmul.f32 %v2390_v2, %v1929_v8  ;;  %v1936_v37 = vmul.f32 %v2392_v49, %v1882_v35  ;;  %vm1942_vm6 = vweird.f32 %v2392_v49 }
 0x664   : > { %2000 = vst.msk [vmem:[%s3278_s25 + $0x18] sm:$0xff] %vm599_vm0, %v1992_v25  ;;  %2393 = vrsqrt.f32 %v1883_v31  ;;  %vm1943_vm8 = vmor %vm1941_vm7, %vm1942_vm6  ;;  %vm1951_vm10 = vweird.f32 %v1883_v31 }
 0x665   : > { %v1934_v58 = vsel %vm1933_vm5, %v2390_v2, %v1930_v3  ;;  %v1937_v56 = vmul.f32 %v2392_v49, %v1936_v37 }
 0x666   : > { %v1969_v1 = vmul.f32 %v1934_v58, %v3237_v7 }
 0x667   : > { %v1938_v61 = vmul.f32 0.5, %v1937_v56  ;;  %v1868_v44 = vpop.xlane.xlu2 %1867 }
 0x668   : > { %v1981_v30 = vmul.f32 %v3265_v62, %v1969_v1  ;;  %v1876_v46 = vmul.f32 %v1868_v44, %v3210_v18 }
 0x669   : > { %v1939_v11 = vsub.f32 1.5, %v1938_v61 }
 0x66a   : > { %v2394_v36 = vpop.eup %2393  ;;  %v1993_v53 = vadd.f32 %v3270_v48, %v1981_v30  ;;  %v1884_v24 = vadd.f32 1e-05, %v1876_v46 }
 0x66b   : > { %v1940_v54 = vmul.f32 %v2392_v49, %v1939_v11  ;;  %v1946_v40 = vmul.f32 %v2394_v36, %v1883_v31  ;;  %vm1952_vm9 = vweird.f32 %v2394_v36 }
 0x66c   : > { %2001 = vst.msk [vmem:[%s3278_s25 + $0x20] sm:$0xff] %vm599_vm0, %v1993_v53  ;;  %2395 = vrsqrt.f32 %v1884_v24  ;;  %vm1953_vm11 = vmor %vm1951_vm10, %vm1952_vm9  ;;  %vm1961_vm13 = vweird.f32 %v1884_v24 }
 0x66d   : > { %v1944_v7 = vsel %vm1943_vm8, %v2392_v49, %v1940_v54  ;;  %v1947_v13 = vmul.f32 %v2394_v36, %v1946_v40 }
 0x66e   : > { %v1970_v52 = vmul.f32 %v1944_v7, %v3243_v20 }
 0x66f   : > { %v1948_v14 = vmul.f32 0.5, %v1947_v13 }
 0x670   : > { %v1982_v18 = vmul.f32 %v3265_v62, %v1970_v52 }
 0x671   : > { %v1949_v0 = vsub.f32 1.5, %v1948_v14 }
 0x672   : > { %v2396_v12 = vpop.eup %2395  ;;  %v1994_v42 = vadd.f32 %v3270_v48, %v1982_v18 }
 0x673   : > { %v1950_v45 = vmul.f32 %v2394_v36, %v1949_v0  ;;  %v1956_v33 = vmul.f32 %v2396_v12, %v1884_v24  ;;  %vm1962_vm12 = vweird.f32 %v2396_v12 }
 0x674   : > { %2002 = vst.msk [vmem:[%s3278_s25 + $0x28] sm:$0xff] %vm599_vm0, %v1994_v42  ;;  %vm1963_vm14 = vmor %vm1961_vm13, %vm1962_vm12 }
 0x675   : > { %v1954_v39 = vsel %vm1953_vm11, %v2394_v36, %v1950_v45  ;;  %v1957_v60 = vmul.f32 %v2396_v12, %v1956_v33 }
 0x676   : > { %v1971_v20 = vmul.f32 %v1954_v39, %v3249_v16 }
 0x677   : > { %v1958_v38 = vmul.f32 0.5, %v1957_v60 }
 0x678   : > { %v1983_v55 = vmul.f32 %v3265_v62, %v1971_v20 }
 0x679   : > { %v1959_v63 = vsub.f32 1.5, %v1958_v38 }
 0x67a   : > { %v1995_v28 = vadd.f32 %v3270_v48, %v1983_v55 }
 0x67b   : > { %v1960_v4 = vmul.f32 %v2396_v12, %v1959_v63 }
 0x67c   : > { %2003 = vst.msk [vmem:[%s3278_s25 + $0x30] sm:$0xff] %vm599_vm0, %v1995_v28 }
 0x67d   : > { %v1964_v9 = vsel %vm1963_vm14, %v2396_v12, %v1960_v4 }
 0x67e   : > { %v1972_v10 = vmul.f32 %v1964_v9, %v3255_v43 }
 0x680   : > { %v1984_v51 = vmul.f32 %v3265_v62, %v1972_v10 }
 0x682   : > { %v1996_v15 = vadd.f32 %v3270_v48, %v1984_v51 }
 0x684   : > { %2004 = vst.msk [vmem:[%s3278_s25 + $0x38] sm:$0xff] %vm599_vm0, %v1996_v15 }
 0x685 PF: > { %s24_s29 = sadd.s32 1, %s2411_s29  }
 0x686   : > { %p21_p4 = scmp.ge.s32.totalorder %s24_s29, 4  }
 0x688   :  { %23 = sbr.rel (!%p21_p4) target bundleno = 1 (0x1), region = 115 }

// kernel: detr_forward.10
= control target key start
LH: loop header
LB: loop body
LE: loop exit
PB: predicated region body
PF: predicated region fallthrough
CT: control target
= control target key end

     0   :  { %s1312_s29 = smov 0   ;;  %s1482_s0 = inlined_call_operand.vmem [shape: f32[2,16,32], index: 0, kind: input, shape index: {}, may-alias: {0,2}]   ;;  %s1483_s1 = inlined_call_operand.vmem [shape: f32[2,16,32], index: 1, kind: input, shape index: {}, may-alias: {1,3}]   ;;  %s1484_s2 = inlined_call_operand.vmem [shape: f32[2,16,32], index: 2, kind: input, shape index: {}, may-alias: {0,2}]   ;;  %s1485_s3 = inlined_call_operand.vmem [shape: f32[2,16,32], index: 3, kind: input, shape index: {}, may-alias: {1,3}]   ;;  %s1486_s4 = inlined_call_operand.vmem [shape: f32[32,32], index: 4, kind: input, shape index: {}]   ;;  %s1487_s5 = inlined_call_operand.vmem [shape: f32[1,32], index: 5, kind: input, shape index: {}]   ;;  %s1488_s6 = inlined_call_operand.vmem [shape: f32[32,32], index: 6, kind: input, shape index: {}]   ;;  %s1489_s7 = inlined_call_operand.vmem [shape: f32[1,32], index: 7, kind: input, shape index: {}]   ;;  %s1490_s8 = inlined_call_operand.vmem [shape: f32[32,32], index: 8, kind: input, shape index: {}]   ;;  %s1491_s9 = inlined_call_operand.vmem [shape: f32[1,32], index: 9, kind: input, shape index: {}]   ;;  %s1492_s10 = inlined_call_operand.vmem [shape: f32[32,32], index: 10, kind: input, shape index: {}]   ;;  %s1493_s11 = inlined_call_operand.vmem [shape: f32[1,32], index: 11, kind: input, shape index: {}]   ;;  %s1494_s12 = inlined_call_operand.vmem [shape: f32[1,32], index: 12, kind: input, shape index: {}]   ;;  %s1495_s13 = inlined_call_operand.vmem [shape: f32[1,32], index: 13, kind: input, shape index: {}]   ;;  %s1496_s14 = inlined_call_operand.vmem [shape: f32[2,16,32], index: 14, kind: output, shape index: {}]  }
   0x1 LB: > { %s1114_s30 = sadd.s32 4294967295, %s1228_s29   ;;  %p1118_p0 = scmp.ge.s32.totalorder %s1228_s29, 1  ;;  %s1228_s29 = sphi %s1312_s29, %s24_s29  }
   0x2   : > { %p442_p1 = scmp.lt.s32.totalorder %s1228_s29, 3 }
   0x4   : > { %p443_p2 = pnand %p1118_p0, %p442_p1 }
   0x5   : > { %p503_p3 = scmp.lt.s32.totalorder (!%p443_p2), %s1114_s30, 1  ;;  %s1231_s21 = smov (!%p443_p2), 120  }
   0x6   : > { %446 = sbr.rel (%p443_p2) target bundleno = 1373 (0x55d), region = 76  ;;  %s1232_s22 = smov (!%p443_p2), 104  }
   0x7   : > { %s1233_s19 = smov (!%p443_p2), 8  }
   0xb   : > { %v546_v0 = vld [vmem:[%s1486_s4 + $0x10] sm:$0xff]  ;;  %v547_v1 = vld [vmem:[%s1486_s4 + $0x18] sm:$0xff]  ;;  %v544_v5 = vld [vmem:[%s1486_s4] sm:$0xff]  ;;  %s1498_s30 = smov (!%p503_p3, %s1114_s30), 1  ;;  %vm554_vm0 = vcmask 261120   ;;  %vm631_vm1 = vcmask 64512  }
   0xc   : > { %v574_v2 = vld [vmem:[%s1488_s6 + $0x10] sm:$0xff]  ;;  %v549_v3 = vpack.c.bf16 %v547_v1, %v546_v0  ;;  %v575_v4 = vld [vmem:[%s1488_s6 + $0x18] sm:$0xff]  ;;  %v545_v6 = vld [vmem:[%s1486_s4 + $0x8] sm:$0xff]  ;;  %s1344_s17 = sshll.u32 %s1498_s30, 4  ;;  %vm652_vm2 = vcmask 130048   ;;  %vm925_vm3 = vcmask 195584  }
   0xd   : > { %v577_v7 = vpack.c.bf16 %v575_v4, %v574_v2  ;;  %v572_v8 = vld [vmem:[%s1488_s6] sm:$0xff]  ;;  %v573_v9 = vld [vmem:[%s1488_s6 + $0x8] sm:$0xff]  ;;  %v548_v10 = vpack.c.bf16 %v545_v6, %v544_v5  ;;  %s507_s20 = scalar_lea.vmem %s1482_s0, %s1344_s17  ;;  %s512_s23 = scalar_lea.vmem %s1483_s1, %s1344_s17  ;;  %v601_v54 = vld [vmem:[%s1490_s8 + $0x10] sm:$0xff] }
   0xe   : > { %564 = vmatpush.bf16.msra.mxu0 %v549_v3  ;;  %v576_v11 = vpack.c.bf16 %v573_v9, %v572_v8  ;;  %v1354_v12 = vld [vmem:[%s507_s20] sm:$0xff]  ;;  %v1356_v13 = vld [vmem:[%s507_s20 + $0x8] sm:$0xff]  ;;  %s517_s25 = scalar_lea.vmem %s1484_s2, %s1344_s17  ;;  %s522_s28 = scalar_lea.vmem %s1485_s3, %s1344_s17  ;;  %v602_v55 = vld [vmem:[%s1490_s8 + $0x18] sm:$0xff] }
   0xf   : > { %591 = vmatpush.bf16.msra.mxu1 %v577_v7  ;;  %v531_v14 = vld [vmem:[%s512_s23] sm:$0xff]  ;;  %v532_v15 = vld [vmem:[%s512_s23 + $0x8] sm:$0xff]  ;;  %s1230_s20 = smov 112   ;;  %v604_v56 = vpack.c.bf16 %v602_v55, %v601_v54  ;;  %s527_s24 = scalar_lea.vmem %s1496_s14, %s1344_s17 }
  0x10   : > { %v537_v16 = vadd.f32 %v531_v14, %v1354_v12  ;;  %v1367_v17 = vld [vmem:[%s517_s25] sm:$0xff]  ;;  %v1369_v18 = vld [vmem:[%s517_s25 + $0x8] sm:$0xff]  ;;  %v538_v19 = vadd.f32 %v532_v15, %v1356_v13 }
  0x11   : > { %v535_v20 = vld [vmem:[%s522_s28] sm:$0xff]  ;;  %v536_v21 = vld [vmem:[%s522_s28 + $0x8] sm:$0xff]  ;;  %618 = vmatpush.bf16.msra.mxu2 %v604_v56  ;;  %v543_v60 = vpack.c.bf16 %v1369_v18, %v1367_v17 }
  0x12   : > { %565 = vmatpush.bf16.msra.mxu0 %v548_v10  ;;  %v540_v22 = vadd.f32 %v535_v20, %v1367_v17  ;;  %v541_v23 = vadd.f32 %v536_v21, %v1369_v18  ;;  %v539_v24 = vpack.c.bf16 %v538_v19, %v537_v16  ;;  %v1178_v27 = vld [vmem:[%s1487_s5] ss:$0 sm:$0xff]  ;;  %v600_v58 = vld [vmem:[%s1490_s8 + $0x8] sm:$0xff] }
  0x13   : > { %592 = vmatpush.bf16.msra.mxu1 %v576_v11  ;;  %v1179_v30 = vld [vmem:[%s1489_s7] ss:$0 sm:$0xff] }
  0x14   : > { %v542_v25 = vpack.c.bf16 %v541_v23, %v540_v22  ;;  %v599_v57 = vld [vmem:[%s1490_s8] sm:$0xff] }
  0x15   : > { %1129 = vmatmul.msk.bf16.vlgmr.msra.gmra.mxu0 %vm554_vm0, %v539_v24  ;;  %v603_v59 = vpack.c.bf16 %v600_v58, %v599_v57  ;;  %v1180_v23 = vld [vmem:[%s1491_s9] ss:$0 sm:$0xff] }
  0x16   : > { %1130 = vmatmul.msk.bf16.vlgmr.msra.gmra.mxu1 %vm554_vm0, %v542_v25 }
  0x17   : > { %619 = vmatpush.bf16.msra.mxu2 %v603_v59 }
  0x1a   : > { %1131 = vmatmul.msk.bf16.vlgmr.msra.gmra.mxu2 %vm554_vm0, %v543_v60 }
  0x92   : > { %v567_v26 = vpop.f32.mrf.mxu0 }
  0x93   : > { %v594_v28 = vpop.f32.mrf.mxu1  ;;  %v568_v29 = vadd.f32 %v1178_v27, %v567_v26 }
  0x94   : > { %v595_v35 = vadd.f32 %v1179_v30, %v594_v28 }
  0x95   : > { %v626_v32 = vmul.f32 0.35355338, %v568_v29 }
  0x9a   : > { %v569_v31 = vpop.f32.mrf.mxu0 }
  0x9b   : > { %v570_v33 = vadd.f32 %v1178_v27, %v569_v31  ;;  %v596_v34 = vpop.f32.mrf.mxu1 }
  0x9c   : > { %v597_v36 = vadd.f32 %v1179_v30, %v596_v34 }
  0x9d   : > { %v627_v37 = vmul.f32 0.35355338, %v570_v33  ;;  %v621_v21 = vpop.f32.mrf.mxu2 }
  0x9e   : > { %v629_v38 = vpack.c.bf16 %v597_v36, %v595_v35  ;;  %v622_v26 = vadd.f32 %v1180_v23, %v621_v21 }
  0x9f   : > { %v628_v39 = vpack.c.bf16 %v627_v37, %v626_v32 }
  0xa0   : > { %765 = vrot.lane.b32.xlu1 %v629_v38, %s1230_s20  ;;  %697 = vrot.lane.b32.xlu0 %v629_v38, %s1231_s21  ;;  %v636_v40 = vsel %vm631_vm1, %v629_v38, 0 }
  0xa1   : > { %645 = vmatpush.bf16.xpose.msra.mxu3 %v636_v40  ;;  %763 = vrot.lane.b32.xlu2 %v628_v39, %s1230_s20 }
  0xa5   : > { %v623_v27 = vpop.f32.mrf.mxu2 }
  0xa6   : > { %v624_v29 = vadd.f32 %v1180_v23, %v623_v27 }
  0xa8   : > { %832 = vrot.lane.b32.xlu1 %v629_v38, %s1232_s22  ;;  %694 = vrot.lane.b32.xlu0 %v628_v39, %s1231_s21  ;;  %v630_v32 = vpack.c.bf16 %v624_v29, %v622_v26 }
  0xa9   : > { %1132 = vmatmul.msk.bf16.vlgmr.msra.gmra.mxu3 %vm631_vm1, %v628_v39  ;;  %830 = vrot.lane.b32.xlu2 %v628_v39, %s1232_s22 }
  0xaa   : > { %686 = vmatpush.bf16.msrb.mxu0 %v630_v32 }
  0xfb   : > { %v764_v45 = vpop.permute.xlu2 %763 }
 0x103   : > { %v831_v49 = vpop.permute.xlu2 %830 }
 0x112   : > { %v766_v41 = vpop.permute.xlu1 %765  ;;  %v698_v42 = vpop.permute.xlu0 %697 }
 0x113   : > { %v703_v43 = vsel %vm631_vm1, %v698_v42, 0  ;;  %v771_v44 = vsel %vm631_vm1, %v766_v41, 0 }
 0x114   : > { %712 = vmatpush.bf16.xpose.msrb.mxu1 %v703_v43  ;;  %780 = vmatpush.bf16.xpose.msrb.mxu3 %v771_v44 }
 0x11a   : > { %v833_v46 = vpop.permute.xlu1 %832  ;;  %v695_v47 = vpop.permute.xlu0 %694 }
 0x11b   : > { %v838_v48 = vsel %vm631_vm1, %v833_v46, 0  ;;  %1134 = vmatmul.msk.bf16.vlgmr.msrb.gmra.mxu1 %vm631_vm1, %v695_v47  ;;  %1136 = vmatmul.msk.bf16.vlgmr.msrb.gmra.mxu3 %vm631_vm1, %v764_v45 }
 0x11c   : > { %847 = vmatpush.bf16.xpose.msra.mxu1 %v838_v48 }
 0x12b   : > { %1138 = vmatmul.msk.bf16.vlgmr.msra.gmra.mxu1 %vm631_vm1, %v831_v49 }
 0x12c   : > { %v647_v50 = vpop.f32.mrf.mxu3 }
 0x12d   : > { %v653_v51 = vsel %vm652_vm2, %v647_v50, -inf }
 0x12e   : > { %654 = vmax.xlane.f32.xlu2 %v653_v51 }
 0x134   : > { %v649_v52 = vpop.f32.mrf.mxu3 }
 0x135   : > { %v656_v53 = vsel %vm652_vm2, %v649_v52, -inf }
 0x136   : > { %657 = vmax.xlane.f32.xlu2 %v656_v53 }
 0x198   : > { %v714_v61 = vpop.f32.mrf.mxu1 }
 0x199   : > { %v719_v62 = vsel %vm652_vm2, %v714_v61, -inf }
 0x19a   : > { %720 = vmax.xlane.f32.xlu0 %v719_v62 }
 0x19e   : > { %v782_v63 = vpop.f32.mrf.mxu3 }
 0x19f   : > { %v787_v0 = vsel %vm652_vm2, %v782_v63, -inf }
 0x1a0   : > { %v716_v1 = vpop.f32.mrf.mxu1  ;;  %788 = vmax.xlane.f32.xlu2 %v787_v0 }
 0x1a1   : > { %v655_v2 = vpop.xlane.xlu2 %654  ;;  %v722_v3 = vsel %vm652_vm2, %v716_v1, -inf }
 0x1a2   : > { %723 = vmax.xlane.f32.xlu1 %v722_v3  ;;  %v659_v4 = vsub.f32 %v647_v50, %v655_v2 }
 0x1a4   : > { %v661_v9 = vmul.f32 1.442695, %v659_v4 }
 0x1a6   : > { %v784_v5 = vpop.f32.mrf.mxu3  ;;  %1184 = vpow2.f32 %v661_v9 }
 0x1a7   : > { %v790_v6 = vsel %vm652_vm2, %v784_v5, -inf }
 0x1a8   : > { %v849_v7 = vpop.f32.mrf.mxu1  ;;  %791 = vmax.xlane.f32.xlu0 %v790_v6 }
 0x1a9   : > { %v658_v8 = vpop.xlane.xlu2 %657  ;;  %v854_v14 = vsel %vm652_vm2, %v849_v7, -inf }
 0x1aa   : > { %v660_v10 = vsub.f32 %v649_v52, %v658_v8 }
 0x1ac   : > { %v663_v11 = vmul.f32 1.442695, %v660_v10  ;;  %v1185_v17 = vpop.eup %1184 }
 0x1ad   : > { %v665_v19 = vsel %vm652_vm2, %v1185_v17, 0.0 }
 0x1ae   : > { %1186 = vpow2.f32 %v663_v11 }
 0x1b0   : > { %v851_v15 = vpop.f32.mrf.mxu1  ;;  %855 = vmax.xlane.f32.xlu0 %v854_v14 }
 0x1b1   : > { %v857_v16 = vsel %vm652_vm2, %v851_v15, -inf }
 0x1b2   : > { %858 = vmax.xlane.f32.xlu1 %v857_v16 }
 0x1b4   : > { %v1187_v18 = vpop.eup %1186 }
 0x1b5   : > { %v668_v20 = vsel %vm652_vm2, %v1187_v18, 0.0 }
 0x1b8   : > { %666 = vadd.xlane.f32.xlu0 %v665_v19 }
 0x1ba   : > { %669 = vadd.xlane.f32.xlu1 %v668_v20 }
 0x20d   : > { %v721_v22 = vpop.xlane.xlu0 %720 }
 0x20e   : > { %v725_v24 = vsub.f32 %v714_v61, %v721_v22 }
 0x210   : > { %v727_v25 = vmul.f32 1.442695, %v725_v24 }
 0x212   : > { %1188 = vpow2.f32 %v727_v25 }
 0x213   : > { %v789_v28 = vpop.xlane.xlu2 %788 }
 0x214   : > { %v793_v30 = vsub.f32 %v782_v63, %v789_v28 }
 0x215   : > { %v724_v31 = vpop.xlane.xlu1 %723 }
 0x216   : > { %v795_v33 = vmul.f32 1.442695, %v793_v30  ;;  %v726_v34 = vsub.f32 %v716_v1, %v724_v31 }
 0x218   : > { %v1189_v35 = vpop.eup %1188  ;;  %1190 = vpow2.f32 %v795_v33  ;;  %v729_v36 = vmul.f32 1.442695, %v726_v34 }
 0x219   : > { %v731_v37 = vsel %vm652_vm2, %v1189_v35, 0.0 }
 0x21a   : > { %1192 = vpow2.f32 %v729_v36  ;;  %732 = vadd.xlane.f32.xlu1 %v731_v37  ;;  %v931_v37 = vld [vmem:[%s1492_s10 + $0x10] sm:$0xff] }
 0x21b   : > { %v792_v38 = vpop.xlane.xlu0 %791 }
 0x21c   : > { %v794_v39 = vsub.f32 %v784_v5, %v792_v38  ;;  %v932_v38 = vld [vmem:[%s1492_s10 + $0x18] sm:$0xff] }
 0x21e   : > { %v1425_v40 = vpop.eup %1190  ;;  %v797_v41 = vmul.f32 1.442695, %v794_v39  ;;  %v934_v39 = vpack.c.bf16 %v932_v38, %v931_v37  ;;  %v1183_v38 = vld [vmem:[%s1495_s13] ss:$0 sm:$0xff] }
 0x21f   : > { %v799_v42 = vsel %vm652_vm2, %v1425_v40, 0.0 }
 0x220   : > { %v1193_v43 = vpop.eup %1192  ;;  %1194 = vpow2.f32 %v797_v41  ;;  %800 = vadd.xlane.f32.xlu0 %v799_v42  ;;  %948 = vmatpush.bf16.msra.mxu3 %v934_v39  ;;  %v930_v41 = vld [vmem:[%s1492_s10 + $0x8] sm:$0xff] }
 0x221   : > { %v734_v44 = vsel %vm652_vm2, %v1193_v43, 0.0 }
 0x222   : > { %735 = vadd.xlane.f32.xlu2 %v734_v44 }
 0x223   : > { %v856_v45 = vpop.xlane.xlu0 %855 }
 0x224   : > { %v860_v46 = vsub.f32 %v849_v7, %v856_v45 }
 0x225   : > { %v859_v47 = vpop.xlane.xlu1 %858 }
 0x226   : > { %v1195_v48 = vpop.eup %1194  ;;  %v862_v49 = vmul.f32 1.442695, %v860_v46  ;;  %v861_v50 = vsub.f32 %v851_v15, %v859_v47 }
 0x227   : > { %v802_v51 = vsel %vm652_vm2, %v1195_v48, 0.0 }
 0x228   : > { %1196 = vpow2.f32 %v862_v49  ;;  %v864_v52 = vmul.f32 1.442695, %v861_v50  ;;  %803 = vadd.xlane.f32.xlu1 %v802_v51 }
 0x22a   : > { %1198 = vpow2.f32 %v864_v52 }
 0x22b   : > { %v667_v53 = vpop.xlane.xlu0 %666 }
 0x22c   : > { %1200 = vrcp.f32 %v667_v53 }
 0x22d   : > { %v670_v54 = vpop.xlane.xlu1 %669 }
 0x22e   : > { %v1197_v55 = vpop.eup %1196  ;;  %1202 = vrcp.f32 %v670_v54 }
 0x22f   : > { %v866_v56 = vsel %vm652_vm2, %v1197_v55, 0.0 }
 0x230   : > { %v1199_v57 = vpop.eup %1198  ;;  %867 = vadd.xlane.f32.xlu0 %v866_v56 }
 0x231   : > { %v869_v58 = vsel %vm652_vm2, %v1199_v57, 0.0 }
 0x232   : > { %v1201_v59 = vpop.eup %1200  ;;  %870 = vadd.xlane.f32.xlu1 %v869_v58 }
 0x233   : > { %v673_v61 = vmul.f32 %v1201_v59, %v1185_v17  ;;  %v1181_v59 = vld [vmem:[%s1493_s11] ss:$0 sm:$0xff] }
 0x234   : > { %v1203_v60 = vpop.eup %1202 }
 0x235   : > { %v674_v62 = vmul.f32 %v1203_v60, %v1187_v18 }
 0x237   : > { %v675_v63 = vpack.c.bf16 %v674_v62, %v673_v61 }
 0x239   : > { %1133 = vmatmul.msk.bf16.vlgmr.msrb.gmra.mxu0 %vm652_vm2, %v675_v63 }
 0x23a   : > { %743 = vrot.lane.b32.xlu2 %v630_v32, %s1231_s21  ;;  %s1235_s21 = smov 16  }
 0x244   : > { %877 = vrot.lane.b32.xlu0 %v630_v32, %s1232_s22 }
 0x24b   : > { %810 = vrot.lane.b32.xlu1 %v630_v32, %s1230_s20  ;;  %s1234_s20 = smov 24  }
 0x28d   : > { %v733_v0 = vpop.xlane.xlu1 %732 }
 0x28e   : > { %1204 = vrcp.f32 %v733_v0 }
 0x293   : > { %v801_v9 = vpop.xlane.xlu0 %800 }
 0x294   : > { %v1205_v2 = vpop.eup %1204 }
 0x295   : > { %v736_v1 = vpop.xlane.xlu2 %735  ;;  %v739_v4 = vmul.f32 %v1205_v2, %v1189_v35 }
 0x296   : > { %1206 = vrcp.f32 %v736_v1 }
 0x29b   : > { %v804_v8 = vpop.xlane.xlu1 %803 }
 0x29c   : > { %v1207_v3 = vpop.eup %1206 }
 0x29d   : > { %v740_v5 = vmul.f32 %v1207_v3, %v1193_v43  ;;  %v744_v6 = vpop.permute.xlu2 %743 }
 0x29e   : > { %756 = vmatpush.bf16.msrb.mxu2 %v744_v6 }
 0x29f   : > { %v741_v7 = vpack.c.bf16 %v740_v5, %v739_v4  ;;  %v1236_v4 = vmov 32.0  }
 0x2a1   : > { %1135 = vmatmul.msk.bf16.vlgmr.msrb.gmra.mxu2 %vm652_vm2, %v741_v7 }
 0x2a3   : > { %v868_v11 = vpop.xlane.xlu0 %867 }
 0x2a5   : > { %v871_v10 = vpop.xlane.xlu1 %870 }
 0x2a6   : > { %1208 = vrcp.f32 %v871_v10 }
 0x2a7   : > { %1210 = vrcp.f32 %v868_v11 }
 0x2a8   : > { %1212 = vrcp.f32 %v804_v8 }
 0x2a9   : > { %1214 = vrcp.f32 %v801_v9 }
 0x2aa   : > { %1216 = vrcp.f32 %v1236_v4 }
 0x2ac   : > { %v1209_v14 = vpop.eup %1208 }
 0x2ad   : > { %v1211_v15 = vpop.eup %1210  ;;  %v875_v16 = vmul.f32 %v1209_v14, %v1199_v57 }
 0x2ae   : > { %v874_v17 = vmul.f32 %v1211_v15, %v1197_v55  ;;  %v1213_v19 = vpop.eup %1212 }
 0x2af   : > { %v1215_v21 = vpop.eup %1214  ;;  %v808_v22 = vmul.f32 %v1213_v19, %v1195_v48 }
 0x2b0   : > { %v876_v20 = vpack.c.bf16 %v875_v16, %v874_v17  ;;  %v807_v23 = vmul.f32 %v1215_v21, %v1425_v40  ;;  %v929_v40 = vld [vmem:[%s1492_s10] sm:$0xff]  ;;  %v1217_v5 = vpop.eup %1216 }
 0x2b1   : > { %v933_v42 = vpack.c.bf16 %v930_v41, %v929_v40  ;;  %v965_v6 = vmul.f32 32.0, %v1217_v5  ;;  %vm969_vm4 = vweird.f32 %v1217_v5 }
 0x2b2   : > { %v809_v25 = vpack.c.bf16 %v808_v22, %v807_v23 }
 0x2b3   : > { %949 = vmatpush.bf16.msra.mxu3 %v933_v42  ;;  %v966_v7 = vsub.f32 1.0, %v965_v6 }
 0x2b5   : > { %v967_v8 = vmul.f32 %v1217_v5, %v966_v7 }
 0x2b6   : > { %v878_v18 = vpop.permute.xlu0 %877  ;;  %v688_v27 = vpop.f32.mrf.mxu0 }
 0x2b7   : > { %890 = vmatpush.bf16.msra.mxu2 %v878_v18  ;;  %v968_v9 = vadd.f32 %v1217_v5, %v967_v8 }
 0x2b9   : > { %v970_v10 = vsel %vm969_vm4, %v1217_v5, %v968_v9 }
 0x2ba   : > { %1139 = vmatmul.msk.bf16.vlgmr.msra.gmra.mxu2 %vm652_vm2, %v876_v20 }
 0x2bd   : > { %v811_v24 = vpop.permute.xlu1 %810 }
 0x2be   : > { %823 = vmatpush.bf16.msra.mxu0 %v811_v24  ;;  %v690_v30 = vpop.f32.mrf.mxu0 }
 0x2c1   : > { %1137 = vmatmul.msk.bf16.vlgmr.msra.gmra.mxu0 %vm652_vm2, %v809_v25 }
 0x324   : > { %v758_v26 = vpop.f32.mrf.mxu2 }
 0x32c   : > { %v760_v28 = vpop.f32.mrf.mxu2 }
 0x32d   : > { %v1163_v29 = vpack.i.bf16 %v760_v28, %v758_v26 }
 0x32f   : > { %1164 = vrot.lane.b32.xlu2 %v1163_v29, %s1233_s19 }
 0x33d   : > { %v892_v31 = vpop.f32.mrf.mxu2 }
 0x33e   : > { %v825_v32 = vpop.f32.mrf.mxu0 }
 0x345   : > { %v894_v33 = vpop.f32.mrf.mxu2 }
 0x346   : > { %v1173_v34 = vpack.i.bf16 %v894_v33, %v892_v31  ;;  %v827_v35 = vpop.f32.mrf.mxu0 }
 0x347   : > { %v1168_v36 = vpack.i.bf16 %v827_v35, %v825_v32  ;;  %v1182_v35 = vld [vmem:[%s1494_s12] ss:$0 sm:$0xff] }
 0x348   : > { %1174 = vrot.lane.b32.xlu0 %v1173_v34, %s1234_s20 }
 0x349   : > { %1169 = vrot.lane.b32.xlu2 %v1168_v36, %s1235_s21 }
 0x389   : > { %v1165_v43 = vpop.permute.xlu2 %1164 }
 0x38a   : > { %v1167_v45 = vunpack.i.h.bf16 %v1165_v43  ;;  %v1166_v46 = vunpack.i.l.bf16 %v1165_v43 }
 0x38c   : > { %v922_v50 = vsel %vm631_vm1, %v690_v30, %v1167_v45  ;;  %v921_v51 = vsel %vm631_vm1, %v688_v27, %v1166_v46 }
 0x3a3   : > { %v1170_v44 = vpop.permute.xlu2 %1169 }
 0x3a4   : > { %v1172_v47 = vunpack.i.h.bf16 %v1170_v44  ;;  %v1171_v48 = vunpack.i.l.bf16 %v1170_v44 }
 0x3a6   : > { %v923_v54 = vsel %vm652_vm2, %v921_v51, %v1171_v48  ;;  %v924_v55 = vsel %vm652_vm2, %v922_v50, %v1172_v47 }
 0x3ba   : > { %v1175_v49 = vpop.permute.xlu0 %1174 }
 0x3bb   : > { %v1177_v52 = vunpack.i.h.bf16 %v1175_v49  ;;  %v1176_v53 = vunpack.i.l.bf16 %v1175_v49 }
 0x3bd   : > { %v927_v56 = vsel %vm925_vm3, %v924_v55, %v1177_v52  ;;  %v926_v57 = vsel %vm925_vm3, %v923_v54, %v1176_v53 }
 0x3be   : > { %v928_v58 = vpack.c.bf16 %v927_v56, %v926_v57 }
 0x3c0   : > { %1140 = vmatmul.msk.bf16.vlgmr.msra.gmra.mxu3 %vm554_vm0, %v928_v58 }
 0x443   : > { %v951_v60 = vpop.f32.mrf.mxu3 }
 0x444   : > { %v952_v61 = vadd.f32 %v1181_v59, %v951_v60 }
 0x446   : > { %v956_v62 = vadd.f32 %v952_v61, %v1354_v12 }
 0x448   : > { %v958_v63 = vsel %vm554_vm0, %v956_v62, 0.0 }
 0x449   : > { %959 = vadd.xlane.f32.xlu2 %v958_v63 }
 0x44b   : > { %v953_v0 = vpop.f32.mrf.mxu3 }
 0x44c   : > { %v954_v1 = vadd.f32 %v1181_v59, %v953_v0 }
 0x44e   : > { %v957_v2 = vadd.f32 %v954_v1, %v1356_v13 }
 0x450   : > { %v961_v3 = vsel %vm554_vm0, %v957_v2, 0.0 }
 0x451   : > { %962 = vadd.xlane.f32.xlu1 %v961_v3 }
 0x4bc   : > { %v960_v12 = vpop.xlane.xlu2 %959 }
 0x4bd   : > { %v971_v11 = vmul.f32 %v970_v10, %v960_v12 }
 0x4bf   : > { %v973_v14 = vsub.f32 %v956_v62, %v971_v11 }
 0x4c1   : > { %v975_v15 = vmul.f32 %v973_v14, %v973_v14 }
 0x4c3   : > { %v977_v16 = vsel %vm554_vm0, %v975_v15, 0.0 }
 0x4c4   : > { %v963_v17 = vpop.xlane.xlu1 %962  ;;  %978 = vadd.xlane.f32.xlu0 %v977_v16 }
 0x4c5   : > { %v972_v13 = vmul.f32 %v970_v10, %v963_v17 }
 0x4c7   : > { %v974_v18 = vsub.f32 %v957_v2, %v972_v13 }
 0x4c9   : > { %v976_v19 = vmul.f32 %v974_v18, %v974_v18 }
 0x4cb   : > { %v980_v20 = vsel %vm554_vm0, %v976_v19, 0.0 }
 0x4cc   : > { %981 = vadd.xlane.f32.xlu2 %v980_v20 }
 0x537   : > { %v979_v21 = vpop.xlane.xlu0 %978 }
 0x538   : > { %v983_v22 = vmul.f32 %v979_v21, %v970_v10 }
 0x53a   : > { %v985_v23 = vadd.f32 1e-05, %v983_v22 }
 0x53c   : > { %1218 = vrsqrt.f32 %v985_v23  ;;  %vm993_vm6 = vweird.f32 %v985_v23 }
 0x53f   : > { %v982_v24 = vpop.xlane.xlu2 %981 }
 0x540   : > { %v984_v25 = vmul.f32 %v982_v24, %v970_v10 }
 0x542   : > { %v1219_v26 = vpop.eup %1218  ;;  %v986_v27 = vadd.f32 1e-05, %v984_v25 }
 0x543   : > { %v988_v28 = vmul.f32 %v1219_v26, %v985_v23  ;;  %vm994_vm5 = vweird.f32 %v1219_v26 }
 0x544   : > { %1220 = vrsqrt.f32 %v986_v27  ;;  %vm995_vm7 = vmor %vm993_vm6, %vm994_vm5  ;;  %vm1003_vm9 = vweird.f32 %v986_v27 }
 0x545   : > { %v989_v29 = vmul.f32 %v1219_v26, %v988_v28 }
 0x547   : > { %v990_v30 = vmul.f32 0.5, %v989_v29 }
 0x549   : > { %v991_v31 = vsub.f32 1.5, %v990_v30 }
 0x54a   : > { %v1221_v32 = vpop.eup %1220 }
 0x54b   : > { %v992_v33 = vmul.f32 %v1219_v26, %v991_v31  ;;  %v998_v34 = vmul.f32 %v1221_v32, %v986_v27  ;;  %vm1004_vm8 = vweird.f32 %v1221_v32 }
 0x54c   : > { %vm1005_vm10 = vmor %vm1003_vm9, %vm1004_vm8 }
 0x54d   : > { %v996_v36 = vsel %vm995_vm7, %v1219_v26, %v992_v33  ;;  %v999_v37 = vmul.f32 %v1221_v32, %v998_v34 }
 0x54e   : > { %v1007_v39 = vmul.f32 %v996_v36, %v973_v14 }
 0x54f   : > { %v1000_v40 = vmul.f32 0.5, %v999_v37 }
 0x550   : > { %v1013_v41 = vmul.f32 %v1182_v35, %v1007_v39 }
 0x551   : > { %v1001_v42 = vsub.f32 1.5, %v1000_v40 }
 0x552   : > { %v1019_v43 = vadd.f32 %v1183_v38, %v1013_v41 }
 0x553   : > { %v1002_v44 = vmul.f32 %v1221_v32, %v1001_v42 }
 0x554   : > { %1021 = vst.msk [vmem:[%s527_s24] sm:$0xff] %vm554_vm0, %v1019_v43 }
 0x555   : > { %v1006_v45 = vsel %vm1005_vm10, %v1221_v32, %v1002_v44 }
 0x556   : > { %v1008_v46 = vmul.f32 %v1006_v45, %v974_v18 }
 0x558   : > { %v1014_v47 = vmul.f32 %v1182_v35, %v1008_v46 }
 0x55a   : > { %v1020_v48 = vadd.f32 %v1183_v38, %v1014_v47 }
 0x55c   : > { %1022 = vst.msk [vmem:[%s527_s24 + $0x8] sm:$0xff] %vm554_vm0, %v1020_v48 }
 0x55d PF: > { %s24_s29 = sadd.s32 1, %s1228_s29  }
 0x55e   : > { %p21_p4 = scmp.ge.s32.totalorder %s24_s29, 4  }
 0x560   :  { %23 = sbr.rel (!%p21_p4) target bundleno = 1 (0x1), region = 115 }

// kernel: detr_forward.12
= control target key start
LH: loop header
LB: loop body
LE: loop exit
PB: predicated region body
PF: predicated region fallthrough
CT: control target
= control target key end

     0   :  { %vm43_vm0 = vcmask 261120   ;;  %vm87_vm1 = vcmask 523264   ;;  %v269_v56 = vmov 32.0   ;;  %s415_s1 = inlined_call_operand.vmem [shape: f32[32,64], index: 1, kind: input, shape index: {}]   ;;  %s416_s0 = inlined_call_operand.vmem [shape: f32[32,32], index: 0, kind: input, shape index: {}]   ;;  %s417_s2 = inlined_call_operand.vmem [shape: f32[1,64], index: 2, kind: input, shape index: {}]   ;;  %s418_s3 = inlined_call_operand.vmem [shape: f32[64,32], index: 3, kind: input, shape index: {}]   ;;  %s419_s4 = inlined_call_operand.vmem [shape: f32[1,32], index: 4, kind: input, shape index: {}]   ;;  %s420_s5 = inlined_call_operand.vmem [shape: f32[1,32], index: 5, kind: input, shape index: {}]   ;;  %s421_s6 = inlined_call_operand.vmem [shape: f32[1,32], index: 6, kind: input, shape index: {}]   ;;  %s422_s7 = inlined_call_operand.vmem [shape: f32[32,32], index: 7, kind: output, shape index: {}]  }
   0x1   :  { %v35_v0 = vld [vmem:[%s415_s1 + $0x10] sm:$0xff]  ;;  %v36_v1 = vld [vmem:[%s415_s1 + $0x18] sm:$0xff]  ;;  %v33_v2 = vld [vmem:[%s415_s1] sm:$0xff]  ;;  %259 = vrcp.f32 %v269_v56 }
   0x2   :  { %v38_v3 = vpack.c.bf16 %v36_v1, %v35_v0  ;;  %v34_v4 = vld [vmem:[%s415_s1 + $0x8] sm:$0xff]  ;;  %v27_v5 = vld [vmem:[%s416_s0] sm:$0xff]  ;;  %v29_v8 = vld [vmem:[%s416_s0 + $0x10] sm:$0xff] }
   0x3   :  { %v37_v6 = vpack.c.bf16 %v34_v4, %v33_v2  ;;  %v28_v7 = vld [vmem:[%s416_s0 + $0x8] sm:$0xff]  ;;  %v334_v9 = vld [vmem:[%s416_s0 + $0x18] sm:$0xff]  ;;  %v81_v12 = vld [vmem:[%s418_s3 + $0x30] sm:$0xff] }
   0x4   :  { %56 = vmatpush.bf16.msra.mxu0 %v38_v3  ;;  %248 = vmatpush.bf16.msra.mxu3 %v38_v3  ;;  %v31_v10 = vpack.c.bf16 %v28_v7, %v27_v5  ;;  %v32_v11 = vpack.c.bf16 %v334_v9, %v29_v8  ;;  %v82_v13 = vld [vmem:[%s418_s3 + $0x38] sm:$0xff]  ;;  %v79_v15 = vld [vmem:[%s418_s3 + $0x20] sm:$0xff]  ;;  %v80_v16 = vld [vmem:[%s418_s3 + $0x28] sm:$0xff] }
   0x5   :  { %v86_v14 = vpack.c.bf16 %v82_v13, %v81_v12  ;;  %v85_v17 = vpack.c.bf16 %v80_v16, %v79_v15  ;;  %v77_v18 = vld [vmem:[%s418_s3 + $0x10] sm:$0xff]  ;;  %v78_v19 = vld [vmem:[%s418_s3 + $0x18] sm:$0xff]  ;;  %v75_v21 = vld [vmem:[%s418_s3] sm:$0xff] }
   0x6   :  { %v84_v20 = vpack.c.bf16 %v78_v19, %v77_v18  ;;  %v76_v22 = vld [vmem:[%s418_s3 + $0x8] sm:$0xff]  ;;  %v255_v25 = vld [vmem:[%s417_s2] ss:$0 sm:$0xff] }
   0x7   :  { %98 = vmatpush.bf16.msra.mxu1 %v86_v14  ;;  %250 = vmatpush.bf16.msra.mxu2 %v86_v14  ;;  %v83_v23 = vpack.c.bf16 %v76_v22, %v75_v21  ;;  %v256_v39 = vld [vmem:[%s419_s4] ss:$0 sm:$0xff]  ;;  %v260_v57 = vpop.eup %259 }
   0x8   :  { %57 = vmatpush.bf16.msra.mxu0 %v37_v6  ;;  %249 = vmatpush.bf16.msra.mxu3 %v37_v6  ;;  %v138_v58 = vmul.f32 32.0, %v260_v57  ;;  %vm142_vm2 = vweird.f32 %v260_v57 }
   0xa   :  { %v139_v59 = vsub.f32 1.0, %v138_v58 }
   0xb   :  { %244 = vmatmul.msk.bf16.vlgmr.msra.gmra.mxu0 %vm43_vm0, %v31_v10  ;;  %245 = vmatmul.msk.bf16.vlgmr.msra.gmra.mxu3 %vm43_vm0, %v32_v11 }
   0xc   :  { %99 = vmatpush.bf16.msra.mxu1 %v85_v17  ;;  %251 = vmatpush.bf16.msra.mxu2 %v85_v17  ;;  %v140_v60 = vmul.f32 %v260_v57, %v139_v59 }
   0xe   :  { %v141_v61 = vadd.f32 %v260_v57, %v140_v60 }
  0x10   :  { %100 = vmatpush.bf16.msra.mxu1 %v84_v20  ;;  %252 = vmatpush.bf16.msra.mxu2 %v84_v20  ;;  %v143_v62 = vsel %vm142_vm2, %v260_v57, %v141_v61 }
  0x14   :  { %101 = vmatpush.bf16.msra.mxu1 %v83_v23  ;;  %253 = vmatpush.bf16.msra.mxu2 %v83_v23 }
  0x88   :  { %v59_v24 = vpop.f32.mrf.mxu0 }
  0x89   :  { %v60_v26 = vadd.f32 %v255_v25, %v59_v24 }
  0x8b   :  { %v69_v29 = vmax.f32 %v60_v26, 0.0 }
  0x8e   :  { %v64_v27 = vpop.f32.mrf.mxu3 }
  0x8f   :  { %v65_v32 = vadd.f32 %v255_v25, %v64_v27 }
  0x90   :  { %v61_v28 = vpop.f32.mrf.mxu0 }
  0x91   :  { %v62_v30 = vadd.f32 %v255_v25, %v61_v28  ;;  %v71_v36 = vmax.f32 %v65_v32, 0.0 }
  0x93   :  { %v70_v31 = vmax.f32 %v62_v30, 0.0 }
  0x95   :  { %v73_v33 = vpack.c.bf16 %v70_v31, %v69_v29 }
  0x96   :  { %v66_v34 = vpop.f32.mrf.mxu3 }
  0x97   :  { %v67_v35 = vadd.f32 %v255_v25, %v66_v34  ;;  %246 = vmatmul.msk.bf16.vlgmr.msra.gmra.mxu1 %vm87_vm1, %v73_v33 }
  0x99   :  { %v72_v37 = vmax.f32 %v67_v35, 0.0 }
  0x9b   :  { %v74_v38 = vpack.c.bf16 %v72_v37, %v71_v36  ;;  %v257_v37 = vld [vmem:[%s420_s5] ss:$0 sm:$0xff] }
  0x9d   :  { %247 = vmatmul.msk.bf16.vlgmr.msra.gmra.mxu2 %vm87_vm1, %v74_v38 }
 0x114   :  { %v103_v40 = vpop.f32.mrf.mxu1 }
 0x115   :  { %v113_v41 = vadd.f32 %v103_v40, %v27_v5 }
 0x117   :  { %v121_v42 = vadd.f32 %v256_v39, %v113_v41 }
 0x119   :  { %v125_v43 = vsel %vm43_vm0, %v121_v42, 0.0 }
 0x11a   :  { %126 = vadd.xlane.f32.xlu0 %v125_v43 }
 0x11c   :  { %v105_v44 = vpop.f32.mrf.mxu1 }
 0x11d   :  { %v114_v45 = vadd.f32 %v105_v44, %v28_v7 }
 0x11f   :  { %v122_v46 = vadd.f32 %v256_v39, %v114_v45 }
 0x120   :  { %v108_v47 = vpop.f32.mrf.mxu2 }
 0x121   :  { %v115_v48 = vadd.f32 %v108_v47, %v29_v8  ;;  %v128_v49 = vsel %vm43_vm0, %v122_v46, 0.0 }
 0x122   :  { %129 = vadd.xlane.f32.xlu0 %v128_v49 }
 0x123   :  { %v123_v50 = vadd.f32 %v256_v39, %v115_v48 }
 0x125   :  { %v131_v51 = vsel %vm43_vm0, %v123_v50, 0.0 }
 0x126   :  { %132 = vadd.xlane.f32.xlu1 %v131_v51 }
 0x128   :  { %v110_v52 = vpop.f32.mrf.mxu2 }
 0x129   :  { %v116_v53 = vadd.f32 %v110_v52, %v334_v9 }
 0x12b   :  { %v124_v54 = vadd.f32 %v256_v39, %v116_v53 }
 0x12d   :  { %v134_v55 = vsel %vm43_vm0, %v124_v54, 0.0 }
 0x12e   :  { %135 = vadd.xlane.f32.xlu1 %v134_v55 }
 0x18d   :  { %v127_v63 = vpop.xlane.xlu0 %126 }
 0x18e   :  { %v144_v0 = vmul.f32 %v143_v62, %v127_v63 }
 0x190   :  { %v148_v1 = vsub.f32 %v121_v42, %v144_v0  ;;  %v258_v42 = vld [vmem:[%s421_s6] ss:$0 sm:$0xff] }
 0x192   :  { %v152_v2 = vmul.f32 %v148_v1, %v148_v1 }
 0x194   :  { %v156_v3 = vsel %vm43_vm0, %v152_v2, 0.0 }
 0x195   :  { %157 = vadd.xlane.f32.xlu2 %v156_v3  ;;  %v130_v4 = vpop.xlane.xlu0 %129 }
 0x196   :  { %v145_v5 = vmul.f32 %v143_v62, %v130_v4 }
 0x198   :  { %v375_v6 = vsub.f32 %v122_v46, %v145_v5 }
 0x199   :  { %v133_v7 = vpop.xlane.xlu1 %132 }
 0x19a   :  { %v146_v8 = vmul.f32 %v143_v62, %v133_v7  ;;  %v153_v9 = vmul.f32 %v375_v6, %v375_v6 }
 0x19c   :  { %v379_v10 = vsub.f32 %v123_v50, %v146_v8  ;;  %v159_v11 = vsel %vm43_vm0, %v153_v9, 0.0 }
 0x19d   :  { %160 = vadd.xlane.f32.xlu2 %v159_v11 }
 0x19e   :  { %v154_v12 = vmul.f32 %v379_v10, %v379_v10 }
 0x1a0   :  { %v162_v13 = vsel %vm43_vm0, %v154_v12, 0.0 }
 0x1a1   :  { %v136_v14 = vpop.xlane.xlu1 %135  ;;  %163 = vadd.xlane.f32.xlu0 %v162_v13 }
 0x1a2   :  { %v147_v15 = vmul.f32 %v143_v62, %v136_v14 }
 0x1a4   :  { %v385_v16 = vsub.f32 %v124_v54, %v147_v15 }
 0x1a6   :  { %v155_v17 = vmul.f32 %v385_v16, %v385_v16 }
 0x1a8   :  { %v165_v18 = vsel %vm43_vm0, %v155_v17, 0.0 }
 0x1a9   :  { %166 = vadd.xlane.f32.xlu1 %v165_v18 }
 0x208   :  { %v158_v19 = vpop.xlane.xlu2 %157 }
 0x209   :  { %v168_v20 = vmul.f32 %v158_v19, %v143_v62 }
 0x20b   :  { %v172_v21 = vadd.f32 1e-05, %v168_v20 }
 0x20d   :  { %261 = vrsqrt.f32 %v172_v21  ;;  %vm182_vm4 = vweird.f32 %v172_v21 }
 0x210   :  { %v161_v22 = vpop.xlane.xlu2 %160 }
 0x211   :  { %v169_v23 = vmul.f32 %v161_v22, %v143_v62 }
 0x213   :  { %v262_v24 = vpop.eup %261  ;;  %v173_v25 = vadd.f32 1e-05, %v169_v23 }
 0x214   :  { %v177_v26 = vmul.f32 %v262_v24, %v172_v21  ;;  %v164_v27 = vpop.xlane.xlu0 %163  ;;  %vm183_vm3 = vweird.f32 %v262_v24 }
 0x215   :  { %263 = vrsqrt.f32 %v173_v25  ;;  %v170_v28 = vmul.f32 %v164_v27, %v143_v62  ;;  %vm184_vm5 = vmor %vm182_vm4, %vm183_vm3  ;;  %vm192_vm7 = vweird.f32 %v173_v25 }
 0x216   :  { %v178_v29 = vmul.f32 %v262_v24, %v177_v26 }
 0x217   :  { %v174_v30 = vadd.f32 1e-05, %v170_v28 }
 0x218   :  { %v179_v31 = vmul.f32 0.5, %v178_v29 }
 0x219   :  { %265 = vrsqrt.f32 %v174_v30  ;;  %vm202_vm10 = vweird.f32 %v174_v30 }
 0x21a   :  { %v180_v32 = vsub.f32 1.5, %v179_v31 }
 0x21b   :  { %v264_v33 = vpop.eup %263 }
 0x21c   :  { %v181_v34 = vmul.f32 %v262_v24, %v180_v32  ;;  %v187_v35 = vmul.f32 %v264_v33, %v173_v25  ;;  %v167_v36 = vpop.xlane.xlu1 %166  ;;  %vm193_vm6 = vweird.f32 %v264_v33 }
 0x21d   :  { %v171_v38 = vmul.f32 %v167_v36, %v143_v62  ;;  %vm194_vm8 = vmor %vm192_vm7, %vm193_vm6 }
 0x21e   :  { %v185_v39 = vsel %vm184_vm5, %v262_v24, %v181_v34  ;;  %v188_v40 = vmul.f32 %v264_v33, %v187_v35 }
 0x21f   :  { %v266_v41 = vpop.eup %265  ;;  %v216_v43 = vmul.f32 %v185_v39, %v148_v1  ;;  %v175_v44 = vadd.f32 1e-05, %v171_v38 }
 0x220   :  { %v189_v45 = vmul.f32 0.5, %v188_v40  ;;  %v197_v46 = vmul.f32 %v266_v41, %v174_v30  ;;  %vm203_vm9 = vweird.f32 %v266_v41 }
 0x221   :  { %v224_v47 = vmul.f32 %v257_v37, %v216_v43  ;;  %267 = vrsqrt.f32 %v175_v44  ;;  %vm204_vm11 = vmor %vm202_vm10, %vm203_vm9  ;;  %vm212_vm13 = vweird.f32 %v175_v44 }
 0x222   :  { %v190_v48 = vsub.f32 1.5, %v189_v45  ;;  %v198_v49 = vmul.f32 %v266_v41, %v197_v46 }
 0x223   :  { %v232_v50 = vadd.f32 %v258_v42, %v224_v47 }
 0x224   :  { %v191_v51 = vmul.f32 %v264_v33, %v190_v48  ;;  %v199_v52 = vmul.f32 0.5, %v198_v49 }
 0x225   :  { %236 = vst.msk [vmem:[%s422_s7] sm:$0xff] %vm43_vm0, %v232_v50 }
 0x226   :  { %v195_v53 = vsel %vm194_vm8, %v264_v33, %v191_v51  ;;  %v200_v54 = vsub.f32 1.5, %v199_v52 }
 0x227   :  { %v268_v55 = vpop.eup %267  ;;  %v217_v56 = vmul.f32 %v195_v53, %v375_v6 }
 0x228   :  { %v201_v57 = vmul.f32 %v266_v41, %v200_v54  ;;  %v207_v58 = vmul.f32 %v268_v55, %v175_v44  ;;  %vm213_vm12 = vweird.f32 %v268_v55 }
 0x229   :  { %v225_v59 = vmul.f32 %v257_v37, %v217_v56  ;;  %vm214_vm14 = vmor %vm212_vm13, %vm213_vm12 }
 0x22a   :  { %v205_v60 = vsel %vm204_vm11, %v266_v41, %v201_v57  ;;  %v208_v61 = vmul.f32 %v268_v55, %v207_v58 }
 0x22b   :  { %v233_v62 = vadd.f32 %v258_v42, %v225_v59  ;;  %v218_v63 = vmul.f32 %v205_v60, %v379_v10 }
 0x22c   :  { %v209_v0 = vmul.f32 0.5, %v208_v61 }
 0x22d   :  { %237 = vst.msk [vmem:[%s422_s7 + $0x8] sm:$0xff] %vm43_vm0, %v233_v62  ;;  %v226_v1 = vmul.f32 %v257_v37, %v218_v63 }
 0x22e   :  { %v210_v2 = vsub.f32 1.5, %v209_v0 }
 0x22f   :  { %v234_v3 = vadd.f32 %v258_v42, %v226_v1 }
 0x230   :  { %v211_v4 = vmul.f32 %v268_v55, %v210_v2 }
 0x231   :  { %238 = vst.msk [vmem:[%s422_s7 + $0x10] sm:$0xff] %vm43_vm0, %v234_v3 }
 0x232   :  { %v215_v5 = vsel %vm214_vm14, %v268_v55, %v211_v4 }
 0x233   :  { %v219_v6 = vmul.f32 %v215_v5, %v385_v16 }
 0x235   :  { %v227_v7 = vmul.f32 %v257_v37, %v219_v6 }
 0x237   :  { %v235_v8 = vadd.f32 %v258_v42, %v227_v7 }
 0x239   :  { %239 = vst.msk [vmem:[%s422_s7 + $0x18] sm:$0xff] %vm43_vm0, %v235_v8 }

// kernel: detr_forward.11
= control target key start
LH: loop header
LB: loop body
LE: loop exit
PB: predicated region body
PF: predicated region fallthrough
CT: control target
= control target key end

     0   :  { %s1484_s29 = smov 0   ;;  %s1752_s0 = inlined_call_operand.vmem [shape: f32[2,16,32], index: 0, kind: input, shape index: {}]   ;;  %s1753_s1 = inlined_call_operand.vmem [shape: f32[2,16,32], index: 1, kind: input, shape index: {}]   ;;  %s1754_s2 = inlined_call_operand.vmem [shape: f32[2,64,32], index: 2, kind: input, shape index: {}]   ;;  %s1755_s3 = inlined_call_operand.vmem [shape: f32[2,64,32], index: 3, kind: input, shape index: {}]   ;;  %s1756_s4 = inlined_call_operand.vmem [shape: f32[32,32], index: 4, kind: input, shape index: {}]   ;;  %s1757_s5 = inlined_call_operand.vmem [shape: f32[1,32], index: 5, kind: input, shape index: {}]   ;;  %s1758_s6 = inlined_call_operand.vmem [shape: f32[32,32], index: 6, kind: input, shape index: {}]   ;;  %s1759_s7 = inlined_call_operand.vmem [shape: f32[1,32], index: 7, kind: input, shape index: {}]   ;;  %s1760_s8 = inlined_call_operand.vmem [shape: f32[32,32], index: 8, kind: input, shape index: {}]   ;;  %s1761_s9 = inlined_call_operand.vmem [shape: f32[1,32], index: 9, kind: input, shape index: {}]   ;;  %s1762_s10 = inlined_call_operand.vmem [shape: f32[32,32], index: 10, kind: input, shape index: {}]   ;;  %s1763_s11 = inlined_call_operand.vmem [shape: f32[1,32], index: 11, kind: input, shape index: {}]   ;;  %s1764_s12 = inlined_call_operand.vmem [shape: f32[1,32], index: 12, kind: input, shape index: {}]   ;;  %s1765_s13 = inlined_call_operand.vmem [shape: f32[1,32], index: 13, kind: input, shape index: {}]   ;;  %s1766_s14 = inlined_call_operand.vmem [shape: f32[2,16,32], index: 14, kind: output, shape index: {}]  }
   0x1 LB: > { %s1280_s30 = sadd.s32 4294967295, %s1400_s29   ;;  %p1284_p0 = scmp.ge.s32.totalorder %s1400_s29, 1  ;;  %s1400_s29 = sphi %s1484_s29, %s24_s29  }
   0x2   : > { %p442_p1 = scmp.lt.s32.totalorder %s1400_s29, 3 }
   0x4   : > { %p443_p2 = pnand %p1284_p0, %p442_p1 }
   0x5   : > { %p503_p3 = scmp.lt.s32.totalorder (!%p443_p2), %s1280_s30, 1  ;;  %s1402_s27 = smov (!%p443_p2), 120  }
   0x6   : > { %446 = sbr.rel (%p443_p2) target bundleno = 1797 (0x705), region = 76  ;;  %s1403_s28 = smov (!%p443_p2), 112  }
   0x7   : > { %s1404_s17 = smov (!%p443_p2), 104   ;;  %s1405_s24 = smov (!%p443_p2), 8  }
   0x8   : > { %s1406_s25 = smov (!%p443_p2), 24  }
   0xb   : > { %v598_v0 = vld [vmem:[%s1758_s6 + $0x10] sm:$0xff]  ;;  %v599_v1 = vld [vmem:[%s1758_s6 + $0x18] sm:$0xff]  ;;  %v596_v2 = vld [vmem:[%s1758_s6] sm:$0xff]  ;;  %s1768_s30 = smov (!%p503_p3, %s1280_s30), 1  ;;  %vm578_vm0 = vcmask 261120   ;;  %vm709_vm1 = vcmask 64512  }
   0xc   : > { %v601_v3 = vpack.c.bf16 %v599_v1, %v598_v0  ;;  %v597_v4 = vld [vmem:[%s1758_s6 + $0x8] sm:$0xff]  ;;  %s1317_s23 = sshll.u32 %s1768_s30, 6  ;;  %s1523_s16 = sshll.u32 %s1768_s30, 4  ;;  %v570_v20 = vld [vmem:[%s1756_s4 + $0x10] sm:$0xff]  ;;  %v571_v21 = vld [vmem:[%s1756_s4 + $0x18] sm:$0xff]  ;;  %vm739_vm2 = vcmask 523264  }
   0xd   : > { %v600_v5 = vpack.c.bf16 %v597_v4, %v596_v2  ;;  %s1507_s26 = scalar_lea.vmem %s1754_s2, %s1317_s23  ;;  %s1512_s15 = scalar_lea.vmem %s1755_s3, %s1317_s23  ;;  %v568_v22 = vld [vmem:[%s1756_s4] sm:$0xff]  ;;  %v573_v23 = vpack.c.bf16 %v571_v21, %v570_v20  ;;  %v569_v24 = vld [vmem:[%s1756_s4 + $0x8] sm:$0xff]  ;;  %v649_v29 = vld [vmem:[%s1760_s8 + $0x10] sm:$0xff]  ;;  %vm1088_vm3 = vcmask 130048   ;;  %vm1091_vm4 = vcmask 195584  }
   0xe   : > { %624 = vmatpush.bf16.msra.mxu1 %v601_v3  ;;  %v533_v6 = vld [vmem:[%s1507_s26] sm:$0xff]  ;;  %v534_v7 = vld [vmem:[%s1507_s26 + $0x8] sm:$0xff]  ;;  %v535_v13 = vld [vmem:[%s1507_s26 + $0x10] sm:$0xff]  ;;  %s507_s19 = scalar_lea.vmem %s1752_s0, %s1523_s16  ;;  %s512_s22 = scalar_lea.vmem %s1753_s1, %s1523_s16  ;;  %v572_v30 = vpack.c.bf16 %v569_v24, %v568_v22 }
   0xf   : > { %v541_v8 = vld [vmem:[%s1512_s15] sm:$0xff]  ;;  %v542_v9 = vld [vmem:[%s1512_s15 + $0x8] sm:$0xff]  ;;  %v536_v14 = vld [vmem:[%s1507_s26 + $0x18] sm:$0xff]  ;;  %588 = vmatpush.bf16.msra.mxu0 %v573_v23  ;;  %v564_v45 = vpack.c.bf16 %v534_v7, %v533_v6  ;;  %s1407_s30 = smov 16  }
  0x10   : > { %v552_v10 = vadd.f32 %v541_v8, %v533_v6  ;;  %v553_v11 = vadd.f32 %v542_v9, %v534_v7  ;;  %v543_v15 = vld [vmem:[%s1512_s15 + $0x10] sm:$0xff]  ;;  %v544_v16 = vld [vmem:[%s1512_s15 + $0x18] sm:$0xff]  ;;  %v1546_v25 = vld [vmem:[%s507_s19] sm:$0xff]  ;;  %v565_v53 = vpack.c.bf16 %v536_v14, %v535_v13 }
  0x11   : > { %v554_v17 = vadd.f32 %v543_v15, %v535_v13  ;;  %v555_v18 = vadd.f32 %v544_v16, %v536_v14  ;;  %v1548_v26 = vld [vmem:[%s507_s19 + $0x8] sm:$0xff]  ;;  %v531_v27 = vld [vmem:[%s512_s22] sm:$0xff]  ;;  %v650_v33 = vld [vmem:[%s1760_s8 + $0x18] sm:$0xff] }
  0x12   : > { %625 = vmatpush.bf16.msra.mxu1 %v600_v5  ;;  %v560_v12 = vpack.c.bf16 %v553_v11, %v552_v10  ;;  %v532_v28 = vld [vmem:[%s512_s22 + $0x8] sm:$0xff]  ;;  %v549_v31 = vadd.f32 %v531_v27, %v1546_v25  ;;  %v647_v34 = vld [vmem:[%s1760_s8] sm:$0xff]  ;;  %v652_v37 = vpack.c.bf16 %v650_v33, %v649_v29  ;;  %v539_v47 = vld [vmem:[%s1507_s26 + $0x30] sm:$0xff] }
  0x13   : > { %v561_v19 = vpack.c.bf16 %v555_v18, %v554_v17  ;;  %v550_v32 = vadd.f32 %v532_v28, %v1548_v26  ;;  %v648_v35 = vld [vmem:[%s1760_s8 + $0x8] sm:$0xff]  ;;  %v537_v36 = vld [vmem:[%s1507_s26 + $0x20] sm:$0xff]  ;;  %589 = vmatpush.bf16.msra.mxu0 %v572_v30  ;;  %v540_v48 = vld [vmem:[%s1507_s26 + $0x38] sm:$0xff] }
  0x14   : > { %v538_v38 = vld [vmem:[%s1507_s26 + $0x28] sm:$0xff]  ;;  %v545_v39 = vld [vmem:[%s1512_s15 + $0x20] sm:$0xff]  ;;  %675 = vmatpush.bf16.msra.mxu2 %v652_v37  ;;  %v651_v42 = vpack.c.bf16 %v648_v35, %v647_v34  ;;  %v547_v49 = vld [vmem:[%s1512_s15 + $0x30] sm:$0xff]  ;;  %v567_v56 = vpack.c.bf16 %v540_v48, %v539_v47  ;;  %s527_s26 = scalar_lea.vmem %s1766_s14, %s1523_s16 }
  0x15   : > { %1296 = vmatmul.msk.bf16.vlgmr.msra.gmra.mxu1 %vm578_vm0, %v560_v12  ;;  %v546_v40 = vld [vmem:[%s1512_s15 + $0x28] sm:$0xff]  ;;  %v551_v41 = vpack.c.bf16 %v550_v32, %v549_v31  ;;  %v556_v43 = vadd.f32 %v545_v39, %v537_v36  ;;  %v548_v50 = vld [vmem:[%s1512_s15 + $0x38] sm:$0xff]  ;;  %v558_v51 = vadd.f32 %v547_v49, %v539_v47  ;;  %v566_v55 = vpack.c.bf16 %v538_v38, %v537_v36  ;;  %v1350_v62 = vld [vmem:[%s1759_s7] ss:$0 sm:$0xff] }
  0x16   : > { %v557_v44 = vadd.f32 %v546_v40, %v538_v38  ;;  %v559_v52 = vadd.f32 %v548_v50, %v540_v48  ;;  %v1351_v20 = vld [vmem:[%s1757_s5] ss:$0 sm:$0xff] }
  0x17   : > { %1295 = vmatmul.msk.bf16.vlgmr.msra.gmra.mxu0 %vm578_vm0, %v551_v41  ;;  %v1352_v35 = vld [vmem:[%s1761_s9] ss:$0 sm:$0xff] }
  0x18   : > { %676 = vmatpush.bf16.msra.mxu2 %v651_v42  ;;  %v562_v46 = vpack.c.bf16 %v557_v44, %v556_v43  ;;  %v563_v54 = vpack.c.bf16 %v559_v52, %v558_v51 }
  0x1b   : > { %1300 = vmatmul.msk.bf16.vlgmr.msra.gmra.mxu2 %vm578_vm0, %v564_v45 }
  0x25   : > { %1297 = vmatmul.msk.bf16.gmra.mxu1 %vm578_vm0, %v561_v19 }
  0x2b   : > { %1301 = vmatmul.msk.bf16.gmra.mxu2 %vm578_vm0, %v565_v53 }
  0x35   : > { %1298 = vmatmul.msk.bf16.gmra.mxu1 %vm578_vm0, %v562_v46 }
  0x3b   : > { %1302 = vmatmul.msk.bf16.gmra.mxu2 %vm578_vm0, %v566_v55 }
  0x45   : > { %1299 = vmatmul.msk.bf16.gmra.mxu1 %vm578_vm0, %v563_v54 }
  0x4b   : > { %1303 = vmatmul.msk.bf16.gmra.mxu2 %vm578_vm0, %v567_v56 }
  0x92   : > { %v627_v57 = vpop.f32.mrf.mxu1 }
  0x93   : > { %v628_v11 = vadd.f32 %v1350_v62, %v627_v57 }
  0x94   : > { %v591_v15 = vpop.f32.mrf.mxu0 }
  0x95   : > { %v592_v23 = vadd.f32 %v1351_v20, %v591_v15 }
  0x97   : > { %v698_v28 = vmul.f32 0.35355338, %v592_v23 }
  0x9a   : > { %v629_v58 = vpop.f32.mrf.mxu1 }
  0x9b   : > { %v630_v10 = vadd.f32 %v1350_v62, %v629_v58 }
  0x9c   : > { %v593_v21 = vpop.f32.mrf.mxu0 }
  0x9d   : > { %v1594_v12 = vpack.c.bf16 %v630_v10, %v628_v11  ;;  %v594_v24 = vadd.f32 %v1351_v20, %v593_v21 }
  0x9e   : > { %v678_v9 = vpop.f32.mrf.mxu2 }
  0x9f   : > { %v714_v27 = vsel %vm709_vm1, %v1594_v12, 0  ;;  %v699_v29 = vmul.f32 0.35355338, %v594_v24  ;;  %v679_v45 = vadd.f32 %v1352_v35, %v678_v9 }
  0xa1   : > { %v1609_v30 = vpack.c.bf16 %v699_v29, %v698_v28 }
  0xa2   : > { %v632_v59 = vpop.f32.mrf.mxu1 }
  0xa3   : > { %v633_v16 = vadd.f32 %v1350_v62, %v632_v59 }
  0xa6   : > { %v680_v17 = vpop.f32.mrf.mxu2 }
  0xa7   : > { %v681_v46 = vadd.f32 %v1352_v35, %v680_v17 }
  0xa9   : > { %v1624_v48 = vpack.c.bf16 %v681_v46, %v679_v45 }
  0xaa   : > { %v634_v60 = vpop.f32.mrf.mxu1 }
  0xab   : > { %v635_v13 = vadd.f32 %v1350_v62, %v634_v60 }
  0xad   : > { %v702_v18 = vpack.c.bf16 %v635_v13, %v633_v16 }
  0xae   : > { %v683_v22 = vpop.f32.mrf.mxu2 }
  0xaf   : > { %v717_v19 = vsel %vm709_vm1, %v702_v18, 0  ;;  %v684_v42 = vadd.f32 %v1352_v35, %v683_v22 }
  0xb2   : > { %v637_v61 = vpop.f32.mrf.mxu1 }
  0xb3   : > { %v638_v0 = vadd.f32 %v1350_v62, %v637_v61 }
  0xb6   : > { %v685_v31 = vpop.f32.mrf.mxu2 }
  0xb7   : > { %v686_v43 = vadd.f32 %v1352_v35, %v685_v31 }
  0xb9   : > { %v1621_v47 = vpack.c.bf16 %v686_v43, %v684_v42 }
  0xba   : > { %v639_v63 = vpop.f32.mrf.mxu1 }
  0xbb   : > { %v640_v1 = vadd.f32 %v1350_v62, %v639_v63 }
  0xbd   : > { %v1582_v2 = vpack.c.bf16 %v640_v1, %v638_v0 }
  0xbe   : > { %v688_v32 = vpop.f32.mrf.mxu2 }
  0xbf   : > { %791 = vrot.lane.b32.xlu2 %v1582_v2, %s1402_s27  ;;  %v720_v14 = vsel %vm709_vm1, %v1582_v2, 0  ;;  %v689_v38 = vadd.f32 %v1352_v35, %v688_v32 }
  0xc2   : > { %v642_v3 = vpop.f32.mrf.mxu1 }
  0xc3   : > { %v643_v5 = vadd.f32 %v1350_v62, %v642_v3 }
  0xc6   : > { %v690_v33 = vpop.f32.mrf.mxu2 }
  0xc7   : > { %v691_v39 = vadd.f32 %v1352_v35, %v690_v33 }
  0xc9   : > { %v1618_v44 = vpack.c.bf16 %v691_v39, %v689_v38 }
  0xca   : > { %v644_v4 = vpop.f32.mrf.mxu1 }
  0xcb   : > { %v645_v6 = vadd.f32 %v1350_v62, %v644_v4 }
  0xcd   : > { %v1586_v7 = vpack.c.bf16 %v645_v6, %v643_v5 }
  0xce   : > { %v693_v34 = vpop.f32.mrf.mxu2 }
  0xcf   : > { %793 = vrot.lane.b32.xlu1 %v1586_v7, %s1402_s27  ;;  %888 = vrot.lane.b32.xlu2 %v1586_v7, %s1403_s28  ;;  %v723_v8 = vsel %vm709_vm1, %v1586_v7, 0  ;;  %v694_v36 = vadd.f32 %v1352_v35, %v693_v34 }
  0xd0   : > { %729 = vmatpush.bf16.xpose.msra.mxu3 %v723_v8 }
  0xd6   : > { %v695_v37 = vpop.f32.mrf.mxu2 }
  0xd7   : > { %787 = vrot.lane.b32.xlu2 %v1594_v12, %s1402_s27  ;;  %v696_v40 = vadd.f32 %v1352_v35, %v695_v37 }
  0xd8   : > { %730 = vmatpush.bf16.xpose.msra.mxu3 %v720_v14 }
  0xd9   : > { %v1616_v41 = vpack.c.bf16 %v696_v40, %v694_v36 }
  0xdb   : > { %770 = vmatpush.bf16.msrb.mxu0 %v1616_v41 }
  0xdf   : > { %977 = vrot.lane.b32.xlu2 %v1582_v2, %s1404_s17  ;;  %771 = vmatpush.bf16.msrb.mxu0 %v1618_v44 }
  0xe0   : > { %731 = vmatpush.bf16.xpose.msra.mxu3 %v717_v19 }
  0xe3   : > { %772 = vmatpush.bf16.msrb.mxu0 %v1621_v47 }
  0xe7   : > { %975 = vrot.lane.b32.xlu2 %v702_v18, %s1404_s17  ;;  %773 = vmatpush.bf16.msrb.mxu0 %v1624_v48 }
  0xe8   : > { %732 = vmatpush.bf16.xpose.msra.mxu3 %v714_v27 }
  0xef   : > { %1304 = vmatmul.msk.bf16.vlgmr.msra.gmra.mxu3 %vm709_vm1, %v1609_v30 }
 0x119   : > { %v792_v49 = vpop.permute.xlu2 %791 }
 0x11a   : > { %v805_v54 = vsel %vm709_vm1, %v792_v49, 0 }
 0x129   : > { %v889_v50 = vpop.permute.xlu2 %888 }
 0x12a   : > { %v903_v51 = vsel %vm709_vm1, %v889_v50, 0 }
 0x12b   : > { %909 = vmatpush.bf16.xpose.msrb.mxu1 %v903_v51 }
 0x141   : > { %v794_v52 = vpop.permute.xlu1 %793 }
 0x142   : > { %v808_v53 = vsel %vm709_vm1, %v794_v52, 0 }
 0x143   : > { %814 = vmatpush.bf16.xpose.msra.mxu0 %v808_v53 }
 0x14b   : > { %815 = vmatpush.bf16.xpose.msra.mxu0 %v805_v54 }
 0x172   : > { %v734_v55 = vpop.f32.mrf.mxu3 }
 0x173   : > { %v740_v56 = vsel %vm739_vm2, %v734_v55, -inf }
 0x174   : > { %741 = vmax.xlane.f32.xlu0 %v740_v56 }
 0x17a   : > { %v736_v57 = vpop.f32.mrf.mxu3 }
 0x17b   : > { %v743_v58 = vsel %vm739_vm2, %v736_v57, -inf }
 0x17c   : > { %744 = vmax.xlane.f32.xlu0 %v743_v58 }
 0x190   : > { %789 = vrot.lane.b32.xlu0 %v702_v18, %s1402_s27 }
 0x198   : > { %979 = vrot.lane.b32.xlu0 %v1586_v7, %s1404_s17  ;;  %v788_v7 = vpop.permute.xlu2 %787 }
 0x199   : > { %v799_v9 = vsel %vm709_vm1, %v788_v7, 0 }
 0x1a0   : > { %886 = vrot.lane.b32.xlu0 %v1582_v2, %s1403_s28  ;;  %v978_v11 = vpop.permute.xlu2 %977 }
 0x1a1   : > { %v991_v15 = vsel %vm709_vm1, %v978_v11, 0 }
 0x1a8   : > { %884 = vrot.lane.b32.xlu0 %v702_v18, %s1403_s28  ;;  %v976_v16 = vpop.permute.xlu2 %975 }
 0x1a9   : > { %v988_v19 = vsel %vm709_vm1, %v976_v16, 0 }
 0x1b0   : > { %882 = vrot.lane.b32.xlu0 %v1594_v12, %s1403_s28 }
 0x1b8   : > { %880 = vrot.lane.b32.xlu0 %v1609_v30, %s1403_s28 }
 0x1e7   : > { %v742_v59 = vpop.xlane.xlu0 %741 }
 0x1e8   : > { %v746_v60 = vsub.f32 %v734_v55, %v742_v59 }
 0x1ea   : > { %v748_v61 = vmul.f32 1.442695, %v746_v60 }
 0x1ec   : > { %1356 = vpow2.f32 %v748_v61 }
 0x1ef   : > { %v745_v62 = vpop.xlane.xlu0 %744 }
 0x1f0   : > { %v747_v63 = vsub.f32 %v736_v57, %v745_v62 }
 0x1f2   : > { %v1357_v0 = vpop.eup %1356  ;;  %v750_v1 = vmul.f32 1.442695, %v747_v63 }
 0x1f3   : > { %v752_v3 = vsel %vm739_vm2, %v1357_v0, 0.0 }
 0x1f4   : > { %1358 = vpow2.f32 %v750_v1  ;;  %753 = vadd.xlane.f32.xlu1 %v752_v3 }
 0x1fa   : > { %v1359_v2 = vpop.eup %1358 }
 0x1fb   : > { %v755_v4 = vsel %vm739_vm2, %v1359_v2, 0.0 }
 0x1fc   : > { %756 = vadd.xlane.f32.xlu2 %v755_v4 }
 0x202   : > { %v790_v5 = vpop.permute.xlu0 %789 }
 0x203   : > { %v802_v6 = vsel %vm709_vm1, %v790_v5, 0 }
 0x204   : > { %816 = vmatpush.bf16.xpose.msra.mxu0 %v802_v6 }
 0x20a   : > { %v980_v8 = vpop.permute.xlu0 %979 }
 0x20b   : > { %v994_v10 = vsel %vm709_vm1, %v980_v8, 0 }
 0x20c   : > { %817 = vmatpush.bf16.xpose.msra.mxu0 %v799_v9  ;;  %1000 = vmatpush.bf16.xpose.msrb.mxu2 %v994_v10 }
 0x20d   : > { %781 = vrot.lane.b32.xlu1 %v1609_v30, %s1402_s27 }
 0x212   : > { %v887_v13 = vpop.permute.xlu0 %886 }
 0x213   : > { %v900_v14 = vsel %vm709_vm1, %v887_v13, 0 }
 0x214   : > { %973 = vrot.lane.b32.xlu2 %v1594_v12, %s1404_s17  ;;  %910 = vmatpush.bf16.xpose.msrb.mxu1 %v900_v14 }
 0x215   : > { %1001 = vmatpush.bf16.xpose.msrb.mxu2 %v991_v15 }
 0x21a   : > { %v885_v17 = vpop.permute.xlu0 %884 }
 0x21b   : > { %v897_v18 = vsel %vm709_vm1, %v885_v17, 0 }
 0x21c   : > { %971 = vrot.lane.b32.xlu2 %v1609_v30, %s1404_s17  ;;  %911 = vmatpush.bf16.xpose.msrb.mxu1 %v897_v18 }
 0x21d   : > { %1002 = vmatpush.bf16.xpose.msrb.mxu2 %v988_v19 }
 0x222   : > { %v883_v20 = vpop.permute.xlu0 %882 }
 0x223   : > { %v894_v21 = vsel %vm709_vm1, %v883_v20, 0 }
 0x224   : > { %912 = vmatpush.bf16.xpose.msrb.mxu1 %v894_v21 }
 0x22a   : > { %v881_v12 = vpop.permute.xlu0 %880 }
 0x22b   : > { %1308 = vmatmul.msk.bf16.vlgmr.msrb.gmra.mxu1 %vm709_vm1, %v881_v12 }
 0x267   : > { %v754_v22 = vpop.xlane.xlu1 %753 }
 0x268   : > { %1360 = vrcp.f32 %v754_v22 }
 0x26e   : > { %v1361_v24 = vpop.eup %1360 }
 0x26f   : > { %v757_v23 = vpop.xlane.xlu2 %756  ;;  %v760_v28 = vmul.f32 %v1361_v24, %v1357_v0 }
 0x270   : > { %1362 = vrcp.f32 %v757_v23 }
 0x276   : > { %v1363_v27 = vpop.eup %1362 }
 0x277   : > { %v761_v29 = vmul.f32 %v1363_v27, %v1359_v2  ;;  %v974_v30 = vpop.permute.xlu2 %973 }
 0x278   : > { %v985_v31 = vsel %vm709_vm1, %v974_v30, 0 }
 0x279   : > { %1003 = vmatpush.bf16.xpose.msrb.mxu2 %v985_v31  ;;  %v762_v32 = vpack.c.bf16 %v761_v29, %v760_v28 }
 0x27b   : > { %1305 = vmatmul.msk.bf16.vlgmr.msrb.gmra.mxu0 %vm739_vm2, %v762_v32 }
 0x27f   : > { %v972_v33 = vpop.permute.xlu2 %971  ;;  %v782_v34 = vpop.permute.xlu1 %781 }
 0x280   : > { %1310 = vmatmul.msk.bf16.vlgmr.msrb.gmra.mxu2 %vm709_vm1, %v972_v33 }
 0x28b   : > { %1306 = vmatmul.msk.bf16.vlgmr.msra.gmra.mxu0 %vm709_vm1, %v782_v34 }
 0x2a8   : > { %v914_v35 = vpop.f32.mrf.mxu1 }
 0x2a9   : > { %v919_v36 = vsel %vm739_vm2, %v914_v35, -inf }
 0x2aa   : > { %920 = vmax.xlane.f32.xlu2 %v919_v36 }
 0x2b0   : > { %v916_v37 = vpop.f32.mrf.mxu1 }
 0x2b1   : > { %v922_v38 = vsel %vm739_vm2, %v916_v37, -inf }
 0x2b2   : > { %923 = vmax.xlane.f32.xlu1 %v922_v38 }
 0x2cb   : > { %857 = vrot.lane.b32.xlu1 %v1616_v41, %s1402_s27 }
 0x2f8   : > { %v1668_v39 = vpop.f32.mrf.mxu0 }
 0x300   : > { %v1670_v40 = vpop.f32.mrf.mxu0 }
 0x303   : > { %v1005_v42 = vpop.f32.mrf.mxu2 }
 0x304   : > { %v1010_v43 = vsel %vm739_vm2, %v1005_v42, -inf }
 0x305   : > { %1011 = vmax.xlane.f32.xlu0 %v1010_v43 }
 0x308   : > { %v819_v45 = vpop.f32.mrf.mxu0 }
 0x309   : > { %v824_v46 = vsel %vm739_vm2, %v819_v45, -inf }
 0x30a   : > { %825 = vmax.xlane.f32.xlu1 %v824_v46 }
 0x30b   : > { %v1007_v49 = vpop.f32.mrf.mxu2 }
 0x30c   : > { %v1013_v50 = vsel %vm739_vm2, %v1007_v49, -inf }
 0x30d   : > { %1014 = vmax.xlane.f32.xlu2 %v1013_v50 }
 0x310   : > { %v821_v62 = vpop.f32.mrf.mxu0 }
 0x319   : > { %855 = vrot.lane.b32.xlu0 %v1618_v44, %s1402_s27 }
 0x31d   : > { %v921_v52 = vpop.xlane.xlu2 %920 }
 0x31e   : > { %v925_v53 = vsub.f32 %v914_v35, %v921_v52 }
 0x320   : > { %v927_v56 = vmul.f32 1.442695, %v925_v53 }
 0x321   : > { %948 = vrot.lane.b32.xlu0 %v1616_v41, %s1403_s28 }
 0x322   : > { %1364 = vpow2.f32 %v927_v56 }
 0x323   : > { %851 = vrot.lane.b32.xlu1 %v1624_v48, %s1402_s27 }
 0x325   : > { %853 = vrot.lane.b32.xlu2 %v1621_v47, %s1402_s27  ;;  %v924_v51 = vpop.xlane.xlu1 %923 }
 0x326   : > { %v926_v54 = vsub.f32 %v916_v37, %v924_v51 }
 0x328   : > { %v929_v57 = vmul.f32 1.442695, %v926_v54  ;;  %v1365_v58 = vpop.eup %1364 }
 0x329   : > { %946 = vrot.lane.b32.xlu0 %v1618_v44, %s1403_s28  ;;  %v931_v60 = vsel %vm739_vm2, %v1365_v58, 0.0 }
 0x32a   : > { %1366 = vpow2.f32 %v929_v57 }
 0x330   : > { %v1367_v59 = vpop.eup %1366 }
 0x331   : > { %1039 = vrot.lane.b32.xlu0 %v1616_v41, %s1404_s17  ;;  %v934_v61 = vsel %vm739_vm2, %v1367_v59, 0.0  ;;  %v827_v41 = vsel %vm739_vm2, %v821_v62, -inf }
 0x33d   : > { %v858_v55 = vpop.permute.xlu1 %857 }
 0x33e   : > { %870 = vmatpush.bf16.msrb.mxu3 %v858_v55 }
 0x34d   : > { %932 = vadd.xlane.f32.xlu1 %v931_v60 }
 0x34e   : > { %935 = vadd.xlane.f32.xlu2 %v934_v61 }
 0x35b   : > { %828 = vmax.xlane.f32.xlu0 %v827_v41 }
 0x366   : > { %1037 = vrot.lane.b32.xlu2 %v1618_v44, %s1404_s17 }
 0x36f   : > { %944 = vrot.lane.b32.xlu0 %v1621_v47, %s1403_s28 }
 0x378   : > { %v1012_v1 = vpop.xlane.xlu0 %1011 }
 0x379   : > { %v1016_v2 = vsub.f32 %v1005_v42, %v1012_v1  ;;  %v1098_v1 = vld [vmem:[%s1762_s10 + $0x18] sm:$0xff] }
 0x37b   : > { %v1018_v5 = vmul.f32 1.442695, %v1016_v2  ;;  %v1095_v2 = vld [vmem:[%s1762_s10] sm:$0xff] }
 0x37d   : > { %v826_v7 = vpop.xlane.xlu1 %825 }
 0x37e   : > { %v830_v44 = vsub.f32 %v819_v45, %v826_v7 }
 0x380   : > { %v1015_v63 = vpop.xlane.xlu2 %1014  ;;  %v832_v10 = vmul.f32 1.442695, %v830_v44 }
 0x381   : > { %v1017_v0 = vsub.f32 %v1007_v49, %v1015_v63 }
 0x383   : > { %v1020_v3 = vmul.f32 1.442695, %v1017_v0  ;;  %v1097_v0 = vld [vmem:[%s1762_s10 + $0x10] sm:$0xff] }
 0x385   : > { %1368 = vpow2.f32 %v1020_v3  ;;  %v1100_v3 = vpack.c.bf16 %v1098_v1, %v1097_v0  ;;  %v1355_v1 = vld [vmem:[%s1765_s13] ss:$0 sm:$0xff] }
 0x386   : > { %1370 = vpow2.f32 %v1018_v5 }
 0x387   : > { %1372 = vpow2.f32 %v832_v10 }
 0x388   : > { %v854_v9 = vpop.permute.xlu2 %853 }
 0x38b   : > { %v1694_v4 = vpop.eup %1368  ;;  %v856_v6 = vpop.permute.xlu0 %855 }
 0x38c   : > { %871 = vmatpush.bf16.msrb.mxu3 %v856_v6  ;;  %v1025_v8 = vsel %vm739_vm2, %v1694_v4, 0.0  ;;  %v1371_v13 = vpop.eup %1370 }
 0x38d   : > { %1026 = vadd.xlane.f32.xlu1 %v1025_v8  ;;  %v1022_v15 = vsel %vm739_vm2, %v1371_v13, 0.0  ;;  %v1373_v17 = vpop.eup %1372 }
 0x38e   : > { %v836_v18 = vsel %vm739_vm2, %v1373_v17, 0.0 }
 0x390   : > { %872 = vmatpush.bf16.msrb.mxu3 %v854_v9 }
 0x393   : > { %v949_v11 = vpop.permute.xlu0 %948 }
 0x395   : > { %v852_v14 = vpop.permute.xlu1 %851 }
 0x396   : > { %873 = vmatpush.bf16.msrb.mxu3 %v852_v14 }
 0x399   : > { %1023 = vadd.xlane.f32.xlu0 %v1022_v15 }
 0x39a   : > { %961 = vmatpush.bf16.msra.mxu3 %v949_v11 }
 0x39b   : > { %v947_v16 = vpop.permute.xlu0 %946 }
 0x39e   : > { %962 = vmatpush.bf16.msra.mxu3 %v947_v16 }
 0x3a1   : > { %837 = vadd.xlane.f32.xlu0 %v836_v18 }
 0x3a3   : > { %v1040_v19 = vpop.permute.xlu0 %1039 }
 0x3a4   : > { %1052 = vmatpush.bf16.msrb.mxu0 %v1040_v19 }
 0x3a6   : > { %942 = vrot.lane.b32.xlu1 %v1624_v48, %s1403_s28 }
 0x3b5   : > { %1033 = vrot.lane.b32.xlu0 %v1624_v48, %s1404_s17 }
 0x3c0   : > { %v933_v20 = vpop.xlane.xlu1 %932 }
 0x3c1   : > { %1374 = vrcp.f32 %v933_v20  ;;  %v936_v21 = vpop.xlane.xlu2 %935 }
 0x3c2   : > { %1376 = vrcp.f32 %v936_v21 }
 0x3c7   : > { %v1375_v12 = vpop.eup %1374 }
 0x3c8   : > { %v1377_v22 = vpop.eup %1376  ;;  %v939_v23 = vmul.f32 %v1375_v12, %v1365_v58 }
 0x3c9   : > { %v940_v24 = vmul.f32 %v1377_v22, %v1367_v59  ;;  %v1038_v27 = vpop.permute.xlu2 %1037 }
 0x3ca   : > { %1053 = vmatpush.bf16.msrb.mxu0 %v1038_v27 }
 0x3cb   : > { %v941_v28 = vpack.c.bf16 %v940_v24, %v939_v23 }
 0x3ce   : > { %v829_v29 = vpop.xlane.xlu0 %828 }
 0x3cf   : > { %v831_v30 = vsub.f32 %v821_v62, %v829_v29 }
 0x3d1   : > { %v834_v31 = vmul.f32 1.442695, %v831_v30  ;;  %v1408_v30 = vmov 32.0  }
 0x3d3   : > { %1378 = vpow2.f32 %v834_v31 }
 0x3d9   : > { %v1379_v32 = vpop.eup %1378 }
 0x3da   : > { %v839_v33 = vsel %vm739_vm2, %v1379_v32, 0.0 }
 0x3db   : > { %840 = vadd.xlane.f32.xlu2 %v839_v33 }
 0x3e1   : > { %v945_v48 = vpop.permute.xlu0 %944 }
 0x3e2   : > { %963 = vmatpush.bf16.msra.mxu3 %v945_v48 }
 0x3f3   : > { %1035 = vrot.lane.b32.xlu2 %v1621_v47, %s1404_s17 }
 0x400   : > { %v1027_v34 = vpop.xlane.xlu1 %1026 }
 0x40c   : > { %v1024_v36 = vpop.xlane.xlu0 %1023 }
 0x414   : > { %v838_v37 = vpop.xlane.xlu0 %837 }
 0x415   : > { %1380 = vrcp.f32 %v838_v37 }
 0x416   : > { %1382 = vrcp.f32 %v1024_v36 }
 0x418   : > { %v943_v35 = vpop.permute.xlu1 %942 }
 0x419   : > { %964 = vmatpush.bf16.msra.mxu3 %v943_v35 }
 0x41b   : > { %v1381_v42 = vpop.eup %1380 }
 0x41c   : > { %v1383_v43 = vpop.eup %1382  ;;  %v844_v46 = vmul.f32 %v1381_v42, %v1373_v17 }
 0x41d   : > { %v1030_v52 = vmul.f32 %v1383_v43, %v1371_v13 }
 0x427   : > { %v1034_v54 = vpop.permute.xlu0 %1033 }
 0x44e   : > { %v841_v38 = vpop.xlane.xlu2 %840 }
 0x44f   : > { %1384 = vrcp.f32 %v841_v38 }
 0x450   : > { %1386 = vrcp.f32 %v1027_v34 }
 0x451   : > { %1388 = vrcp.f32 %v1408_v30 }
 0x455   : > { %v1385_v45 = vpop.eup %1384 }
 0x456   : > { %v845_v49 = vmul.f32 %v1385_v45, %v1379_v32  ;;  %v1036_v50 = vpop.permute.xlu2 %1035  ;;  %v1387_v51 = vpop.eup %1386 }
 0x457   : > { %1054 = vmatpush.bf16.msrb.mxu0 %v1036_v50  ;;  %v1031_v53 = vmul.f32 %v1387_v51, %v1694_v4  ;;  %v1096_v4 = vld [vmem:[%s1762_s10 + $0x8] sm:$0xff]  ;;  %v1389_v31 = vpop.eup %1388 }
 0x458   : > { %v846_v47 = vpack.c.bf16 %v845_v49, %v844_v46  ;;  %v1099_v5 = vpack.c.bf16 %v1096_v4, %v1095_v2  ;;  %v1131_v32 = vmul.f32 32.0, %v1389_v31  ;;  %vm1135_vm5 = vweird.f32 %v1389_v31 }
 0x459   : > { %v1032_v55 = vpack.c.bf16 %v1031_v53, %v1030_v52 }
 0x45a   : > { %1307 = vmatmul.msk.bf16.vlgmr.msrb.gmra.mxu3 %vm739_vm2, %v846_v47  ;;  %v1132_v33 = vsub.f32 1.0, %v1131_v32 }
 0x45b   : > { %1055 = vmatpush.bf16.msrb.mxu0 %v1034_v54  ;;  %1114 = vmatpush.bf16.msrb.mxu3 %v1100_v3 }
 0x45c   : > { %v1133_v48 = vmul.f32 %v1389_v31, %v1132_v33 }
 0x45e   : > { %1311 = vmatmul.msk.bf16.vlgmr.msrb.gmra.mxu0 %vm739_vm2, %v1032_v55  ;;  %v1134_v34 = vadd.f32 %v1389_v31, %v1133_v48 }
 0x45f   : > { %1115 = vmatpush.bf16.msrb.mxu3 %v1099_v5 }
 0x460   : > { %v1136_v35 = vsel %vm1135_vm5, %v1389_v31, %v1134_v34 }
 0x46a   : > { %1309 = vmatmul.msk.bf16.vlgmr.msra.gmra.mxu3 %vm739_vm2, %v941_v28 }
 0x4db   : > { %v1057_v57 = vpop.f32.mrf.mxu0 }
 0x4dd   : > { %v875_v56 = vpop.f32.mrf.mxu3 }
 0x4e3   : > { %v1059_v60 = vpop.f32.mrf.mxu0 }
 0x4e4   : > { %v1345_v62 = vpack.i.bf16 %v1059_v60, %v1057_v57 }
 0x4e5   : > { %v877_v58 = vpop.f32.mrf.mxu3 }
 0x4e6   : > { %v1335_v59 = vpack.i.bf16 %v877_v58, %v875_v56 }
 0x4e8   : > { %1336 = vrot.lane.b32.xlu1 %v1335_v59, %s1405_s24 }
 0x4ed   : > { %v966_v61 = vpop.f32.mrf.mxu3 }
 0x4f0   : > { %1346 = vrot.lane.b32.xlu1 %v1345_v62, %s1406_s25 }
 0x4f5   : > { %v968_v41 = vpop.f32.mrf.mxu3 }
 0x4f6   : > { %v1340_v63 = vpack.i.bf16 %v968_v41, %v966_v61  ;;  %v1354_v41 = vld [vmem:[%s1764_s12] ss:$0 sm:$0xff] }
 0x4f8   : > { %1341 = vrot.lane.b32.xlu2 %v1340_v63, %s1407_s30 }
 0x552   : > { %v1342_v44 = vpop.permute.xlu2 %1341 }
 0x553   : > { %v1344_v11 = vunpack.i.h.bf16 %v1342_v44  ;;  %v1343_v13 = vunpack.i.l.bf16 %v1342_v44 }
 0x55a   : > { %v1337_v6 = vpop.permute.xlu1 %1336 }
 0x55b   : > { %v1339_v7 = vunpack.i.h.bf16 %v1337_v6  ;;  %v1338_v8 = vunpack.i.l.bf16 %v1337_v6 }
 0x55d   : > { %v1087_v9 = vsel %vm709_vm1, %v1670_v40, %v1339_v7  ;;  %v1086_v10 = vsel %vm709_vm1, %v1668_v39, %v1338_v8  ;;  %v1353_v40 = vld [vmem:[%s1763_s11] ss:$0 sm:$0xff] }
 0x55e   : > { %v1089_v17 = vsel %vm1088_vm3, %v1086_v10, %v1343_v13  ;;  %v1090_v18 = vsel %vm1088_vm3, %v1087_v9, %v1344_v11 }
 0x562   : > { %v1347_v14 = vpop.permute.xlu1 %1346 }
 0x563   : > { %v1349_v15 = vunpack.i.h.bf16 %v1347_v14  ;;  %v1348_v16 = vunpack.i.l.bf16 %v1347_v14 }
 0x565   : > { %v1093_v19 = vsel %vm1091_vm4, %v1090_v18, %v1349_v15  ;;  %v1092_v20 = vsel %vm1091_vm4, %v1089_v17, %v1348_v16 }
 0x566   : > { %v1094_v21 = vpack.c.bf16 %v1093_v19, %v1092_v20 }
 0x568   : > { %1312 = vmatmul.msk.bf16.vlgmr.msrb.gmra.mxu3 %vm578_vm0, %v1094_v21 }
 0x5eb   : > { %v1117_v12 = vpop.f32.mrf.mxu3 }
 0x5ec   : > { %v1118_v39 = vadd.f32 %v1353_v40, %v1117_v12 }
 0x5ee   : > { %v1122_v22 = vadd.f32 %v1118_v39, %v1546_v25 }
 0x5f0   : > { %v1124_v23 = vsel %vm578_vm0, %v1122_v22, 0.0 }
 0x5f1   : > { %1125 = vadd.xlane.f32.xlu2 %v1124_v23 }
 0x5f3   : > { %v1119_v24 = vpop.f32.mrf.mxu3 }
 0x5f4   : > { %v1120_v27 = vadd.f32 %v1353_v40, %v1119_v24 }
 0x5f6   : > { %v1123_v28 = vadd.f32 %v1120_v27, %v1548_v26 }
 0x5f8   : > { %v1127_v29 = vsel %vm578_vm0, %v1123_v28, 0.0 }
 0x5f9   : > { %1128 = vadd.xlane.f32.xlu0 %v1127_v29 }
 0x664   : > { %v1126_v25 = vpop.xlane.xlu2 %1125 }
 0x665   : > { %v1137_v36 = vmul.f32 %v1136_v35, %v1126_v25 }
 0x667   : > { %v1139_v37 = vsub.f32 %v1122_v22, %v1137_v36 }
 0x669   : > { %v1141_v38 = vmul.f32 %v1139_v37, %v1139_v37 }
 0x66b   : > { %v1143_v42 = vsel %vm578_vm0, %v1141_v38, 0.0 }
 0x66c   : > { %v1129_v43 = vpop.xlane.xlu0 %1128  ;;  %1144 = vadd.xlane.f32.xlu1 %v1143_v42 }
 0x66d   : > { %v1138_v26 = vmul.f32 %v1136_v35, %v1129_v43 }
 0x66f   : > { %v1140_v45 = vsub.f32 %v1123_v28, %v1138_v26 }
 0x671   : > { %v1142_v46 = vmul.f32 %v1140_v45, %v1140_v45 }
 0x673   : > { %v1146_v49 = vsel %vm578_vm0, %v1142_v46, 0.0 }
 0x674   : > { %1147 = vadd.xlane.f32.xlu2 %v1146_v49 }
 0x6df   : > { %v1145_v50 = vpop.xlane.xlu1 %1144 }
 0x6e0   : > { %v1149_v51 = vmul.f32 %v1145_v50, %v1136_v35 }
 0x6e2   : > { %v1151_v52 = vadd.f32 1e-05, %v1149_v51 }
 0x6e4   : > { %1390 = vrsqrt.f32 %v1151_v52  ;;  %vm1159_vm7 = vweird.f32 %v1151_v52 }
 0x6e7   : > { %v1148_v47 = vpop.xlane.xlu2 %1147 }
 0x6e8   : > { %v1150_v53 = vmul.f32 %v1148_v47, %v1136_v35 }
 0x6ea   : > { %v1391_v54 = vpop.eup %1390  ;;  %v1152_v55 = vadd.f32 1e-05, %v1150_v53 }
 0x6eb   : > { %v1154_v56 = vmul.f32 %v1391_v54, %v1151_v52  ;;  %vm1160_vm6 = vweird.f32 %v1391_v54 }
 0x6ec   : > { %1392 = vrsqrt.f32 %v1152_v55  ;;  %vm1161_vm8 = vmor %vm1159_vm7, %vm1160_vm6  ;;  %vm1169_vm10 = vweird.f32 %v1152_v55 }
 0x6ed   : > { %v1155_v57 = vmul.f32 %v1391_v54, %v1154_v56 }
 0x6ef   : > { %v1156_v58 = vmul.f32 0.5, %v1155_v57 }
 0x6f1   : > { %v1157_v59 = vsub.f32 1.5, %v1156_v58 }
 0x6f2   : > { %v1393_v60 = vpop.eup %1392 }
 0x6f3   : > { %v1158_v61 = vmul.f32 %v1391_v54, %v1157_v59  ;;  %v1164_v62 = vmul.f32 %v1393_v60, %v1152_v55  ;;  %vm1170_vm9 = vweird.f32 %v1393_v60 }
 0x6f4   : > { %vm1171_vm11 = vmor %vm1169_vm10, %vm1170_vm9 }
 0x6f5   : > { %v1162_v63 = vsel %vm1161_vm8, %v1391_v54, %v1158_v61  ;;  %v1165_v0 = vmul.f32 %v1393_v60, %v1164_v62 }
 0x6f6   : > { %v1173_v3 = vmul.f32 %v1162_v63, %v1139_v37 }
 0x6f7   : > { %v1166_v2 = vmul.f32 0.5, %v1165_v0 }
 0x6f8   : > { %v1179_v4 = vmul.f32 %v1354_v41, %v1173_v3 }
 0x6f9   : > { %v1167_v5 = vsub.f32 1.5, %v1166_v2 }
 0x6fa   : > { %v1185_v6 = vadd.f32 %v1355_v1, %v1179_v4 }
 0x6fb   : > { %v1168_v7 = vmul.f32 %v1393_v60, %v1167_v5 }
 0x6fc   : > { %1187 = vst.msk [vmem:[%s527_s26] sm:$0xff] %vm578_vm0, %v1185_v6 }
 0x6fd   : > { %v1172_v8 = vsel %vm1171_vm11, %v1393_v60, %v1168_v7 }
 0x6fe   : > { %v1174_v44 = vmul.f32 %v1172_v8, %v1140_v45 }
 0x700   : > { %v1180_v9 = vmul.f32 %v1354_v41, %v1174_v44 }
 0x702   : > { %v1186_v10 = vadd.f32 %v1355_v1, %v1180_v9 }
 0x704   : > { %1188 = vst.msk [vmem:[%s527_s26 + $0x8] sm:$0xff] %vm578_vm0, %v1186_v10 }
 0x705 PF: > { %s24_s29 = sadd.s32 1, %s1400_s29  }
 0x706   : > { %p21_p4 = scmp.ge.s32.totalorder %s24_s29, 4  }
 0x708   :  { %23 = sbr.rel (!%p21_p4) target bundleno = 1 (0x1), region = 115 }

// kernel: detr_forward.13
= control target key start
LH: loop header
LB: loop body
LE: loop exit
PB: predicated region body
PF: predicated region fallthrough
CT: control target
= control target key end

     0   :  { %vm45_vm0 = vcmask 261120   ;;  %v444_v8 = vmov 32.0   ;;  %vm194_vm14 = vcmask 39936   ;;  %s656_s0 = inlined_call_operand.vmem [shape: f32[32,32], index: 0, kind: input, shape index: {}]   ;;  %s657_s1 = inlined_call_operand.vmem [shape: f32[1,32], index: 1, kind: input, shape index: {}]   ;;  %s658_s2 = inlined_call_operand.vmem [shape: f32[1,32], index: 2, kind: input, shape index: {}]   ;;  %s659_s4 = inlined_call_operand.vmem [shape: f32[1,5], index: 4, kind: input, shape index: {}]   ;;  %s660_s3 = inlined_call_operand.vmem [shape: f32[32,5], index: 3, kind: input, shape index: {}]   ;;  %s661_s5 = inlined_call_operand.vmem [shape: f32[32,32], index: 5, kind: input, shape index: {}]   ;;  %s662_s6 = inlined_call_operand.vmem [shape: f32[1,32], index: 6, kind: input, shape index: {}]   ;;  %s663_s8 = inlined_call_operand.vmem [shape: f32[1,32], index: 8, kind: input, shape index: {}]   ;;  %s664_s7 = inlined_call_operand.vmem [shape: f32[32,32], index: 7, kind: input, shape index: {}]   ;;  %s665_s11 = inlined_call_operand.vmem [shape: f32[32,5], index: 11, kind: output, shape index: {0}]   ;;  %s666_s10 = inlined_call_operand.vmem [shape: f32[1,4], index: 10, kind: input, shape index: {}]   ;;  %s667_s9 = inlined_call_operand.vmem [shape: f32[32,4], index: 9, kind: input, shape index: {}]   ;;  %s668_s12 = inlined_call_operand.vmem [shape: f32[32,4], index: 12, kind: output, shape index: {1}]  }
   0x1   :  { %v43_v0 = vld [vmem:[%s656_s0 + $0x10] sm:$0xff]  ;;  %v41_v1 = vld [vmem:[%s656_s0] sm:$0xff]  ;;  %v44_v4 = vld [vmem:[%s656_s0 + $0x18] sm:$0xff]  ;;  %418 = vrcp.f32 %v444_v8 }
   0x2   :  { %v52_v2 = vsel %vm45_vm0, %v43_v0, 0.0  ;;  %v46_v3 = vsel %vm45_vm0, %v41_v1, 0.0  ;;  %v42_v5 = vld [vmem:[%s656_s0 + $0x8] sm:$0xff]  ;;  %v55_v6 = vsel %vm45_vm0, %v44_v4, 0.0  ;;  %v161_v35 = vld [vmem:[%s660_s3 + $0x10] sm:$0xff]  ;;  %v162_v36 = vld [vmem:[%s660_s3 + $0x18] sm:$0xff] }
   0x3   :  { %53 = vadd.xlane.f32.xlu1 %v52_v2  ;;  %47 = vadd.xlane.f32.xlu0 %v46_v3  ;;  %v49_v7 = vsel %vm45_vm0, %v42_v5, 0.0  ;;  %v201_v37 = vld [vmem:[%s661_s5 + $0x10] sm:$0xff]  ;;  %v164_v38 = vpack.c.bf16 %v162_v36, %v161_v35  ;;  %v202_v39 = vld [vmem:[%s661_s5 + $0x18] sm:$0xff]  ;;  %v159_v42 = vld [vmem:[%s660_s3] sm:$0xff] }
   0x4   :  { %v204_v41 = vpack.c.bf16 %v202_v39, %v201_v37  ;;  %v160_v43 = vld [vmem:[%s660_s3 + $0x8] sm:$0xff]  ;;  %v199_v44 = vld [vmem:[%s661_s5] sm:$0xff] }
   0x5   :  { %181 = vmatpush.bf16.msra.mxu0 %v164_v38  ;;  %v163_v47 = vpack.c.bf16 %v160_v43, %v159_v42  ;;  %v200_v48 = vld [vmem:[%s661_s5 + $0x8] sm:$0xff]  ;;  %v237_v42 = vld [vmem:[%s664_s7 + $0x18] sm:$0xff] }
   0x6   :  { %215 = vmatpush.bf16.msra.mxu1 %v204_v41  ;;  %v203_v49 = vpack.c.bf16 %v200_v48, %v199_v44  ;;  %v236_v41 = vld [vmem:[%s664_s7 + $0x10] sm:$0xff]  ;;  %v235_v43 = vld [vmem:[%s664_s7 + $0x8] sm:$0xff] }
   0x7   :  { %v419_v9 = vpop.eup %418 }
   0x8   :  { %v59_v10 = vmul.f32 32.0, %v419_v9  ;;  %vm63_vm1 = vweird.f32 %v419_v9 }
   0x9   :  { %182 = vmatpush.bf16.msra.mxu0 %v163_v47 }
   0xa   :  { %v60_v11 = vsub.f32 1.0, %v59_v10  ;;  %216 = vmatpush.bf16.msra.mxu1 %v203_v49  ;;  %v415_v49 = vld [vmem:[%s662_s6] ss:$0 sm:$0xff] }
   0xb   :  { %56 = vadd.xlane.f32.xlu1 %v55_v6  ;;  %50 = vadd.xlane.f32.xlu0 %v49_v7 }
   0xc   :  { %v61_v12 = vmul.f32 %v419_v9, %v60_v11 }
   0xe   :  { %v62_v13 = vadd.f32 %v419_v9, %v61_v12 }
  0x10   :  { %v64_v14 = vsel %vm63_vm1, %v419_v9, %v62_v13 }
  0x76   :  { %v54_v15 = vpop.xlane.xlu1 %53  ;;  %v48_v16 = vpop.xlane.xlu0 %47 }
  0x77   :  { %v67_v17 = vmul.f32 %v64_v14, %v54_v15  ;;  %v65_v18 = vmul.f32 %v64_v14, %v48_v16  ;;  %v412_v15 = vld [vmem:[%s657_s1] ss:$0 sm:$0xff] }
  0x79   :  { %v526_v19 = vsub.f32 %v43_v0, %v67_v17  ;;  %v528_v20 = vsub.f32 %v41_v1, %v65_v18 }
  0x7b   :  { %v75_v21 = vmul.f32 %v526_v19, %v526_v19  ;;  %v73_v22 = vmul.f32 %v528_v20, %v528_v20 }
  0x7d   :  { %v83_v23 = vsel %vm45_vm0, %v75_v21, 0.0  ;;  %v77_v24 = vsel %vm45_vm0, %v73_v22, 0.0 }
  0x7e   :  { %v57_v25 = vpop.xlane.xlu1 %56  ;;  %84 = vadd.xlane.f32.xlu0 %v83_v23  ;;  %78 = vadd.xlane.f32.xlu2 %v77_v24  ;;  %v51_v26 = vpop.xlane.xlu0 %50  ;;  %v413_v24 = vld [vmem:[%s658_s2] ss:$0 sm:$0xff] }
  0x7f   :  { %v68_v27 = vmul.f32 %v64_v14, %v57_v25  ;;  %v66_v28 = vmul.f32 %v64_v14, %v51_v26 }
  0x81   :  { %v536_v29 = vsub.f32 %v44_v4, %v68_v27  ;;  %v538_v30 = vsub.f32 %v42_v5, %v66_v28 }
  0x83   :  { %v76_v31 = vmul.f32 %v536_v29, %v536_v29  ;;  %v74_v32 = vmul.f32 %v538_v30, %v538_v30 }
  0x85   :  { %v86_v33 = vsel %vm45_vm0, %v76_v31, 0.0  ;;  %v80_v34 = vsel %vm45_vm0, %v74_v32, 0.0 }
  0x86   :  { %87 = vadd.xlane.f32.xlu1 %v86_v33  ;;  %81 = vadd.xlane.f32.xlu2 %v80_v34 }
  0xf1   :  { %v79_v40 = vpop.xlane.xlu2 %78  ;;  %v85_v46 = vpop.xlane.xlu0 %84 }
  0xf2   :  { %v89_v45 = vmul.f32 %v79_v40, %v64_v14  ;;  %v91_v51 = vmul.f32 %v85_v46, %v64_v14 }
  0xf4   :  { %v93_v50 = vadd.f32 1e-05, %v89_v45  ;;  %v95_v52 = vadd.f32 1e-05, %v91_v51  ;;  %v414_v45 = vld [vmem:[%s659_s4] ss:$0 sm:$0xff] }
  0xf6   :  { %420 = vrsqrt.f32 %v93_v50  ;;  %vm103_vm3 = vweird.f32 %v93_v50  ;;  %vm123_vm10 = vweird.f32 %v95_v52 }
  0xf7   :  { %422 = vrsqrt.f32 %v95_v52 }
  0xf9   :  { %v88_v53 = vpop.xlane.xlu1 %87  ;;  %v82_v54 = vpop.xlane.xlu2 %81 }
  0xfa   :  { %v92_v55 = vmul.f32 %v88_v53, %v64_v14  ;;  %v90_v56 = vmul.f32 %v82_v54, %v64_v14 }
  0xfc   :  { %v421_v57 = vpop.eup %420  ;;  %v96_v58 = vadd.f32 1e-05, %v92_v55  ;;  %v94_v59 = vadd.f32 1e-05, %v90_v56 }
  0xfd   :  { %v98_v60 = vmul.f32 %v421_v57, %v93_v50  ;;  %v423_v63 = vpop.eup %422  ;;  %vm104_vm2 = vweird.f32 %v421_v57 }
  0xfe   :  { %424 = vrsqrt.f32 %v96_v58  ;;  %v118_v5 = vmul.f32 %v423_v63, %v95_v52  ;;  %vm105_vm4 = vmor %vm103_vm3, %vm104_vm2  ;;  %vm113_vm6 = vweird.f32 %v94_v59  ;;  %vm133_vm8 = vweird.f32 %v96_v58 }
  0xff   :  { %v99_v61 = vmul.f32 %v421_v57, %v98_v60  ;;  %426 = vrsqrt.f32 %v94_v59  ;;  %vm124_vm11 = vweird.f32 %v423_v63  ;;  %vm386_vm2 = vcmask 31744  }
 0x100   :  { %v119_v10 = vmul.f32 %v423_v63, %v118_v5  ;;  %vm125_vm13 = vmor %vm123_vm10, %vm124_vm11  ;;  %v277_v5 = vld [vmem:[%s667_s9 + $0x10] sm:$0xff] }
 0x101   :  { %v100_v62 = vmul.f32 0.5, %v99_v61 }
 0x102   :  { %v120_v16 = vmul.f32 0.5, %v119_v10 }
 0x103   :  { %v101_v0 = vsub.f32 1.5, %v100_v62 }
 0x104   :  { %v425_v1 = vpop.eup %424  ;;  %v121_v25 = vsub.f32 1.5, %v120_v16 }
 0x105   :  { %v427_v2 = vpop.eup %426  ;;  %v128_v3 = vmul.f32 %v425_v1, %v96_v58  ;;  %v102_v4 = vmul.f32 %v421_v57, %v101_v0  ;;  %vm134_vm9 = vweird.f32 %v425_v1 }
 0x106   :  { %v108_v6 = vmul.f32 %v427_v2, %v94_v59  ;;  %vm114_vm5 = vweird.f32 %v427_v2  ;;  %vm135_vm12 = vmor %vm133_vm8, %vm134_vm9  ;;  %v122_v31 = vmul.f32 %v423_v63, %v121_v25 }
 0x107   :  { %v129_v7 = vmul.f32 %v425_v1, %v128_v3  ;;  %v106_v9 = vsel %vm105_vm4, %v421_v57, %v102_v4  ;;  %vm115_vm7 = vmor %vm113_vm6, %vm114_vm5 }
 0x108   :  { %v109_v8 = vmul.f32 %v427_v2, %v108_v6  ;;  %v137_v14 = vmul.f32 %v106_v9, %v528_v20  ;;  %v278_v6 = vld [vmem:[%s667_s9 + $0x18] sm:$0xff]  ;;  %v276_v9 = vld [vmem:[%s667_s9 + $0x8] sm:$0xff] }
 0x109   :  { %v130_v12 = vmul.f32 0.5, %v129_v7  ;;  %v280_v7 = vpack.c.bf16 %v278_v6, %v277_v5 }
 0x10a   :  { %v110_v11 = vmul.f32 0.5, %v109_v8  ;;  %v145_v23 = vmul.f32 %v412_v15, %v137_v14  ;;  %v275_v8 = vld [vmem:[%s667_s9] sm:$0xff] }
 0x10b   :  { %v131_v18 = vsub.f32 1.5, %v130_v12  ;;  %297 = vmatpush.bf16.msra.mxu3 %v280_v7  ;;  %v279_v10 = vpack.c.bf16 %v276_v9, %v275_v8  ;;  %v416_v12 = vld [vmem:[%s663_s8] ss:$0 sm:$0xff] }
 0x10c   :  { %v111_v13 = vsub.f32 1.5, %v110_v11  ;;  %v153_v27 = vadd.f32 %v413_v24, %v145_v23 }
 0x10d   :  { %v132_v26 = vmul.f32 %v425_v1, %v131_v18 }
 0x10e   :  { %v112_v17 = vmul.f32 %v427_v2, %v111_v13 }
 0x10f   :  { %v136_v33 = vsel %vm135_vm12, %v425_v1, %v132_v26  ;;  %298 = vmatpush.bf16.msra.mxu3 %v279_v10 }
 0x110   :  { %v116_v21 = vsel %vm115_vm7, %v427_v2, %v112_v17  ;;  %v140_v34 = vmul.f32 %v136_v33, %v536_v29  ;;  %v239_v29 = vpack.c.bf16 %v237_v42, %v236_v41 }
 0x111   :  { %v138_v22 = vmul.f32 %v116_v21, %v538_v30  ;;  %v126_v30 = vsel %vm125_vm13, %v423_v63, %v122_v31 }
 0x112   :  { %v139_v35 = vmul.f32 %v126_v30, %v526_v19  ;;  %v148_v36 = vmul.f32 %v412_v15, %v140_v34  ;;  %256 = vmatpush.bf16.msra.mxu2 %v239_v29  ;;  %v234_v19 = vld [vmem:[%s664_s7] sm:$0xff] }
 0x113   :  { %v146_v20 = vmul.f32 %v412_v15, %v138_v22  ;;  %v238_v44 = vpack.c.bf16 %v235_v43, %v234_v19 }
 0x114   :  { %v147_v37 = vmul.f32 %v412_v15, %v139_v35  ;;  %v156_v38 = vadd.f32 %v413_v24, %v148_v36 }
 0x115   :  { %v154_v28 = vadd.f32 %v413_v24, %v146_v20 }
 0x116   :  { %v155_v39 = vadd.f32 %v413_v24, %v147_v37  ;;  %257 = vmatpush.bf16.msra.mxu2 %v238_v44 }
 0x117   :  { %v157_v32 = vpack.c.bf16 %v154_v28, %v153_v27  ;;  %v417_v27 = vld [vmem:[%s666_s10] ss:$0 sm:$0xff] }
 0x118   :  { %v158_v40 = vpack.c.bf16 %v156_v38, %v155_v39 }
 0x119   :  { %399 = vmatmul.msk.bf16.vlgmr.msra.gmra.mxu0 %vm45_vm0, %v157_v32  ;;  %401 = vmatmul.msk.bf16.vlgmr.msra.gmra.mxu1 %vm45_vm0, %v157_v32 }
 0x129   :  { %400 = vmatmul.msk.bf16.gmra.mxu0 %vm45_vm0, %v158_v40  ;;  %402 = vmatmul.msk.bf16.gmra.mxu1 %vm45_vm0, %v158_v40 }
 0x196   :  { %v184_v46 = vpop.f32.mrf.mxu0  ;;  %v218_v47 = vpop.f32.mrf.mxu1 }
 0x197   :  { %v185_v48 = vadd.f32 %v414_v45, %v184_v46  ;;  %v219_v50 = vadd.f32 %v415_v49, %v218_v47 }
 0x199   :  { %195 = vst.msk [vmem:[%s665_s11] sm:$0xff] %vm194_vm14, %v185_v48  ;;  %v228_v55 = vmax.f32 %v219_v50, 0.0 }
 0x19e   :  { %v186_v51 = vpop.f32.mrf.mxu0  ;;  %v220_v52 = vpop.f32.mrf.mxu1 }
 0x19f   :  { %v187_v53 = vadd.f32 %v414_v45, %v186_v51  ;;  %v221_v54 = vadd.f32 %v415_v49, %v220_v52 }
 0x1a1   :  { %196 = vst.msk [vmem:[%s665_s11 + $0x8] sm:$0xff] %vm194_vm14, %v187_v53  ;;  %v229_v56 = vmax.f32 %v221_v54, 0.0 }
 0x1a3   :  { %v232_v57 = vpack.c.bf16 %v229_v56, %v228_v55 }
 0x1a5   :  { %403 = vmatmul.msk.bf16.vlgmr.msra.gmra.mxu2 %vm45_vm0, %v232_v57 }
 0x1a6   :  { %v189_v58 = vpop.f32.mrf.mxu0  ;;  %v223_v59 = vpop.f32.mrf.mxu1 }
 0x1a7   :  { %v190_v60 = vadd.f32 %v414_v45, %v189_v58  ;;  %v224_v61 = vadd.f32 %v415_v49, %v223_v59 }
 0x1a9   :  { %197 = vst.msk [vmem:[%s665_s11 + $0x10] sm:$0xff] %vm194_vm14, %v190_v60  ;;  %v230_v2 = vmax.f32 %v224_v61, 0.0 }
 0x1ae   :  { %v191_v62 = vpop.f32.mrf.mxu0  ;;  %v225_v63 = vpop.f32.mrf.mxu1 }
 0x1af   :  { %v192_v0 = vadd.f32 %v414_v45, %v191_v62  ;;  %v226_v1 = vadd.f32 %v415_v49, %v225_v63 }
 0x1b1   :  { %198 = vst.msk [vmem:[%s665_s11 + $0x18] sm:$0xff] %vm194_vm14, %v192_v0  ;;  %v231_v3 = vmax.f32 %v226_v1, 0.0 }
 0x1b3   :  { %v233_v4 = vpack.c.bf16 %v231_v3, %v230_v2 }
 0x1b5   :  { %404 = vmatmul.msk.bf16.gmra.mxu2 %vm45_vm0, %v233_v4 }
 0x228   :  { %v259_v11 = vpop.f32.mrf.mxu2 }
 0x229   :  { %v260_v13 = vadd.f32 %v416_v12, %v259_v11 }
 0x22b   :  { %v269_v16 = vmax.f32 %v260_v13, 0.0 }
 0x230   :  { %v261_v14 = vpop.f32.mrf.mxu2 }
 0x231   :  { %v262_v15 = vadd.f32 %v416_v12, %v261_v14 }
 0x233   :  { %v270_v17 = vmax.f32 %v262_v15, 0.0 }
 0x235   :  { %v273_v18 = vpack.c.bf16 %v270_v17, %v269_v16 }
 0x237   :  { %405 = vmatmul.msk.bf16.vlgmr.msra.gmra.mxu3 %vm45_vm0, %v273_v18 }
 0x238   :  { %v264_v21 = vpop.f32.mrf.mxu2 }
 0x239   :  { %v265_v22 = vadd.f32 %v416_v12, %v264_v21 }
 0x23b   :  { %v271_v25 = vmax.f32 %v265_v22, 0.0 }
 0x240   :  { %v266_v23 = vpop.f32.mrf.mxu2 }
 0x241   :  { %v267_v24 = vadd.f32 %v416_v12, %v266_v23 }
 0x243   :  { %v272_v20 = vmax.f32 %v267_v24, 0.0 }
 0x245   :  { %v274_v26 = vpack.c.bf16 %v272_v20, %v271_v25 }
 0x247   :  { %406 = vmatmul.msk.bf16.gmra.mxu3 %vm45_vm0, %v274_v26 }
 0x2ba   :  { %v300_v28 = vpop.f32.mrf.mxu3 }
 0x2bb   :  { %v301_v31 = vadd.f32 %v417_v27, %v300_v28 }
 0x2bd   :  { %v407_v32 = vmul.f32 -1.442695, %v301_v31 }
 0x2bf   :  { %428 = vpow2.f32 %v407_v32 }
 0x2c2   :  { %v302_v33 = vpop.f32.mrf.mxu3 }
 0x2c3   :  { %v303_v30 = vadd.f32 %v417_v27, %v302_v33 }
 0x2c5   :  { %v429_v34 = vpop.eup %428  ;;  %v408_v35 = vmul.f32 -1.442695, %v303_v30 }
 0x2c6   :  { %v322_v36 = vadd.f32 1.0, %v429_v34 }
 0x2c7   :  { %430 = vpow2.f32 %v408_v35 }
 0x2c8   :  { %432 = vrcp.f32 %v322_v36  ;;  %v337_v43 = vand.u32 2147483648, %v322_v36  ;;  %v335_v46 = vand.u32 2147483647, %v322_v36  ;;  %vm331_vm0 = vweird.f32 %v322_v36 }
 0x2ca   :  { %v305_v37 = vpop.f32.mrf.mxu3  ;;  %v338_v52 = vor.u32 1.1754944e-38, %v337_v43  ;;  %vm336_vm3 = vcmp.eq.f32.partialorder %v335_v46, 8.507059e+37 }
 0x2cb   :  { %v306_v38 = vadd.f32 %v417_v27, %v305_v37 }
 0x2cd   :  { %v431_v39 = vpop.eup %430  ;;  %v409_v40 = vmul.f32 -1.442695, %v306_v38 }
 0x2ce   :  { %v433_v41 = vpop.eup %432  ;;  %v323_v42 = vadd.f32 1.0, %v431_v39 }
 0x2cf   :  { %v327_v29 = vmul.f32 %v433_v41, %v322_v36  ;;  %434 = vpow2.f32 %v409_v40  ;;  %vm332_vm15 = vweird.f32 %v433_v41 }
 0x2d0   :  { %436 = vrcp.f32 %v323_v42  ;;  %vm333_vm1 = vmor %vm331_vm0, %vm332_vm15  ;;  %v352_v58 = vand.u32 2147483648, %v323_v42  ;;  %v350_v60 = vand.u32 2147483647, %v323_v42  ;;  %vm346_vm5 = vweird.f32 %v323_v42 }
 0x2d1   :  { %v328_v19 = vsub.f32 1.0, %v327_v29 }
 0x2d2   :  { %v307_v44 = vpop.f32.mrf.mxu3  ;;  %v353_v0 = vor.u32 1.1754944e-38, %v352_v58  ;;  %vm351_vm7 = vcmp.eq.f32.partialorder %v350_v60, 8.507059e+37 }
 0x2d3   :  { %v329_v45 = vmul.f32 %v433_v41, %v328_v19  ;;  %v308_v47 = vadd.f32 %v417_v27, %v307_v44 }
 0x2d5   :  { %v435_v48 = vpop.eup %434  ;;  %v330_v49 = vadd.f32 %v433_v41, %v329_v45  ;;  %v410_v50 = vmul.f32 -1.442695, %v308_v47 }
 0x2d6   :  { %v437_v51 = vpop.eup %436  ;;  %v324_v53 = vadd.f32 1.0, %v435_v48 }
 0x2d7   :  { %v334_v54 = vsel %vm333_vm1, %v433_v41, %v330_v49  ;;  %v342_v55 = vmul.f32 %v437_v51, %v323_v42  ;;  %438 = vpow2.f32 %v410_v50  ;;  %vm347_vm4 = vweird.f32 %v437_v51 }
 0x2d8   :  { %v339_v56 = vsel %vm336_vm3, %v338_v52, %v334_v54  ;;  %440 = vrcp.f32 %v324_v53  ;;  %vm348_vm6 = vmor %vm346_vm5, %vm347_vm4  ;;  %v367_v6 = vand.u32 2147483648, %v324_v53  ;;  %v365_v8 = vand.u32 2147483647, %v324_v53 }
 0x2d9   :  { %387 = vst.msk [vmem:[%s668_s12] sm:$0xff] %vm386_vm2, %v339_v56  ;;  %v343_v57 = vsub.f32 1.0, %v342_v55  ;;  %vm361_vm9 = vweird.f32 %v324_v53 }
 0x2da   :  { %v368_v11 = vor.u32 1.1754944e-38, %v367_v6  ;;  %vm366_vm11 = vcmp.eq.f32.partialorder %v365_v8, 8.507059e+37 }
 0x2db   :  { %v344_v59 = vmul.f32 %v437_v51, %v343_v57 }
 0x2dd   :  { %v439_v61 = vpop.eup %438  ;;  %v345_v62 = vadd.f32 %v437_v51, %v344_v59 }
 0x2de   :  { %v441_v63 = vpop.eup %440  ;;  %v325_v1 = vadd.f32 1.0, %v439_v61 }
 0x2df   :  { %v349_v2 = vsel %vm348_vm6, %v437_v51, %v345_v62  ;;  %v357_v3 = vmul.f32 %v441_v63, %v324_v53  ;;  %vm362_vm8 = vweird.f32 %v441_v63 }
 0x2e0   :  { %v354_v4 = vsel %vm351_vm7, %v353_v0, %v349_v2  ;;  %442 = vrcp.f32 %v325_v1  ;;  %vm363_vm10 = vmor %vm361_vm9, %vm362_vm8  ;;  %v382_v16 = vand.u32 2147483648, %v325_v1  ;;  %v380_v18 = vand.u32 2147483647, %v325_v1 }
 0x2e1   :  { %388 = vst.msk [vmem:[%s668_s12 + $0x8] sm:$0xff] %vm386_vm2, %v354_v4  ;;  %v358_v5 = vsub.f32 1.0, %v357_v3  ;;  %vm376_vm13 = vweird.f32 %v325_v1 }
 0x2e2   :  { %v383_v22 = vor.u32 1.1754944e-38, %v382_v16  ;;  %vm381_vm15 = vcmp.eq.f32.partialorder %v380_v18, 8.507059e+37 }
 0x2e3   :  { %v359_v7 = vmul.f32 %v441_v63, %v358_v5 }
 0x2e5   :  { %v360_v9 = vadd.f32 %v441_v63, %v359_v7 }
 0x2e6   :  { %v443_v10 = vpop.eup %442 }
 0x2e7   :  { %v364_v12 = vsel %vm363_vm10, %v441_v63, %v360_v9  ;;  %v372_v13 = vmul.f32 %v443_v10, %v325_v1  ;;  %vm377_vm12 = vweird.f32 %v443_v10 }
 0x2e8   :  { %v369_v14 = vsel %vm366_vm11, %v368_v11, %v364_v12  ;;  %vm378_vm14 = vmor %vm376_vm13, %vm377_vm12 }
 0x2e9   :  { %389 = vst.msk [vmem:[%s668_s12 + $0x10] sm:$0xff] %vm386_vm2, %v369_v14  ;;  %v373_v15 = vsub.f32 1.0, %v372_v13 }
 0x2eb   :  { %v374_v17 = vmul.f32 %v443_v10, %v373_v15 }
 0x2ed   :  { %v375_v21 = vadd.f32 %v443_v10, %v374_v17 }
 0x2ef   :  { %v379_v23 = vsel %vm378_vm14, %v443_v10, %v375_v21 }
 0x2f0   :  { %v384_v24 = vsel %vm381_vm15, %v383_v22, %v379_v23 }
 0x2f1   :  { %390 = vst.msk [vmem:[%s668_s12 + $0x18] sm:$0xff] %vm386_vm2, %v384_v24 }

</bundles_post_ra>
